<compile_context>
chip_gen: v6e
topology: v6e:2x2x1
jax: 0.10.0
libtpu: 0.0.40
codegen_flags: <defaults>
</compile_context>

<pallas_src>
import jax
import jax.numpy as jnp
from jax import lax
from jax.experimental import pallas as pl
from jax.experimental.pallas import tpu as pltpu

NUM_CLASSES = 4
NUM_VERTICES = 8

# Channel-major packed layout (sublane axis), padded to 32 channels:
#   ch 0      : objectness logit / target   (BCE, weighted by `valid`)
#   ch 1..4   : class logits / targets      (BCE, weighted by `mask`)
#   ch 5..7   : pad  (ch 5 of the OUTPUT is repurposed for the positive count)
#   ch 8..11  : bbox                         (SmoothL1, weighted by `mask`)
#   ch 12..27 : polygon vertices             (SmoothL1, weighted by `mask`)
#   ch 28..31 : pad
C_PAD = 32
CH_OBJ = 0
CH_CLS_LO, CH_CLS_HI = 1, 1 + NUM_CLASSES            # 1..5
CH_CNT = 5                                            # output-only count slot
CH_BOX_LO, CH_BOX_HI = 8, 12
CH_POLY_LO, CH_POLY_HI = 12, 12 + 2 * NUM_VERTICES    # 12..28

LANES = 128
TM = 4096            # grid cells per tile (lane axis of the kernel blocks)


# ---------------------------------------------------------------- math helpers
def _bce_with_logits(x, t):
    # matches torch.nn.BCEWithLogitsLoss(reduction='none'):
    #   max(x,0) - x*t + log(1 + exp(-|x|))
    return jnp.maximum(x, 0.0) - x * t + jnp.log1p(jnp.exp(-jnp.abs(x)))


def _smooth_l1(x, t):
    # matches torch.nn.SmoothL1Loss(reduction='none'), beta = 1.0
    d = x - t
    ad = jnp.abs(d)
    return jnp.where(ad < 1.0, 0.5 * d * d, ad - 0.5)


# -------------------------------------------------------------------- kernel
def _make_loss_kernel(tm):
    n_blocks = tm // LANES

    def kernel(pred_ref, tgt_ref, out_ref):
        # pred_ref / tgt_ref : (32, tm) channel-major tile
        # out_ref            : (1, 32, 128) per-tile lane-dense partial sums
        row8 = lax.broadcasted_iota(jnp.int32, (8, LANES), 0)   # channel id / sublane
        acc_bce = jnp.zeros((8, LANES), jnp.float32)
        acc_sl1 = jnp.zeros((C_PAD - 8, LANES), jnp.float32)

        # Static 128-lane blocks: every slice is lane/sublane aligned, the
        # working set per iteration is a handful of vregs, and the partial
        # sums live in registers (no VMEM scratch, no RMW stores).
        for b in range(n_blocks):
            cols = slice(b * LANES, (b + 1) * LANES)
            p0 = pred_ref[0:8, cols].astype(jnp.float32)        # obj|cls (+pad)
            t0 = tgt_ref[0:8, cols].astype(jnp.float32)
            p1 = pred_ref[8:C_PAD, cols].astype(jnp.float32)    # bbox|poly (+pad)
            t1 = tgt_ref[8:C_PAD, cols].astype(jnp.float32)

            obj_t = t0[0:1, :]                                  # (1, 128)
            valid = (obj_t >= 0.0).astype(jnp.float32)          # padded cells carry -1
            mask = (obj_t > 0.5).astype(jnp.float32)            # positive cells

            bce = _bce_with_logits(p0, t0)                      # (8, 128)
            sl1 = _smooth_l1(p1, t1)                            # (24, 128)

            # Per-channel weight inside the BCE group:
            #   ch 0 -> valid, ch 1..4 -> mask, ch 5..7 -> 0 (pad)
            w = jnp.where(row8 == CH_OBJ, valid,
                          jnp.where(row8 < CH_CLS_HI, mask, 0.0))
            g = jnp.where(row8 == CH_CNT, mask, bce * w)        # count into ch 5
            acc_bce = acc_bce + g
            # pad channels 28..31 have pred=tgt=0 -> sl1 = 0, contribute nothing
            acc_sl1 = acc_sl1 + sl1 * mask

        # Single, fully lane-dense, unmasked store per tile.
        out_ref[0, 0:8, :] = acc_bce
        out_ref[0, 8:C_PAD, :] = acc_sl1

    return kernel


# ----------------------------------------------------------------- packing
def _pack_level_cm(head):
    """Per-head dict of (B, N, C) arrays -> channel-major (32, B*N) array."""
    B, N, _ = head['cls'].shape

    def cm(a):
        return a.reshape(B * N, a.shape[-1]).T        # (C, B*N); dtype preserved

    obj, cls = cm(head['obj']), cm(head['cls'])
    bbox, poly = cm(head['bbox']), cm(head['poly'])
    dt = cls.dtype
    M = B * N
    pad_a = jnp.zeros((CH_BOX_LO - CH_CLS_HI, M), dt)            # ch 5..7
    pad_b = jnp.zeros((C_PAD - CH_POLY_HI, M), dt)               # ch 28..31
    return jnp.concatenate([obj, cls, pad_a, bbox, poly, pad_b], axis=0)


def _pad_cols(x, n_cols, *, sentinel_obj):
    pad = n_cols - x.shape[1]
    if pad == 0:
        return x
    filler = jnp.zeros((C_PAD, pad), x.dtype)
    if sentinel_obj:
        filler = filler.at[CH_OBJ, :].set(-1)   # marks padded cells invalid in-kernel
    return jnp.concatenate([x, filler], axis=1)


# ----------------------------------------------------------------- loss module
def poly_yolo_loss(predictions, targets, *, tm=TM):
    """predictions/targets: lists (one per pyramid level) of dicts of (B,N,C) arrays."""
    assert tm % LANES == 0

    pred_parts, tgt_parts, level_dims, tiles_per_level = [], [], [], []
    for pred, tgt in zip(predictions, targets):
        B, N, _ = pred['cls'].shape
        level_dims.append((B, N))
        n_tiles = pl.cdiv(B * N, tm)
        cols = n_tiles * tm
        pred_parts.append(_pad_cols(_pack_level_cm(pred), cols, sentinel_obj=False))
        tgt_parts.append(_pad_cols(_pack_level_cm(tgt), cols, sentinel_obj=True))
        tiles_per_level.append(n_tiles)

    pred_cm = jnp.concatenate(pred_parts, axis=1)          # (32, num_tiles*tm)
    tgt_cm = jnp.concatenate(tgt_parts, axis=1)
    num_tiles = sum(tiles_per_level)

    in_spec = pl.BlockSpec((C_PAD, tm), lambda s: (0, s))

    # One independent tile per grid step -> no cross-step state, axis is truly
    # parallel.  TODO(synk): on v7x promote this axis to pltpu.CORE_PARALLEL
    # (or pl.core_map over create_tensorcore_mesh) to shard tiles over the two
    # TensorCores; plain "parallel" is sufficient on single-TC v5e/v6e.
    partials = pl.pallas_call(
        _make_loss_kernel(tm),
        out_shape=jax.ShapeDtypeStruct((num_tiles, C_PAD, LANES), jnp.float32),
        grid_spec=pltpu.PrefetchScalarGridSpec(
            num_scalar_prefetch=0,
            grid=(num_tiles,),
            in_specs=[in_spec, in_spec],
            out_specs=pl.BlockSpec((1, C_PAD, LANES), lambda s: (s, 0, 0)),
        ),
        compiler_params=pltpu.CompilerParams(dimension_semantics=("parallel",)),
    )(pred_cm, tgt_cm)

    # Tiny JAX-side epilogue: lane reduce + per-level segment sum over tiles.
    tile_sums = partials.sum(axis=2)                       # (num_tiles, 32)

    losses = {'obj': jnp.float32(0.0), 'cls': jnp.float32(0.0),
              'bbox': jnp.float32(0.0), 'poly': jnp.float32(0.0)}
    t0 = 0
    for l, (B, N) in enumerate(level_dims):
        t1 = t0 + tiles_per_level[l]
        seg = tile_sums[t0:t1].sum(axis=0)                 # (32,) per-level sums
        t0 = t1

        obj_s = seg[CH_OBJ]
        cls_s = jnp.sum(seg[CH_CLS_LO:CH_CLS_HI])
        bbox_s = jnp.sum(seg[CH_BOX_LO:CH_BOX_HI])
        poly_s = jnp.sum(seg[CH_POLY_LO:CH_POLY_HI])
        cnt = seg[CH_CNT]

        losses['obj'] += obj_s / (B * N)
        # NOTE: jnp.where mirrors the reference's `if obj_mask.sum() > 0` branch in
        # the forward pass; if a backward pass is added later, gradients flow
        # through safe_cnt.
        pos = cnt > 0.0
        safe_cnt = jnp.maximum(cnt, 1.0)
        losses['cls'] += jnp.where(pos, cls_s / (safe_cnt * NUM_CLASSES), 0.0)
        losses['bbox'] += jnp.where(pos, bbox_s / (safe_cnt * 4.0), 0.0)
        losses['poly'] += jnp.where(pos, poly_s / (safe_cnt * 2.0 * NUM_VERTICES), 0.0)

    total = losses['obj'] + losses['cls'] + losses['bbox'] * 5.0 + losses['poly'] * 10.0
    return total, losses


# ---------------------------------------------------------- pure-JAX reference
def reference_loss(predictions, targets):
    losses = {'obj': jnp.float32(0.0), 'cls': jnp.float32(0.0),
              'bbox': jnp.float32(0.0), 'poly': jnp.float32(0.0)}
    for pred, tgt in zip(predictions, targets):
        mask = tgt['obj'][..., 0] > 0.5
        losses['obj'] += _bce_with_logits(pred['obj'], tgt['obj']).mean()
        if int(mask.sum()) > 0:
            losses['cls'] += _bce_with_logits(pred['cls'], tgt['cls'])[mask].mean()
            losses['bbox'] += _smooth_l1(pred['bbox'], tgt['bbox'])[mask].mean()
            losses['poly'] += _smooth_l1(pred['poly'], tgt['poly'])[mask].mean()
    total = losses['obj'] + losses['cls'] + losses['bbox'] * 5.0 + losses['poly'] * 10.0
    return total, losses


# ------------------------------------------------------------------------ main
if __name__ == "__main__":
    key = jax.random.PRNGKey(0)
    B = 2
    feat_sizes = [64, 32, 16, 8]   # strides 4, 8, 16, 32 on a 256x256 input

    preds, tgts = [], []
    for fs in feat_sizes:
        N = fs * fs
        key, *ks = jax.random.split(key, 9)
        preds.append({
            'obj':  jax.random.normal(ks[0], (B, N, 1), jnp.float32),
            'cls':  jax.random.normal(ks[1], (B, N, NUM_CLASSES), jnp.float32),
            'bbox': jax.random.normal(ks[2], (B, N, 4), jnp.float32),
            'poly': jax.random.normal(ks[3], (B, N, 2 * NUM_VERTICES), jnp.float32),
        })
        tgts.append({
            'obj':  (jax.random.uniform(ks[4], (B, N, 1)) > 0.7).astype(jnp.float32),
            'cls':  (jax.random.uniform(ks[5], (B, N, NUM_CLASSES)) > 0.5).astype(jnp.float32),
            'bbox': jax.random.uniform(ks[6], (B, N, 4), jnp.float32),
            'poly': jax.random.normal(ks[7], (B, N, 2 * NUM_VERTICES), jnp.float32),
        })

    total, losses = poly_yolo_loss(preds, tgts)
    total = jax.block_until_ready(total)

    ref_total, ref_losses = reference_loss(preds, tgts)
    assert jnp.allclose(total, ref_total, rtol=1e-4, atol=1e-4), (float(total), float(ref_total))
    for k in ('obj', 'cls', 'bbox', 'poly'):
        assert jnp.allclose(losses[k], ref_losses[k], rtol=1e-4, atol=1e-4), (
            k, float(losses[k]), float(ref_losses[k]))

    print("KERNEL_OK")
</pallas_src>

<mosaic_0001>
module attributes {stable_mosaic.version = 11 : i64} {
  func.func @kernel(%arg0: i32, %arg1: memref<32x4096xf32, #tpu.memory_space<vmem>>, %arg2: memref<32x4096xf32, #tpu.memory_space<vmem>>, %arg3: memref<1x32x128xf32, #tpu.memory_space<vmem>>) attributes {dimension_semantics = [#tpu.dimension_semantics<parallel>], iteration_bounds = array<i64: 5>, scalar_prefetch = 0 : i64, scratch_operands = 0 : i64, tpu.core_type = #tpu.core_type<tc>, window_params = [{transform_indices = @transform_0, window_bounds = array<i64: 32, 4096>}, {transform_indices = @transform_1, window_bounds = array<i64: 32, 4096>}, {transform_indices = @transform_2, window_bounds = array<i64: 1, 32, 128>}]} {
    %0 = tpu.iota {dimensions = array<i32: 0>} : vector<8x128xi32>
    %cst = arith.constant 0.000000e+00 : f32
    %1 = vector.broadcast %cst : f32 to vector<8x128xf32>
    %cst_0 = arith.constant 0.000000e+00 : f32
    %2 = vector.broadcast %cst_0 : f32 to vector<24x128xf32>
    %c0 = arith.constant 0 : index
    %c0_1 = arith.constant 0 : index
    %3 = vector.load %arg1[%c0, %c0_1] : memref<32x4096xf32, #tpu.memory_space<vmem>>, vector<8x128xf32>
    %c0_2 = arith.constant 0 : index
    %c0_3 = arith.constant 0 : index
    %4 = vector.load %arg2[%c0_2, %c0_3] : memref<32x4096xf32, #tpu.memory_space<vmem>>, vector<8x128xf32>
    %c8 = arith.constant 8 : index
    %c0_4 = arith.constant 0 : index
    %5 = vector.load %arg1[%c8, %c0_4] : memref<32x4096xf32, #tpu.memory_space<vmem>>, vector<24x128xf32>
    %c8_5 = arith.constant 8 : index
    %c0_6 = arith.constant 0 : index
    %6 = vector.load %arg2[%c8_5, %c0_6] : memref<32x4096xf32, #tpu.memory_space<vmem>>, vector<24x128xf32>
    %7 = vector.extract_strided_slice %4 {offsets = [0, 0], sizes = [1, 128], strides = [1, 1]} : vector<8x128xf32> to vector<1x128xf32>
    %cst_7 = arith.constant 0.000000e+00 : f32
    %8 = vector.broadcast %cst_7 : f32 to vector<1x128xf32>
    %9 = arith.cmpf oge, %7, %8 : vector<1x128xf32>
    %10 = arith.extui %9 : vector<1x128xi1> to vector<1x128xi32>
    %11 = arith.sitofp %10 : vector<1x128xi32> to vector<1x128xf32>
    %cst_8 = arith.constant 5.000000e-01 : f32
    %12 = vector.broadcast %cst_8 : f32 to vector<1x128xf32>
    %13 = arith.cmpf ogt, %7, %12 : vector<1x128xf32>
    %14 = arith.extui %13 : vector<1x128xi1> to vector<1x128xi32>
    %15 = arith.sitofp %14 : vector<1x128xi32> to vector<1x128xf32>
    %cst_9 = arith.constant 0.000000e+00 : f32
    %16 = vector.broadcast %cst_9 : f32 to vector<8x128xf32>
    %17 = arith.maximumf %3, %16 : vector<8x128xf32>
    %18 = arith.mulf %3, %4 : vector<8x128xf32>
    %19 = arith.subf %17, %18 : vector<8x128xf32>
    %20 = math.absf %3 : vector<8x128xf32>
    %cst_10 = arith.constant 0.000000e+00 : f32
    %21 = vector.broadcast %cst_10 : f32 to vector<8x128xf32>
    %22 = arith.subf %21, %20 : vector<8x128xf32>
    %23 = math.exp %22 : vector<8x128xf32>
    %24 = math.log1p %23 : vector<8x128xf32>
    %25 = arith.addf %19, %24 : vector<8x128xf32>
    %26 = arith.subf %5, %6 : vector<24x128xf32>
    %27 = math.absf %26 : vector<24x128xf32>
    %cst_11 = arith.constant 1.000000e+00 : f32
    %28 = vector.broadcast %cst_11 : f32 to vector<24x128xf32>
    %29 = arith.cmpf olt, %27, %28 : vector<24x128xf32>
    %cst_12 = arith.constant 5.000000e-01 : f32
    %30 = vector.broadcast %cst_12 : f32 to vector<24x128xf32>
    %31 = arith.mulf %30, %26 : vector<24x128xf32>
    %32 = arith.mulf %31, %26 : vector<24x128xf32>
    %cst_13 = arith.constant 5.000000e-01 : f32
    %33 = vector.broadcast %cst_13 : f32 to vector<24x128xf32>
    %34 = arith.subf %27, %33 : vector<24x128xf32>
    %35 = arith.select %29, %32, %34 : vector<24x128xi1>, vector<24x128xf32>
    %c0_i32 = arith.constant 0 : i32
    %36 = vector.broadcast %c0_i32 : i32 to vector<8x128xi32>
    %37 = arith.cmpi eq, %0, %36 : vector<8x128xi32>
    %c5_i32 = arith.constant 5 : i32
    %38 = vector.broadcast %c5_i32 : i32 to vector<8x128xi32>
    %39 = arith.cmpi slt, %0, %38 : vector<8x128xi32>
    %cst_14 = arith.constant 0.000000e+00 : f32
    %40 = vector.shape_cast %15 : vector<1x128xf32> to vector<1x128xf32>
    %41 = vector.broadcast %40 : vector<1x128xf32> to vector<8x128xf32>
    %42 = vector.broadcast %cst_14 : f32 to vector<8x128xf32>
    %43 = arith.select %39, %41, %42 : vector<8x128xi1>, vector<8x128xf32>
    %44 = vector.shape_cast %11 : vector<1x128xf32> to vector<1x128xf32>
    %45 = vector.broadcast %44 : vector<1x128xf32> to vector<8x128xf32>
    %46 = arith.select %37, %45, %43 : vector<8x128xi1>, vector<8x128xf32>
    %c5_i32_15 = arith.constant 5 : i32
    %47 = vector.broadcast %c5_i32_15 : i32 to vector<8x128xi32>
    %48 = arith.cmpi eq, %0, %47 : vector<8x128xi32>
    %49 = arith.mulf %25, %46 : vector<8x128xf32>
    %50 = vector.shape_cast %15 : vector<1x128xf32> to vector<1x128xf32>
    %51 = vector.broadcast %50 : vector<1x128xf32> to vector<8x128xf32>
    %52 = arith.select %48, %51, %49 : vector<8x128xi1>, vector<8x128xf32>
    %53 = arith.addf %1, %52 : vector<8x128xf32>
    %54 = vector.broadcast %15 : vector<1x128xf32> to vector<24x128xf32>
    %55 = arith.mulf %35, %54 : vector<24x128xf32>
    %56 = arith.addf %2, %55 : vector<24x128xf32>
    %c0_16 = arith.constant 0 : index
    %c128 = arith.constant 128 : index
    %57 = vector.load %arg1[%c0_16, %c128] : memref<32x4096xf32, #tpu.memory_space<vmem>>, vector<8x128xf32>
    %c0_17 = arith.constant 0 : index
    %c128_18 = arith.constant 128 : index
    %58 = vector.load %arg2[%c0_17, %c128_18] : memref<32x4096xf32, #tpu.memory_space<vmem>>, vector<8x128xf32>
    %c8_19 = arith.constant 8 : index
    %c128_20 = arith.constant 128 : index
    %59 = vector.load %arg1[%c8_19, %c128_20] : memref<32x4096xf32, #tpu.memory_space<vmem>>, vector<24x128xf32>
    %c8_21 = arith.constant 8 : index
    %c128_22 = arith.constant 128 : index
    %60 = vector.load %arg2[%c8_21, %c128_22] : memref<32x4096xf32, #tpu.memory_space<vmem>>, vector<24x128xf32>
    %61 = vector.extract_strided_slice %58 {offsets = [0, 0], sizes = [1, 128], strides = [1, 1]} : vector<8x128xf32> to vector<1x128xf32>
    %cst_23 = arith.constant 0.000000e+00 : f32
    %62 = vector.broadcast %cst_23 : f32 to vector<1x128xf32>
    %63 = arith.cmpf oge, %61, %62 : vector<1x128xf32>
    %64 = arith.extui %63 : vector<1x128xi1> to vector<1x128xi32>
    %65 = arith.sitofp %64 : vector<1x128xi32> to vector<1x128xf32>
    %cst_24 = arith.constant 5.000000e-01 : f32
    %66 = vector.broadcast %cst_24 : f32 to vector<1x128xf32>
    %67 = arith.cmpf ogt, %61, %66 : vector<1x128xf32>
    %68 = arith.extui %67 : vector<1x128xi1> to vector<1x128xi32>
    %69 = arith.sitofp %68 : vector<1x128xi32> to vector<1x128xf32>
    %cst_25 = arith.constant 0.000000e+00 : f32
    %70 = vector.broadcast %cst_25 : f32 to vector<8x128xf32>
    %71 = arith.maximumf %57, %70 : vector<8x128xf32>
    %72 = arith.mulf %57, %58 : vector<8x128xf32>
    %73 = arith.subf %71, %72 : vector<8x128xf32>
    %74 = math.absf %57 : vector<8x128xf32>
    %cst_26 = arith.constant 0.000000e+00 : f32
    %75 = vector.broadcast %cst_26 : f32 to vector<8x128xf32>
    %76 = arith.subf %75, %74 : vector<8x128xf32>
    %77 = math.exp %76 : vector<8x128xf32>
    %78 = math.log1p %77 : vector<8x128xf32>
    %79 = arith.addf %73, %78 : vector<8x128xf32>
    %80 = arith.subf %59, %60 : vector<24x128xf32>
    %81 = math.absf %80 : vector<24x128xf32>
    %cst_27 = arith.constant 1.000000e+00 : f32
    %82 = vector.broadcast %cst_27 : f32 to vector<24x128xf32>
    %83 = arith.cmpf olt, %81, %82 : vector<24x128xf32>
    %cst_28 = arith.constant 5.000000e-01 : f32
    %84 = vector.broadcast %cst_28 : f32 to vector<24x128xf32>
    %85 = arith.mulf %84, %80 : vector<24x128xf32>
    %86 = arith.mulf %85, %80 : vector<24x128xf32>
    %cst_29 = arith.constant 5.000000e-01 : f32
    %87 = vector.broadcast %cst_29 : f32 to vector<24x128xf32>
    %88 = arith.subf %81, %87 : vector<24x128xf32>
    %89 = arith.select %83, %86, %88 : vector<24x128xi1>, vector<24x128xf32>
    %c0_i32_30 = arith.constant 0 : i32
    %90 = vector.broadcast %c0_i32_30 : i32 to vector<8x128xi32>
    %91 = arith.cmpi eq, %0, %90 : vector<8x128xi32>
    %c5_i32_31 = arith.constant 5 : i32
    %92 = vector.broadcast %c5_i32_31 : i32 to vector<8x128xi32>
    %93 = arith.cmpi slt, %0, %92 : vector<8x128xi32>
    %cst_32 = arith.constant 0.000000e+00 : f32
    %94 = vector.shape_cast %69 : vector<1x128xf32> to vector<1x128xf32>
    %95 = vector.broadcast %94 : vector<1x128xf32> to vector<8x128xf32>
    %96 = vector.broadcast %cst_32 : f32 to vector<8x128xf32>
    %97 = arith.select %93, %95, %96 : vector<8x128xi1>, vector<8x128xf32>
    %98 = vector.shape_cast %65 : vector<1x128xf32> to vector<1x128xf32>
    %99 = vector.broadcast %98 : vector<1x128xf32> to vector<8x128xf32>
    %100 = arith.select %91, %99, %97 : vector<8x128xi1>, vector<8x128xf32>
    %c5_i32_33 = arith.constant 5 : i32
    %101 = vector.broadcast %c5_i32_33 : i32 to vector<8x128xi32>
    %102 = arith.cmpi eq, %0, %101 : vector<8x128xi32>
    %103 = arith.mulf %79, %100 : vector<8x128xf32>
    %104 = vector.shape_cast %69 : vector<1x128xf32> to vector<1x128xf32>
    %105 = vector.broadcast %104 : vector<1x128xf32> to vector<8x128xf32>
    %106 = arith.select %102, %105, %103 : vector<8x128xi1>, vector<8x128xf32>
    %107 = arith.addf %53, %106 : vector<8x128xf32>
    %108 = vector.broadcast %69 : vector<1x128xf32> to vector<24x128xf32>
    %109 = arith.mulf %89, %108 : vector<24x128xf32>
    %110 = arith.addf %56, %109 : vector<24x128xf32>
    %c0_34 = arith.constant 0 : index
    %c256 = arith.constant 256 : index
    %111 = vector.load %arg1[%c0_34, %c256] : memref<32x4096xf32, #tpu.memory_space<vmem>>, vector<8x128xf32>
    %c0_35 = arith.constant 0 : index
    %c256_36 = arith.constant 256 : index
    %112 = vector.load %arg2[%c0_35, %c256_36] : memref<32x4096xf32, #tpu.memory_space<vmem>>, vector<8x128xf32>
    %c8_37 = arith.constant 8 : index
    %c256_38 = arith.constant 256 : index
    %113 = vector.load %arg1[%c8_37, %c256_38] : memref<32x4096xf32, #tpu.memory_space<vmem>>, vector<24x128xf32>
    %c8_39 = arith.constant 8 : index
    %c256_40 = arith.constant 256 : index
    %114 = vector.load %arg2[%c8_39, %c256_40] : memref<32x4096xf32, #tpu.memory_space<vmem>>, vector<24x128xf32>
    %115 = vector.extract_strided_slice %112 {offsets = [0, 0], sizes = [1, 128], strides = [1, 1]} : vector<8x128xf32> to vector<1x128xf32>
    %cst_41 = arith.constant 0.000000e+00 : f32
    %116 = vector.broadcast %cst_41 : f32 to vector<1x128xf32>
    %117 = arith.cmpf oge, %115, %116 : vector<1x128xf32>
    %118 = arith.extui %117 : vector<1x128xi1> to vector<1x128xi32>
    %119 = arith.sitofp %118 : vector<1x128xi32> to vector<1x128xf32>
    %cst_42 = arith.constant 5.000000e-01 : f32
    %120 = vector.broadcast %cst_42 : f32 to vector<1x128xf32>
    %121 = arith.cmpf ogt, %115, %120 : vector<1x128xf32>
    %122 = arith.extui %121 : vector<1x128xi1> to vector<1x128xi32>
    %123 = arith.sitofp %122 : vector<1x128xi32> to vector<1x128xf32>
    %cst_43 = arith.constant 0.000000e+00 : f32
    %124 = vector.broadcast %cst_43 : f32 to vector<8x128xf32>
    %125 = arith.maximumf %111, %124 : vector<8x128xf32>
    %126 = arith.mulf %111, %112 : vector<8x128xf32>
    %127 = arith.subf %125, %126 : vector<8x128xf32>
    %128 = math.absf %111 : vector<8x128xf32>
    %cst_44 = arith.constant 0.000000e+00 : f32
    %129 = vector.broadcast %cst_44 : f32 to vector<8x128xf32>
    %130 = arith.subf %129, %128 : vector<8x128xf32>
    %131 = math.exp %130 : vector<8x128xf32>
    %132 = math.log1p %131 : vector<8x128xf32>
    %133 = arith.addf %127, %132 : vector<8x128xf32>
    %134 = arith.subf %113, %114 : vector<24x128xf32>
    %135 = math.absf %134 : vector<24x128xf32>
    %cst_45 = arith.constant 1.000000e+00 : f32
    %136 = vector.broadcast %cst_45 : f32 to vector<24x128xf32>
    %137 = arith.cmpf olt, %135, %136 : vector<24x128xf32>
    %cst_46 = arith.constant 5.000000e-01 : f32
    %138 = vector.broadcast %cst_46 : f32 to vector<24x128xf32>
    %139 = arith.mulf %138, %134 : vector<24x128xf32>
    %140 = arith.mulf %139, %134 : vector<24x128xf32>
    %cst_47 = arith.constant 5.000000e-01 : f32
    %141 = vector.broadcast %cst_47 : f32 to vector<24x128xf32>
    %142 = arith.subf %135, %141 : vector<24x128xf32>
    %143 = arith.select %137, %140, %142 : vector<24x128xi1>, vector<24x128xf32>
    %c0_i32_48 = arith.constant 0 : i32
    %144 = vector.broadcast %c0_i32_48 : i32 to vector<8x128xi32>
    %145 = arith.cmpi eq, %0, %144 : vector<8x128xi32>
    %c5_i32_49 = arith.constant 5 : i32
    %146 = vector.broadcast %c5_i32_49 : i32 to vector<8x128xi32>
    %147 = arith.cmpi slt, %0, %146 : vector<8x128xi32>
    %cst_50 = arith.constant 0.000000e+00 : f32
    %148 = vector.shape_cast %123 : vector<1x128xf32> to vector<1x128xf32>
    %149 = vector.broadcast %148 : vector<1x128xf32> to vector<8x128xf32>
    %150 = vector.broadcast %cst_50 : f32 to vector<8x128xf32>
    %151 = arith.select %147, %149, %150 : vector<8x128xi1>, vector<8x128xf32>
    %152 = vector.shape_cast %119 : vector<1x128xf32> to vector<1x128xf32>
    %153 = vector.broadcast %152 : vector<1x128xf32> to vector<8x128xf32>
    %154 = arith.select %145, %153, %151 : vector<8x128xi1>, vector<8x128xf32>
    %c5_i32_51 = arith.constant 5 : i32
    %155 = vector.broadcast %c5_i32_51 : i32 to vector<8x128xi32>
    %156 = arith.cmpi eq, %0, %155 : vector<8x128xi32>
    %157 = arith.mulf %133, %154 : vector<8x128xf32>
    %158 = vector.shape_cast %123 : vector<1x128xf32> to vector<1x128xf32>
    %159 = vector.broadcast %158 : vector<1x128xf32> to vector<8x128xf32>
    %160 = arith.select %156, %159, %157 : vector<8x128xi1>, vector<8x128xf32>
    %161 = arith.addf %107, %160 : vector<8x128xf32>
    %162 = vector.broadcast %123 : vector<1x128xf32> to vector<24x128xf32>
    %163 = arith.mulf %143, %162 : vector<24x128xf32>
    %164 = arith.addf %110, %163 : vector<24x128xf32>
    %c0_52 = arith.constant 0 : index
    %c384 = arith.constant 384 : index
    %165 = vector.load %arg1[%c0_52, %c384] : memref<32x4096xf32, #tpu.memory_space<vmem>>, vector<8x128xf32>
    %c0_53 = arith.constant 0 : index
    %c384_54 = arith.constant 384 : index
    %166 = vector.load %arg2[%c0_53, %c384_54] : memref<32x4096xf32, #tpu.memory_space<vmem>>, vector<8x128xf32>
    %c8_55 = arith.constant 8 : index
    %c384_56 = arith.constant 384 : index
    %167 = vector.load %arg1[%c8_55, %c384_56] : memref<32x4096xf32, #tpu.memory_space<vmem>>, vector<24x128xf32>
    %c8_57 = arith.constant 8 : index
    %c384_58 = arith.constant 384 : index
    %168 = vector.load %arg2[%c8_57, %c384_58] : memref<32x4096xf32, #tpu.memory_space<vmem>>, vector<24x128xf32>
    %169 = vector.extract_strided_slice %166 {offsets = [0, 0], sizes = [1, 128], strides = [1, 1]} : vector<8x128xf32> to vector<1x128xf32>
    %cst_59 = arith.constant 0.000000e+00 : f32
    %170 = vector.broadcast %cst_59 : f32 to vector<1x128xf32>
    %171 = arith.cmpf oge, %169, %170 : vector<1x128xf32>
    %172 = arith.extui %171 : vector<1x128xi1> to vector<1x128xi32>
    %173 = arith.sitofp %172 : vector<1x128xi32> to vector<1x128xf32>
    %cst_60 = arith.constant 5.000000e-01 : f32
    %174 = vector.broadcast %cst_60 : f32 to vector<1x128xf32>
    %175 = arith.cmpf ogt, %169, %174 : vector<1x128xf32>
    %176 = arith.extui %175 : vector<1x128xi1> to vector<1x128xi32>
    %177 = arith.sitofp %176 : vector<1x128xi32> to vector<1x128xf32>
    %cst_61 = arith.constant 0.000000e+00 : f32
    %178 = vector.broadcast %cst_61 : f32 to vector<8x128xf32>
    %179 = arith.maximumf %165, %178 : vector<8x128xf32>
    %180 = arith.mulf %165, %166 : vector<8x128xf32>
    %181 = arith.subf %179, %180 : vector<8x128xf32>
    %182 = math.absf %165 : vector<8x128xf32>
    %cst_62 = arith.constant 0.000000e+00 : f32
    %183 = vector.broadcast %cst_62 : f32 to vector<8x128xf32>
    %184 = arith.subf %183, %182 : vector<8x128xf32>
    %185 = math.exp %184 : vector<8x128xf32>
    %186 = math.log1p %185 : vector<8x128xf32>
    %187 = arith.addf %181, %186 : vector<8x128xf32>
    %188 = arith.subf %167, %168 : vector<24x128xf32>
    %189 = math.absf %188 : vector<24x128xf32>
    %cst_63 = arith.constant 1.000000e+00 : f32
    %190 = vector.broadcast %cst_63 : f32 to vector<24x128xf32>
    %191 = arith.cmpf olt, %189, %190 : vector<24x128xf32>
    %cst_64 = arith.constant 5.000000e-01 : f32
    %192 = vector.broadcast %cst_64 : f32 to vector<24x128xf32>
    %193 = arith.mulf %192, %188 : vector<24x128xf32>
    %194 = arith.mulf %193, %188 : vector<24x128xf32>
    %cst_65 = arith.constant 5.000000e-01 : f32
    %195 = vector.broadcast %cst_65 : f32 to vector<24x128xf32>
    %196 = arith.subf %189, %195 : vector<24x128xf32>
    %197 = arith.select %191, %194, %196 : vector<24x128xi1>, vector<24x128xf32>
    %c0_i32_66 = arith.constant 0 : i32
    %198 = vector.broadcast %c0_i32_66 : i32 to vector<8x128xi32>
    %199 = arith.cmpi eq, %0, %198 : vector<8x128xi32>
    %c5_i32_67 = arith.constant 5 : i32
    %200 = vector.broadcast %c5_i32_67 : i32 to vector<8x128xi32>
    %201 = arith.cmpi slt, %0, %200 : vector<8x128xi32>
    %cst_68 = arith.constant 0.000000e+00 : f32
    %202 = vector.shape_cast %177 : vector<1x128xf32> to vector<1x128xf32>
    %203 = vector.broadcast %202 : vector<1x128xf32> to vector<8x128xf32>
    %204 = vector.broadcast %cst_68 : f32 to vector<8x128xf32>
    %205 = arith.select %201, %203, %204 : vector<8x128xi1>, vector<8x128xf32>
    %206 = vector.shape_cast %173 : vector<1x128xf32> to vector<1x128xf32>
    %207 = vector.broadcast %206 : vector<1x128xf32> to vector<8x128xf32>
    %208 = arith.select %199, %207, %205 : vector<8x128xi1>, vector<8x128xf32>
    %c5_i32_69 = arith.constant 5 : i32
    %209 = vector.broadcast %c5_i32_69 : i32 to vector<8x128xi32>
    %210 = arith.cmpi eq, %0, %209 : vector<8x128xi32>
    %211 = arith.mulf %187, %208 : vector<8x128xf32>
    %212 = vector.shape_cast %177 : vector<1x128xf32> to vector<1x128xf32>
    %213 = vector.broadcast %212 : vector<1x128xf32> to vector<8x128xf32>
    %214 = arith.select %210, %213, %211 : vector<8x128xi1>, vector<8x128xf32>
    %215 = arith.addf %161, %214 : vector<8x128xf32>
    %216 = vector.broadcast %177 : vector<1x128xf32> to vector<24x128xf32>
    %217 = arith.mulf %197, %216 : vector<24x128xf32>
    %218 = arith.addf %164, %217 : vector<24x128xf32>
    %c0_70 = arith.constant 0 : index
    %c512 = arith.constant 512 : index
    %219 = vector.load %arg1[%c0_70, %c512] : memref<32x4096xf32, #tpu.memory_space<vmem>>, vector<8x128xf32>
    %c0_71 = arith.constant 0 : index
    %c512_72 = arith.constant 512 : index
    %220 = vector.load %arg2[%c0_71, %c512_72] : memref<32x4096xf32, #tpu.memory_space<vmem>>, vector<8x128xf32>
    %c8_73 = arith.constant 8 : index
    %c512_74 = arith.constant 512 : index
    %221 = vector.load %arg1[%c8_73, %c512_74] : memref<32x4096xf32, #tpu.memory_space<vmem>>, vector<24x128xf32>
    %c8_75 = arith.constant 8 : index
    %c512_76 = arith.constant 512 : index
    %222 = vector.load %arg2[%c8_75, %c512_76] : memref<32x4096xf32, #tpu.memory_space<vmem>>, vector<24x128xf32>
    %223 = vector.extract_strided_slice %220 {offsets = [0, 0], sizes = [1, 128], strides = [1, 1]} : vector<8x128xf32> to vector<1x128xf32>
    %cst_77 = arith.constant 0.000000e+00 : f32
    %224 = vector.broadcast %cst_77 : f32 to vector<1x128xf32>
    %225 = arith.cmpf oge, %223, %224 : vector<1x128xf32>
    %226 = arith.extui %225 : vector<1x128xi1> to vector<1x128xi32>
    %227 = arith.sitofp %226 : vector<1x128xi32> to vector<1x128xf32>
    %cst_78 = arith.constant 5.000000e-01 : f32
    %228 = vector.broadcast %cst_78 : f32 to vector<1x128xf32>
    %229 = arith.cmpf ogt, %223, %228 : vector<1x128xf32>
    %230 = arith.extui %229 : vector<1x128xi1> to vector<1x128xi32>
    %231 = arith.sitofp %230 : vector<1x128xi32> to vector<1x128xf32>
    %cst_79 = arith.constant 0.000000e+00 : f32
    %232 = vector.broadcast %cst_79 : f32 to vector<8x128xf32>
    %233 = arith.maximumf %219, %232 : vector<8x128xf32>
    %234 = arith.mulf %219, %220 : vector<8x128xf32>
    %235 = arith.subf %233, %234 : vector<8x128xf32>
    %236 = math.absf %219 : vector<8x128xf32>
    %cst_80 = arith.constant 0.000000e+00 : f32
    %237 = vector.broadcast %cst_80 : f32 to vector<8x128xf32>
    %238 = arith.subf %237, %236 : vector<8x128xf32>
    %239 = math.exp %238 : vector<8x128xf32>
    %240 = math.log1p %239 : vector<8x128xf32>
    %241 = arith.addf %235, %240 : vector<8x128xf32>
    %242 = arith.subf %221, %222 : vector<24x128xf32>
    %243 = math.absf %242 : vector<24x128xf32>
    %cst_81 = arith.constant 1.000000e+00 : f32
    %244 = vector.broadcast %cst_81 : f32 to vector<24x128xf32>
    %245 = arith.cmpf olt, %243, %244 : vector<24x128xf32>
    %cst_82 = arith.constant 5.000000e-01 : f32
    %246 = vector.broadcast %cst_82 : f32 to vector<24x128xf32>
    %247 = arith.mulf %246, %242 : vector<24x128xf32>
    %248 = arith.mulf %247, %242 : vector<24x128xf32>
    %cst_83 = arith.constant 5.000000e-01 : f32
    %249 = vector.broadcast %cst_83 : f32 to vector<24x128xf32>
    %250 = arith.subf %243, %249 : vector<24x128xf32>
    %251 = arith.select %245, %248, %250 : vector<24x128xi1>, vector<24x128xf32>
    %c0_i32_84 = arith.constant 0 : i32
    %252 = vector.broadcast %c0_i32_84 : i32 to vector<8x128xi32>
    %253 = arith.cmpi eq, %0, %252 : vector<8x128xi32>
    %c5_i32_85 = arith.constant 5 : i32
    %254 = vector.broadcast %c5_i32_85 : i32 to vector<8x128xi32>
    %255 = arith.cmpi slt, %0, %254 : vector<8x128xi32>
    %cst_86 = arith.constant 0.000000e+00 : f32
    %256 = vector.shape_cast %231 : vector<1x128xf32> to vector<1x128xf32>
    %257 = vector.broadcast %256 : vector<1x128xf32> to vector<8x128xf32>
    %258 = vector.broadcast %cst_86 : f32 to vector<8x128xf32>
    %259 = arith.select %255, %257, %258 : vector<8x128xi1>, vector<8x128xf32>
    %260 = vector.shape_cast %227 : vector<1x128xf32> to vector<1x128xf32>
    %261 = vector.broadcast %260 : vector<1x128xf32> to vector<8x128xf32>
    %262 = arith.select %253, %261, %259 : vector<8x128xi1>, vector<8x128xf32>
    %c5_i32_87 = arith.constant 5 : i32
    %263 = vector.broadcast %c5_i32_87 : i32 to vector<8x128xi32>
    %264 = arith.cmpi eq, %0, %263 : vector<8x128xi32>
    %265 = arith.mulf %241, %262 : vector<8x128xf32>
    %266 = vector.shape_cast %231 : vector<1x128xf32> to vector<1x128xf32>
    %267 = vector.broadcast %266 : vector<1x128xf32> to vector<8x128xf32>
    %268 = arith.select %264, %267, %265 : vector<8x128xi1>, vector<8x128xf32>
    %269 = arith.addf %215, %268 : vector<8x128xf32>
    %270 = vector.broadcast %231 : vector<1x128xf32> to vector<24x128xf32>
    %271 = arith.mulf %251, %270 : vector<24x128xf32>
    %272 = arith.addf %218, %271 : vector<24x128xf32>
    %c0_88 = arith.constant 0 : index
    %c640 = arith.constant 640 : index
    %273 = vector.load %arg1[%c0_88, %c640] : memref<32x4096xf32, #tpu.memory_space<vmem>>, vector<8x128xf32>
    %c0_89 = arith.constant 0 : index
    %c640_90 = arith.constant 640 : index
    %274 = vector.load %arg2[%c0_89, %c640_90] : memref<32x4096xf32, #tpu.memory_space<vmem>>, vector<8x128xf32>
    %c8_91 = arith.constant 8 : index
    %c640_92 = arith.constant 640 : index
    %275 = vector.load %arg1[%c8_91, %c640_92] : memref<32x4096xf32, #tpu.memory_space<vmem>>, vector<24x128xf32>
    %c8_93 = arith.constant 8 : index
    %c640_94 = arith.constant 640 : index
    %276 = vector.load %arg2[%c8_93, %c640_94] : memref<32x4096xf32, #tpu.memory_space<vmem>>, vector<24x128xf32>
    %277 = vector.extract_strided_slice %274 {offsets = [0, 0], sizes = [1, 128], strides = [1, 1]} : vector<8x128xf32> to vector<1x128xf32>
    %cst_95 = arith.constant 0.000000e+00 : f32
    %278 = vector.broadcast %cst_95 : f32 to vector<1x128xf32>
    %279 = arith.cmpf oge, %277, %278 : vector<1x128xf32>
    %280 = arith.extui %279 : vector<1x128xi1> to vector<1x128xi32>
    %281 = arith.sitofp %280 : vector<1x128xi32> to vector<1x128xf32>
    %cst_96 = arith.constant 5.000000e-01 : f32
    %282 = vector.broadcast %cst_96 : f32 to vector<1x128xf32>
    %283 = arith.cmpf ogt, %277, %282 : vector<1x128xf32>
    %284 = arith.extui %283 : vector<1x128xi1> to vector<1x128xi32>
    %285 = arith.sitofp %284 : vector<1x128xi32> to vector<1x128xf32>
    %cst_97 = arith.constant 0.000000e+00 : f32
    %286 = vector.broadcast %cst_97 : f32 to vector<8x128xf32>
    %287 = arith.maximumf %273, %286 : vector<8x128xf32>
    %288 = arith.mulf %273, %274 : vector<8x128xf32>
    %289 = arith.subf %287, %288 : vector<8x128xf32>
    %290 = math.absf %273 : vector<8x128xf32>
    %cst_98 = arith.constant 0.000000e+00 : f32
    %291 = vector.broadcast %cst_98 : f32 to vector<8x128xf32>
    %292 = arith.subf %291, %290 : vector<8x128xf32>
    %293 = math.exp %292 : vector<8x128xf32>
    %294 = math.log1p %293 : vector<8x128xf32>
    %295 = arith.addf %289, %294 : vector<8x128xf32>
    %296 = arith.subf %275, %276 : vector<24x128xf32>
    %297 = math.absf %296 : vector<24x128xf32>
    %cst_99 = arith.constant 1.000000e+00 : f32
    %298 = vector.broadcast %cst_99 : f32 to vector<24x128xf32>
    %299 = arith.cmpf olt, %297, %298 : vector<24x128xf32>
    %cst_100 = arith.constant 5.000000e-01 : f32
    %300 = vector.broadcast %cst_100 : f32 to vector<24x128xf32>
    %301 = arith.mulf %300, %296 : vector<24x128xf32>
    %302 = arith.mulf %301, %296 : vector<24x128xf32>
    %cst_101 = arith.constant 5.000000e-01 : f32
    %303 = vector.broadcast %cst_101 : f32 to vector<24x128xf32>
    %304 = arith.subf %297, %303 : vector<24x128xf32>
    %305 = arith.select %299, %302, %304 : vector<24x128xi1>, vector<24x128xf32>
    %c0_i32_102 = arith.constant 0 : i32
    %306 = vector.broadcast %c0_i32_102 : i32 to vector<8x128xi32>
    %307 = arith.cmpi eq, %0, %306 : vector<8x128xi32>
    %c5_i32_103 = arith.constant 5 : i32
    %308 = vector.broadcast %c5_i32_103 : i32 to vector<8x128xi32>
    %309 = arith.cmpi slt, %0, %308 : vector<8x128xi32>
    %cst_104 = arith.constant 0.000000e+00 : f32
    %310 = vector.shape_cast %285 : vector<1x128xf32> to vector<1x128xf32>
    %311 = vector.broadcast %310 : vector<1x128xf32> to vector<8x128xf32>
    %312 = vector.broadcast %cst_104 : f32 to vector<8x128xf32>
    %313 = arith.select %309, %311, %312 : vector<8x128xi1>, vector<8x128xf32>
    %314 = vector.shape_cast %281 : vector<1x128xf32> to vector<1x128xf32>
    %315 = vector.broadcast %314 : vector<1x128xf32> to vector<8x128xf32>
    %316 = arith.select %307, %315, %313 : vector<8x128xi1>, vector<8x128xf32>
    %c5_i32_105 = arith.constant 5 : i32
    %317 = vector.broadcast %c5_i32_105 : i32 to vector<8x128xi32>
    %318 = arith.cmpi eq, %0, %317 : vector<8x128xi32>
    %319 = arith.mulf %295, %316 : vector<8x128xf32>
    %320 = vector.shape_cast %285 : vector<1x128xf32> to vector<1x128xf32>
    %321 = vector.broadcast %320 : vector<1x128xf32> to vector<8x128xf32>
    %322 = arith.select %318, %321, %319 : vector<8x128xi1>, vector<8x128xf32>
    %323 = arith.addf %269, %322 : vector<8x128xf32>
    %324 = vector.broadcast %285 : vector<1x128xf32> to vector<24x128xf32>
    %325 = arith.mulf %305, %324 : vector<24x128xf32>
    %326 = arith.addf %272, %325 : vector<24x128xf32>
    %c0_106 = arith.constant 0 : index
    %c768 = arith.constant 768 : index
    %327 = vector.load %arg1[%c0_106, %c768] : memref<32x4096xf32, #tpu.memory_space<vmem>>, vector<8x128xf32>
    %c0_107 = arith.constant 0 : index
    %c768_108 = arith.constant 768 : index
    %328 = vector.load %arg2[%c0_107, %c768_108] : memref<32x4096xf32, #tpu.memory_space<vmem>>, vector<8x128xf32>
    %c8_109 = arith.constant 8 : index
    %c768_110 = arith.constant 768 : index
    %329 = vector.load %arg1[%c8_109, %c768_110] : memref<32x4096xf32, #tpu.memory_space<vmem>>, vector<24x128xf32>
    %c8_111 = arith.constant 8 : index
    %c768_112 = arith.constant 768 : index
    %330 = vector.load %arg2[%c8_111, %c768_112] : memref<32x4096xf32, #tpu.memory_space<vmem>>, vector<24x128xf32>
    %331 = vector.extract_strided_slice %328 {offsets = [0, 0], sizes = [1, 128], strides = [1, 1]} : vector<8x128xf32> to vector<1x128xf32>
    %cst_113 = arith.constant 0.000000e+00 : f32
    %332 = vector.broadcast %cst_113 : f32 to vector<1x128xf32>
    %333 = arith.cmpf oge, %331, %332 : vector<1x128xf32>
    %334 = arith.extui %333 : vector<1x128xi1> to vector<1x128xi32>
    %335 = arith.sitofp %334 : vector<1x128xi32> to vector<1x128xf32>
    %cst_114 = arith.constant 5.000000e-01 : f32
    %336 = vector.broadcast %cst_114 : f32 to vector<1x128xf32>
    %337 = arith.cmpf ogt, %331, %336 : vector<1x128xf32>
    %338 = arith.extui %337 : vector<1x128xi1> to vector<1x128xi32>
    %339 = arith.sitofp %338 : vector<1x128xi32> to vector<1x128xf32>
    %cst_115 = arith.constant 0.000000e+00 : f32
    %340 = vector.broadcast %cst_115 : f32 to vector<8x128xf32>
    %341 = arith.maximumf %327, %340 : vector<8x128xf32>
    %342 = arith.mulf %327, %328 : vector<8x128xf32>
    %343 = arith.subf %341, %342 : vector<8x128xf32>
    %344 = math.absf %327 : vector<8x128xf32>
    %cst_116 = arith.constant 0.000000e+00 : f32
    %345 = vector.broadcast %cst_116 : f32 to vector<8x128xf32>
    %346 = arith.subf %345, %344 : vector<8x128xf32>
    %347 = math.exp %346 : vector<8x128xf32>
    %348 = math.log1p %347 : vector<8x128xf32>
    %349 = arith.addf %343, %348 : vector<8x128xf32>
    %350 = arith.subf %329, %330 : vector<24x128xf32>
    %351 = math.absf %350 : vector<24x128xf32>
    %cst_117 = arith.constant 1.000000e+00 : f32
    %352 = vector.broadcast %cst_117 : f32 to vector<24x128xf32>
    %353 = arith.cmpf olt, %351, %352 : vector<24x128xf32>
    %cst_118 = arith.constant 5.000000e-01 : f32
    %354 = vector.broadcast %cst_118 : f32 to vector<24x128xf32>
    %355 = arith.mulf %354, %350 : vector<24x128xf32>
    %356 = arith.mulf %355, %350 : vector<24x128xf32>
    %cst_119 = arith.constant 5.000000e-01 : f32
    %357 = vector.broadcast %cst_119 : f32 to vector<24x128xf32>
    %358 = arith.subf %351, %357 : vector<24x128xf32>
    %359 = arith.select %353, %356, %358 : vector<24x128xi1>, vector<24x128xf32>
    %c0_i32_120 = arith.constant 0 : i32
    %360 = vector.broadcast %c0_i32_120 : i32 to vector<8x128xi32>
    %361 = arith.cmpi eq, %0, %360 : vector<8x128xi32>
    %c5_i32_121 = arith.constant 5 : i32
    %362 = vector.broadcast %c5_i32_121 : i32 to vector<8x128xi32>
    %363 = arith.cmpi slt, %0, %362 : vector<8x128xi32>
    %cst_122 = arith.constant 0.000000e+00 : f32
    %364 = vector.shape_cast %339 : vector<1x128xf32> to vector<1x128xf32>
    %365 = vector.broadcast %364 : vector<1x128xf32> to vector<8x128xf32>
    %366 = vector.broadcast %cst_122 : f32 to vector<8x128xf32>
    %367 = arith.select %363, %365, %366 : vector<8x128xi1>, vector<8x128xf32>
    %368 = vector.shape_cast %335 : vector<1x128xf32> to vector<1x128xf32>
    %369 = vector.broadcast %368 : vector<1x128xf32> to vector<8x128xf32>
    %370 = arith.select %361, %369, %367 : vector<8x128xi1>, vector<8x128xf32>
    %c5_i32_123 = arith.constant 5 : i32
    %371 = vector.broadcast %c5_i32_123 : i32 to vector<8x128xi32>
    %372 = arith.cmpi eq, %0, %371 : vector<8x128xi32>
    %373 = arith.mulf %349, %370 : vector<8x128xf32>
    %374 = vector.shape_cast %339 : vector<1x128xf32> to vector<1x128xf32>
    %375 = vector.broadcast %374 : vector<1x128xf32> to vector<8x128xf32>
    %376 = arith.select %372, %375, %373 : vector<8x128xi1>, vector<8x128xf32>
    %377 = arith.addf %323, %376 : vector<8x128xf32>
    %378 = vector.broadcast %339 : vector<1x128xf32> to vector<24x128xf32>
    %379 = arith.mulf %359, %378 : vector<24x128xf32>
    %380 = arith.addf %326, %379 : vector<24x128xf32>
    %c0_124 = arith.constant 0 : index
    %c896 = arith.constant 896 : index
    %381 = vector.load %arg1[%c0_124, %c896] : memref<32x4096xf32, #tpu.memory_space<vmem>>, vector<8x128xf32>
    %c0_125 = arith.constant 0 : index
    %c896_126 = arith.constant 896 : index
    %382 = vector.load %arg2[%c0_125, %c896_126] : memref<32x4096xf32, #tpu.memory_space<vmem>>, vector<8x128xf32>
    %c8_127 = arith.constant 8 : index
    %c896_128 = arith.constant 896 : index
    %383 = vector.load %arg1[%c8_127, %c896_128] : memref<32x4096xf32, #tpu.memory_space<vmem>>, vector<24x128xf32>
    %c8_129 = arith.constant 8 : index
    %c896_130 = arith.constant 896 : index
    %384 = vector.load %arg2[%c8_129, %c896_130] : memref<32x4096xf32, #tpu.memory_space<vmem>>, vector<24x128xf32>
    %385 = vector.extract_strided_slice %382 {offsets = [0, 0], sizes = [1, 128], strides = [1, 1]} : vector<8x128xf32> to vector<1x128xf32>
    %cst_131 = arith.constant 0.000000e+00 : f32
    %386 = vector.broadcast %cst_131 : f32 to vector<1x128xf32>
    %387 = arith.cmpf oge, %385, %386 : vector<1x128xf32>
    %388 = arith.extui %387 : vector<1x128xi1> to vector<1x128xi32>
    %389 = arith.sitofp %388 : vector<1x128xi32> to vector<1x128xf32>
    %cst_132 = arith.constant 5.000000e-01 : f32
    %390 = vector.broadcast %cst_132 : f32 to vector<1x128xf32>
    %391 = arith.cmpf ogt, %385, %390 : vector<1x128xf32>
    %392 = arith.extui %391 : vector<1x128xi1> to vector<1x128xi32>
    %393 = arith.sitofp %392 : vector<1x128xi32> to vector<1x128xf32>
    %cst_133 = arith.constant 0.000000e+00 : f32
    %394 = vector.broadcast %cst_133 : f32 to vector<8x128xf32>
    %395 = arith.maximumf %381, %394 : vector<8x128xf32>
    %396 = arith.mulf %381, %382 : vector<8x128xf32>
    %397 = arith.subf %395, %396 : vector<8x128xf32>
    %398 = math.absf %381 : vector<8x128xf32>
    %cst_134 = arith.constant 0.000000e+00 : f32
    %399 = vector.broadcast %cst_134 : f32 to vector<8x128xf32>
    %400 = arith.subf %399, %398 : vector<8x128xf32>
    %401 = math.exp %400 : vector<8x128xf32>
    %402 = math.log1p %401 : vector<8x128xf32>
    %403 = arith.addf %397, %402 : vector<8x128xf32>
    %404 = arith.subf %383, %384 : vector<24x128xf32>
    %405 = math.absf %404 : vector<24x128xf32>
    %cst_135 = arith.constant 1.000000e+00 : f32
    %406 = vector.broadcast %cst_135 : f32 to vector<24x128xf32>
    %407 = arith.cmpf olt, %405, %406 : vector<24x128xf32>
    %cst_136 = arith.constant 5.000000e-01 : f32
    %408 = vector.broadcast %cst_136 : f32 to vector<24x128xf32>
    %409 = arith.mulf %408, %404 : vector<24x128xf32>
    %410 = arith.mulf %409, %404 : vector<24x128xf32>
    %cst_137 = arith.constant 5.000000e-01 : f32
    %411 = vector.broadcast %cst_137 : f32 to vector<24x128xf32>
    %412 = arith.subf %405, %411 : vector<24x128xf32>
    %413 = arith.select %407, %410, %412 : vector<24x128xi1>, vector<24x128xf32>
    %c0_i32_138 = arith.constant 0 : i32
    %414 = vector.broadcast %c0_i32_138 : i32 to vector<8x128xi32>
    %415 = arith.cmpi eq, %0, %414 : vector<8x128xi32>
    %c5_i32_139 = arith.constant 5 : i32
    %416 = vector.broadcast %c5_i32_139 : i32 to vector<8x128xi32>
    %417 = arith.cmpi slt, %0, %416 : vector<8x128xi32>
    %cst_140 = arith.constant 0.000000e+00 : f32
    %418 = vector.shape_cast %393 : vector<1x128xf32> to vector<1x128xf32>
    %419 = vector.broadcast %418 : vector<1x128xf32> to vector<8x128xf32>
    %420 = vector.broadcast %cst_140 : f32 to vector<8x128xf32>
    %421 = arith.select %417, %419, %420 : vector<8x128xi1>, vector<8x128xf32>
    %422 = vector.shape_cast %389 : vector<1x128xf32> to vector<1x128xf32>
    %423 = vector.broadcast %422 : vector<1x128xf32> to vector<8x128xf32>
    %424 = arith.select %415, %423, %421 : vector<8x128xi1>, vector<8x128xf32>
    %c5_i32_141 = arith.constant 5 : i32
    %425 = vector.broadcast %c5_i32_141 : i32 to vector<8x128xi32>
    %426 = arith.cmpi eq, %0, %425 : vector<8x128xi32>
    %427 = arith.mulf %403, %424 : vector<8x128xf32>
    %428 = vector.shape_cast %393 : vector<1x128xf32> to vector<1x128xf32>
    %429 = vector.broadcast %428 : vector<1x128xf32> to vector<8x128xf32>
    %430 = arith.select %426, %429, %427 : vector<8x128xi1>, vector<8x128xf32>
    %431 = arith.addf %377, %430 : vector<8x128xf32>
    %432 = vector.broadcast %393 : vector<1x128xf32> to vector<24x128xf32>
    %433 = arith.mulf %413, %432 : vector<24x128xf32>
    %434 = arith.addf %380, %433 : vector<24x128xf32>
    %c0_142 = arith.constant 0 : index
    %c1024 = arith.constant 1024 : index
    %435 = vector.load %arg1[%c0_142, %c1024] : memref<32x4096xf32, #tpu.memory_space<vmem>>, vector<8x128xf32>
    %c0_143 = arith.constant 0 : index
    %c1024_144 = arith.constant 1024 : index
    %436 = vector.load %arg2[%c0_143, %c1024_144] : memref<32x4096xf32, #tpu.memory_space<vmem>>, vector<8x128xf32>
    %c8_145 = arith.constant 8 : index
    %c1024_146 = arith.constant 1024 : index
    %437 = vector.load %arg1[%c8_145, %c1024_146] : memref<32x4096xf32, #tpu.memory_space<vmem>>, vector<24x128xf32>
    %c8_147 = arith.constant 8 : index
    %c1024_148 = arith.constant 1024 : index
    %438 = vector.load %arg2[%c8_147, %c1024_148] : memref<32x4096xf32, #tpu.memory_space<vmem>>, vector<24x128xf32>
    %439 = vector.extract_strided_slice %436 {offsets = [0, 0], sizes = [1, 128], strides = [1, 1]} : vector<8x128xf32> to vector<1x128xf32>
    %cst_149 = arith.constant 0.000000e+00 : f32
    %440 = vector.broadcast %cst_149 : f32 to vector<1x128xf32>
    %441 = arith.cmpf oge, %439, %440 : vector<1x128xf32>
    %442 = arith.extui %441 : vector<1x128xi1> to vector<1x128xi32>
    %443 = arith.sitofp %442 : vector<1x128xi32> to vector<1x128xf32>
    %cst_150 = arith.constant 5.000000e-01 : f32
    %444 = vector.broadcast %cst_150 : f32 to vector<1x128xf32>
    %445 = arith.cmpf ogt, %439, %444 : vector<1x128xf32>
    %446 = arith.extui %445 : vector<1x128xi1> to vector<1x128xi32>
    %447 = arith.sitofp %446 : vector<1x128xi32> to vector<1x128xf32>
    %cst_151 = arith.constant 0.000000e+00 : f32
    %448 = vector.broadcast %cst_151 : f32 to vector<8x128xf32>
    %449 = arith.maximumf %435, %448 : vector<8x128xf32>
    %450 = arith.mulf %435, %436 : vector<8x128xf32>
    %451 = arith.subf %449, %450 : vector<8x128xf32>
    %452 = math.absf %435 : vector<8x128xf32>
    %cst_152 = arith.constant 0.000000e+00 : f32
    %453 = vector.broadcast %cst_152 : f32 to vector<8x128xf32>
    %454 = arith.subf %453, %452 : vector<8x128xf32>
    %455 = math.exp %454 : vector<8x128xf32>
    %456 = math.log1p %455 : vector<8x128xf32>
    %457 = arith.addf %451, %456 : vector<8x128xf32>
    %458 = arith.subf %437, %438 : vector<24x128xf32>
    %459 = math.absf %458 : vector<24x128xf32>
    %cst_153 = arith.constant 1.000000e+00 : f32
    %460 = vector.broadcast %cst_153 : f32 to vector<24x128xf32>
    %461 = arith.cmpf olt, %459, %460 : vector<24x128xf32>
    %cst_154 = arith.constant 5.000000e-01 : f32
    %462 = vector.broadcast %cst_154 : f32 to vector<24x128xf32>
    %463 = arith.mulf %462, %458 : vector<24x128xf32>
    %464 = arith.mulf %463, %458 : vector<24x128xf32>
    %cst_155 = arith.constant 5.000000e-01 : f32
    %465 = vector.broadcast %cst_155 : f32 to vector<24x128xf32>
    %466 = arith.subf %459, %465 : vector<24x128xf32>
    %467 = arith.select %461, %464, %466 : vector<24x128xi1>, vector<24x128xf32>
    %c0_i32_156 = arith.constant 0 : i32
    %468 = vector.broadcast %c0_i32_156 : i32 to vector<8x128xi32>
    %469 = arith.cmpi eq, %0, %468 : vector<8x128xi32>
    %c5_i32_157 = arith.constant 5 : i32
    %470 = vector.broadcast %c5_i32_157 : i32 to vector<8x128xi32>
    %471 = arith.cmpi slt, %0, %470 : vector<8x128xi32>
    %cst_158 = arith.constant 0.000000e+00 : f32
    %472 = vector.shape_cast %447 : vector<1x128xf32> to vector<1x128xf32>
    %473 = vector.broadcast %472 : vector<1x128xf32> to vector<8x128xf32>
    %474 = vector.broadcast %cst_158 : f32 to vector<8x128xf32>
    %475 = arith.select %471, %473, %474 : vector<8x128xi1>, vector<8x128xf32>
    %476 = vector.shape_cast %443 : vector<1x128xf32> to vector<1x128xf32>
    %477 = vector.broadcast %476 : vector<1x128xf32> to vector<8x128xf32>
    %478 = arith.select %469, %477, %475 : vector<8x128xi1>, vector<8x128xf32>
    %c5_i32_159 = arith.constant 5 : i32
    %479 = vector.broadcast %c5_i32_159 : i32 to vector<8x128xi32>
    %480 = arith.cmpi eq, %0, %479 : vector<8x128xi32>
    %481 = arith.mulf %457, %478 : vector<8x128xf32>
    %482 = vector.shape_cast %447 : vector<1x128xf32> to vector<1x128xf32>
    %483 = vector.broadcast %482 : vector<1x128xf32> to vector<8x128xf32>
    %484 = arith.select %480, %483, %481 : vector<8x128xi1>, vector<8x128xf32>
    %485 = arith.addf %431, %484 : vector<8x128xf32>
    %486 = vector.broadcast %447 : vector<1x128xf32> to vector<24x128xf32>
    %487 = arith.mulf %467, %486 : vector<24x128xf32>
    %488 = arith.addf %434, %487 : vector<24x128xf32>
    %c0_160 = arith.constant 0 : index
    %c1152 = arith.constant 1152 : index
    %489 = vector.load %arg1[%c0_160, %c1152] : memref<32x4096xf32, #tpu.memory_space<vmem>>, vector<8x128xf32>
    %c0_161 = arith.constant 0 : index
    %c1152_162 = arith.constant 1152 : index
    %490 = vector.load %arg2[%c0_161, %c1152_162] : memref<32x4096xf32, #tpu.memory_space<vmem>>, vector<8x128xf32>
    %c8_163 = arith.constant 8 : index
    %c1152_164 = arith.constant 1152 : index
    %491 = vector.load %arg1[%c8_163, %c1152_164] : memref<32x4096xf32, #tpu.memory_space<vmem>>, vector<24x128xf32>
    %c8_165 = arith.constant 8 : index
    %c1152_166 = arith.constant 1152 : index
    %492 = vector.load %arg2[%c8_165, %c1152_166] : memref<32x4096xf32, #tpu.memory_space<vmem>>, vector<24x128xf32>
    %493 = vector.extract_strided_slice %490 {offsets = [0, 0], sizes = [1, 128], strides = [1, 1]} : vector<8x128xf32> to vector<1x128xf32>
    %cst_167 = arith.constant 0.000000e+00 : f32
    %494 = vector.broadcast %cst_167 : f32 to vector<1x128xf32>
    %495 = arith.cmpf oge, %493, %494 : vector<1x128xf32>
    %496 = arith.extui %495 : vector<1x128xi1> to vector<1x128xi32>
    %497 = arith.sitofp %496 : vector<1x128xi32> to vector<1x128xf32>
    %cst_168 = arith.constant 5.000000e-01 : f32
    %498 = vector.broadcast %cst_168 : f32 to vector<1x128xf32>
    %499 = arith.cmpf ogt, %493, %498 : vector<1x128xf32>
    %500 = arith.extui %499 : vector<1x128xi1> to vector<1x128xi32>
    %501 = arith.sitofp %500 : vector<1x128xi32> to vector<1x128xf32>
    %cst_169 = arith.constant 0.000000e+00 : f32
    %502 = vector.broadcast %cst_169 : f32 to vector<8x128xf32>
    %503 = arith.maximumf %489, %502 : vector<8x128xf32>
    %504 = arith.mulf %489, %490 : vector<8x128xf32>
    %505 = arith.subf %503, %504 : vector<8x128xf32>
    %506 = math.absf %489 : vector<8x128xf32>
    %cst_170 = arith.constant 0.000000e+00 : f32
    %507 = vector.broadcast %cst_170 : f32 to vector<8x128xf32>
    %508 = arith.subf %507, %506 : vector<8x128xf32>
    %509 = math.exp %508 : vector<8x128xf32>
    %510 = math.log1p %509 : vector<8x128xf32>
    %511 = arith.addf %505, %510 : vector<8x128xf32>
    %512 = arith.subf %491, %492 : vector<24x128xf32>
    %513 = math.absf %512 : vector<24x128xf32>
    %cst_171 = arith.constant 1.000000e+00 : f32
    %514 = vector.broadcast %cst_171 : f32 to vector<24x128xf32>
    %515 = arith.cmpf olt, %513, %514 : vector<24x128xf32>
    %cst_172 = arith.constant 5.000000e-01 : f32
    %516 = vector.broadcast %cst_172 : f32 to vector<24x128xf32>
    %517 = arith.mulf %516, %512 : vector<24x128xf32>
    %518 = arith.mulf %517, %512 : vector<24x128xf32>
    %cst_173 = arith.constant 5.000000e-01 : f32
    %519 = vector.broadcast %cst_173 : f32 to vector<24x128xf32>
    %520 = arith.subf %513, %519 : vector<24x128xf32>
    %521 = arith.select %515, %518, %520 : vector<24x128xi1>, vector<24x128xf32>
    %c0_i32_174 = arith.constant 0 : i32
    %522 = vector.broadcast %c0_i32_174 : i32 to vector<8x128xi32>
    %523 = arith.cmpi eq, %0, %522 : vector<8x128xi32>
    %c5_i32_175 = arith.constant 5 : i32
    %524 = vector.broadcast %c5_i32_175 : i32 to vector<8x128xi32>
    %525 = arith.cmpi slt, %0, %524 : vector<8x128xi32>
    %cst_176 = arith.constant 0.000000e+00 : f32
    %526 = vector.shape_cast %501 : vector<1x128xf32> to vector<1x128xf32>
    %527 = vector.broadcast %526 : vector<1x128xf32> to vector<8x128xf32>
    %528 = vector.broadcast %cst_176 : f32 to vector<8x128xf32>
    %529 = arith.select %525, %527, %528 : vector<8x128xi1>, vector<8x128xf32>
    %530 = vector.shape_cast %497 : vector<1x128xf32> to vector<1x128xf32>
    %531 = vector.broadcast %530 : vector<1x128xf32> to vector<8x128xf32>
    %532 = arith.select %523, %531, %529 : vector<8x128xi1>, vector<8x128xf32>
    %c5_i32_177 = arith.constant 5 : i32
    %533 = vector.broadcast %c5_i32_177 : i32 to vector<8x128xi32>
    %534 = arith.cmpi eq, %0, %533 : vector<8x128xi32>
    %535 = arith.mulf %511, %532 : vector<8x128xf32>
    %536 = vector.shape_cast %501 : vector<1x128xf32> to vector<1x128xf32>
    %537 = vector.broadcast %536 : vector<1x128xf32> to vector<8x128xf32>
    %538 = arith.select %534, %537, %535 : vector<8x128xi1>, vector<8x128xf32>
    %539 = arith.addf %485, %538 : vector<8x128xf32>
    %540 = vector.broadcast %501 : vector<1x128xf32> to vector<24x128xf32>
    %541 = arith.mulf %521, %540 : vector<24x128xf32>
    %542 = arith.addf %488, %541 : vector<24x128xf32>
    %c0_178 = arith.constant 0 : index
    %c1280 = arith.constant 1280 : index
    %543 = vector.load %arg1[%c0_178, %c1280] : memref<32x4096xf32, #tpu.memory_space<vmem>>, vector<8x128xf32>
    %c0_179 = arith.constant 0 : index
    %c1280_180 = arith.constant 1280 : index
    %544 = vector.load %arg2[%c0_179, %c1280_180] : memref<32x4096xf32, #tpu.memory_space<vmem>>, vector<8x128xf32>
    %c8_181 = arith.constant 8 : index
    %c1280_182 = arith.constant 1280 : index
    %545 = vector.load %arg1[%c8_181, %c1280_182] : memref<32x4096xf32, #tpu.memory_space<vmem>>, vector<24x128xf32>
    %c8_183 = arith.constant 8 : index
    %c1280_184 = arith.constant 1280 : index
    %546 = vector.load %arg2[%c8_183, %c1280_184] : memref<32x4096xf32, #tpu.memory_space<vmem>>, vector<24x128xf32>
    %547 = vector.extract_strided_slice %544 {offsets = [0, 0], sizes = [1, 128], strides = [1, 1]} : vector<8x128xf32> to vector<1x128xf32>
    %cst_185 = arith.constant 0.000000e+00 : f32
    %548 = vector.broadcast %cst_185 : f32 to vector<1x128xf32>
    %549 = arith.cmpf oge, %547, %548 : vector<1x128xf32>
    %550 = arith.extui %549 : vector<1x128xi1> to vector<1x128xi32>
    %551 = arith.sitofp %550 : vector<1x128xi32> to vector<1x128xf32>
    %cst_186 = arith.constant 5.000000e-01 : f32
    %552 = vector.broadcast %cst_186 : f32 to vector<1x128xf32>
    %553 = arith.cmpf ogt, %547, %552 : vector<1x128xf32>
    %554 = arith.extui %553 : vector<1x128xi1> to vector<1x128xi32>
    %555 = arith.sitofp %554 : vector<1x128xi32> to vector<1x128xf32>
    %cst_187 = arith.constant 0.000000e+00 : f32
    %556 = vector.broadcast %cst_187 : f32 to vector<8x128xf32>
    %557 = arith.maximumf %543, %556 : vector<8x128xf32>
    %558 = arith.mulf %543, %544 : vector<8x128xf32>
    %559 = arith.subf %557, %558 : vector<8x128xf32>
    %560 = math.absf %543 : vector<8x128xf32>
    %cst_188 = arith.constant 0.000000e+00 : f32
    %561 = vector.broadcast %cst_188 : f32 to vector<8x128xf32>
    %562 = arith.subf %561, %560 : vector<8x128xf32>
    %563 = math.exp %562 : vector<8x128xf32>
    %564 = math.log1p %563 : vector<8x128xf32>
    %565 = arith.addf %559, %564 : vector<8x128xf32>
    %566 = arith.subf %545, %546 : vector<24x128xf32>
    %567 = math.absf %566 : vector<24x128xf32>
    %cst_189 = arith.constant 1.000000e+00 : f32
    %568 = vector.broadcast %cst_189 : f32 to vector<24x128xf32>
    %569 = arith.cmpf olt, %567, %568 : vector<24x128xf32>
    %cst_190 = arith.constant 5.000000e-01 : f32
    %570 = vector.broadcast %cst_190 : f32 to vector<24x128xf32>
    %571 = arith.mulf %570, %566 : vector<24x128xf32>
    %572 = arith.mulf %571, %566 : vector<24x128xf32>
    %cst_191 = arith.constant 5.000000e-01 : f32
    %573 = vector.broadcast %cst_191 : f32 to vector<24x128xf32>
    %574 = arith.subf %567, %573 : vector<24x128xf32>
    %575 = arith.select %569, %572, %574 : vector<24x128xi1>, vector<24x128xf32>
    %c0_i32_192 = arith.constant 0 : i32
    %576 = vector.broadcast %c0_i32_192 : i32 to vector<8x128xi32>
    %577 = arith.cmpi eq, %0, %576 : vector<8x128xi32>
    %c5_i32_193 = arith.constant 5 : i32
    %578 = vector.broadcast %c5_i32_193 : i32 to vector<8x128xi32>
    %579 = arith.cmpi slt, %0, %578 : vector<8x128xi32>
    %cst_194 = arith.constant 0.000000e+00 : f32
    %580 = vector.shape_cast %555 : vector<1x128xf32> to vector<1x128xf32>
    %581 = vector.broadcast %580 : vector<1x128xf32> to vector<8x128xf32>
    %582 = vector.broadcast %cst_194 : f32 to vector<8x128xf32>
    %583 = arith.select %579, %581, %582 : vector<8x128xi1>, vector<8x128xf32>
    %584 = vector.shape_cast %551 : vector<1x128xf32> to vector<1x128xf32>
    %585 = vector.broadcast %584 : vector<1x128xf32> to vector<8x128xf32>
    %586 = arith.select %577, %585, %583 : vector<8x128xi1>, vector<8x128xf32>
    %c5_i32_195 = arith.constant 5 : i32
    %587 = vector.broadcast %c5_i32_195 : i32 to vector<8x128xi32>
    %588 = arith.cmpi eq, %0, %587 : vector<8x128xi32>
    %589 = arith.mulf %565, %586 : vector<8x128xf32>
    %590 = vector.shape_cast %555 : vector<1x128xf32> to vector<1x128xf32>
    %591 = vector.broadcast %590 : vector<1x128xf32> to vector<8x128xf32>
    %592 = arith.select %588, %591, %589 : vector<8x128xi1>, vector<8x128xf32>
    %593 = arith.addf %539, %592 : vector<8x128xf32>
    %594 = vector.broadcast %555 : vector<1x128xf32> to vector<24x128xf32>
    %595 = arith.mulf %575, %594 : vector<24x128xf32>
    %596 = arith.addf %542, %595 : vector<24x128xf32>
    %c0_196 = arith.constant 0 : index
    %c1408 = arith.constant 1408 : index
    %597 = vector.load %arg1[%c0_196, %c1408] : memref<32x4096xf32, #tpu.memory_space<vmem>>, vector<8x128xf32>
    %c0_197 = arith.constant 0 : index
    %c1408_198 = arith.constant 1408 : index
    %598 = vector.load %arg2[%c0_197, %c1408_198] : memref<32x4096xf32, #tpu.memory_space<vmem>>, vector<8x128xf32>
    %c8_199 = arith.constant 8 : index
    %c1408_200 = arith.constant 1408 : index
    %599 = vector.load %arg1[%c8_199, %c1408_200] : memref<32x4096xf32, #tpu.memory_space<vmem>>, vector<24x128xf32>
    %c8_201 = arith.constant 8 : index
    %c1408_202 = arith.constant 1408 : index
    %600 = vector.load %arg2[%c8_201, %c1408_202] : memref<32x4096xf32, #tpu.memory_space<vmem>>, vector<24x128xf32>
    %601 = vector.extract_strided_slice %598 {offsets = [0, 0], sizes = [1, 128], strides = [1, 1]} : vector<8x128xf32> to vector<1x128xf32>
    %cst_203 = arith.constant 0.000000e+00 : f32
    %602 = vector.broadcast %cst_203 : f32 to vector<1x128xf32>
    %603 = arith.cmpf oge, %601, %602 : vector<1x128xf32>
    %604 = arith.extui %603 : vector<1x128xi1> to vector<1x128xi32>
    %605 = arith.sitofp %604 : vector<1x128xi32> to vector<1x128xf32>
    %cst_204 = arith.constant 5.000000e-01 : f32
    %606 = vector.broadcast %cst_204 : f32 to vector<1x128xf32>
    %607 = arith.cmpf ogt, %601, %606 : vector<1x128xf32>
    %608 = arith.extui %607 : vector<1x128xi1> to vector<1x128xi32>
    %609 = arith.sitofp %608 : vector<1x128xi32> to vector<1x128xf32>
    %cst_205 = arith.constant 0.000000e+00 : f32
    %610 = vector.broadcast %cst_205 : f32 to vector<8x128xf32>
    %611 = arith.maximumf %597, %610 : vector<8x128xf32>
    %612 = arith.mulf %597, %598 : vector<8x128xf32>
    %613 = arith.subf %611, %612 : vector<8x128xf32>
    %614 = math.absf %597 : vector<8x128xf32>
    %cst_206 = arith.constant 0.000000e+00 : f32
    %615 = vector.broadcast %cst_206 : f32 to vector<8x128xf32>
    %616 = arith.subf %615, %614 : vector<8x128xf32>
    %617 = math.exp %616 : vector<8x128xf32>
    %618 = math.log1p %617 : vector<8x128xf32>
    %619 = arith.addf %613, %618 : vector<8x128xf32>
    %620 = arith.subf %599, %600 : vector<24x128xf32>
    %621 = math.absf %620 : vector<24x128xf32>
    %cst_207 = arith.constant 1.000000e+00 : f32
    %622 = vector.broadcast %cst_207 : f32 to vector<24x128xf32>
    %623 = arith.cmpf olt, %621, %622 : vector<24x128xf32>
    %cst_208 = arith.constant 5.000000e-01 : f32
    %624 = vector.broadcast %cst_208 : f32 to vector<24x128xf32>
    %625 = arith.mulf %624, %620 : vector<24x128xf32>
    %626 = arith.mulf %625, %620 : vector<24x128xf32>
    %cst_209 = arith.constant 5.000000e-01 : f32
    %627 = vector.broadcast %cst_209 : f32 to vector<24x128xf32>
    %628 = arith.subf %621, %627 : vector<24x128xf32>
    %629 = arith.select %623, %626, %628 : vector<24x128xi1>, vector<24x128xf32>
    %c0_i32_210 = arith.constant 0 : i32
    %630 = vector.broadcast %c0_i32_210 : i32 to vector<8x128xi32>
    %631 = arith.cmpi eq, %0, %630 : vector<8x128xi32>
    %c5_i32_211 = arith.constant 5 : i32
    %632 = vector.broadcast %c5_i32_211 : i32 to vector<8x128xi32>
    %633 = arith.cmpi slt, %0, %632 : vector<8x128xi32>
    %cst_212 = arith.constant 0.000000e+00 : f32
    %634 = vector.shape_cast %609 : vector<1x128xf32> to vector<1x128xf32>
    %635 = vector.broadcast %634 : vector<1x128xf32> to vector<8x128xf32>
    %636 = vector.broadcast %cst_212 : f32 to vector<8x128xf32>
    %637 = arith.select %633, %635, %636 : vector<8x128xi1>, vector<8x128xf32>
    %638 = vector.shape_cast %605 : vector<1x128xf32> to vector<1x128xf32>
    %639 = vector.broadcast %638 : vector<1x128xf32> to vector<8x128xf32>
    %640 = arith.select %631, %639, %637 : vector<8x128xi1>, vector<8x128xf32>
    %c5_i32_213 = arith.constant 5 : i32
    %641 = vector.broadcast %c5_i32_213 : i32 to vector<8x128xi32>
    %642 = arith.cmpi eq, %0, %641 : vector<8x128xi32>
    %643 = arith.mulf %619, %640 : vector<8x128xf32>
    %644 = vector.shape_cast %609 : vector<1x128xf32> to vector<1x128xf32>
    %645 = vector.broadcast %644 : vector<1x128xf32> to vector<8x128xf32>
    %646 = arith.select %642, %645, %643 : vector<8x128xi1>, vector<8x128xf32>
    %647 = arith.addf %593, %646 : vector<8x128xf32>
    %648 = vector.broadcast %609 : vector<1x128xf32> to vector<24x128xf32>
    %649 = arith.mulf %629, %648 : vector<24x128xf32>
    %650 = arith.addf %596, %649 : vector<24x128xf32>
    %c0_214 = arith.constant 0 : index
    %c1536 = arith.constant 1536 : index
    %651 = vector.load %arg1[%c0_214, %c1536] : memref<32x4096xf32, #tpu.memory_space<vmem>>, vector<8x128xf32>
    %c0_215 = arith.constant 0 : index
    %c1536_216 = arith.constant 1536 : index
    %652 = vector.load %arg2[%c0_215, %c1536_216] : memref<32x4096xf32, #tpu.memory_space<vmem>>, vector<8x128xf32>
    %c8_217 = arith.constant 8 : index
    %c1536_218 = arith.constant 1536 : index
    %653 = vector.load %arg1[%c8_217, %c1536_218] : memref<32x4096xf32, #tpu.memory_space<vmem>>, vector<24x128xf32>
    %c8_219 = arith.constant 8 : index
    %c1536_220 = arith.constant 1536 : index
    %654 = vector.load %arg2[%c8_219, %c1536_220] : memref<32x4096xf32, #tpu.memory_space<vmem>>, vector<24x128xf32>
    %655 = vector.extract_strided_slice %652 {offsets = [0, 0], sizes = [1, 128], strides = [1, 1]} : vector<8x128xf32> to vector<1x128xf32>
    %cst_221 = arith.constant 0.000000e+00 : f32
    %656 = vector.broadcast %cst_221 : f32 to vector<1x128xf32>
    %657 = arith.cmpf oge, %655, %656 : vector<1x128xf32>
    %658 = arith.extui %657 : vector<1x128xi1> to vector<1x128xi32>
    %659 = arith.sitofp %658 : vector<1x128xi32> to vector<1x128xf32>
    %cst_222 = arith.constant 5.000000e-01 : f32
    %660 = vector.broadcast %cst_222 : f32 to vector<1x128xf32>
    %661 = arith.cmpf ogt, %655, %660 : vector<1x128xf32>
    %662 = arith.extui %661 : vector<1x128xi1> to vector<1x128xi32>
    %663 = arith.sitofp %662 : vector<1x128xi32> to vector<1x128xf32>
    %cst_223 = arith.constant 0.000000e+00 : f32
    %664 = vector.broadcast %cst_223 : f32 to vector<8x128xf32>
    %665 = arith.maximumf %651, %664 : vector<8x128xf32>
    %666 = arith.mulf %651, %652 : vector<8x128xf32>
    %667 = arith.subf %665, %666 : vector<8x128xf32>
    %668 = math.absf %651 : vector<8x128xf32>
    %cst_224 = arith.constant 0.000000e+00 : f32
    %669 = vector.broadcast %cst_224 : f32 to vector<8x128xf32>
    %670 = arith.subf %669, %668 : vector<8x128xf32>
    %671 = math.exp %670 : vector<8x128xf32>
    %672 = math.log1p %671 : vector<8x128xf32>
    %673 = arith.addf %667, %672 : vector<8x128xf32>
    %674 = arith.subf %653, %654 : vector<24x128xf32>
    %675 = math.absf %674 : vector<24x128xf32>
    %cst_225 = arith.constant 1.000000e+00 : f32
    %676 = vector.broadcast %cst_225 : f32 to vector<24x128xf32>
    %677 = arith.cmpf olt, %675, %676 : vector<24x128xf32>
    %cst_226 = arith.constant 5.000000e-01 : f32
    %678 = vector.broadcast %cst_226 : f32 to vector<24x128xf32>
    %679 = arith.mulf %678, %674 : vector<24x128xf32>
    %680 = arith.mulf %679, %674 : vector<24x128xf32>
    %cst_227 = arith.constant 5.000000e-01 : f32
    %681 = vector.broadcast %cst_227 : f32 to vector<24x128xf32>
    %682 = arith.subf %675, %681 : vector<24x128xf32>
    %683 = arith.select %677, %680, %682 : vector<24x128xi1>, vector<24x128xf32>
    %c0_i32_228 = arith.constant 0 : i32
    %684 = vector.broadcast %c0_i32_228 : i32 to vector<8x128xi32>
    %685 = arith.cmpi eq, %0, %684 : vector<8x128xi32>
    %c5_i32_229 = arith.constant 5 : i32
    %686 = vector.broadcast %c5_i32_229 : i32 to vector<8x128xi32>
    %687 = arith.cmpi slt, %0, %686 : vector<8x128xi32>
    %cst_230 = arith.constant 0.000000e+00 : f32
    %688 = vector.shape_cast %663 : vector<1x128xf32> to vector<1x128xf32>
    %689 = vector.broadcast %688 : vector<1x128xf32> to vector<8x128xf32>
    %690 = vector.broadcast %cst_230 : f32 to vector<8x128xf32>
    %691 = arith.select %687, %689, %690 : vector<8x128xi1>, vector<8x128xf32>
    %692 = vector.shape_cast %659 : vector<1x128xf32> to vector<1x128xf32>
    %693 = vector.broadcast %692 : vector<1x128xf32> to vector<8x128xf32>
    %694 = arith.select %685, %693, %691 : vector<8x128xi1>, vector<8x128xf32>
    %c5_i32_231 = arith.constant 5 : i32
    %695 = vector.broadcast %c5_i32_231 : i32 to vector<8x128xi32>
    %696 = arith.cmpi eq, %0, %695 : vector<8x128xi32>
    %697 = arith.mulf %673, %694 : vector<8x128xf32>
    %698 = vector.shape_cast %663 : vector<1x128xf32> to vector<1x128xf32>
    %699 = vector.broadcast %698 : vector<1x128xf32> to vector<8x128xf32>
    %700 = arith.select %696, %699, %697 : vector<8x128xi1>, vector<8x128xf32>
    %701 = arith.addf %647, %700 : vector<8x128xf32>
    %702 = vector.broadcast %663 : vector<1x128xf32> to vector<24x128xf32>
    %703 = arith.mulf %683, %702 : vector<24x128xf32>
    %704 = arith.addf %650, %703 : vector<24x128xf32>
    %c0_232 = arith.constant 0 : index
    %c1664 = arith.constant 1664 : index
    %705 = vector.load %arg1[%c0_232, %c1664] : memref<32x4096xf32, #tpu.memory_space<vmem>>, vector<8x128xf32>
    %c0_233 = arith.constant 0 : index
    %c1664_234 = arith.constant 1664 : index
    %706 = vector.load %arg2[%c0_233, %c1664_234] : memref<32x4096xf32, #tpu.memory_space<vmem>>, vector<8x128xf32>
    %c8_235 = arith.constant 8 : index
    %c1664_236 = arith.constant 1664 : index
    %707 = vector.load %arg1[%c8_235, %c1664_236] : memref<32x4096xf32, #tpu.memory_space<vmem>>, vector<24x128xf32>
    %c8_237 = arith.constant 8 : index
    %c1664_238 = arith.constant 1664 : index
    %708 = vector.load %arg2[%c8_237, %c1664_238] : memref<32x4096xf32, #tpu.memory_space<vmem>>, vector<24x128xf32>
    %709 = vector.extract_strided_slice %706 {offsets = [0, 0], sizes = [1, 128], strides = [1, 1]} : vector<8x128xf32> to vector<1x128xf32>
    %cst_239 = arith.constant 0.000000e+00 : f32
    %710 = vector.broadcast %cst_239 : f32 to vector<1x128xf32>
    %711 = arith.cmpf oge, %709, %710 : vector<1x128xf32>
    %712 = arith.extui %711 : vector<1x128xi1> to vector<1x128xi32>
    %713 = arith.sitofp %712 : vector<1x128xi32> to vector<1x128xf32>
    %cst_240 = arith.constant 5.000000e-01 : f32
    %714 = vector.broadcast %cst_240 : f32 to vector<1x128xf32>
    %715 = arith.cmpf ogt, %709, %714 : vector<1x128xf32>
    %716 = arith.extui %715 : vector<1x128xi1> to vector<1x128xi32>
    %717 = arith.sitofp %716 : vector<1x128xi32> to vector<1x128xf32>
    %cst_241 = arith.constant 0.000000e+00 : f32
    %718 = vector.broadcast %cst_241 : f32 to vector<8x128xf32>
    %719 = arith.maximumf %705, %718 : vector<8x128xf32>
    %720 = arith.mulf %705, %706 : vector<8x128xf32>
    %721 = arith.subf %719, %720 : vector<8x128xf32>
    %722 = math.absf %705 : vector<8x128xf32>
    %cst_242 = arith.constant 0.000000e+00 : f32
    %723 = vector.broadcast %cst_242 : f32 to vector<8x128xf32>
    %724 = arith.subf %723, %722 : vector<8x128xf32>
    %725 = math.exp %724 : vector<8x128xf32>
    %726 = math.log1p %725 : vector<8x128xf32>
    %727 = arith.addf %721, %726 : vector<8x128xf32>
    %728 = arith.subf %707, %708 : vector<24x128xf32>
    %729 = math.absf %728 : vector<24x128xf32>
    %cst_243 = arith.constant 1.000000e+00 : f32
    %730 = vector.broadcast %cst_243 : f32 to vector<24x128xf32>
    %731 = arith.cmpf olt, %729, %730 : vector<24x128xf32>
    %cst_244 = arith.constant 5.000000e-01 : f32
    %732 = vector.broadcast %cst_244 : f32 to vector<24x128xf32>
    %733 = arith.mulf %732, %728 : vector<24x128xf32>
    %734 = arith.mulf %733, %728 : vector<24x128xf32>
    %cst_245 = arith.constant 5.000000e-01 : f32
    %735 = vector.broadcast %cst_245 : f32 to vector<24x128xf32>
    %736 = arith.subf %729, %735 : vector<24x128xf32>
    %737 = arith.select %731, %734, %736 : vector<24x128xi1>, vector<24x128xf32>
    %c0_i32_246 = arith.constant 0 : i32
    %738 = vector.broadcast %c0_i32_246 : i32 to vector<8x128xi32>
    %739 = arith.cmpi eq, %0, %738 : vector<8x128xi32>
    %c5_i32_247 = arith.constant 5 : i32
    %740 = vector.broadcast %c5_i32_247 : i32 to vector<8x128xi32>
    %741 = arith.cmpi slt, %0, %740 : vector<8x128xi32>
    %cst_248 = arith.constant 0.000000e+00 : f32
    %742 = vector.shape_cast %717 : vector<1x128xf32> to vector<1x128xf32>
    %743 = vector.broadcast %742 : vector<1x128xf32> to vector<8x128xf32>
    %744 = vector.broadcast %cst_248 : f32 to vector<8x128xf32>
    %745 = arith.select %741, %743, %744 : vector<8x128xi1>, vector<8x128xf32>
    %746 = vector.shape_cast %713 : vector<1x128xf32> to vector<1x128xf32>
    %747 = vector.broadcast %746 : vector<1x128xf32> to vector<8x128xf32>
    %748 = arith.select %739, %747, %745 : vector<8x128xi1>, vector<8x128xf32>
    %c5_i32_249 = arith.constant 5 : i32
    %749 = vector.broadcast %c5_i32_249 : i32 to vector<8x128xi32>
    %750 = arith.cmpi eq, %0, %749 : vector<8x128xi32>
    %751 = arith.mulf %727, %748 : vector<8x128xf32>
    %752 = vector.shape_cast %717 : vector<1x128xf32> to vector<1x128xf32>
    %753 = vector.broadcast %752 : vector<1x128xf32> to vector<8x128xf32>
    %754 = arith.select %750, %753, %751 : vector<8x128xi1>, vector<8x128xf32>
    %755 = arith.addf %701, %754 : vector<8x128xf32>
    %756 = vector.broadcast %717 : vector<1x128xf32> to vector<24x128xf32>
    %757 = arith.mulf %737, %756 : vector<24x128xf32>
    %758 = arith.addf %704, %757 : vector<24x128xf32>
    %c0_250 = arith.constant 0 : index
    %c1792 = arith.constant 1792 : index
    %759 = vector.load %arg1[%c0_250, %c1792] : memref<32x4096xf32, #tpu.memory_space<vmem>>, vector<8x128xf32>
    %c0_251 = arith.constant 0 : index
    %c1792_252 = arith.constant 1792 : index
    %760 = vector.load %arg2[%c0_251, %c1792_252] : memref<32x4096xf32, #tpu.memory_space<vmem>>, vector<8x128xf32>
    %c8_253 = arith.constant 8 : index
    %c1792_254 = arith.constant 1792 : index
    %761 = vector.load %arg1[%c8_253, %c1792_254] : memref<32x4096xf32, #tpu.memory_space<vmem>>, vector<24x128xf32>
    %c8_255 = arith.constant 8 : index
    %c1792_256 = arith.constant 1792 : index
    %762 = vector.load %arg2[%c8_255, %c1792_256] : memref<32x4096xf32, #tpu.memory_space<vmem>>, vector<24x128xf32>
    %763 = vector.extract_strided_slice %760 {offsets = [0, 0], sizes = [1, 128], strides = [1, 1]} : vector<8x128xf32> to vector<1x128xf32>
    %cst_257 = arith.constant 0.000000e+00 : f32
    %764 = vector.broadcast %cst_257 : f32 to vector<1x128xf32>
    %765 = arith.cmpf oge, %763, %764 : vector<1x128xf32>
    %766 = arith.extui %765 : vector<1x128xi1> to vector<1x128xi32>
    %767 = arith.sitofp %766 : vector<1x128xi32> to vector<1x128xf32>
    %cst_258 = arith.constant 5.000000e-01 : f32
    %768 = vector.broadcast %cst_258 : f32 to vector<1x128xf32>
    %769 = arith.cmpf ogt, %763, %768 : vector<1x128xf32>
    %770 = arith.extui %769 : vector<1x128xi1> to vector<1x128xi32>
    %771 = arith.sitofp %770 : vector<1x128xi32> to vector<1x128xf32>
    %cst_259 = arith.constant 0.000000e+00 : f32
    %772 = vector.broadcast %cst_259 : f32 to vector<8x128xf32>
    %773 = arith.maximumf %759, %772 : vector<8x128xf32>
    %774 = arith.mulf %759, %760 : vector<8x128xf32>
    %775 = arith.subf %773, %774 : vector<8x128xf32>
    %776 = math.absf %759 : vector<8x128xf32>
    %cst_260 = arith.constant 0.000000e+00 : f32
    %777 = vector.broadcast %cst_260 : f32 to vector<8x128xf32>
    %778 = arith.subf %777, %776 : vector<8x128xf32>
    %779 = math.exp %778 : vector<8x128xf32>
    %780 = math.log1p %779 : vector<8x128xf32>
    %781 = arith.addf %775, %780 : vector<8x128xf32>
    %782 = arith.subf %761, %762 : vector<24x128xf32>
    %783 = math.absf %782 : vector<24x128xf32>
    %cst_261 = arith.constant 1.000000e+00 : f32
    %784 = vector.broadcast %cst_261 : f32 to vector<24x128xf32>
    %785 = arith.cmpf olt, %783, %784 : vector<24x128xf32>
    %cst_262 = arith.constant 5.000000e-01 : f32
    %786 = vector.broadcast %cst_262 : f32 to vector<24x128xf32>
    %787 = arith.mulf %786, %782 : vector<24x128xf32>
    %788 = arith.mulf %787, %782 : vector<24x128xf32>
    %cst_263 = arith.constant 5.000000e-01 : f32
    %789 = vector.broadcast %cst_263 : f32 to vector<24x128xf32>
    %790 = arith.subf %783, %789 : vector<24x128xf32>
    %791 = arith.select %785, %788, %790 : vector<24x128xi1>, vector<24x128xf32>
    %c0_i32_264 = arith.constant 0 : i32
    %792 = vector.broadcast %c0_i32_264 : i32 to vector<8x128xi32>
    %793 = arith.cmpi eq, %0, %792 : vector<8x128xi32>
    %c5_i32_265 = arith.constant 5 : i32
    %794 = vector.broadcast %c5_i32_265 : i32 to vector<8x128xi32>
    %795 = arith.cmpi slt, %0, %794 : vector<8x128xi32>
    %cst_266 = arith.constant 0.000000e+00 : f32
    %796 = vector.shape_cast %771 : vector<1x128xf32> to vector<1x128xf32>
    %797 = vector.broadcast %796 : vector<1x128xf32> to vector<8x128xf32>
    %798 = vector.broadcast %cst_266 : f32 to vector<8x128xf32>
    %799 = arith.select %795, %797, %798 : vector<8x128xi1>, vector<8x128xf32>
    %800 = vector.shape_cast %767 : vector<1x128xf32> to vector<1x128xf32>
    %801 = vector.broadcast %800 : vector<1x128xf32> to vector<8x128xf32>
    %802 = arith.select %793, %801, %799 : vector<8x128xi1>, vector<8x128xf32>
    %c5_i32_267 = arith.constant 5 : i32
    %803 = vector.broadcast %c5_i32_267 : i32 to vector<8x128xi32>
    %804 = arith.cmpi eq, %0, %803 : vector<8x128xi32>
    %805 = arith.mulf %781, %802 : vector<8x128xf32>
    %806 = vector.shape_cast %771 : vector<1x128xf32> to vector<1x128xf32>
    %807 = vector.broadcast %806 : vector<1x128xf32> to vector<8x128xf32>
    %808 = arith.select %804, %807, %805 : vector<8x128xi1>, vector<8x128xf32>
    %809 = arith.addf %755, %808 : vector<8x128xf32>
    %810 = vector.broadcast %771 : vector<1x128xf32> to vector<24x128xf32>
    %811 = arith.mulf %791, %810 : vector<24x128xf32>
    %812 = arith.addf %758, %811 : vector<24x128xf32>
    %c0_268 = arith.constant 0 : index
    %c1920 = arith.constant 1920 : index
    %813 = vector.load %arg1[%c0_268, %c1920] : memref<32x4096xf32, #tpu.memory_space<vmem>>, vector<8x128xf32>
    %c0_269 = arith.constant 0 : index
    %c1920_270 = arith.constant 1920 : index
    %814 = vector.load %arg2[%c0_269, %c1920_270] : memref<32x4096xf32, #tpu.memory_space<vmem>>, vector<8x128xf32>
    %c8_271 = arith.constant 8 : index
    %c1920_272 = arith.constant 1920 : index
    %815 = vector.load %arg1[%c8_271, %c1920_272] : memref<32x4096xf32, #tpu.memory_space<vmem>>, vector<24x128xf32>
    %c8_273 = arith.constant 8 : index
    %c1920_274 = arith.constant 1920 : index
    %816 = vector.load %arg2[%c8_273, %c1920_274] : memref<32x4096xf32, #tpu.memory_space<vmem>>, vector<24x128xf32>
    %817 = vector.extract_strided_slice %814 {offsets = [0, 0], sizes = [1, 128], strides = [1, 1]} : vector<8x128xf32> to vector<1x128xf32>
    %cst_275 = arith.constant 0.000000e+00 : f32
    %818 = vector.broadcast %cst_275 : f32 to vector<1x128xf32>
    %819 = arith.cmpf oge, %817, %818 : vector<1x128xf32>
    %820 = arith.extui %819 : vector<1x128xi1> to vector<1x128xi32>
    %821 = arith.sitofp %820 : vector<1x128xi32> to vector<1x128xf32>
    %cst_276 = arith.constant 5.000000e-01 : f32
    %822 = vector.broadcast %cst_276 : f32 to vector<1x128xf32>
    %823 = arith.cmpf ogt, %817, %822 : vector<1x128xf32>
    %824 = arith.extui %823 : vector<1x128xi1> to vector<1x128xi32>
    %825 = arith.sitofp %824 : vector<1x128xi32> to vector<1x128xf32>
    %cst_277 = arith.constant 0.000000e+00 : f32
    %826 = vector.broadcast %cst_277 : f32 to vector<8x128xf32>
    %827 = arith.maximumf %813, %826 : vector<8x128xf32>
    %828 = arith.mulf %813, %814 : vector<8x128xf32>
    %829 = arith.subf %827, %828 : vector<8x128xf32>
    %830 = math.absf %813 : vector<8x128xf32>
    %cst_278 = arith.constant 0.000000e+00 : f32
    %831 = vector.broadcast %cst_278 : f32 to vector<8x128xf32>
    %832 = arith.subf %831, %830 : vector<8x128xf32>
    %833 = math.exp %832 : vector<8x128xf32>
    %834 = math.log1p %833 : vector<8x128xf32>
    %835 = arith.addf %829, %834 : vector<8x128xf32>
    %836 = arith.subf %815, %816 : vector<24x128xf32>
    %837 = math.absf %836 : vector<24x128xf32>
    %cst_279 = arith.constant 1.000000e+00 : f32
    %838 = vector.broadcast %cst_279 : f32 to vector<24x128xf32>
    %839 = arith.cmpf olt, %837, %838 : vector<24x128xf32>
    %cst_280 = arith.constant 5.000000e-01 : f32
    %840 = vector.broadcast %cst_280 : f32 to vector<24x128xf32>
    %841 = arith.mulf %840, %836 : vector<24x128xf32>
    %842 = arith.mulf %841, %836 : vector<24x128xf32>
    %cst_281 = arith.constant 5.000000e-01 : f32
    %843 = vector.broadcast %cst_281 : f32 to vector<24x128xf32>
    %844 = arith.subf %837, %843 : vector<24x128xf32>
    %845 = arith.select %839, %842, %844 : vector<24x128xi1>, vector<24x128xf32>
    %c0_i32_282 = arith.constant 0 : i32
    %846 = vector.broadcast %c0_i32_282 : i32 to vector<8x128xi32>
    %847 = arith.cmpi eq, %0, %846 : vector<8x128xi32>
    %c5_i32_283 = arith.constant 5 : i32
    %848 = vector.broadcast %c5_i32_283 : i32 to vector<8x128xi32>
    %849 = arith.cmpi slt, %0, %848 : vector<8x128xi32>
    %cst_284 = arith.constant 0.000000e+00 : f32
    %850 = vector.shape_cast %825 : vector<1x128xf32> to vector<1x128xf32>
    %851 = vector.broadcast %850 : vector<1x128xf32> to vector<8x128xf32>
    %852 = vector.broadcast %cst_284 : f32 to vector<8x128xf32>
    %853 = arith.select %849, %851, %852 : vector<8x128xi1>, vector<8x128xf32>
    %854 = vector.shape_cast %821 : vector<1x128xf32> to vector<1x128xf32>
    %855 = vector.broadcast %854 : vector<1x128xf32> to vector<8x128xf32>
    %856 = arith.select %847, %855, %853 : vector<8x128xi1>, vector<8x128xf32>
    %c5_i32_285 = arith.constant 5 : i32
    %857 = vector.broadcast %c5_i32_285 : i32 to vector<8x128xi32>
    %858 = arith.cmpi eq, %0, %857 : vector<8x128xi32>
    %859 = arith.mulf %835, %856 : vector<8x128xf32>
    %860 = vector.shape_cast %825 : vector<1x128xf32> to vector<1x128xf32>
    %861 = vector.broadcast %860 : vector<1x128xf32> to vector<8x128xf32>
    %862 = arith.select %858, %861, %859 : vector<8x128xi1>, vector<8x128xf32>
    %863 = arith.addf %809, %862 : vector<8x128xf32>
    %864 = vector.broadcast %825 : vector<1x128xf32> to vector<24x128xf32>
    %865 = arith.mulf %845, %864 : vector<24x128xf32>
    %866 = arith.addf %812, %865 : vector<24x128xf32>
    %c0_286 = arith.constant 0 : index
    %c2048 = arith.constant 2048 : index
    %867 = vector.load %arg1[%c0_286, %c2048] : memref<32x4096xf32, #tpu.memory_space<vmem>>, vector<8x128xf32>
    %c0_287 = arith.constant 0 : index
    %c2048_288 = arith.constant 2048 : index
    %868 = vector.load %arg2[%c0_287, %c2048_288] : memref<32x4096xf32, #tpu.memory_space<vmem>>, vector<8x128xf32>
    %c8_289 = arith.constant 8 : index
    %c2048_290 = arith.constant 2048 : index
    %869 = vector.load %arg1[%c8_289, %c2048_290] : memref<32x4096xf32, #tpu.memory_space<vmem>>, vector<24x128xf32>
    %c8_291 = arith.constant 8 : index
    %c2048_292 = arith.constant 2048 : index
    %870 = vector.load %arg2[%c8_291, %c2048_292] : memref<32x4096xf32, #tpu.memory_space<vmem>>, vector<24x128xf32>
    %871 = vector.extract_strided_slice %868 {offsets = [0, 0], sizes = [1, 128], strides = [1, 1]} : vector<8x128xf32> to vector<1x128xf32>
    %cst_293 = arith.constant 0.000000e+00 : f32
    %872 = vector.broadcast %cst_293 : f32 to vector<1x128xf32>
    %873 = arith.cmpf oge, %871, %872 : vector<1x128xf32>
    %874 = arith.extui %873 : vector<1x128xi1> to vector<1x128xi32>
    %875 = arith.sitofp %874 : vector<1x128xi32> to vector<1x128xf32>
    %cst_294 = arith.constant 5.000000e-01 : f32
    %876 = vector.broadcast %cst_294 : f32 to vector<1x128xf32>
    %877 = arith.cmpf ogt, %871, %876 : vector<1x128xf32>
    %878 = arith.extui %877 : vector<1x128xi1> to vector<1x128xi32>
    %879 = arith.sitofp %878 : vector<1x128xi32> to vector<1x128xf32>
    %cst_295 = arith.constant 0.000000e+00 : f32
    %880 = vector.broadcast %cst_295 : f32 to vector<8x128xf32>
    %881 = arith.maximumf %867, %880 : vector<8x128xf32>
    %882 = arith.mulf %867, %868 : vector<8x128xf32>
    %883 = arith.subf %881, %882 : vector<8x128xf32>
    %884 = math.absf %867 : vector<8x128xf32>
    %cst_296 = arith.constant 0.000000e+00 : f32
    %885 = vector.broadcast %cst_296 : f32 to vector<8x128xf32>
    %886 = arith.subf %885, %884 : vector<8x128xf32>
    %887 = math.exp %886 : vector<8x128xf32>
    %888 = math.log1p %887 : vector<8x128xf32>
    %889 = arith.addf %883, %888 : vector<8x128xf32>
    %890 = arith.subf %869, %870 : vector<24x128xf32>
    %891 = math.absf %890 : vector<24x128xf32>
    %cst_297 = arith.constant 1.000000e+00 : f32
    %892 = vector.broadcast %cst_297 : f32 to vector<24x128xf32>
    %893 = arith.cmpf olt, %891, %892 : vector<24x128xf32>
    %cst_298 = arith.constant 5.000000e-01 : f32
    %894 = vector.broadcast %cst_298 : f32 to vector<24x128xf32>
    %895 = arith.mulf %894, %890 : vector<24x128xf32>
    %896 = arith.mulf %895, %890 : vector<24x128xf32>
    %cst_299 = arith.constant 5.000000e-01 : f32
    %897 = vector.broadcast %cst_299 : f32 to vector<24x128xf32>
    %898 = arith.subf %891, %897 : vector<24x128xf32>
    %899 = arith.select %893, %896, %898 : vector<24x128xi1>, vector<24x128xf32>
    %c0_i32_300 = arith.constant 0 : i32
    %900 = vector.broadcast %c0_i32_300 : i32 to vector<8x128xi32>
    %901 = arith.cmpi eq, %0, %900 : vector<8x128xi32>
    %c5_i32_301 = arith.constant 5 : i32
    %902 = vector.broadcast %c5_i32_301 : i32 to vector<8x128xi32>
    %903 = arith.cmpi slt, %0, %902 : vector<8x128xi32>
    %cst_302 = arith.constant 0.000000e+00 : f32
    %904 = vector.shape_cast %879 : vector<1x128xf32> to vector<1x128xf32>
    %905 = vector.broadcast %904 : vector<1x128xf32> to vector<8x128xf32>
    %906 = vector.broadcast %cst_302 : f32 to vector<8x128xf32>
    %907 = arith.select %903, %905, %906 : vector<8x128xi1>, vector<8x128xf32>
    %908 = vector.shape_cast %875 : vector<1x128xf32> to vector<1x128xf32>
    %909 = vector.broadcast %908 : vector<1x128xf32> to vector<8x128xf32>
    %910 = arith.select %901, %909, %907 : vector<8x128xi1>, vector<8x128xf32>
    %c5_i32_303 = arith.constant 5 : i32
    %911 = vector.broadcast %c5_i32_303 : i32 to vector<8x128xi32>
    %912 = arith.cmpi eq, %0, %911 : vector<8x128xi32>
    %913 = arith.mulf %889, %910 : vector<8x128xf32>
    %914 = vector.shape_cast %879 : vector<1x128xf32> to vector<1x128xf32>
    %915 = vector.broadcast %914 : vector<1x128xf32> to vector<8x128xf32>
    %916 = arith.select %912, %915, %913 : vector<8x128xi1>, vector<8x128xf32>
    %917 = arith.addf %863, %916 : vector<8x128xf32>
    %918 = vector.broadcast %879 : vector<1x128xf32> to vector<24x128xf32>
    %919 = arith.mulf %899, %918 : vector<24x128xf32>
    %920 = arith.addf %866, %919 : vector<24x128xf32>
    %c0_304 = arith.constant 0 : index
    %c2176 = arith.constant 2176 : index
    %921 = vector.load %arg1[%c0_304, %c2176] : memref<32x4096xf32, #tpu.memory_space<vmem>>, vector<8x128xf32>
    %c0_305 = arith.constant 0 : index
    %c2176_306 = arith.constant 2176 : index
    %922 = vector.load %arg2[%c0_305, %c2176_306] : memref<32x4096xf32, #tpu.memory_space<vmem>>, vector<8x128xf32>
    %c8_307 = arith.constant 8 : index
    %c2176_308 = arith.constant 2176 : index
    %923 = vector.load %arg1[%c8_307, %c2176_308] : memref<32x4096xf32, #tpu.memory_space<vmem>>, vector<24x128xf32>
    %c8_309 = arith.constant 8 : index
    %c2176_310 = arith.constant 2176 : index
    %924 = vector.load %arg2[%c8_309, %c2176_310] : memref<32x4096xf32, #tpu.memory_space<vmem>>, vector<24x128xf32>
    %925 = vector.extract_strided_slice %922 {offsets = [0, 0], sizes = [1, 128], strides = [1, 1]} : vector<8x128xf32> to vector<1x128xf32>
    %cst_311 = arith.constant 0.000000e+00 : f32
    %926 = vector.broadcast %cst_311 : f32 to vector<1x128xf32>
    %927 = arith.cmpf oge, %925, %926 : vector<1x128xf32>
    %928 = arith.extui %927 : vector<1x128xi1> to vector<1x128xi32>
    %929 = arith.sitofp %928 : vector<1x128xi32> to vector<1x128xf32>
    %cst_312 = arith.constant 5.000000e-01 : f32
    %930 = vector.broadcast %cst_312 : f32 to vector<1x128xf32>
    %931 = arith.cmpf ogt, %925, %930 : vector<1x128xf32>
    %932 = arith.extui %931 : vector<1x128xi1> to vector<1x128xi32>
    %933 = arith.sitofp %932 : vector<1x128xi32> to vector<1x128xf32>
    %cst_313 = arith.constant 0.000000e+00 : f32
    %934 = vector.broadcast %cst_313 : f32 to vector<8x128xf32>
    %935 = arith.maximumf %921, %934 : vector<8x128xf32>
    %936 = arith.mulf %921, %922 : vector<8x128xf32>
    %937 = arith.subf %935, %936 : vector<8x128xf32>
    %938 = math.absf %921 : vector<8x128xf32>
    %cst_314 = arith.constant 0.000000e+00 : f32
    %939 = vector.broadcast %cst_314 : f32 to vector<8x128xf32>
    %940 = arith.subf %939, %938 : vector<8x128xf32>
    %941 = math.exp %940 : vector<8x128xf32>
    %942 = math.log1p %941 : vector<8x128xf32>
    %943 = arith.addf %937, %942 : vector<8x128xf32>
    %944 = arith.subf %923, %924 : vector<24x128xf32>
    %945 = math.absf %944 : vector<24x128xf32>
    %cst_315 = arith.constant 1.000000e+00 : f32
    %946 = vector.broadcast %cst_315 : f32 to vector<24x128xf32>
    %947 = arith.cmpf olt, %945, %946 : vector<24x128xf32>
    %cst_316 = arith.constant 5.000000e-01 : f32
    %948 = vector.broadcast %cst_316 : f32 to vector<24x128xf32>
    %949 = arith.mulf %948, %944 : vector<24x128xf32>
    %950 = arith.mulf %949, %944 : vector<24x128xf32>
    %cst_317 = arith.constant 5.000000e-01 : f32
    %951 = vector.broadcast %cst_317 : f32 to vector<24x128xf32>
    %952 = arith.subf %945, %951 : vector<24x128xf32>
    %953 = arith.select %947, %950, %952 : vector<24x128xi1>, vector<24x128xf32>
    %c0_i32_318 = arith.constant 0 : i32
    %954 = vector.broadcast %c0_i32_318 : i32 to vector<8x128xi32>
    %955 = arith.cmpi eq, %0, %954 : vector<8x128xi32>
    %c5_i32_319 = arith.constant 5 : i32
    %956 = vector.broadcast %c5_i32_319 : i32 to vector<8x128xi32>
    %957 = arith.cmpi slt, %0, %956 : vector<8x128xi32>
    %cst_320 = arith.constant 0.000000e+00 : f32
    %958 = vector.shape_cast %933 : vector<1x128xf32> to vector<1x128xf32>
    %959 = vector.broadcast %958 : vector<1x128xf32> to vector<8x128xf32>
    %960 = vector.broadcast %cst_320 : f32 to vector<8x128xf32>
    %961 = arith.select %957, %959, %960 : vector<8x128xi1>, vector<8x128xf32>
    %962 = vector.shape_cast %929 : vector<1x128xf32> to vector<1x128xf32>
    %963 = vector.broadcast %962 : vector<1x128xf32> to vector<8x128xf32>
    %964 = arith.select %955, %963, %961 : vector<8x128xi1>, vector<8x128xf32>
    %c5_i32_321 = arith.constant 5 : i32
    %965 = vector.broadcast %c5_i32_321 : i32 to vector<8x128xi32>
    %966 = arith.cmpi eq, %0, %965 : vector<8x128xi32>
    %967 = arith.mulf %943, %964 : vector<8x128xf32>
    %968 = vector.shape_cast %933 : vector<1x128xf32> to vector<1x128xf32>
    %969 = vector.broadcast %968 : vector<1x128xf32> to vector<8x128xf32>
    %970 = arith.select %966, %969, %967 : vector<8x128xi1>, vector<8x128xf32>
    %971 = arith.addf %917, %970 : vector<8x128xf32>
    %972 = vector.broadcast %933 : vector<1x128xf32> to vector<24x128xf32>
    %973 = arith.mulf %953, %972 : vector<24x128xf32>
    %974 = arith.addf %920, %973 : vector<24x128xf32>
    %c0_322 = arith.constant 0 : index
    %c2304 = arith.constant 2304 : index
    %975 = vector.load %arg1[%c0_322, %c2304] : memref<32x4096xf32, #tpu.memory_space<vmem>>, vector<8x128xf32>
    %c0_323 = arith.constant 0 : index
    %c2304_324 = arith.constant 2304 : index
    %976 = vector.load %arg2[%c0_323, %c2304_324] : memref<32x4096xf32, #tpu.memory_space<vmem>>, vector<8x128xf32>
    %c8_325 = arith.constant 8 : index
    %c2304_326 = arith.constant 2304 : index
    %977 = vector.load %arg1[%c8_325, %c2304_326] : memref<32x4096xf32, #tpu.memory_space<vmem>>, vector<24x128xf32>
    %c8_327 = arith.constant 8 : index
    %c2304_328 = arith.constant 2304 : index
    %978 = vector.load %arg2[%c8_327, %c2304_328] : memref<32x4096xf32, #tpu.memory_space<vmem>>, vector<24x128xf32>
    %979 = vector.extract_strided_slice %976 {offsets = [0, 0], sizes = [1, 128], strides = [1, 1]} : vector<8x128xf32> to vector<1x128xf32>
    %cst_329 = arith.constant 0.000000e+00 : f32
    %980 = vector.broadcast %cst_329 : f32 to vector<1x128xf32>
    %981 = arith.cmpf oge, %979, %980 : vector<1x128xf32>
    %982 = arith.extui %981 : vector<1x128xi1> to vector<1x128xi32>
    %983 = arith.sitofp %982 : vector<1x128xi32> to vector<1x128xf32>
    %cst_330 = arith.constant 5.000000e-01 : f32
    %984 = vector.broadcast %cst_330 : f32 to vector<1x128xf32>
    %985 = arith.cmpf ogt, %979, %984 : vector<1x128xf32>
    %986 = arith.extui %985 : vector<1x128xi1> to vector<1x128xi32>
    %987 = arith.sitofp %986 : vector<1x128xi32> to vector<1x128xf32>
    %cst_331 = arith.constant 0.000000e+00 : f32
    %988 = vector.broadcast %cst_331 : f32 to vector<8x128xf32>
    %989 = arith.maximumf %975, %988 : vector<8x128xf32>
    %990 = arith.mulf %975, %976 : vector<8x128xf32>
    %991 = arith.subf %989, %990 : vector<8x128xf32>
    %992 = math.absf %975 : vector<8x128xf32>
    %cst_332 = arith.constant 0.000000e+00 : f32
    %993 = vector.broadcast %cst_332 : f32 to vector<8x128xf32>
    %994 = arith.subf %993, %992 : vector<8x128xf32>
    %995 = math.exp %994 : vector<8x128xf32>
    %996 = math.log1p %995 : vector<8x128xf32>
    %997 = arith.addf %991, %996 : vector<8x128xf32>
    %998 = arith.subf %977, %978 : vector<24x128xf32>
    %999 = math.absf %998 : vector<24x128xf32>
    %cst_333 = arith.constant 1.000000e+00 : f32
    %1000 = vector.broadcast %cst_333 : f32 to vector<24x128xf32>
    %1001 = arith.cmpf olt, %999, %1000 : vector<24x128xf32>
    %cst_334 = arith.constant 5.000000e-01 : f32
    %1002 = vector.broadcast %cst_334 : f32 to vector<24x128xf32>
    %1003 = arith.mulf %1002, %998 : vector<24x128xf32>
    %1004 = arith.mulf %1003, %998 : vector<24x128xf32>
    %cst_335 = arith.constant 5.000000e-01 : f32
    %1005 = vector.broadcast %cst_335 : f32 to vector<24x128xf32>
    %1006 = arith.subf %999, %1005 : vector<24x128xf32>
    %1007 = arith.select %1001, %1004, %1006 : vector<24x128xi1>, vector<24x128xf32>
    %c0_i32_336 = arith.constant 0 : i32
    %1008 = vector.broadcast %c0_i32_336 : i32 to vector<8x128xi32>
    %1009 = arith.cmpi eq, %0, %1008 : vector<8x128xi32>
    %c5_i32_337 = arith.constant 5 : i32
    %1010 = vector.broadcast %c5_i32_337 : i32 to vector<8x128xi32>
    %1011 = arith.cmpi slt, %0, %1010 : vector<8x128xi32>
    %cst_338 = arith.constant 0.000000e+00 : f32
    %1012 = vector.shape_cast %987 : vector<1x128xf32> to vector<1x128xf32>
    %1013 = vector.broadcast %1012 : vector<1x128xf32> to vector<8x128xf32>
    %1014 = vector.broadcast %cst_338 : f32 to vector<8x128xf32>
    %1015 = arith.select %1011, %1013, %1014 : vector<8x128xi1>, vector<8x128xf32>
    %1016 = vector.shape_cast %983 : vector<1x128xf32> to vector<1x128xf32>
    %1017 = vector.broadcast %1016 : vector<1x128xf32> to vector<8x128xf32>
    %1018 = arith.select %1009, %1017, %1015 : vector<8x128xi1>, vector<8x128xf32>
    %c5_i32_339 = arith.constant 5 : i32
    %1019 = vector.broadcast %c5_i32_339 : i32 to vector<8x128xi32>
    %1020 = arith.cmpi eq, %0, %1019 : vector<8x128xi32>
    %1021 = arith.mulf %997, %1018 : vector<8x128xf32>
    %1022 = vector.shape_cast %987 : vector<1x128xf32> to vector<1x128xf32>
    %1023 = vector.broadcast %1022 : vector<1x128xf32> to vector<8x128xf32>
    %1024 = arith.select %1020, %1023, %1021 : vector<8x128xi1>, vector<8x128xf32>
    %1025 = arith.addf %971, %1024 : vector<8x128xf32>
    %1026 = vector.broadcast %987 : vector<1x128xf32> to vector<24x128xf32>
    %1027 = arith.mulf %1007, %1026 : vector<24x128xf32>
    %1028 = arith.addf %974, %1027 : vector<24x128xf32>
    %c0_340 = arith.constant 0 : index
    %c2432 = arith.constant 2432 : index
    %1029 = vector.load %arg1[%c0_340, %c2432] : memref<32x4096xf32, #tpu.memory_space<vmem>>, vector<8x128xf32>
    %c0_341 = arith.constant 0 : index
    %c2432_342 = arith.constant 2432 : index
    %1030 = vector.load %arg2[%c0_341, %c2432_342] : memref<32x4096xf32, #tpu.memory_space<vmem>>, vector<8x128xf32>
    %c8_343 = arith.constant 8 : index
    %c2432_344 = arith.constant 2432 : index
    %1031 = vector.load %arg1[%c8_343, %c2432_344] : memref<32x4096xf32, #tpu.memory_space<vmem>>, vector<24x128xf32>
    %c8_345 = arith.constant 8 : index
    %c2432_346 = arith.constant 2432 : index
    %1032 = vector.load %arg2[%c8_345, %c2432_346] : memref<32x4096xf32, #tpu.memory_space<vmem>>, vector<24x128xf32>
    %1033 = vector.extract_strided_slice %1030 {offsets = [0, 0], sizes = [1, 128], strides = [1, 1]} : vector<8x128xf32> to vector<1x128xf32>
    %cst_347 = arith.constant 0.000000e+00 : f32
    %1034 = vector.broadcast %cst_347 : f32 to vector<1x128xf32>
    %1035 = arith.cmpf oge, %1033, %1034 : vector<1x128xf32>
    %1036 = arith.extui %1035 : vector<1x128xi1> to vector<1x128xi32>
    %1037 = arith.sitofp %1036 : vector<1x128xi32> to vector<1x128xf32>
    %cst_348 = arith.constant 5.000000e-01 : f32
    %1038 = vector.broadcast %cst_348 : f32 to vector<1x128xf32>
    %1039 = arith.cmpf ogt, %1033, %1038 : vector<1x128xf32>
    %1040 = arith.extui %1039 : vector<1x128xi1> to vector<1x128xi32>
    %1041 = arith.sitofp %1040 : vector<1x128xi32> to vector<1x128xf32>
    %cst_349 = arith.constant 0.000000e+00 : f32
    %1042 = vector.broadcast %cst_349 : f32 to vector<8x128xf32>
    %1043 = arith.maximumf %1029, %1042 : vector<8x128xf32>
    %1044 = arith.mulf %1029, %1030 : vector<8x128xf32>
    %1045 = arith.subf %1043, %1044 : vector<8x128xf32>
    %1046 = math.absf %1029 : vector<8x128xf32>
    %cst_350 = arith.constant 0.000000e+00 : f32
    %1047 = vector.broadcast %cst_350 : f32 to vector<8x128xf32>
    %1048 = arith.subf %1047, %1046 : vector<8x128xf32>
    %1049 = math.exp %1048 : vector<8x128xf32>
    %1050 = math.log1p %1049 : vector<8x128xf32>
    %1051 = arith.addf %1045, %1050 : vector<8x128xf32>
    %1052 = arith.subf %1031, %1032 : vector<24x128xf32>
    %1053 = math.absf %1052 : vector<24x128xf32>
    %cst_351 = arith.constant 1.000000e+00 : f32
    %1054 = vector.broadcast %cst_351 : f32 to vector<24x128xf32>
    %1055 = arith.cmpf olt, %1053, %1054 : vector<24x128xf32>
    %cst_352 = arith.constant 5.000000e-01 : f32
    %1056 = vector.broadcast %cst_352 : f32 to vector<24x128xf32>
    %1057 = arith.mulf %1056, %1052 : vector<24x128xf32>
    %1058 = arith.mulf %1057, %1052 : vector<24x128xf32>
    %cst_353 = arith.constant 5.000000e-01 : f32
    %1059 = vector.broadcast %cst_353 : f32 to vector<24x128xf32>
    %1060 = arith.subf %1053, %1059 : vector<24x128xf32>
    %1061 = arith.select %1055, %1058, %1060 : vector<24x128xi1>, vector<24x128xf32>
    %c0_i32_354 = arith.constant 0 : i32
    %1062 = vector.broadcast %c0_i32_354 : i32 to vector<8x128xi32>
    %1063 = arith.cmpi eq, %0, %1062 : vector<8x128xi32>
    %c5_i32_355 = arith.constant 5 : i32
    %1064 = vector.broadcast %c5_i32_355 : i32 to vector<8x128xi32>
    %1065 = arith.cmpi slt, %0, %1064 : vector<8x128xi32>
    %cst_356 = arith.constant 0.000000e+00 : f32
    %1066 = vector.shape_cast %1041 : vector<1x128xf32> to vector<1x128xf32>
    %1067 = vector.broadcast %1066 : vector<1x128xf32> to vector<8x128xf32>
    %1068 = vector.broadcast %cst_356 : f32 to vector<8x128xf32>
    %1069 = arith.select %1065, %1067, %1068 : vector<8x128xi1>, vector<8x128xf32>
    %1070 = vector.shape_cast %1037 : vector<1x128xf32> to vector<1x128xf32>
    %1071 = vector.broadcast %1070 : vector<1x128xf32> to vector<8x128xf32>
    %1072 = arith.select %1063, %1071, %1069 : vector<8x128xi1>, vector<8x128xf32>
    %c5_i32_357 = arith.constant 5 : i32
    %1073 = vector.broadcast %c5_i32_357 : i32 to vector<8x128xi32>
    %1074 = arith.cmpi eq, %0, %1073 : vector<8x128xi32>
    %1075 = arith.mulf %1051, %1072 : vector<8x128xf32>
    %1076 = vector.shape_cast %1041 : vector<1x128xf32> to vector<1x128xf32>
    %1077 = vector.broadcast %1076 : vector<1x128xf32> to vector<8x128xf32>
    %1078 = arith.select %1074, %1077, %1075 : vector<8x128xi1>, vector<8x128xf32>
    %1079 = arith.addf %1025, %1078 : vector<8x128xf32>
    %1080 = vector.broadcast %1041 : vector<1x128xf32> to vector<24x128xf32>
    %1081 = arith.mulf %1061, %1080 : vector<24x128xf32>
    %1082 = arith.addf %1028, %1081 : vector<24x128xf32>
    %c0_358 = arith.constant 0 : index
    %c2560 = arith.constant 2560 : index
    %1083 = vector.load %arg1[%c0_358, %c2560] : memref<32x4096xf32, #tpu.memory_space<vmem>>, vector<8x128xf32>
    %c0_359 = arith.constant 0 : index
    %c2560_360 = arith.constant 2560 : index
    %1084 = vector.load %arg2[%c0_359, %c2560_360] : memref<32x4096xf32, #tpu.memory_space<vmem>>, vector<8x128xf32>
    %c8_361 = arith.constant 8 : index
    %c2560_362 = arith.constant 2560 : index
    %1085 = vector.load %arg1[%c8_361, %c2560_362] : memref<32x4096xf32, #tpu.memory_space<vmem>>, vector<24x128xf32>
    %c8_363 = arith.constant 8 : index
    %c2560_364 = arith.constant 2560 : index
    %1086 = vector.load %arg2[%c8_363, %c2560_364] : memref<32x4096xf32, #tpu.memory_space<vmem>>, vector<24x128xf32>
    %1087 = vector.extract_strided_slice %1084 {offsets = [0, 0], sizes = [1, 128], strides = [1, 1]} : vector<8x128xf32> to vector<1x128xf32>
    %cst_365 = arith.constant 0.000000e+00 : f32
    %1088 = vector.broadcast %cst_365 : f32 to vector<1x128xf32>
    %1089 = arith.cmpf oge, %1087, %1088 : vector<1x128xf32>
    %1090 = arith.extui %1089 : vector<1x128xi1> to vector<1x128xi32>
    %1091 = arith.sitofp %1090 : vector<1x128xi32> to vector<1x128xf32>
    %cst_366 = arith.constant 5.000000e-01 : f32
    %1092 = vector.broadcast %cst_366 : f32 to vector<1x128xf32>
    %1093 = arith.cmpf ogt, %1087, %1092 : vector<1x128xf32>
    %1094 = arith.extui %1093 : vector<1x128xi1> to vector<1x128xi32>
    %1095 = arith.sitofp %1094 : vector<1x128xi32> to vector<1x128xf32>
    %cst_367 = arith.constant 0.000000e+00 : f32
    %1096 = vector.broadcast %cst_367 : f32 to vector<8x128xf32>
    %1097 = arith.maximumf %1083, %1096 : vector<8x128xf32>
    %1098 = arith.mulf %1083, %1084 : vector<8x128xf32>
    %1099 = arith.subf %1097, %1098 : vector<8x128xf32>
    %1100 = math.absf %1083 : vector<8x128xf32>
    %cst_368 = arith.constant 0.000000e+00 : f32
    %1101 = vector.broadcast %cst_368 : f32 to vector<8x128xf32>
    %1102 = arith.subf %1101, %1100 : vector<8x128xf32>
    %1103 = math.exp %1102 : vector<8x128xf32>
    %1104 = math.log1p %1103 : vector<8x128xf32>
    %1105 = arith.addf %1099, %1104 : vector<8x128xf32>
    %1106 = arith.subf %1085, %1086 : vector<24x128xf32>
    %1107 = math.absf %1106 : vector<24x128xf32>
    %cst_369 = arith.constant 1.000000e+00 : f32
    %1108 = vector.broadcast %cst_369 : f32 to vector<24x128xf32>
    %1109 = arith.cmpf olt, %1107, %1108 : vector<24x128xf32>
    %cst_370 = arith.constant 5.000000e-01 : f32
    %1110 = vector.broadcast %cst_370 : f32 to vector<24x128xf32>
    %1111 = arith.mulf %1110, %1106 : vector<24x128xf32>
    %1112 = arith.mulf %1111, %1106 : vector<24x128xf32>
    %cst_371 = arith.constant 5.000000e-01 : f32
    %1113 = vector.broadcast %cst_371 : f32 to vector<24x128xf32>
    %1114 = arith.subf %1107, %1113 : vector<24x128xf32>
    %1115 = arith.select %1109, %1112, %1114 : vector<24x128xi1>, vector<24x128xf32>
    %c0_i32_372 = arith.constant 0 : i32
    %1116 = vector.broadcast %c0_i32_372 : i32 to vector<8x128xi32>
    %1117 = arith.cmpi eq, %0, %1116 : vector<8x128xi32>
    %c5_i32_373 = arith.constant 5 : i32
    %1118 = vector.broadcast %c5_i32_373 : i32 to vector<8x128xi32>
    %1119 = arith.cmpi slt, %0, %1118 : vector<8x128xi32>
    %cst_374 = arith.constant 0.000000e+00 : f32
    %1120 = vector.shape_cast %1095 : vector<1x128xf32> to vector<1x128xf32>
    %1121 = vector.broadcast %1120 : vector<1x128xf32> to vector<8x128xf32>
    %1122 = vector.broadcast %cst_374 : f32 to vector<8x128xf32>
    %1123 = arith.select %1119, %1121, %1122 : vector<8x128xi1>, vector<8x128xf32>
    %1124 = vector.shape_cast %1091 : vector<1x128xf32> to vector<1x128xf32>
    %1125 = vector.broadcast %1124 : vector<1x128xf32> to vector<8x128xf32>
    %1126 = arith.select %1117, %1125, %1123 : vector<8x128xi1>, vector<8x128xf32>
    %c5_i32_375 = arith.constant 5 : i32
    %1127 = vector.broadcast %c5_i32_375 : i32 to vector<8x128xi32>
    %1128 = arith.cmpi eq, %0, %1127 : vector<8x128xi32>
    %1129 = arith.mulf %1105, %1126 : vector<8x128xf32>
    %1130 = vector.shape_cast %1095 : vector<1x128xf32> to vector<1x128xf32>
    %1131 = vector.broadcast %1130 : vector<1x128xf32> to vector<8x128xf32>
    %1132 = arith.select %1128, %1131, %1129 : vector<8x128xi1>, vector<8x128xf32>
    %1133 = arith.addf %1079, %1132 : vector<8x128xf32>
    %1134 = vector.broadcast %1095 : vector<1x128xf32> to vector<24x128xf32>
    %1135 = arith.mulf %1115, %1134 : vector<24x128xf32>
    %1136 = arith.addf %1082, %1135 : vector<24x128xf32>
    %c0_376 = arith.constant 0 : index
    %c2688 = arith.constant 2688 : index
    %1137 = vector.load %arg1[%c0_376, %c2688] : memref<32x4096xf32, #tpu.memory_space<vmem>>, vector<8x128xf32>
    %c0_377 = arith.constant 0 : index
    %c2688_378 = arith.constant 2688 : index
    %1138 = vector.load %arg2[%c0_377, %c2688_378] : memref<32x4096xf32, #tpu.memory_space<vmem>>, vector<8x128xf32>
    %c8_379 = arith.constant 8 : index
    %c2688_380 = arith.constant 2688 : index
    %1139 = vector.load %arg1[%c8_379, %c2688_380] : memref<32x4096xf32, #tpu.memory_space<vmem>>, vector<24x128xf32>
    %c8_381 = arith.constant 8 : index
    %c2688_382 = arith.constant 2688 : index
    %1140 = vector.load %arg2[%c8_381, %c2688_382] : memref<32x4096xf32, #tpu.memory_space<vmem>>, vector<24x128xf32>
    %1141 = vector.extract_strided_slice %1138 {offsets = [0, 0], sizes = [1, 128], strides = [1, 1]} : vector<8x128xf32> to vector<1x128xf32>
    %cst_383 = arith.constant 0.000000e+00 : f32
    %1142 = vector.broadcast %cst_383 : f32 to vector<1x128xf32>
    %1143 = arith.cmpf oge, %1141, %1142 : vector<1x128xf32>
    %1144 = arith.extui %1143 : vector<1x128xi1> to vector<1x128xi32>
    %1145 = arith.sitofp %1144 : vector<1x128xi32> to vector<1x128xf32>
    %cst_384 = arith.constant 5.000000e-01 : f32
    %1146 = vector.broadcast %cst_384 : f32 to vector<1x128xf32>
    %1147 = arith.cmpf ogt, %1141, %1146 : vector<1x128xf32>
    %1148 = arith.extui %1147 : vector<1x128xi1> to vector<1x128xi32>
    %1149 = arith.sitofp %1148 : vector<1x128xi32> to vector<1x128xf32>
    %cst_385 = arith.constant 0.000000e+00 : f32
    %1150 = vector.broadcast %cst_385 : f32 to vector<8x128xf32>
    %1151 = arith.maximumf %1137, %1150 : vector<8x128xf32>
    %1152 = arith.mulf %1137, %1138 : vector<8x128xf32>
    %1153 = arith.subf %1151, %1152 : vector<8x128xf32>
    %1154 = math.absf %1137 : vector<8x128xf32>
    %cst_386 = arith.constant 0.000000e+00 : f32
    %1155 = vector.broadcast %cst_386 : f32 to vector<8x128xf32>
    %1156 = arith.subf %1155, %1154 : vector<8x128xf32>
    %1157 = math.exp %1156 : vector<8x128xf32>
    %1158 = math.log1p %1157 : vector<8x128xf32>
    %1159 = arith.addf %1153, %1158 : vector<8x128xf32>
    %1160 = arith.subf %1139, %1140 : vector<24x128xf32>
    %1161 = math.absf %1160 : vector<24x128xf32>
    %cst_387 = arith.constant 1.000000e+00 : f32
    %1162 = vector.broadcast %cst_387 : f32 to vector<24x128xf32>
    %1163 = arith.cmpf olt, %1161, %1162 : vector<24x128xf32>
    %cst_388 = arith.constant 5.000000e-01 : f32
    %1164 = vector.broadcast %cst_388 : f32 to vector<24x128xf32>
    %1165 = arith.mulf %1164, %1160 : vector<24x128xf32>
    %1166 = arith.mulf %1165, %1160 : vector<24x128xf32>
    %cst_389 = arith.constant 5.000000e-01 : f32
    %1167 = vector.broadcast %cst_389 : f32 to vector<24x128xf32>
    %1168 = arith.subf %1161, %1167 : vector<24x128xf32>
    %1169 = arith.select %1163, %1166, %1168 : vector<24x128xi1>, vector<24x128xf32>
    %c0_i32_390 = arith.constant 0 : i32
    %1170 = vector.broadcast %c0_i32_390 : i32 to vector<8x128xi32>
    %1171 = arith.cmpi eq, %0, %1170 : vector<8x128xi32>
    %c5_i32_391 = arith.constant 5 : i32
    %1172 = vector.broadcast %c5_i32_391 : i32 to vector<8x128xi32>
    %1173 = arith.cmpi slt, %0, %1172 : vector<8x128xi32>
    %cst_392 = arith.constant 0.000000e+00 : f32
    %1174 = vector.shape_cast %1149 : vector<1x128xf32> to vector<1x128xf32>
    %1175 = vector.broadcast %1174 : vector<1x128xf32> to vector<8x128xf32>
    %1176 = vector.broadcast %cst_392 : f32 to vector<8x128xf32>
    %1177 = arith.select %1173, %1175, %1176 : vector<8x128xi1>, vector<8x128xf32>
    %1178 = vector.shape_cast %1145 : vector<1x128xf32> to vector<1x128xf32>
    %1179 = vector.broadcast %1178 : vector<1x128xf32> to vector<8x128xf32>
    %1180 = arith.select %1171, %1179, %1177 : vector<8x128xi1>, vector<8x128xf32>
    %c5_i32_393 = arith.constant 5 : i32
    %1181 = vector.broadcast %c5_i32_393 : i32 to vector<8x128xi32>
    %1182 = arith.cmpi eq, %0, %1181 : vector<8x128xi32>
    %1183 = arith.mulf %1159, %1180 : vector<8x128xf32>
    %1184 = vector.shape_cast %1149 : vector<1x128xf32> to vector<1x128xf32>
    %1185 = vector.broadcast %1184 : vector<1x128xf32> to vector<8x128xf32>
    %1186 = arith.select %1182, %1185, %1183 : vector<8x128xi1>, vector<8x128xf32>
    %1187 = arith.addf %1133, %1186 : vector<8x128xf32>
    %1188 = vector.broadcast %1149 : vector<1x128xf32> to vector<24x128xf32>
    %1189 = arith.mulf %1169, %1188 : vector<24x128xf32>
    %1190 = arith.addf %1136, %1189 : vector<24x128xf32>
    %c0_394 = arith.constant 0 : index
    %c2816 = arith.constant 2816 : index
    %1191 = vector.load %arg1[%c0_394, %c2816] : memref<32x4096xf32, #tpu.memory_space<vmem>>, vector<8x128xf32>
    %c0_395 = arith.constant 0 : index
    %c2816_396 = arith.constant 2816 : index
    %1192 = vector.load %arg2[%c0_395, %c2816_396] : memref<32x4096xf32, #tpu.memory_space<vmem>>, vector<8x128xf32>
    %c8_397 = arith.constant 8 : index
    %c2816_398 = arith.constant 2816 : index
    %1193 = vector.load %arg1[%c8_397, %c2816_398] : memref<32x4096xf32, #tpu.memory_space<vmem>>, vector<24x128xf32>
    %c8_399 = arith.constant 8 : index
    %c2816_400 = arith.constant 2816 : index
    %1194 = vector.load %arg2[%c8_399, %c2816_400] : memref<32x4096xf32, #tpu.memory_space<vmem>>, vector<24x128xf32>
    %1195 = vector.extract_strided_slice %1192 {offsets = [0, 0], sizes = [1, 128], strides = [1, 1]} : vector<8x128xf32> to vector<1x128xf32>
    %cst_401 = arith.constant 0.000000e+00 : f32
    %1196 = vector.broadcast %cst_401 : f32 to vector<1x128xf32>
    %1197 = arith.cmpf oge, %1195, %1196 : vector<1x128xf32>
    %1198 = arith.extui %1197 : vector<1x128xi1> to vector<1x128xi32>
    %1199 = arith.sitofp %1198 : vector<1x128xi32> to vector<1x128xf32>
    %cst_402 = arith.constant 5.000000e-01 : f32
    %1200 = vector.broadcast %cst_402 : f32 to vector<1x128xf32>
    %1201 = arith.cmpf ogt, %1195, %1200 : vector<1x128xf32>
    %1202 = arith.extui %1201 : vector<1x128xi1> to vector<1x128xi32>
    %1203 = arith.sitofp %1202 : vector<1x128xi32> to vector<1x128xf32>
    %cst_403 = arith.constant 0.000000e+00 : f32
    %1204 = vector.broadcast %cst_403 : f32 to vector<8x128xf32>
    %1205 = arith.maximumf %1191, %1204 : vector<8x128xf32>
    %1206 = arith.mulf %1191, %1192 : vector<8x128xf32>
    %1207 = arith.subf %1205, %1206 : vector<8x128xf32>
    %1208 = math.absf %1191 : vector<8x128xf32>
    %cst_404 = arith.constant 0.000000e+00 : f32
    %1209 = vector.broadcast %cst_404 : f32 to vector<8x128xf32>
    %1210 = arith.subf %1209, %1208 : vector<8x128xf32>
    %1211 = math.exp %1210 : vector<8x128xf32>
    %1212 = math.log1p %1211 : vector<8x128xf32>
    %1213 = arith.addf %1207, %1212 : vector<8x128xf32>
    %1214 = arith.subf %1193, %1194 : vector<24x128xf32>
    %1215 = math.absf %1214 : vector<24x128xf32>
    %cst_405 = arith.constant 1.000000e+00 : f32
    %1216 = vector.broadcast %cst_405 : f32 to vector<24x128xf32>
    %1217 = arith.cmpf olt, %1215, %1216 : vector<24x128xf32>
    %cst_406 = arith.constant 5.000000e-01 : f32
    %1218 = vector.broadcast %cst_406 : f32 to vector<24x128xf32>
    %1219 = arith.mulf %1218, %1214 : vector<24x128xf32>
    %1220 = arith.mulf %1219, %1214 : vector<24x128xf32>
    %cst_407 = arith.constant 5.000000e-01 : f32
    %1221 = vector.broadcast %cst_407 : f32 to vector<24x128xf32>
    %1222 = arith.subf %1215, %1221 : vector<24x128xf32>
    %1223 = arith.select %1217, %1220, %1222 : vector<24x128xi1>, vector<24x128xf32>
    %c0_i32_408 = arith.constant 0 : i32
    %1224 = vector.broadcast %c0_i32_408 : i32 to vector<8x128xi32>
    %1225 = arith.cmpi eq, %0, %1224 : vector<8x128xi32>
    %c5_i32_409 = arith.constant 5 : i32
    %1226 = vector.broadcast %c5_i32_409 : i32 to vector<8x128xi32>
    %1227 = arith.cmpi slt, %0, %1226 : vector<8x128xi32>
    %cst_410 = arith.constant 0.000000e+00 : f32
    %1228 = vector.shape_cast %1203 : vector<1x128xf32> to vector<1x128xf32>
    %1229 = vector.broadcast %1228 : vector<1x128xf32> to vector<8x128xf32>
    %1230 = vector.broadcast %cst_410 : f32 to vector<8x128xf32>
    %1231 = arith.select %1227, %1229, %1230 : vector<8x128xi1>, vector<8x128xf32>
    %1232 = vector.shape_cast %1199 : vector<1x128xf32> to vector<1x128xf32>
    %1233 = vector.broadcast %1232 : vector<1x128xf32> to vector<8x128xf32>
    %1234 = arith.select %1225, %1233, %1231 : vector<8x128xi1>, vector<8x128xf32>
    %c5_i32_411 = arith.constant 5 : i32
    %1235 = vector.broadcast %c5_i32_411 : i32 to vector<8x128xi32>
    %1236 = arith.cmpi eq, %0, %1235 : vector<8x128xi32>
    %1237 = arith.mulf %1213, %1234 : vector<8x128xf32>
    %1238 = vector.shape_cast %1203 : vector<1x128xf32> to vector<1x128xf32>
    %1239 = vector.broadcast %1238 : vector<1x128xf32> to vector<8x128xf32>
    %1240 = arith.select %1236, %1239, %1237 : vector<8x128xi1>, vector<8x128xf32>
    %1241 = arith.addf %1187, %1240 : vector<8x128xf32>
    %1242 = vector.broadcast %1203 : vector<1x128xf32> to vector<24x128xf32>
    %1243 = arith.mulf %1223, %1242 : vector<24x128xf32>
    %1244 = arith.addf %1190, %1243 : vector<24x128xf32>
    %c0_412 = arith.constant 0 : index
    %c2944 = arith.constant 2944 : index
    %1245 = vector.load %arg1[%c0_412, %c2944] : memref<32x4096xf32, #tpu.memory_space<vmem>>, vector<8x128xf32>
    %c0_413 = arith.constant 0 : index
    %c2944_414 = arith.constant 2944 : index
    %1246 = vector.load %arg2[%c0_413, %c2944_414] : memref<32x4096xf32, #tpu.memory_space<vmem>>, vector<8x128xf32>
    %c8_415 = arith.constant 8 : index
    %c2944_416 = arith.constant 2944 : index
    %1247 = vector.load %arg1[%c8_415, %c2944_416] : memref<32x4096xf32, #tpu.memory_space<vmem>>, vector<24x128xf32>
    %c8_417 = arith.constant 8 : index
    %c2944_418 = arith.constant 2944 : index
    %1248 = vector.load %arg2[%c8_417, %c2944_418] : memref<32x4096xf32, #tpu.memory_space<vmem>>, vector<24x128xf32>
    %1249 = vector.extract_strided_slice %1246 {offsets = [0, 0], sizes = [1, 128], strides = [1, 1]} : vector<8x128xf32> to vector<1x128xf32>
    %cst_419 = arith.constant 0.000000e+00 : f32
    %1250 = vector.broadcast %cst_419 : f32 to vector<1x128xf32>
    %1251 = arith.cmpf oge, %1249, %1250 : vector<1x128xf32>
    %1252 = arith.extui %1251 : vector<1x128xi1> to vector<1x128xi32>
    %1253 = arith.sitofp %1252 : vector<1x128xi32> to vector<1x128xf32>
    %cst_420 = arith.constant 5.000000e-01 : f32
    %1254 = vector.broadcast %cst_420 : f32 to vector<1x128xf32>
    %1255 = arith.cmpf ogt, %1249, %1254 : vector<1x128xf32>
    %1256 = arith.extui %1255 : vector<1x128xi1> to vector<1x128xi32>
    %1257 = arith.sitofp %1256 : vector<1x128xi32> to vector<1x128xf32>
    %cst_421 = arith.constant 0.000000e+00 : f32
    %1258 = vector.broadcast %cst_421 : f32 to vector<8x128xf32>
    %1259 = arith.maximumf %1245, %1258 : vector<8x128xf32>
    %1260 = arith.mulf %1245, %1246 : vector<8x128xf32>
    %1261 = arith.subf %1259, %1260 : vector<8x128xf32>
    %1262 = math.absf %1245 : vector<8x128xf32>
    %cst_422 = arith.constant 0.000000e+00 : f32
    %1263 = vector.broadcast %cst_422 : f32 to vector<8x128xf32>
    %1264 = arith.subf %1263, %1262 : vector<8x128xf32>
    %1265 = math.exp %1264 : vector<8x128xf32>
    %1266 = math.log1p %1265 : vector<8x128xf32>
    %1267 = arith.addf %1261, %1266 : vector<8x128xf32>
    %1268 = arith.subf %1247, %1248 : vector<24x128xf32>
    %1269 = math.absf %1268 : vector<24x128xf32>
    %cst_423 = arith.constant 1.000000e+00 : f32
    %1270 = vector.broadcast %cst_423 : f32 to vector<24x128xf32>
    %1271 = arith.cmpf olt, %1269, %1270 : vector<24x128xf32>
    %cst_424 = arith.constant 5.000000e-01 : f32
    %1272 = vector.broadcast %cst_424 : f32 to vector<24x128xf32>
    %1273 = arith.mulf %1272, %1268 : vector<24x128xf32>
    %1274 = arith.mulf %1273, %1268 : vector<24x128xf32>
    %cst_425 = arith.constant 5.000000e-01 : f32
    %1275 = vector.broadcast %cst_425 : f32 to vector<24x128xf32>
    %1276 = arith.subf %1269, %1275 : vector<24x128xf32>
    %1277 = arith.select %1271, %1274, %1276 : vector<24x128xi1>, vector<24x128xf32>
    %c0_i32_426 = arith.constant 0 : i32
    %1278 = vector.broadcast %c0_i32_426 : i32 to vector<8x128xi32>
    %1279 = arith.cmpi eq, %0, %1278 : vector<8x128xi32>
    %c5_i32_427 = arith.constant 5 : i32
    %1280 = vector.broadcast %c5_i32_427 : i32 to vector<8x128xi32>
    %1281 = arith.cmpi slt, %0, %1280 : vector<8x128xi32>
    %cst_428 = arith.constant 0.000000e+00 : f32
    %1282 = vector.shape_cast %1257 : vector<1x128xf32> to vector<1x128xf32>
    %1283 = vector.broadcast %1282 : vector<1x128xf32> to vector<8x128xf32>
    %1284 = vector.broadcast %cst_428 : f32 to vector<8x128xf32>
    %1285 = arith.select %1281, %1283, %1284 : vector<8x128xi1>, vector<8x128xf32>
    %1286 = vector.shape_cast %1253 : vector<1x128xf32> to vector<1x128xf32>
    %1287 = vector.broadcast %1286 : vector<1x128xf32> to vector<8x128xf32>
    %1288 = arith.select %1279, %1287, %1285 : vector<8x128xi1>, vector<8x128xf32>
    %c5_i32_429 = arith.constant 5 : i32
    %1289 = vector.broadcast %c5_i32_429 : i32 to vector<8x128xi32>
    %1290 = arith.cmpi eq, %0, %1289 : vector<8x128xi32>
    %1291 = arith.mulf %1267, %1288 : vector<8x128xf32>
    %1292 = vector.shape_cast %1257 : vector<1x128xf32> to vector<1x128xf32>
    %1293 = vector.broadcast %1292 : vector<1x128xf32> to vector<8x128xf32>
    %1294 = arith.select %1290, %1293, %1291 : vector<8x128xi1>, vector<8x128xf32>
    %1295 = arith.addf %1241, %1294 : vector<8x128xf32>
    %1296 = vector.broadcast %1257 : vector<1x128xf32> to vector<24x128xf32>
    %1297 = arith.mulf %1277, %1296 : vector<24x128xf32>
    %1298 = arith.addf %1244, %1297 : vector<24x128xf32>
    %c0_430 = arith.constant 0 : index
    %c3072 = arith.constant 3072 : index
    %1299 = vector.load %arg1[%c0_430, %c3072] : memref<32x4096xf32, #tpu.memory_space<vmem>>, vector<8x128xf32>
    %c0_431 = arith.constant 0 : index
    %c3072_432 = arith.constant 3072 : index
    %1300 = vector.load %arg2[%c0_431, %c3072_432] : memref<32x4096xf32, #tpu.memory_space<vmem>>, vector<8x128xf32>
    %c8_433 = arith.constant 8 : index
    %c3072_434 = arith.constant 3072 : index
    %1301 = vector.load %arg1[%c8_433, %c3072_434] : memref<32x4096xf32, #tpu.memory_space<vmem>>, vector<24x128xf32>
    %c8_435 = arith.constant 8 : index
    %c3072_436 = arith.constant 3072 : index
    %1302 = vector.load %arg2[%c8_435, %c3072_436] : memref<32x4096xf32, #tpu.memory_space<vmem>>, vector<24x128xf32>
    %1303 = vector.extract_strided_slice %1300 {offsets = [0, 0], sizes = [1, 128], strides = [1, 1]} : vector<8x128xf32> to vector<1x128xf32>
    %cst_437 = arith.constant 0.000000e+00 : f32
    %1304 = vector.broadcast %cst_437 : f32 to vector<1x128xf32>
    %1305 = arith.cmpf oge, %1303, %1304 : vector<1x128xf32>
    %1306 = arith.extui %1305 : vector<1x128xi1> to vector<1x128xi32>
    %1307 = arith.sitofp %1306 : vector<1x128xi32> to vector<1x128xf32>
    %cst_438 = arith.constant 5.000000e-01 : f32
    %1308 = vector.broadcast %cst_438 : f32 to vector<1x128xf32>
    %1309 = arith.cmpf ogt, %1303, %1308 : vector<1x128xf32>
    %1310 = arith.extui %1309 : vector<1x128xi1> to vector<1x128xi32>
    %1311 = arith.sitofp %1310 : vector<1x128xi32> to vector<1x128xf32>
    %cst_439 = arith.constant 0.000000e+00 : f32
    %1312 = vector.broadcast %cst_439 : f32 to vector<8x128xf32>
    %1313 = arith.maximumf %1299, %1312 : vector<8x128xf32>
    %1314 = arith.mulf %1299, %1300 : vector<8x128xf32>
    %1315 = arith.subf %1313, %1314 : vector<8x128xf32>
    %1316 = math.absf %1299 : vector<8x128xf32>
    %cst_440 = arith.constant 0.000000e+00 : f32
    %1317 = vector.broadcast %cst_440 : f32 to vector<8x128xf32>
    %1318 = arith.subf %1317, %1316 : vector<8x128xf32>
    %1319 = math.exp %1318 : vector<8x128xf32>
    %1320 = math.log1p %1319 : vector<8x128xf32>
    %1321 = arith.addf %1315, %1320 : vector<8x128xf32>
    %1322 = arith.subf %1301, %1302 : vector<24x128xf32>
    %1323 = math.absf %1322 : vector<24x128xf32>
    %cst_441 = arith.constant 1.000000e+00 : f32
    %1324 = vector.broadcast %cst_441 : f32 to vector<24x128xf32>
    %1325 = arith.cmpf olt, %1323, %1324 : vector<24x128xf32>
    %cst_442 = arith.constant 5.000000e-01 : f32
    %1326 = vector.broadcast %cst_442 : f32 to vector<24x128xf32>
    %1327 = arith.mulf %1326, %1322 : vector<24x128xf32>
    %1328 = arith.mulf %1327, %1322 : vector<24x128xf32>
    %cst_443 = arith.constant 5.000000e-01 : f32
    %1329 = vector.broadcast %cst_443 : f32 to vector<24x128xf32>
    %1330 = arith.subf %1323, %1329 : vector<24x128xf32>
    %1331 = arith.select %1325, %1328, %1330 : vector<24x128xi1>, vector<24x128xf32>
    %c0_i32_444 = arith.constant 0 : i32
    %1332 = vector.broadcast %c0_i32_444 : i32 to vector<8x128xi32>
    %1333 = arith.cmpi eq, %0, %1332 : vector<8x128xi32>
    %c5_i32_445 = arith.constant 5 : i32
    %1334 = vector.broadcast %c5_i32_445 : i32 to vector<8x128xi32>
    %1335 = arith.cmpi slt, %0, %1334 : vector<8x128xi32>
    %cst_446 = arith.constant 0.000000e+00 : f32
    %1336 = vector.shape_cast %1311 : vector<1x128xf32> to vector<1x128xf32>
    %1337 = vector.broadcast %1336 : vector<1x128xf32> to vector<8x128xf32>
    %1338 = vector.broadcast %cst_446 : f32 to vector<8x128xf32>
    %1339 = arith.select %1335, %1337, %1338 : vector<8x128xi1>, vector<8x128xf32>
    %1340 = vector.shape_cast %1307 : vector<1x128xf32> to vector<1x128xf32>
    %1341 = vector.broadcast %1340 : vector<1x128xf32> to vector<8x128xf32>
    %1342 = arith.select %1333, %1341, %1339 : vector<8x128xi1>, vector<8x128xf32>
    %c5_i32_447 = arith.constant 5 : i32
    %1343 = vector.broadcast %c5_i32_447 : i32 to vector<8x128xi32>
    %1344 = arith.cmpi eq, %0, %1343 : vector<8x128xi32>
    %1345 = arith.mulf %1321, %1342 : vector<8x128xf32>
    %1346 = vector.shape_cast %1311 : vector<1x128xf32> to vector<1x128xf32>
    %1347 = vector.broadcast %1346 : vector<1x128xf32> to vector<8x128xf32>
    %1348 = arith.select %1344, %1347, %1345 : vector<8x128xi1>, vector<8x128xf32>
    %1349 = arith.addf %1295, %1348 : vector<8x128xf32>
    %1350 = vector.broadcast %1311 : vector<1x128xf32> to vector<24x128xf32>
    %1351 = arith.mulf %1331, %1350 : vector<24x128xf32>
    %1352 = arith.addf %1298, %1351 : vector<24x128xf32>
    %c0_448 = arith.constant 0 : index
    %c3200 = arith.constant 3200 : index
    %1353 = vector.load %arg1[%c0_448, %c3200] : memref<32x4096xf32, #tpu.memory_space<vmem>>, vector<8x128xf32>
    %c0_449 = arith.constant 0 : index
    %c3200_450 = arith.constant 3200 : index
    %1354 = vector.load %arg2[%c0_449, %c3200_450] : memref<32x4096xf32, #tpu.memory_space<vmem>>, vector<8x128xf32>
    %c8_451 = arith.constant 8 : index
    %c3200_452 = arith.constant 3200 : index
    %1355 = vector.load %arg1[%c8_451, %c3200_452] : memref<32x4096xf32, #tpu.memory_space<vmem>>, vector<24x128xf32>
    %c8_453 = arith.constant 8 : index
    %c3200_454 = arith.constant 3200 : index
    %1356 = vector.load %arg2[%c8_453, %c3200_454] : memref<32x4096xf32, #tpu.memory_space<vmem>>, vector<24x128xf32>
    %1357 = vector.extract_strided_slice %1354 {offsets = [0, 0], sizes = [1, 128], strides = [1, 1]} : vector<8x128xf32> to vector<1x128xf32>
    %cst_455 = arith.constant 0.000000e+00 : f32
    %1358 = vector.broadcast %cst_455 : f32 to vector<1x128xf32>
    %1359 = arith.cmpf oge, %1357, %1358 : vector<1x128xf32>
    %1360 = arith.extui %1359 : vector<1x128xi1> to vector<1x128xi32>
    %1361 = arith.sitofp %1360 : vector<1x128xi32> to vector<1x128xf32>
    %cst_456 = arith.constant 5.000000e-01 : f32
    %1362 = vector.broadcast %cst_456 : f32 to vector<1x128xf32>
    %1363 = arith.cmpf ogt, %1357, %1362 : vector<1x128xf32>
    %1364 = arith.extui %1363 : vector<1x128xi1> to vector<1x128xi32>
    %1365 = arith.sitofp %1364 : vector<1x128xi32> to vector<1x128xf32>
    %cst_457 = arith.constant 0.000000e+00 : f32
    %1366 = vector.broadcast %cst_457 : f32 to vector<8x128xf32>
    %1367 = arith.maximumf %1353, %1366 : vector<8x128xf32>
    %1368 = arith.mulf %1353, %1354 : vector<8x128xf32>
    %1369 = arith.subf %1367, %1368 : vector<8x128xf32>
    %1370 = math.absf %1353 : vector<8x128xf32>
    %cst_458 = arith.constant 0.000000e+00 : f32
    %1371 = vector.broadcast %cst_458 : f32 to vector<8x128xf32>
    %1372 = arith.subf %1371, %1370 : vector<8x128xf32>
    %1373 = math.exp %1372 : vector<8x128xf32>
    %1374 = math.log1p %1373 : vector<8x128xf32>
    %1375 = arith.addf %1369, %1374 : vector<8x128xf32>
    %1376 = arith.subf %1355, %1356 : vector<24x128xf32>
    %1377 = math.absf %1376 : vector<24x128xf32>
    %cst_459 = arith.constant 1.000000e+00 : f32
    %1378 = vector.broadcast %cst_459 : f32 to vector<24x128xf32>
    %1379 = arith.cmpf olt, %1377, %1378 : vector<24x128xf32>
    %cst_460 = arith.constant 5.000000e-01 : f32
    %1380 = vector.broadcast %cst_460 : f32 to vector<24x128xf32>
    %1381 = arith.mulf %1380, %1376 : vector<24x128xf32>
    %1382 = arith.mulf %1381, %1376 : vector<24x128xf32>
    %cst_461 = arith.constant 5.000000e-01 : f32
    %1383 = vector.broadcast %cst_461 : f32 to vector<24x128xf32>
    %1384 = arith.subf %1377, %1383 : vector<24x128xf32>
    %1385 = arith.select %1379, %1382, %1384 : vector<24x128xi1>, vector<24x128xf32>
    %c0_i32_462 = arith.constant 0 : i32
    %1386 = vector.broadcast %c0_i32_462 : i32 to vector<8x128xi32>
    %1387 = arith.cmpi eq, %0, %1386 : vector<8x128xi32>
    %c5_i32_463 = arith.constant 5 : i32
    %1388 = vector.broadcast %c5_i32_463 : i32 to vector<8x128xi32>
    %1389 = arith.cmpi slt, %0, %1388 : vector<8x128xi32>
    %cst_464 = arith.constant 0.000000e+00 : f32
    %1390 = vector.shape_cast %1365 : vector<1x128xf32> to vector<1x128xf32>
    %1391 = vector.broadcast %1390 : vector<1x128xf32> to vector<8x128xf32>
    %1392 = vector.broadcast %cst_464 : f32 to vector<8x128xf32>
    %1393 = arith.select %1389, %1391, %1392 : vector<8x128xi1>, vector<8x128xf32>
    %1394 = vector.shape_cast %1361 : vector<1x128xf32> to vector<1x128xf32>
    %1395 = vector.broadcast %1394 : vector<1x128xf32> to vector<8x128xf32>
    %1396 = arith.select %1387, %1395, %1393 : vector<8x128xi1>, vector<8x128xf32>
    %c5_i32_465 = arith.constant 5 : i32
    %1397 = vector.broadcast %c5_i32_465 : i32 to vector<8x128xi32>
    %1398 = arith.cmpi eq, %0, %1397 : vector<8x128xi32>
    %1399 = arith.mulf %1375, %1396 : vector<8x128xf32>
    %1400 = vector.shape_cast %1365 : vector<1x128xf32> to vector<1x128xf32>
    %1401 = vector.broadcast %1400 : vector<1x128xf32> to vector<8x128xf32>
    %1402 = arith.select %1398, %1401, %1399 : vector<8x128xi1>, vector<8x128xf32>
    %1403 = arith.addf %1349, %1402 : vector<8x128xf32>
    %1404 = vector.broadcast %1365 : vector<1x128xf32> to vector<24x128xf32>
    %1405 = arith.mulf %1385, %1404 : vector<24x128xf32>
    %1406 = arith.addf %1352, %1405 : vector<24x128xf32>
    %c0_466 = arith.constant 0 : index
    %c3328 = arith.constant 3328 : index
    %1407 = vector.load %arg1[%c0_466, %c3328] : memref<32x4096xf32, #tpu.memory_space<vmem>>, vector<8x128xf32>
    %c0_467 = arith.constant 0 : index
    %c3328_468 = arith.constant 3328 : index
    %1408 = vector.load %arg2[%c0_467, %c3328_468] : memref<32x4096xf32, #tpu.memory_space<vmem>>, vector<8x128xf32>
    %c8_469 = arith.constant 8 : index
    %c3328_470 = arith.constant 3328 : index
    %1409 = vector.load %arg1[%c8_469, %c3328_470] : memref<32x4096xf32, #tpu.memory_space<vmem>>, vector<24x128xf32>
    %c8_471 = arith.constant 8 : index
    %c3328_472 = arith.constant 3328 : index
    %1410 = vector.load %arg2[%c8_471, %c3328_472] : memref<32x4096xf32, #tpu.memory_space<vmem>>, vector<24x128xf32>
    %1411 = vector.extract_strided_slice %1408 {offsets = [0, 0], sizes = [1, 128], strides = [1, 1]} : vector<8x128xf32> to vector<1x128xf32>
    %cst_473 = arith.constant 0.000000e+00 : f32
    %1412 = vector.broadcast %cst_473 : f32 to vector<1x128xf32>
    %1413 = arith.cmpf oge, %1411, %1412 : vector<1x128xf32>
    %1414 = arith.extui %1413 : vector<1x128xi1> to vector<1x128xi32>
    %1415 = arith.sitofp %1414 : vector<1x128xi32> to vector<1x128xf32>
    %cst_474 = arith.constant 5.000000e-01 : f32
    %1416 = vector.broadcast %cst_474 : f32 to vector<1x128xf32>
    %1417 = arith.cmpf ogt, %1411, %1416 : vector<1x128xf32>
    %1418 = arith.extui %1417 : vector<1x128xi1> to vector<1x128xi32>
    %1419 = arith.sitofp %1418 : vector<1x128xi32> to vector<1x128xf32>
    %cst_475 = arith.constant 0.000000e+00 : f32
    %1420 = vector.broadcast %cst_475 : f32 to vector<8x128xf32>
    %1421 = arith.maximumf %1407, %1420 : vector<8x128xf32>
    %1422 = arith.mulf %1407, %1408 : vector<8x128xf32>
    %1423 = arith.subf %1421, %1422 : vector<8x128xf32>
    %1424 = math.absf %1407 : vector<8x128xf32>
    %cst_476 = arith.constant 0.000000e+00 : f32
    %1425 = vector.broadcast %cst_476 : f32 to vector<8x128xf32>
    %1426 = arith.subf %1425, %1424 : vector<8x128xf32>
    %1427 = math.exp %1426 : vector<8x128xf32>
    %1428 = math.log1p %1427 : vector<8x128xf32>
    %1429 = arith.addf %1423, %1428 : vector<8x128xf32>
    %1430 = arith.subf %1409, %1410 : vector<24x128xf32>
    %1431 = math.absf %1430 : vector<24x128xf32>
    %cst_477 = arith.constant 1.000000e+00 : f32
    %1432 = vector.broadcast %cst_477 : f32 to vector<24x128xf32>
    %1433 = arith.cmpf olt, %1431, %1432 : vector<24x128xf32>
    %cst_478 = arith.constant 5.000000e-01 : f32
    %1434 = vector.broadcast %cst_478 : f32 to vector<24x128xf32>
    %1435 = arith.mulf %1434, %1430 : vector<24x128xf32>
    %1436 = arith.mulf %1435, %1430 : vector<24x128xf32>
    %cst_479 = arith.constant 5.000000e-01 : f32
    %1437 = vector.broadcast %cst_479 : f32 to vector<24x128xf32>
    %1438 = arith.subf %1431, %1437 : vector<24x128xf32>
    %1439 = arith.select %1433, %1436, %1438 : vector<24x128xi1>, vector<24x128xf32>
    %c0_i32_480 = arith.constant 0 : i32
    %1440 = vector.broadcast %c0_i32_480 : i32 to vector<8x128xi32>
    %1441 = arith.cmpi eq, %0, %1440 : vector<8x128xi32>
    %c5_i32_481 = arith.constant 5 : i32
    %1442 = vector.broadcast %c5_i32_481 : i32 to vector<8x128xi32>
    %1443 = arith.cmpi slt, %0, %1442 : vector<8x128xi32>
    %cst_482 = arith.constant 0.000000e+00 : f32
    %1444 = vector.shape_cast %1419 : vector<1x128xf32> to vector<1x128xf32>
    %1445 = vector.broadcast %1444 : vector<1x128xf32> to vector<8x128xf32>
    %1446 = vector.broadcast %cst_482 : f32 to vector<8x128xf32>
    %1447 = arith.select %1443, %1445, %1446 : vector<8x128xi1>, vector<8x128xf32>
    %1448 = vector.shape_cast %1415 : vector<1x128xf32> to vector<1x128xf32>
    %1449 = vector.broadcast %1448 : vector<1x128xf32> to vector<8x128xf32>
    %1450 = arith.select %1441, %1449, %1447 : vector<8x128xi1>, vector<8x128xf32>
    %c5_i32_483 = arith.constant 5 : i32
    %1451 = vector.broadcast %c5_i32_483 : i32 to vector<8x128xi32>
    %1452 = arith.cmpi eq, %0, %1451 : vector<8x128xi32>
    %1453 = arith.mulf %1429, %1450 : vector<8x128xf32>
    %1454 = vector.shape_cast %1419 : vector<1x128xf32> to vector<1x128xf32>
    %1455 = vector.broadcast %1454 : vector<1x128xf32> to vector<8x128xf32>
    %1456 = arith.select %1452, %1455, %1453 : vector<8x128xi1>, vector<8x128xf32>
    %1457 = arith.addf %1403, %1456 : vector<8x128xf32>
    %1458 = vector.broadcast %1419 : vector<1x128xf32> to vector<24x128xf32>
    %1459 = arith.mulf %1439, %1458 : vector<24x128xf32>
    %1460 = arith.addf %1406, %1459 : vector<24x128xf32>
    %c0_484 = arith.constant 0 : index
    %c3456 = arith.constant 3456 : index
    %1461 = vector.load %arg1[%c0_484, %c3456] : memref<32x4096xf32, #tpu.memory_space<vmem>>, vector<8x128xf32>
    %c0_485 = arith.constant 0 : index
    %c3456_486 = arith.constant 3456 : index
    %1462 = vector.load %arg2[%c0_485, %c3456_486] : memref<32x4096xf32, #tpu.memory_space<vmem>>, vector<8x128xf32>
    %c8_487 = arith.constant 8 : index
    %c3456_488 = arith.constant 3456 : index
    %1463 = vector.load %arg1[%c8_487, %c3456_488] : memref<32x4096xf32, #tpu.memory_space<vmem>>, vector<24x128xf32>
    %c8_489 = arith.constant 8 : index
    %c3456_490 = arith.constant 3456 : index
    %1464 = vector.load %arg2[%c8_489, %c3456_490] : memref<32x4096xf32, #tpu.memory_space<vmem>>, vector<24x128xf32>
    %1465 = vector.extract_strided_slice %1462 {offsets = [0, 0], sizes = [1, 128], strides = [1, 1]} : vector<8x128xf32> to vector<1x128xf32>
    %cst_491 = arith.constant 0.000000e+00 : f32
    %1466 = vector.broadcast %cst_491 : f32 to vector<1x128xf32>
    %1467 = arith.cmpf oge, %1465, %1466 : vector<1x128xf32>
    %1468 = arith.extui %1467 : vector<1x128xi1> to vector<1x128xi32>
    %1469 = arith.sitofp %1468 : vector<1x128xi32> to vector<1x128xf32>
    %cst_492 = arith.constant 5.000000e-01 : f32
    %1470 = vector.broadcast %cst_492 : f32 to vector<1x128xf32>
    %1471 = arith.cmpf ogt, %1465, %1470 : vector<1x128xf32>
    %1472 = arith.extui %1471 : vector<1x128xi1> to vector<1x128xi32>
    %1473 = arith.sitofp %1472 : vector<1x128xi32> to vector<1x128xf32>
    %cst_493 = arith.constant 0.000000e+00 : f32
    %1474 = vector.broadcast %cst_493 : f32 to vector<8x128xf32>
    %1475 = arith.maximumf %1461, %1474 : vector<8x128xf32>
    %1476 = arith.mulf %1461, %1462 : vector<8x128xf32>
    %1477 = arith.subf %1475, %1476 : vector<8x128xf32>
    %1478 = math.absf %1461 : vector<8x128xf32>
    %cst_494 = arith.constant 0.000000e+00 : f32
    %1479 = vector.broadcast %cst_494 : f32 to vector<8x128xf32>
    %1480 = arith.subf %1479, %1478 : vector<8x128xf32>
    %1481 = math.exp %1480 : vector<8x128xf32>
    %1482 = math.log1p %1481 : vector<8x128xf32>
    %1483 = arith.addf %1477, %1482 : vector<8x128xf32>
    %1484 = arith.subf %1463, %1464 : vector<24x128xf32>
    %1485 = math.absf %1484 : vector<24x128xf32>
    %cst_495 = arith.constant 1.000000e+00 : f32
    %1486 = vector.broadcast %cst_495 : f32 to vector<24x128xf32>
    %1487 = arith.cmpf olt, %1485, %1486 : vector<24x128xf32>
    %cst_496 = arith.constant 5.000000e-01 : f32
    %1488 = vector.broadcast %cst_496 : f32 to vector<24x128xf32>
    %1489 = arith.mulf %1488, %1484 : vector<24x128xf32>
    %1490 = arith.mulf %1489, %1484 : vector<24x128xf32>
    %cst_497 = arith.constant 5.000000e-01 : f32
    %1491 = vector.broadcast %cst_497 : f32 to vector<24x128xf32>
    %1492 = arith.subf %1485, %1491 : vector<24x128xf32>
    %1493 = arith.select %1487, %1490, %1492 : vector<24x128xi1>, vector<24x128xf32>
    %c0_i32_498 = arith.constant 0 : i32
    %1494 = vector.broadcast %c0_i32_498 : i32 to vector<8x128xi32>
    %1495 = arith.cmpi eq, %0, %1494 : vector<8x128xi32>
    %c5_i32_499 = arith.constant 5 : i32
    %1496 = vector.broadcast %c5_i32_499 : i32 to vector<8x128xi32>
    %1497 = arith.cmpi slt, %0, %1496 : vector<8x128xi32>
    %cst_500 = arith.constant 0.000000e+00 : f32
    %1498 = vector.shape_cast %1473 : vector<1x128xf32> to vector<1x128xf32>
    %1499 = vector.broadcast %1498 : vector<1x128xf32> to vector<8x128xf32>
    %1500 = vector.broadcast %cst_500 : f32 to vector<8x128xf32>
    %1501 = arith.select %1497, %1499, %1500 : vector<8x128xi1>, vector<8x128xf32>
    %1502 = vector.shape_cast %1469 : vector<1x128xf32> to vector<1x128xf32>
    %1503 = vector.broadcast %1502 : vector<1x128xf32> to vector<8x128xf32>
    %1504 = arith.select %1495, %1503, %1501 : vector<8x128xi1>, vector<8x128xf32>
    %c5_i32_501 = arith.constant 5 : i32
    %1505 = vector.broadcast %c5_i32_501 : i32 to vector<8x128xi32>
    %1506 = arith.cmpi eq, %0, %1505 : vector<8x128xi32>
    %1507 = arith.mulf %1483, %1504 : vector<8x128xf32>
    %1508 = vector.shape_cast %1473 : vector<1x128xf32> to vector<1x128xf32>
    %1509 = vector.broadcast %1508 : vector<1x128xf32> to vector<8x128xf32>
    %1510 = arith.select %1506, %1509, %1507 : vector<8x128xi1>, vector<8x128xf32>
    %1511 = arith.addf %1457, %1510 : vector<8x128xf32>
    %1512 = vector.broadcast %1473 : vector<1x128xf32> to vector<24x128xf32>
    %1513 = arith.mulf %1493, %1512 : vector<24x128xf32>
    %1514 = arith.addf %1460, %1513 : vector<24x128xf32>
    %c0_502 = arith.constant 0 : index
    %c3584 = arith.constant 3584 : index
    %1515 = vector.load %arg1[%c0_502, %c3584] : memref<32x4096xf32, #tpu.memory_space<vmem>>, vector<8x128xf32>
    %c0_503 = arith.constant 0 : index
    %c3584_504 = arith.constant 3584 : index
    %1516 = vector.load %arg2[%c0_503, %c3584_504] : memref<32x4096xf32, #tpu.memory_space<vmem>>, vector<8x128xf32>
    %c8_505 = arith.constant 8 : index
    %c3584_506 = arith.constant 3584 : index
    %1517 = vector.load %arg1[%c8_505, %c3584_506] : memref<32x4096xf32, #tpu.memory_space<vmem>>, vector<24x128xf32>
    %c8_507 = arith.constant 8 : index
    %c3584_508 = arith.constant 3584 : index
    %1518 = vector.load %arg2[%c8_507, %c3584_508] : memref<32x4096xf32, #tpu.memory_space<vmem>>, vector<24x128xf32>
    %1519 = vector.extract_strided_slice %1516 {offsets = [0, 0], sizes = [1, 128], strides = [1, 1]} : vector<8x128xf32> to vector<1x128xf32>
    %cst_509 = arith.constant 0.000000e+00 : f32
    %1520 = vector.broadcast %cst_509 : f32 to vector<1x128xf32>
    %1521 = arith.cmpf oge, %1519, %1520 : vector<1x128xf32>
    %1522 = arith.extui %1521 : vector<1x128xi1> to vector<1x128xi32>
    %1523 = arith.sitofp %1522 : vector<1x128xi32> to vector<1x128xf32>
    %cst_510 = arith.constant 5.000000e-01 : f32
    %1524 = vector.broadcast %cst_510 : f32 to vector<1x128xf32>
    %1525 = arith.cmpf ogt, %1519, %1524 : vector<1x128xf32>
    %1526 = arith.extui %1525 : vector<1x128xi1> to vector<1x128xi32>
    %1527 = arith.sitofp %1526 : vector<1x128xi32> to vector<1x128xf32>
    %cst_511 = arith.constant 0.000000e+00 : f32
    %1528 = vector.broadcast %cst_511 : f32 to vector<8x128xf32>
    %1529 = arith.maximumf %1515, %1528 : vector<8x128xf32>
    %1530 = arith.mulf %1515, %1516 : vector<8x128xf32>
    %1531 = arith.subf %1529, %1530 : vector<8x128xf32>
    %1532 = math.absf %1515 : vector<8x128xf32>
    %cst_512 = arith.constant 0.000000e+00 : f32
    %1533 = vector.broadcast %cst_512 : f32 to vector<8x128xf32>
    %1534 = arith.subf %1533, %1532 : vector<8x128xf32>
    %1535 = math.exp %1534 : vector<8x128xf32>
    %1536 = math.log1p %1535 : vector<8x128xf32>
    %1537 = arith.addf %1531, %1536 : vector<8x128xf32>
    %1538 = arith.subf %1517, %1518 : vector<24x128xf32>
    %1539 = math.absf %1538 : vector<24x128xf32>
    %cst_513 = arith.constant 1.000000e+00 : f32
    %1540 = vector.broadcast %cst_513 : f32 to vector<24x128xf32>
    %1541 = arith.cmpf olt, %1539, %1540 : vector<24x128xf32>
    %cst_514 = arith.constant 5.000000e-01 : f32
    %1542 = vector.broadcast %cst_514 : f32 to vector<24x128xf32>
    %1543 = arith.mulf %1542, %1538 : vector<24x128xf32>
    %1544 = arith.mulf %1543, %1538 : vector<24x128xf32>
    %cst_515 = arith.constant 5.000000e-01 : f32
    %1545 = vector.broadcast %cst_515 : f32 to vector<24x128xf32>
    %1546 = arith.subf %1539, %1545 : vector<24x128xf32>
    %1547 = arith.select %1541, %1544, %1546 : vector<24x128xi1>, vector<24x128xf32>
    %c0_i32_516 = arith.constant 0 : i32
    %1548 = vector.broadcast %c0_i32_516 : i32 to vector<8x128xi32>
    %1549 = arith.cmpi eq, %0, %1548 : vector<8x128xi32>
    %c5_i32_517 = arith.constant 5 : i32
    %1550 = vector.broadcast %c5_i32_517 : i32 to vector<8x128xi32>
    %1551 = arith.cmpi slt, %0, %1550 : vector<8x128xi32>
    %cst_518 = arith.constant 0.000000e+00 : f32
    %1552 = vector.shape_cast %1527 : vector<1x128xf32> to vector<1x128xf32>
    %1553 = vector.broadcast %1552 : vector<1x128xf32> to vector<8x128xf32>
    %1554 = vector.broadcast %cst_518 : f32 to vector<8x128xf32>
    %1555 = arith.select %1551, %1553, %1554 : vector<8x128xi1>, vector<8x128xf32>
    %1556 = vector.shape_cast %1523 : vector<1x128xf32> to vector<1x128xf32>
    %1557 = vector.broadcast %1556 : vector<1x128xf32> to vector<8x128xf32>
    %1558 = arith.select %1549, %1557, %1555 : vector<8x128xi1>, vector<8x128xf32>
    %c5_i32_519 = arith.constant 5 : i32
    %1559 = vector.broadcast %c5_i32_519 : i32 to vector<8x128xi32>
    %1560 = arith.cmpi eq, %0, %1559 : vector<8x128xi32>
    %1561 = arith.mulf %1537, %1558 : vector<8x128xf32>
    %1562 = vector.shape_cast %1527 : vector<1x128xf32> to vector<1x128xf32>
    %1563 = vector.broadcast %1562 : vector<1x128xf32> to vector<8x128xf32>
    %1564 = arith.select %1560, %1563, %1561 : vector<8x128xi1>, vector<8x128xf32>
    %1565 = arith.addf %1511, %1564 : vector<8x128xf32>
    %1566 = vector.broadcast %1527 : vector<1x128xf32> to vector<24x128xf32>
    %1567 = arith.mulf %1547, %1566 : vector<24x128xf32>
    %1568 = arith.addf %1514, %1567 : vector<24x128xf32>
    %c0_520 = arith.constant 0 : index
    %c3712 = arith.constant 3712 : index
    %1569 = vector.load %arg1[%c0_520, %c3712] : memref<32x4096xf32, #tpu.memory_space<vmem>>, vector<8x128xf32>
    %c0_521 = arith.constant 0 : index
    %c3712_522 = arith.constant 3712 : index
    %1570 = vector.load %arg2[%c0_521, %c3712_522] : memref<32x4096xf32, #tpu.memory_space<vmem>>, vector<8x128xf32>
    %c8_523 = arith.constant 8 : index
    %c3712_524 = arith.constant 3712 : index
    %1571 = vector.load %arg1[%c8_523, %c3712_524] : memref<32x4096xf32, #tpu.memory_space<vmem>>, vector<24x128xf32>
    %c8_525 = arith.constant 8 : index
    %c3712_526 = arith.constant 3712 : index
    %1572 = vector.load %arg2[%c8_525, %c3712_526] : memref<32x4096xf32, #tpu.memory_space<vmem>>, vector<24x128xf32>
    %1573 = vector.extract_strided_slice %1570 {offsets = [0, 0], sizes = [1, 128], strides = [1, 1]} : vector<8x128xf32> to vector<1x128xf32>
    %cst_527 = arith.constant 0.000000e+00 : f32
    %1574 = vector.broadcast %cst_527 : f32 to vector<1x128xf32>
    %1575 = arith.cmpf oge, %1573, %1574 : vector<1x128xf32>
    %1576 = arith.extui %1575 : vector<1x128xi1> to vector<1x128xi32>
    %1577 = arith.sitofp %1576 : vector<1x128xi32> to vector<1x128xf32>
    %cst_528 = arith.constant 5.000000e-01 : f32
    %1578 = vector.broadcast %cst_528 : f32 to vector<1x128xf32>
    %1579 = arith.cmpf ogt, %1573, %1578 : vector<1x128xf32>
    %1580 = arith.extui %1579 : vector<1x128xi1> to vector<1x128xi32>
    %1581 = arith.sitofp %1580 : vector<1x128xi32> to vector<1x128xf32>
    %cst_529 = arith.constant 0.000000e+00 : f32
    %1582 = vector.broadcast %cst_529 : f32 to vector<8x128xf32>
    %1583 = arith.maximumf %1569, %1582 : vector<8x128xf32>
    %1584 = arith.mulf %1569, %1570 : vector<8x128xf32>
    %1585 = arith.subf %1583, %1584 : vector<8x128xf32>
    %1586 = math.absf %1569 : vector<8x128xf32>
    %cst_530 = arith.constant 0.000000e+00 : f32
    %1587 = vector.broadcast %cst_530 : f32 to vector<8x128xf32>
    %1588 = arith.subf %1587, %1586 : vector<8x128xf32>
    %1589 = math.exp %1588 : vector<8x128xf32>
    %1590 = math.log1p %1589 : vector<8x128xf32>
    %1591 = arith.addf %1585, %1590 : vector<8x128xf32>
    %1592 = arith.subf %1571, %1572 : vector<24x128xf32>
    %1593 = math.absf %1592 : vector<24x128xf32>
    %cst_531 = arith.constant 1.000000e+00 : f32
    %1594 = vector.broadcast %cst_531 : f32 to vector<24x128xf32>
    %1595 = arith.cmpf olt, %1593, %1594 : vector<24x128xf32>
    %cst_532 = arith.constant 5.000000e-01 : f32
    %1596 = vector.broadcast %cst_532 : f32 to vector<24x128xf32>
    %1597 = arith.mulf %1596, %1592 : vector<24x128xf32>
    %1598 = arith.mulf %1597, %1592 : vector<24x128xf32>
    %cst_533 = arith.constant 5.000000e-01 : f32
    %1599 = vector.broadcast %cst_533 : f32 to vector<24x128xf32>
    %1600 = arith.subf %1593, %1599 : vector<24x128xf32>
    %1601 = arith.select %1595, %1598, %1600 : vector<24x128xi1>, vector<24x128xf32>
    %c0_i32_534 = arith.constant 0 : i32
    %1602 = vector.broadcast %c0_i32_534 : i32 to vector<8x128xi32>
    %1603 = arith.cmpi eq, %0, %1602 : vector<8x128xi32>
    %c5_i32_535 = arith.constant 5 : i32
    %1604 = vector.broadcast %c5_i32_535 : i32 to vector<8x128xi32>
    %1605 = arith.cmpi slt, %0, %1604 : vector<8x128xi32>
    %cst_536 = arith.constant 0.000000e+00 : f32
    %1606 = vector.shape_cast %1581 : vector<1x128xf32> to vector<1x128xf32>
    %1607 = vector.broadcast %1606 : vector<1x128xf32> to vector<8x128xf32>
    %1608 = vector.broadcast %cst_536 : f32 to vector<8x128xf32>
    %1609 = arith.select %1605, %1607, %1608 : vector<8x128xi1>, vector<8x128xf32>
    %1610 = vector.shape_cast %1577 : vector<1x128xf32> to vector<1x128xf32>
    %1611 = vector.broadcast %1610 : vector<1x128xf32> to vector<8x128xf32>
    %1612 = arith.select %1603, %1611, %1609 : vector<8x128xi1>, vector<8x128xf32>
    %c5_i32_537 = arith.constant 5 : i32
    %1613 = vector.broadcast %c5_i32_537 : i32 to vector<8x128xi32>
    %1614 = arith.cmpi eq, %0, %1613 : vector<8x128xi32>
    %1615 = arith.mulf %1591, %1612 : vector<8x128xf32>
    %1616 = vector.shape_cast %1581 : vector<1x128xf32> to vector<1x128xf32>
    %1617 = vector.broadcast %1616 : vector<1x128xf32> to vector<8x128xf32>
    %1618 = arith.select %1614, %1617, %1615 : vector<8x128xi1>, vector<8x128xf32>
    %1619 = arith.addf %1565, %1618 : vector<8x128xf32>
    %1620 = vector.broadcast %1581 : vector<1x128xf32> to vector<24x128xf32>
    %1621 = arith.mulf %1601, %1620 : vector<24x128xf32>
    %1622 = arith.addf %1568, %1621 : vector<24x128xf32>
    %c0_538 = arith.constant 0 : index
    %c3840 = arith.constant 3840 : index
    %1623 = vector.load %arg1[%c0_538, %c3840] : memref<32x4096xf32, #tpu.memory_space<vmem>>, vector<8x128xf32>
    %c0_539 = arith.constant 0 : index
    %c3840_540 = arith.constant 3840 : index
    %1624 = vector.load %arg2[%c0_539, %c3840_540] : memref<32x4096xf32, #tpu.memory_space<vmem>>, vector<8x128xf32>
    %c8_541 = arith.constant 8 : index
    %c3840_542 = arith.constant 3840 : index
    %1625 = vector.load %arg1[%c8_541, %c3840_542] : memref<32x4096xf32, #tpu.memory_space<vmem>>, vector<24x128xf32>
    %c8_543 = arith.constant 8 : index
    %c3840_544 = arith.constant 3840 : index
    %1626 = vector.load %arg2[%c8_543, %c3840_544] : memref<32x4096xf32, #tpu.memory_space<vmem>>, vector<24x128xf32>
    %1627 = vector.extract_strided_slice %1624 {offsets = [0, 0], sizes = [1, 128], strides = [1, 1]} : vector<8x128xf32> to vector<1x128xf32>
    %cst_545 = arith.constant 0.000000e+00 : f32
    %1628 = vector.broadcast %cst_545 : f32 to vector<1x128xf32>
    %1629 = arith.cmpf oge, %1627, %1628 : vector<1x128xf32>
    %1630 = arith.extui %1629 : vector<1x128xi1> to vector<1x128xi32>
    %1631 = arith.sitofp %1630 : vector<1x128xi32> to vector<1x128xf32>
    %cst_546 = arith.constant 5.000000e-01 : f32
    %1632 = vector.broadcast %cst_546 : f32 to vector<1x128xf32>
    %1633 = arith.cmpf ogt, %1627, %1632 : vector<1x128xf32>
    %1634 = arith.extui %1633 : vector<1x128xi1> to vector<1x128xi32>
    %1635 = arith.sitofp %1634 : vector<1x128xi32> to vector<1x128xf32>
    %cst_547 = arith.constant 0.000000e+00 : f32
    %1636 = vector.broadcast %cst_547 : f32 to vector<8x128xf32>
    %1637 = arith.maximumf %1623, %1636 : vector<8x128xf32>
    %1638 = arith.mulf %1623, %1624 : vector<8x128xf32>
    %1639 = arith.subf %1637, %1638 : vector<8x128xf32>
    %1640 = math.absf %1623 : vector<8x128xf32>
    %cst_548 = arith.constant 0.000000e+00 : f32
    %1641 = vector.broadcast %cst_548 : f32 to vector<8x128xf32>
    %1642 = arith.subf %1641, %1640 : vector<8x128xf32>
    %1643 = math.exp %1642 : vector<8x128xf32>
    %1644 = math.log1p %1643 : vector<8x128xf32>
    %1645 = arith.addf %1639, %1644 : vector<8x128xf32>
    %1646 = arith.subf %1625, %1626 : vector<24x128xf32>
    %1647 = math.absf %1646 : vector<24x128xf32>
    %cst_549 = arith.constant 1.000000e+00 : f32
    %1648 = vector.broadcast %cst_549 : f32 to vector<24x128xf32>
    %1649 = arith.cmpf olt, %1647, %1648 : vector<24x128xf32>
    %cst_550 = arith.constant 5.000000e-01 : f32
    %1650 = vector.broadcast %cst_550 : f32 to vector<24x128xf32>
    %1651 = arith.mulf %1650, %1646 : vector<24x128xf32>
    %1652 = arith.mulf %1651, %1646 : vector<24x128xf32>
    %cst_551 = arith.constant 5.000000e-01 : f32
    %1653 = vector.broadcast %cst_551 : f32 to vector<24x128xf32>
    %1654 = arith.subf %1647, %1653 : vector<24x128xf32>
    %1655 = arith.select %1649, %1652, %1654 : vector<24x128xi1>, vector<24x128xf32>
    %c0_i32_552 = arith.constant 0 : i32
    %1656 = vector.broadcast %c0_i32_552 : i32 to vector<8x128xi32>
    %1657 = arith.cmpi eq, %0, %1656 : vector<8x128xi32>
    %c5_i32_553 = arith.constant 5 : i32
    %1658 = vector.broadcast %c5_i32_553 : i32 to vector<8x128xi32>
    %1659 = arith.cmpi slt, %0, %1658 : vector<8x128xi32>
    %cst_554 = arith.constant 0.000000e+00 : f32
    %1660 = vector.shape_cast %1635 : vector<1x128xf32> to vector<1x128xf32>
    %1661 = vector.broadcast %1660 : vector<1x128xf32> to vector<8x128xf32>
    %1662 = vector.broadcast %cst_554 : f32 to vector<8x128xf32>
    %1663 = arith.select %1659, %1661, %1662 : vector<8x128xi1>, vector<8x128xf32>
    %1664 = vector.shape_cast %1631 : vector<1x128xf32> to vector<1x128xf32>
    %1665 = vector.broadcast %1664 : vector<1x128xf32> to vector<8x128xf32>
    %1666 = arith.select %1657, %1665, %1663 : vector<8x128xi1>, vector<8x128xf32>
    %c5_i32_555 = arith.constant 5 : i32
    %1667 = vector.broadcast %c5_i32_555 : i32 to vector<8x128xi32>
    %1668 = arith.cmpi eq, %0, %1667 : vector<8x128xi32>
    %1669 = arith.mulf %1645, %1666 : vector<8x128xf32>
    %1670 = vector.shape_cast %1635 : vector<1x128xf32> to vector<1x128xf32>
    %1671 = vector.broadcast %1670 : vector<1x128xf32> to vector<8x128xf32>
    %1672 = arith.select %1668, %1671, %1669 : vector<8x128xi1>, vector<8x128xf32>
    %1673 = arith.addf %1619, %1672 : vector<8x128xf32>
    %1674 = vector.broadcast %1635 : vector<1x128xf32> to vector<24x128xf32>
    %1675 = arith.mulf %1655, %1674 : vector<24x128xf32>
    %1676 = arith.addf %1622, %1675 : vector<24x128xf32>
    %c0_556 = arith.constant 0 : index
    %c3968 = arith.constant 3968 : index
    %1677 = vector.load %arg1[%c0_556, %c3968] : memref<32x4096xf32, #tpu.memory_space<vmem>>, vector<8x128xf32>
    %c0_557 = arith.constant 0 : index
    %c3968_558 = arith.constant 3968 : index
    %1678 = vector.load %arg2[%c0_557, %c3968_558] : memref<32x4096xf32, #tpu.memory_space<vmem>>, vector<8x128xf32>
    %c8_559 = arith.constant 8 : index
    %c3968_560 = arith.constant 3968 : index
    %1679 = vector.load %arg1[%c8_559, %c3968_560] : memref<32x4096xf32, #tpu.memory_space<vmem>>, vector<24x128xf32>
    %c8_561 = arith.constant 8 : index
    %c3968_562 = arith.constant 3968 : index
    %1680 = vector.load %arg2[%c8_561, %c3968_562] : memref<32x4096xf32, #tpu.memory_space<vmem>>, vector<24x128xf32>
    %1681 = vector.extract_strided_slice %1678 {offsets = [0, 0], sizes = [1, 128], strides = [1, 1]} : vector<8x128xf32> to vector<1x128xf32>
    %cst_563 = arith.constant 0.000000e+00 : f32
    %1682 = vector.broadcast %cst_563 : f32 to vector<1x128xf32>
    %1683 = arith.cmpf oge, %1681, %1682 : vector<1x128xf32>
    %1684 = arith.extui %1683 : vector<1x128xi1> to vector<1x128xi32>
    %1685 = arith.sitofp %1684 : vector<1x128xi32> to vector<1x128xf32>
    %cst_564 = arith.constant 5.000000e-01 : f32
    %1686 = vector.broadcast %cst_564 : f32 to vector<1x128xf32>
    %1687 = arith.cmpf ogt, %1681, %1686 : vector<1x128xf32>
    %1688 = arith.extui %1687 : vector<1x128xi1> to vector<1x128xi32>
    %1689 = arith.sitofp %1688 : vector<1x128xi32> to vector<1x128xf32>
    %cst_565 = arith.constant 0.000000e+00 : f32
    %1690 = vector.broadcast %cst_565 : f32 to vector<8x128xf32>
    %1691 = arith.maximumf %1677, %1690 : vector<8x128xf32>
    %1692 = arith.mulf %1677, %1678 : vector<8x128xf32>
    %1693 = arith.subf %1691, %1692 : vector<8x128xf32>
    %1694 = math.absf %1677 : vector<8x128xf32>
    %cst_566 = arith.constant 0.000000e+00 : f32
    %1695 = vector.broadcast %cst_566 : f32 to vector<8x128xf32>
    %1696 = arith.subf %1695, %1694 : vector<8x128xf32>
    %1697 = math.exp %1696 : vector<8x128xf32>
    %1698 = math.log1p %1697 : vector<8x128xf32>
    %1699 = arith.addf %1693, %1698 : vector<8x128xf32>
    %1700 = arith.subf %1679, %1680 : vector<24x128xf32>
    %1701 = math.absf %1700 : vector<24x128xf32>
    %cst_567 = arith.constant 1.000000e+00 : f32
    %1702 = vector.broadcast %cst_567 : f32 to vector<24x128xf32>
    %1703 = arith.cmpf olt, %1701, %1702 : vector<24x128xf32>
    %cst_568 = arith.constant 5.000000e-01 : f32
    %1704 = vector.broadcast %cst_568 : f32 to vector<24x128xf32>
    %1705 = arith.mulf %1704, %1700 : vector<24x128xf32>
    %1706 = arith.mulf %1705, %1700 : vector<24x128xf32>
    %cst_569 = arith.constant 5.000000e-01 : f32
    %1707 = vector.broadcast %cst_569 : f32 to vector<24x128xf32>
    %1708 = arith.subf %1701, %1707 : vector<24x128xf32>
    %1709 = arith.select %1703, %1706, %1708 : vector<24x128xi1>, vector<24x128xf32>
    %c0_i32_570 = arith.constant 0 : i32
    %1710 = vector.broadcast %c0_i32_570 : i32 to vector<8x128xi32>
    %1711 = arith.cmpi eq, %0, %1710 : vector<8x128xi32>
    %c5_i32_571 = arith.constant 5 : i32
    %1712 = vector.broadcast %c5_i32_571 : i32 to vector<8x128xi32>
    %1713 = arith.cmpi slt, %0, %1712 : vector<8x128xi32>
    %cst_572 = arith.constant 0.000000e+00 : f32
    %1714 = vector.shape_cast %1689 : vector<1x128xf32> to vector<1x128xf32>
    %1715 = vector.broadcast %1714 : vector<1x128xf32> to vector<8x128xf32>
    %1716 = vector.broadcast %cst_572 : f32 to vector<8x128xf32>
    %1717 = arith.select %1713, %1715, %1716 : vector<8x128xi1>, vector<8x128xf32>
    %1718 = vector.shape_cast %1685 : vector<1x128xf32> to vector<1x128xf32>
    %1719 = vector.broadcast %1718 : vector<1x128xf32> to vector<8x128xf32>
    %1720 = arith.select %1711, %1719, %1717 : vector<8x128xi1>, vector<8x128xf32>
    %c5_i32_573 = arith.constant 5 : i32
    %1721 = vector.broadcast %c5_i32_573 : i32 to vector<8x128xi32>
    %1722 = arith.cmpi eq, %0, %1721 : vector<8x128xi32>
    %1723 = arith.mulf %1699, %1720 : vector<8x128xf32>
    %1724 = vector.shape_cast %1689 : vector<1x128xf32> to vector<1x128xf32>
    %1725 = vector.broadcast %1724 : vector<1x128xf32> to vector<8x128xf32>
    %1726 = arith.select %1722, %1725, %1723 : vector<8x128xi1>, vector<8x128xf32>
    %1727 = arith.addf %1673, %1726 : vector<8x128xf32>
    %1728 = vector.broadcast %1689 : vector<1x128xf32> to vector<24x128xf32>
    %1729 = arith.mulf %1709, %1728 : vector<24x128xf32>
    %1730 = arith.addf %1676, %1729 : vector<24x128xf32>
    %c0_574 = arith.constant 0 : index
    %c0_575 = arith.constant 0 : index
    %c0_576 = arith.constant 0 : index
    %1731 = vector.load %arg3[%c0_574, %c0_575, %c0_576] : memref<1x32x128xf32, #tpu.memory_space<vmem>>, vector<1x8x128xf32>
    %1732 = vector.shape_cast %1731 : vector<1x8x128xf32> to vector<8x128xf32>
    %1733 = vector.shape_cast %1727 : vector<8x128xf32> to vector<1x8x128xf32>
    tpu.vector_store %arg3[%c0_574, %c0_575, %c0_576], %1733 {strides = array<i32>} : memref<1x32x128xf32, #tpu.memory_space<vmem>>, vector<1x8x128xf32>,
    %c0_577 = arith.constant 0 : index
    %c8_578 = arith.constant 8 : index
    %c0_579 = arith.constant 0 : index
    %1734 = vector.load %arg3[%c0_577, %c8_578, %c0_579] : memref<1x32x128xf32, #tpu.memory_space<vmem>>, vector<1x24x128xf32>
    %1735 = vector.shape_cast %1734 : vector<1x24x128xf32> to vector<24x128xf32>
    %1736 = vector.shape_cast %1730 : vector<24x128xf32> to vector<1x24x128xf32>
    tpu.vector_store %arg3[%c0_577, %c8_578, %c0_579], %1736 {strides = array<i32>} : memref<1x32x128xf32, #tpu.memory_space<vmem>>, vector<1x24x128xf32>,
    return
  }
  func.func @transform_0(%arg0: i32) -> (i32, i32) {
    %c0_i32 = arith.constant 0 : i32
    %c0_i32_0 = arith.constant 0 : i32
    return %c0_i32, %arg0 : i32, i32
  }
  func.func @transform_1(%arg0: i32) -> (i32, i32) {
    %c0_i32 = arith.constant 0 : i32
    %c0_i32_0 = arith.constant 0 : i32
    return %c0_i32, %arg0 : i32, i32
  }
  func.func @transform_2(%arg0: i32) -> (i32, i32, i32) {
    %c0_i32 = arith.constant 0 : i32
    %c0_i32_0 = arith.constant 0 : i32
    %c0_i32_1 = arith.constant 0 : i32
    return %arg0, %c0_i32, %c0_i32_0 : i32, i32, i32
  }
}

</mosaic_0001>

<bundles_post_ra>
// kernel: tpu_custom_call.1
= control target key start
LH: loop header
LB: loop body
LE: loop exit
PB: predicated region body
PF: predicated region fallthrough
CT: control target
= control target key end

     0   :  { %7 = vsyncpa [#allocation3], 0  ;;  %s5706_s0 = inlined_call_operand.hbm [shape: f32[32,20480], index: 0, kind: input, shape index: {}]   ;;  %s5707_s1 = inlined_call_operand.hbm [shape: f32[32,20480], index: 1, kind: input, shape index: {}]   ;;  %s5708_s2 = inlined_call_operand.hbm [shape: f32[5,32,128], index: 2, kind: output, shape index: {}]  }
   0x1   :  { %9 = vsyncpa [#allocation3 + $0x1], 0 }
   0x2   :  { %10 = vsyncpa [#allocation6], 0 }
   0x3   :  { %12 = vsyncpa [#allocation6 + $0x1], 0 }
   0x4   :  { %13 = vsyncpa [#allocation4], 0 }
   0x5   :  { %15 = vsyncpa [#allocation4 + $0x1], 0  ;;  %s3111_s9 = smov 0   ;;  %s3113_s10 = smov 0  }
   0x6   :  { %s3115_s11 = smov 0   ;;  %s3117_s12 = smov 0  }
   0x7 LB: > { %s3132_s13 = sadd.s32 4294967295, %s3085_s12   ;;  %s2595_s14 = sadd.s32 4294967294, %s3085_s12   ;;  %s3085_s12 = sphi %s3117_s12, %s5976_s12   ;;  %s3081_s11 = sphi %s3115_s11, %s5975_s11   ;;  %s3077_s10 = sphi %s3113_s10, %s5974_s10   ;;  %s3073_s9 = sphi %s3111_s9, %s5973_s9  }
   0x8   : > { %s3136_s15 = sadd.s32 1, %s3085_s12   ;;  %s28_s16 = sadd.s32 1, %s3081_s11 }
   0x9   : > { %s25_s17 = ssub.s32 %s3085_s12, %s3136_s15  ;;  %p35_p0 = scmp.ne.s32.totalorder %s3081_s11, %s3077_s10 }
   0xa   : > { %p26_p1 = scmp.eq.s32.totalorder %s25_s17, 0  ;;  %p36_p2 = scmp.eq.s32.totalorder %s3085_s12, 0 }
   0xb   : > { %p41_p3 = scmp.ne.s32.totalorder %s3077_s10, %s3073_s9  ;;  %p42_p4 = scmp.eq.s32.totalorder %s3132_s13, 0 }
   0xc   : > { %s3148_s18 = scalar_select %p26_p1, %s3081_s11, %s28_s16  }
   0xd   : > { %p3150_p5 = por %p36_p2, %p35_p0  ;;  %p3154_p6 = por %p42_p4, %p41_p3 }
   0xe   : > { %p91_p7 = scmp.eq.s32.totalorder %s3132_s13, 4  ;;  %p97_p8 = scmp.eq.s32.totalorder %s2595_s14, 4 }
   0xf   : > { %s5712_s20 = scalar_select %p3154_p6, 1, 0 }
  0x10   : > { %p2793_p9 = scmp.lt.s32.totalorder %s3085_s12, 5  ;;  %p3160_p10 = por %p91_p7, %p35_p0 }
  0x11   : > { %p3164_p11 = por %p97_p8, %p41_p3  ;;  %s3169_s23 = sand.u32 1, %s3081_s11  }
  0x12   : > { %s5713_s21 = scalar_select %p3160_p10, 1, 0 }
  0x13   : > { %s5714_s22 = scalar_select %p3164_p11, 1, 0 }
  0x14   : > { %s2773_s24 = sshll.u32 %s3085_s12, 12  ;;  %s2598_s25 = sshll.u32 %s3169_s23, 10 }
  0x15   : > { %s3178_s28 = scalar_lea.hbm %s5706_s0, %s2773_s24  ;;  %s121_s29 = scalar_lea.vmem [#allocation2], %s2598_s25 }
  0x16   : > { %s128_s30 = sshll.u32 %s121_s29, 4  ;;  %p3184_p12 = pnand %p2793_p9, %p3150_p5  ;;  %s3188_s30 = int_to_ptr.vmem [resolvable:$true] %s128_s30 }
  0x17   : > { %s118_s4 = scalar_lea.sflag [#allocation3], %s3169_s23  ;;  %s2961_s5 = scalar_lea.hbm %s3178_s28, 16384 }
  0x18   : > { %p2962_p0 = scmp.ne.s32.totalorder %s3178_s28, %s2961_s5  ;;  %p2963_p1 = pneg %p3184_p12 }
  0x19   : > { %s2966_s8 = scalar_lea.hbm %s5706_s0, 81920  ;;  %p2967_p4 = scmp.lt.s32.totalorder %s3178_s28, %s5706_s0 }
  0x1a   : > { %p2964_p2 = pnand %p2963_p1, %p2962_p0  ;;  %p2968_p5 = scmp.lt.s32.totalorder %s2966_s8, %s2961_s5 }
  0x1c   : > { %p2965_p3 = pneg %p2964_p2  ;;  %p2969_p7 = por %p2968_p5, %p2967_p4 }
  0x1e   : > { %p2970_p8 = pnand %p2969_p7, %p2965_p3 }
  0x20   : > { %2973 = shalt.err (!%p2970_p8)
}
  0x21   : > { %s2974_s17 = scalar_lea.vmem %s3188_s30, 16384  ;;  %s3087_s19 = smov [#allocation2]  }
  0x22   : > { %p2975_p9 = scmp.ne.s32.totalorder %s3188_s30, %s2974_s17  ;;  %s2979_s26 = sshll.u32 %s3087_s19, 4  ;;  %s2980_s26 = int_to_ptr.vmem [resolvable:$false] %s2979_s26 }
  0x23   : > { %s2981_s27 = scalar_lea.vmem %s2980_s26, 32768  ;;  %p2982_p13 = scmp.lt.s32.totalorder %s3188_s30, %s2980_s26 }
  0x24   : > { %p2977_p0 = pnand %p2975_p9, %p2963_p1  ;;  %p2983_p11 = scmp.lt.s32.totalorder %s2981_s27, %s2974_s17 }
  0x26   : > { %p2978_p2 = pneg %p2977_p0  ;;  %p2984_p10 = por %p2983_p11, %p2982_p13 }
  0x28   : > { %p2985_p4 = pnand %p2984_p10, %p2978_p2 }
  0x2a   : > { %2988 = shalt.err (!%p2985_p4)
}
  0x2b   : > { %s3088_s29 = smov 20480   ;;  %s3089_s5 = smov 4096  }
  0x2c   : > { %s3090_s6 = smov 256   ;;  %p157_p10 = scmp.lt.s32.totalorder %s3085_s12, 6 }
  0x2d   : > { %2785 = dma.hbm_to_vmem [thread:$0]  (!%p3184_p12), %s3178_s28, 16384, %s3188_s30, %s118_s4, %s3088_s29, %s3089_s5, %s3090_s6  }
  0x2e   : > { %s3227_s14 = scalar_lea.hbm %s5707_s1, %s2773_s24  ;;  %p5716_p11 = scmp.ge.s32.totalorder %s3085_s12, 1 }
  0x2f   : > { %s142_s17 = scalar_lea.vmem [#allocation5], %s2598_s25  ;;  %s139_s28 = scalar_lea.sflag [#allocation6], %s3169_s23 }
  0x30   : > { %p3231_p13 = pnand %p5716_p11, %p157_p10  ;;  %s149_s19 = sshll.u32 %s142_s17, 4  ;;  %s3237_s19 = int_to_ptr.vmem [resolvable:$true] %s149_s19 }
  0x31   : > { %s2989_s30 = scalar_lea.hbm %s3227_s14, 16384  ;;  %s2994_s26 = scalar_lea.hbm %s5707_s1, 81920 }
  0x32   : > { %p2990_p3 = scmp.ne.s32.totalorder %s3227_s14, %s2989_s30  ;;  %p2995_p8 = scmp.lt.s32.totalorder %s3227_s14, %s5707_s1 }
  0x33   : > { %p2996_p9 = scmp.lt.s32.totalorder %s2994_s26, %s2989_s30 }
  0x34   : > { %p2992_p5 = pnand %p2990_p3, %p2963_p1 }
  0x35   : > { %p2997_p0 = por %p2996_p9, %p2995_p8 }
  0x36   : > { %p2993_p7 = pneg %p2992_p5 }
  0x38   : > { %p2998_p2 = pnand %p2997_p0, %p2993_p7 }
  0x3a   : > { %3001 = shalt.err (!%p2998_p2)
}
  0x3b   : > { %s3002_s23 = scalar_lea.vmem %s3237_s19, 16384  ;;  %s3091_s25 = smov [#allocation5]  }
  0x3c   : > { %p3003_p4 = scmp.ne.s32.totalorder %s3237_s19, %s3002_s23  ;;  %s3007_s8 = sshll.u32 %s3091_s25, 4  ;;  %s3008_s8 = int_to_ptr.vmem [resolvable:$false] %s3007_s8 }
  0x3d   : > { %s3009_s17 = scalar_lea.vmem %s3008_s8, 32768  ;;  %p3010_p3 = scmp.lt.s32.totalorder %s3237_s19, %s3008_s8 }
  0x3e   : > { %p3005_p10 = pnand %p3003_p4, %p2963_p1  ;;  %p3011_p5 = scmp.lt.s32.totalorder %s3009_s17, %s3002_s23 }
  0x40   : > { %p3006_p11 = pneg %p3005_p10  ;;  %p3012_p6 = por %p3011_p5, %p3010_p3 }
  0x42   : > { %p3013_p8 = pnand %p3012_p6, %p3006_p11 }
  0x44   : > { %3016 = shalt.err (!%p3013_p8)
}
  0x45   : > { %2788 = dma.hbm_to_vmem [thread:$0]  (!%p3184_p12), %s3227_s14, 16384, %s3237_s19, %s139_s28, %s3088_s29, %s3089_s5, %s3090_s6  }
  0x46   : > { %161 = sbr.rel (%p3231_p13) target bundleno = 547 (0x223), region = 28  ;;  %s3268_s30 = sand.u32 (!%p3231_p13), 1, %s3077_s10  }
  0x47   : > { %s2605_s24 = sshll.u32 (!%p3231_p13), %s3268_s30, 10  ;;  %s164_s4 = scalar_lea.sflag (!%p3231_p13), [#allocation3], %s3268_s30 }
  0x48   : > { %s3272_s26 = scalar_lea.vmem (!%p3231_p13), [#allocation2], %s2605_s24  ;;  %p5718_p6 = scmp.ne.s32.totalorder (!%p3231_p13), %s5712_s20, 0 }
  0x4b   : > { %3060 = dma.done.wait (%p5718_p6), %s164_s4, 16384  }
  0x4c   : > { %3062 = vsyncadd (%p5718_p6), %s164_s4, 4294950912  ;;  %s173_s3 = scalar_lea.sflag [#allocation6], %s3268_s30  ;;  %s3279_s29 = scalar_lea.vmem [#allocation5], %s2605_s24 }
  0x4d   : > { %3064 = dma.done.wait (%p5718_p6), %s173_s3, 16384  }
  0x4e   : > { %3066 = vsyncadd (%p5718_p6), %s173_s3, 4294950912  ;;  %v206_v0 = vld [vmem:[%s3272_s26] sm:$0xff]  ;;  %v3287_v3 = vld [vmem:[%s3272_s26 + $0x8] sm:$0xff]  ;;  %v204_v8 = vlaneseq  ;;  %v3092_v23 = vmov 0.0   ;;  %s2607_s20 = sshll.u32 %s3268_s30, 5  ;;  %s2775_s6 = sshll.u32 %s3132_s13, 9 }
  0x4f   : > { %v223_v1 = vand.u32 2147483647, %v206_v0  ;;  %v208_v5 = vld [vmem:[%s3272_s26 + $0x100] sm:$0xff]  ;;  %v297_v7 = vand.u32 2147483647, %v3287_v3  ;;  %v220_v26 = vmax.f32 %v206_v0, 0.0  ;;  %s5661_s28 = scalar_lea.hbm %s5708_s2, %s2775_s6 }
  0x50   : > { %v211_v6 = vld [vmem:[%s3279_s29 + $0x100] sm:$0xff]  ;;  %v3295_v14 = vshrl.u32 %v204_v8, 7  ;;  %v3305_v28 = vld [vmem:[%s3272_s26 + $0x10] sm:$0xff]  ;;  %v281_v32 = vld [vmem:[%s3279_s29 + $0x8] sm:$0xff]  ;;  %s5568_s5 = scalar_lea.vmem [#allocation7], %s2607_s20  ;;  %s2486_s27 = scalar_lea.sflag [#allocation4], %s3268_s30 }
  0x51   : > { %v224_v2 = vsub.f32 0.0, %v223_v1  ;;  %v207_v9 = vld [vmem:[%s3279_s29] sm:$0xff]  ;;  %v237_v10 = vsub.f32 %v208_v5, %v211_v6  ;;  %v298_v13 = vsub.f32 0.0, %v297_v7  ;;  %v282_v33 = vld [vmem:[%s3272_s26 + $0x108] sm:$0xff]  ;;  %v368_v43 = vand.u32 2147483647, %v3305_v28 }
  0x52   : > { %v209_v11 = vld [vmem:[%s3272_s26 + $0x200] sm:$0xff]  ;;  %vm214_vm0 = vcmp.ge.f32.partialorder %v207_v9, 0.0  ;;  %vm217_vm1 = vcmp.gt.f32.partialorder %v207_v9, 0.5  ;;  %v3300_v22 = vsub.s32 0, %v3295_v14  ;;  %v221_v27 = vmul.f32 %v207_v9, %v206_v0  ;;  %v283_v34 = vld [vmem:[%s3272_s26 + $0x208] sm:$0xff]  ;;  %s2499_s14 = sshll.u32 %s5568_s5, 4  ;;  %s5663_s14 = int_to_ptr.vmem [resolvable:$true] %s2499_s14 }
  0x53   : > { %v225_v4 = vmul.f32 1.442695, %v224_v2  ;;  %v212_v12 = vld [vmem:[%s3279_s29 + $0x200] sm:$0xff]  ;;  %v240_v18 = vand.u32 2147483647, %v237_v10  ;;  %v246_v19 = vmul.f32 0.5, %v237_v10 }
  0x54   : > { %v210_v15 = vld [vmem:[%s3272_s26 + $0x300] sm:$0xff]  ;;  %v238_v17 = vsub.f32 %v209_v11, %v212_v12  ;;  %v299_v20 = vmul.f32 1.442695, %v298_v13  ;;  %v2608_v24 = vsel %vm214_vm0, 1.0, %v3092_v23  ;;  %v2609_v25 = vsel %vm217_vm1, 1.0, %v3092_v23  ;;  %v284_v37 = vld [vmem:[%s3272_s26 + $0x308] sm:$0xff] }
  0x55   : > { %2833 = vpow2.f32 %v225_v4  ;;  %v213_v16 = vld [vmem:[%s3279_s29 + $0x300] sm:$0xff]  ;;  %v249_v30 = vmul.f32 %v246_v19, %v237_v10  ;;  %v2610_v31 = vadd.f32 -0.5, %v240_v18  ;;  %vm3310_vm2 = vcmp.lt.f32.partialorder %v240_v18, 1.0  ;;  %v285_v38 = vld [vmem:[%s3279_s29 + $0x108] sm:$0xff]  ;;  %s3017_s13 = scalar_lea.vmem %s5663_s14, 512  ;;  %p5971_p1 = scmp.ne.s32.totalorder %s5713_s21, 0 }
  0x56   : > { %v239_v21 = vsub.f32 %v210_v15, %v213_v16  ;;  %v241_v29 = vand.u32 2147483647, %v238_v17  ;;  %v247_v36 = vmul.f32 0.5, %v238_v17  ;;  %vm258_vm3 = vcmp.eq.s32.totalorder %v3295_v14, 0  ;;  %v286_v39 = vld [vmem:[%s3279_s29 + $0x208] sm:$0xff]  ;;  %v353_v15 = vld [vmem:[%s3272_s26 + $0x110] sm:$0xff]  ;;  %p3018_p12 = scmp.ne.s32.totalorder %s5663_s14, %s3017_s13 }
  0x57   : > { %2835 = vpow2.f32 %v299_v20  ;;  %v287_v42 = vld [vmem:[%s3279_s29 + $0x308] sm:$0xff]  ;;  %v3320_v44 = vsub.f32 %v220_v26, %v221_v27  ;;  %vm259_vm4 = vcmp.lt.s32.totalorder %v3295_v14, 5  ;;  %v3324_v45 = vrot.slane %v2609_v25, %v3300_v22  ;;  %v356_v16 = vld [vmem:[%s3279_s29 + $0x110] sm:$0xff]  ;;  %s3093_s7 = smov [#allocation7]  }
  0x58   : > { %v242_v40 = vand.u32 2147483647, %v239_v21  ;;  %v248_v41 = vmul.f32 0.5, %v239_v21  ;;  %v268_v46 = vrot.slane %v2608_v24, %v3300_v22  ;;  %vm3329_vm5 = vcmp.lt.f32.partialorder %v241_v29, 1.0  ;;  %v357_v24 = vld [vmem:[%s3279_s29 + $0x210] sm:$0xff]  ;;  %p3019_p13 = pnand %p3018_p12, %p5971_p1  ;;  %s3021_s23 = sshll.u32 %s3093_s7, 4  ;;  %s3022_s23 = int_to_ptr.vmem [resolvable:$false] %s3021_s23 }
  0x59   : > { %v255_v49 = vsel %vm3310_vm2, %v249_v30, %v2610_v31  ;;  %v311_v50 = vsub.f32 %v282_v33, %v285_v38  ;;  %v312_v51 = vsub.f32 %v283_v34, %v286_v39  ;;  %v250_v52 = vmul.f32 %v247_v36, %v238_v17  ;;  %v3364_v17 = vld [vmem:[%s3272_s26 + $0x18] sm:$0xff]  ;;  %v352_v30 = vld [vmem:[%s3279_s29 + $0x10] sm:$0xff]  ;;  %s3023_s25 = scalar_lea.vmem %s3022_s23, 1024  ;;  %p3024_p9 = scmp.lt.s32.totalorder %s5663_s14, %s3022_s23 }
  0x5a   : > { %v2611_v53 = vadd.f32 -0.5, %v241_v29  ;;  %vm291_vm6 = vcmp.gt.f32.partialorder %v281_v32, 0.5  ;;  %v313_v54 = vsub.f32 %v284_v37, %v287_v42  ;;  %vm3335_vm7 = vcmp.lt.f32.partialorder %v242_v40, 1.0  ;;  %v355_v33 = vld [vmem:[%s3272_s26 + $0x310] sm:$0xff]  ;;  %p3020_p7 = pneg %p3019_p13  ;;  %p3025_p0 = scmp.lt.s32.totalorder %s3023_s25, %s3017_s13 }
  0x5b   : > { %v251_v56 = vmul.f32 %v248_v41, %v239_v21  ;;  %v2612_v57 = vadd.f32 -0.5, %v242_v40  ;;  %v369_v58 = vsub.f32 0.0, %v368_v43  ;;  %v264_v60 = vsel %vm259_vm4, %v3324_v45, 0.0  ;;  %v358_v34 = vld [vmem:[%s3279_s29 + $0x310] sm:$0xff] }
  0x5c   : > { %v3344_v61 = vmul.f32 %v3324_v45, %v255_v49  ;;  %vm288_vm8 = vcmp.ge.f32.partialorder %v281_v32, 0.0  ;;  %v2614_v62 = vsel %vm291_vm6, 1.0, %v3092_v23  ;;  %v314_v63 = vand.u32 2147483647, %v311_v50  ;;  %p3026_p2 = por %p3025_p0, %p3024_p9 }
  0x5d   : > { %v315_v0 = vand.u32 2147483647, %v312_v51  ;;  %v320_v1 = vmul.f32 0.5, %v311_v50  ;;  %v256_v2 = vsel %vm3329_vm5, %v250_v52, %v2611_v53  ;;  %v316_v4 = vand.u32 2147483647, %v313_v54 }
  0x5e   : > { %v321_v5 = vmul.f32 0.5, %v312_v51  ;;  %v322_v6 = vmul.f32 0.5, %v313_v54  ;;  %v257_v7 = vsel %vm3335_vm7, %v251_v56, %v2612_v57  ;;  %v3353_v8 = vsel %vm258_vm3, %v268_v46, %v264_v60  ;;  %p3027_p4 = pnand %p3026_p2, %p3020_p7 }
  0x5f   : > { %v2613_v9 = vsel %vm288_vm8, 1.0, %v3092_v23  ;;  %v370_v10 = vmul.f32 1.442695, %v369_v58  ;;  %v294_v11 = vmax.f32 %v3287_v3, 0.0  ;;  %v295_v12 = vmul.f32 %v281_v32, %v3287_v3  ;;  %v354_v3 = vld [vmem:[%s3272_s26 + $0x210] sm:$0xff] }
  0x60   : > { %v3359_v13 = vrot.slane %v2614_v62, %v3300_v22  ;;  %vm3366_vm9 = vcmp.lt.f32.partialorder %v314_v63, 1.0  ;;  %vm3370_vm10 = vcmp.lt.f32.partialorder %v315_v0, 1.0  ;;  %v323_v20 = vmul.f32 %v320_v1, %v311_v50 }
  0x61   : > { %v2615_v21 = vadd.f32 -0.5, %v314_v63  ;;  %v324_v25 = vmul.f32 %v321_v5, %v312_v51  ;;  %v325_v26 = vmul.f32 %v322_v6, %v313_v54  ;;  %v2616_v27 = vadd.f32 -0.5, %v315_v0 }
  0x62   : > { %v3327_v47 = vpop.eup %2833  ;;  %v2617_v29 = vadd.f32 -0.5, %v316_v4  ;;  %vm3379_vm11 = vcmp.lt.f32.partialorder %v316_v4, 1.0  ;;  %v382_v35 = vsub.f32 %v353_v15, %v356_v16  ;;  %v439_v36 = vand.u32 2147483647, %v3364_v17 }
  0x63   : > { %v227_v59 = vadd.f32 1.0, %v3327_v47  ;;  %v275_v37 = vmul.f32 %v3324_v45, %v256_v2  ;;  %v276_v38 = vmul.f32 %v3324_v45, %v257_v7  ;;  %v340_v39 = vrot.slane %v2613_v9, %v3300_v22 }
  0x64   : > { %v3377_v31 = vpop.eup %2835  ;;  %v383_v40 = vsub.f32 %v354_v3, %v357_v24  ;;  %v329_v41 = vsel %vm3366_vm9, %v323_v20, %v2615_v21  ;;  %v336_v42 = vsel %vm259_vm4, %v3359_v13, 0.0  ;;  %vm359_vm12 = vcmp.ge.f32.partialorder %v352_v30, 0.0  ;;  %v423_v24 = vld [vmem:[%s3279_s29 + $0x18] sm:$0xff] }
  0x65   : > { %2837 = vlog2.f32 %v227_v59  ;;  %vm362_vm13 = vcmp.gt.f32.partialorder %v352_v30, 0.5  ;;  %v301_v43 = vadd.f32 1.0, %v3377_v31  ;;  %v330_v46 = vsel %vm3370_vm10, %v324_v25, %v2616_v27  ;;  %v424_v27 = vld [vmem:[%s3272_s26 + $0x118] sm:$0xff] }
  0x66   : > { %2839 = vpow2.f32 %v370_v10  ;;  %v331_v48 = vsel %vm3379_vm11, %v325_v26, %v2617_v29  ;;  %v384_v49 = vsub.f32 %v355_v33, %v358_v34  ;;  %v3399_v50 = vsub.f32 %v294_v11, %v295_v12  ;;  %v425_v29 = vld [vmem:[%s3272_s26 + $0x218] sm:$0xff] }
  0x67   : > { %v385_v51 = vand.u32 2147483647, %v382_v35  ;;  %v391_v52 = vmul.f32 0.5, %v382_v35  ;;  %v440_v53 = vsub.f32 0.0, %v439_v36  ;;  %v230_v54 = vmul.f32 -0.5, %v3327_v47 }
  0x68   : > { %v3404_v55 = vsel %vm258_vm3, %v340_v39, %v336_v42  ;;  %v386_v56 = vand.u32 2147483647, %v383_v40  ;;  %v392_v57 = vmul.f32 0.5, %v383_v40  ;;  %v345_v58 = vmul.f32 %v3359_v13, %v329_v41  ;;  %v429_v39 = vld [vmem:[%s3279_s29 + $0x318] sm:$0xff] }
  0x69   : > { %v346_v59 = vmul.f32 %v3359_v13, %v330_v46  ;;  %v347_v60 = vmul.f32 %v3359_v13, %v331_v48  ;;  %v2619_v62 = vsel %vm362_vm13, 1.0, %v3092_v23  ;;  %2841 = vlog2.f32 %v301_v43  ;;  %v3456_v43 = vld [vmem:[%s3272_s26 + $0x20] sm:$0xff] }
  0x6a   : > { %v365_v63 = vmax.f32 %v3305_v28, 0.0  ;;  %v366_v0 = vmul.f32 %v352_v30, %v3305_v28  ;;  %v387_v1 = vand.u32 2147483647, %v384_v49  ;;  %v393_v2 = vmul.f32 0.5, %v384_v49  ;;  %v427_v30 = vld [vmem:[%s3279_s29 + $0x118] sm:$0xff] }
  0x6b   : > { %v394_v4 = vmul.f32 %v391_v52, %v382_v35  ;;  %v2620_v5 = vadd.f32 -0.5, %v385_v51  ;;  %v441_v6 = vmul.f32 1.442695, %v440_v53  ;;  %v231_v7 = vadd.f32 1.0, %v230_v54  ;;  %v495_v35 = vld [vmem:[%s3272_s26 + $0x120] sm:$0xff] }
  0x6c   : > { %vm3413_vm14 = vcmp.lt.f32.partialorder %v385_v51, 1.0  ;;  %v395_v10 = vmul.f32 %v392_v57, %v383_v40  ;;  %v2621_v11 = vadd.f32 -0.5, %v386_v56  ;;  %v233_v15 = vand.u32 2147483647, %v3327_v47 }
  0x6d   : > { %v348_v28 = vadd.f32 %v345_v58, %v3344_v61  ;;  %v2618_v16 = vsel %vm359_vm12, 1.0, %v3092_v23  ;;  %vm3421_vm15 = vcmp.lt.f32.partialorder %v386_v56, 1.0  ;;  %v349_v19 = vadd.f32 %v346_v59, %v275_v37  ;;  %v426_v37 = vld [vmem:[%s3272_s26 + $0x318] sm:$0xff] }
  0x6e   : > { %v350_v20 = vadd.f32 %v347_v60, %v276_v38  ;;  %v3425_v21 = vsub.f32 %v365_v63, %v366_v0  ;;  %v3428_v3 = vrot.slane %v2619_v62, %v3300_v22  ;;  %v396_v25 = vmul.f32 %v393_v2, %v384_v49  ;;  %v428_v38 = vld [vmem:[%s3279_s29 + $0x218] sm:$0xff] }
  0x6f   : > { %v2622_v61 = vadd.f32 -0.5, %v387_v1  ;;  %v400_v26 = vsel %vm3413_vm14, %v394_v4, %v2620_v5  ;;  %2843 = vpow2.f32 %v441_v6  ;;  %v232_v34 = vmul.f32 %v3327_v47, %v231_v7 }
  0x70   : > { %vm3439_vm0 = vcmp.lt.f32.partialorder %v387_v1, 1.0  ;;  %v401_v36 = vsel %vm3421_vm15, %v395_v10, %v2621_v11  ;;  %vm3448_vm1 = vcmp.lt.f32.partialorder %v233_v15, 0.0004427343  ;;  %v304_v41 = vmul.f32 -0.5, %v3377_v31 }
  0x71   : > { %v307_v42 = vand.u32 2147483647, %v3377_v31  ;;  %v411_v47 = vrot.slane %v2618_v16, %v3300_v22  ;;  %v407_v46 = vsel %vm259_vm4, %v3428_v3, 0.0  ;;  %v416_v48 = vmul.f32 %v3428_v3, %v400_v26 }
  0x72   : > { %v2838_v12 = vpop.eup %2837  ;;  %v437_v49 = vmul.f32 %v423_v24, %v3364_v17  ;;  %v453_v51 = vsub.f32 %v424_v27, %v427_v30  ;;  %v402_v53 = vsel %vm3439_vm0, %v396_v25, %v2622_v61  ;;  %v417_v54 = vmul.f32 %v3428_v3, %v401_v36  ;;  %v498_v36 = vld [vmem:[%s3279_s29 + $0x120] sm:$0xff] }
  0x73   : > { %v3436_v32 = vpop.eup %2839  ;;  %v229_v33 = vmul.f32 0.6931472, %v2838_v12  ;;  %v454_v56 = vsub.f32 %v425_v29, %v428_v38  ;;  %vm430_vm2 = vcmp.ge.f32.partialorder %v423_v24, 0.0  ;;  %v455_v58 = vsub.f32 %v426_v37, %v429_v39 }
  0x74   : > { %v372_v52 = vadd.f32 1.0, %v3436_v32  ;;  %v510_v59 = vand.u32 2147483647, %v3456_v43  ;;  %vm270_vm5 = vcmp.eq.s32.totalorder %v3295_v14, 5  ;;  %v305_v60 = vadd.f32 1.0, %v304_v41 }
  0x75   : > { %v235_v57 = vsel %vm3448_vm1, %v232_v34, %v229_v33  ;;  %vm3471_vm6 = vcmp.lt.f32.partialorder %v307_v42, 0.0004427343  ;;  %v3477_v63 = vsel %vm258_vm3, %v411_v47, %v407_v46  ;;  %vm433_vm7 = vcmp.gt.f32.partialorder %v423_v24, 0.5  ;;  %v494_v24 = vld [vmem:[%s3279_s29 + $0x20] sm:$0xff] }
  0x76   : > { %v418_v0 = vmul.f32 %v3428_v3, %v402_v53  ;;  %v3480_v1 = vadd.f32 %v416_v48, %v348_v28  ;;  %v456_v2 = vand.u32 2147483647, %v453_v51  ;;  %v462_v4 = vmul.f32 0.5, %v453_v51  ;;  %v2842_v5 = vpop.eup %2841  ;;  %v496_v48 = vld [vmem:[%s3272_s26 + $0x220] sm:$0xff] }
  0x77   : > { %v236_v6 = vadd.f32 %v235_v57, %v3320_v44  ;;  %2845 = vlog2.f32 %v372_v52  ;;  %v3483_v7 = vadd.f32 %v417_v54, %v349_v19  ;;  %v463_v9 = vmul.f32 0.5, %v454_v56  ;;  %v497_v53 = vld [vmem:[%s3272_s26 + $0x320] sm:$0xff] }
  0x78   : > { %v457_v10 = vand.u32 2147483647, %v454_v56  ;;  %v458_v11 = vand.u32 2147483647, %v455_v58  ;;  %v464_v12 = vmul.f32 0.5, %v455_v58  ;;  %v511_v15 = vsub.f32 0.0, %v510_v59 }
  0x79   : > { %v306_v16 = vmul.f32 %v3377_v31, %v305_v60  ;;  %v2623_v28 = vsel %vm430_vm2, 1.0, %v3092_v23  ;;  %v2624_v18 = vsel %vm433_vm7, 1.0, %v3092_v23  ;;  %v436_v44 = vmax.f32 %v3364_v17, 0.0  ;;  %v500_v54 = vld [vmem:[%s3279_s29 + $0x320] sm:$0xff] }
  0x7a   : > { %v303_v19 = vmul.f32 0.6931472, %v2842_v5  ;;  %v3491_v25 = vadd.f32 %v418_v0, %v350_v20  ;;  %v465_v61 = vmul.f32 %v462_v4, %v453_v51  ;;  %v2625_v26 = vadd.f32 -0.5, %v456_v2 }
  0x7b   : > { %v271_v27 = vmul.f32 %v3353_v8, %v236_v6  ;;  %v375_v29 = vmul.f32 -0.5, %v3436_v32  ;;  %vm3495_vm8 = vcmp.lt.f32.partialorder %v456_v2, 1.0  ;;  %v466_v30 = vmul.f32 %v463_v9, %v454_v56 }
  0x7c   : > { %v3500_v33 = vpop.eup %2843  ;;  %v467_v17 = vmul.f32 %v464_v12, %v455_v58  ;;  %v2626_v34 = vadd.f32 -0.5, %v457_v10  ;;  %v2627_v20 = vadd.f32 -0.5, %v458_v11  ;;  %v512_v8 = vmul.f32 1.442695, %v511_v15  ;;  %v3530_v58 = vld [vmem:[%s3272_s26 + $0x28] sm:$0xff] }
  0x7d   : > { %v3504_v37 = vsub.f32 %v436_v44, %v437_v49  ;;  %vm3506_vm9 = vcmp.lt.f32.partialorder %v457_v10, 1.0  ;;  %vm3510_vm10 = vcmp.lt.f32.partialorder %v458_v11, 1.0  ;;  %v3515_v40 = vrot.slane %v2624_v18, %v3300_v22  ;;  %v499_v49 = vld [vmem:[%s3279_s29 + $0x220] sm:$0xff] }
  0x7e   : > { %v309_v41 = vsel %vm3471_vm6, %v306_v16, %v303_v19  ;;  %v378_v42 = vand.u32 2147483647, %v3436_v32  ;;  %v471_v47 = vsel %vm3495_vm8, %v465_v61, %v2625_v26  ;;  %v482_v46 = vrot.slane %v2623_v28, %v3300_v22 }
  0x7f   : > { %v376_v51 = vadd.f32 1.0, %v375_v29  ;;  %v443_v52 = vadd.f32 1.0, %v3500_v33  ;;  %v508_v56 = vmul.f32 %v494_v24, %v3456_v43  ;;  %v524_v57 = vsub.f32 %v495_v35, %v498_v36 }
  0x80   : > { %v272_v59 = vsel %vm270_vm5, %v3324_v45, %v271_v27  ;;  %v472_v60 = vsel %vm3506_vm9, %v466_v30, %v2626_v34  ;;  %v473_v62 = vsel %vm3510_vm10, %v467_v17, %v2627_v20  ;;  %2847 = vpow2.f32 %v512_v8 }
  0x81   : > { %v310_v0 = vadd.f32 %v309_v41, %v3399_v50  ;;  %v478_v2 = vsel %vm259_vm4, %v3515_v40, 0.0  ;;  %v487_v4 = vmul.f32 %v3515_v40, %v471_v47  ;;  %v525_v5 = vsub.f32 %v496_v48, %v499_v49  ;;  %v566_v41 = vld [vmem:[%s3272_s26 + $0x128] sm:$0xff] }
  0x82   : > { %vm3544_vm11 = vcmp.lt.f32.partialorder %v378_v42, 0.0004427343  ;;  %vm504_vm12 = vcmp.gt.f32.partialorder %v494_v24, 0.5  ;;  %v526_v45 = vsub.f32 %v497_v53, %v500_v54  ;;  %v581_v9 = vand.u32 2147483647, %v3530_v58  ;;  %v569_v42 = vld [vmem:[%s3279_s29 + $0x128] sm:$0xff] }
  0x83   : > { %v377_v10 = vmul.f32 %v3436_v32, %v376_v51  ;;  %2849 = vlog2.f32 %v443_v52  ;;  %v527_v11 = vand.u32 2147483647, %v524_v57  ;;  %v533_v50 = vmul.f32 0.5, %v524_v57 }
  0x84   : > { %v2846_v12 = vpop.eup %2845  ;;  %v3552_v15 = vsel %vm258_vm3, %v482_v46, %v478_v2  ;;  %v488_v16 = vmul.f32 %v3515_v40, %v472_v60  ;;  %v489_v28 = vmul.f32 %v3515_v40, %v473_v62  ;;  %vm501_vm13 = vcmp.ge.f32.partialorder %v494_v24, 0.0  ;;  %v567_v60 = vld [vmem:[%s3272_s26 + $0x228] sm:$0xff] }
  0x85   : > { %v342_v18 = vmul.f32 %v3404_v55, %v310_v0  ;;  %v3558_v44 = vadd.f32 %v487_v4, %v3480_v1  ;;  %v2629_v32 = vsel %vm504_vm12, 1.0, %v3092_v23  ;;  %v528_v19 = vand.u32 2147483647, %v525_v5  ;;  %v570_v62 = vld [vmem:[%s3279_s29 + $0x228] sm:$0xff] }
  0x86   : > { %v529_v61 = vand.u32 2147483647, %v526_v45  ;;  %v534_v26 = vmul.f32 0.5, %v525_v5  ;;  %v535_v27 = vmul.f32 0.5, %v526_v45  ;;  %v582_v29 = vsub.f32 0.0, %v581_v9 }
  0x87   : > { %v374_v31 = vmul.f32 0.6931472, %v2846_v12  ;;  %v446_v30 = vmul.f32 -0.5, %v3500_v33  ;;  %v536_v17 = vmul.f32 %v533_v50, %v524_v57  ;;  %v2630_v34 = vadd.f32 -0.5, %v527_v11  ;;  %v565_v57 = vld [vmem:[%s3279_s29 + $0x28] sm:$0xff] }
  0x88   : > { %v3563_v24 = vadd.f32 %v488_v16, %v3483_v7  ;;  %v2628_v55 = vsel %vm501_vm13, 1.0, %v3092_v23  ;;  %v507_v1 = vmax.f32 %v3456_v43, 0.0  ;;  %vm3567_vm14 = vcmp.lt.f32.partialorder %v527_v11, 1.0 }
  0x89   : > { %v343_v35 = vsel %vm270_vm5, %v3359_v13, %v342_v18  ;;  %v449_v36 = vand.u32 2147483647, %v3500_v33  ;;  %vm3575_vm15 = vcmp.lt.f32.partialorder %v528_v19, 1.0  ;;  %v3580_v7 = vrot.slane %v2629_v32, %v3300_v22 }
  0x8a   : > { %v537_v43 = vmul.f32 %v534_v26, %v525_v5  ;;  %v538_v38 = vmul.f32 %v535_v27, %v526_v45  ;;  %v2631_v39 = vadd.f32 -0.5, %v528_v19  ;;  %v583_v47 = vmul.f32 1.442695, %v582_v29  ;;  %v571_v5 = vld [vmem:[%s3279_s29 + $0x328] sm:$0xff]  ;;  %v3615_v45 = vld [vmem:[%s3272_s26 + $0x30] sm:$0xff] }
  0x8b   : > { %v380_v13 = vsel %vm3544_vm11, %v377_v10, %v374_v31  ;;  %v447_v46 = vadd.f32 1.0, %v446_v30  ;;  %v2632_v48 = vadd.f32 -0.5, %v529_v61  ;;  %v542_v49 = vsel %vm3567_vm14, %v536_v17, %v2630_v34 }
  0x8c   : > { %v3589_v51 = vadd.f32 %v489_v28, %v3491_v25  ;;  %v3591_v52 = vsub.f32 %v507_v1, %v508_v56  ;;  %vm3593_vm0 = vcmp.lt.f32.partialorder %v529_v61, 1.0  ;;  %v553_v54 = vrot.slane %v2628_v55, %v3300_v22  ;;  %v568_v56 = vld [vmem:[%s3272_s26 + $0x328] sm:$0xff] }
  0x8d   : > { %v3601_v0 = vpop.eup %2847  ;;  %v3603_v2 = vadd.f32 %v343_v35, %v272_v59  ;;  %vm3605_vm1 = vcmp.lt.f32.partialorder %v449_v36, 0.0004427343  ;;  %v549_v25 = vsel %vm259_vm4, %v3580_v7, 0.0  ;;  %v595_v6 = vsub.f32 %v566_v41, %v569_v42 }
  0x8e   : > { %v381_v9 = vadd.f32 %v380_v13, %v3425_v21  ;;  %v543_v10 = vsel %vm3575_vm15, %v537_v43, %v2631_v39  ;;  %v558_v59 = vmul.f32 %v3580_v7, %v542_v49  ;;  %2851 = vpow2.f32 %v583_v47  ;;  %v640_v13 = vld [vmem:[%s3279_s29 + $0x130] sm:$0xff] }
  0x8f   : > { %v448_v11 = vmul.f32 %v3500_v33, %v447_v46  ;;  %v544_v50 = vsel %vm3593_vm0, %v538_v38, %v2632_v48  ;;  %vm572_vm2 = vcmp.ge.f32.partialorder %v565_v57, 0.0  ;;  %v596_v12 = vsub.f32 %v567_v60, %v570_v62  ;;  %v3664_v46 = vld [vmem:[%s3272_s26 + $0x38] sm:$0xff] }
  0x90   : > { %v2850_v16 = vpop.eup %2849  ;;  %v514_v28 = vadd.f32 1.0, %v3601_v0  ;;  %vm575_vm6 = vcmp.gt.f32.partialorder %v565_v57, 0.5  ;;  %v597_v18 = vsub.f32 %v568_v56, %v571_v5  ;;  %v652_v21 = vand.u32 2147483647, %v3615_v45  ;;  %v639_v5 = vld [vmem:[%s3272_s26 + $0x330] sm:$0xff] }
  0x91   : > { %v3628_v32 = vsel %vm258_vm3, %v553_v54, %v549_v25  ;;  %v559_v19 = vmul.f32 %v3580_v7, %v543_v10  ;;  %v598_v61 = vand.u32 2147483647, %v595_v6  ;;  %v604_v33 = vmul.f32 0.5, %v595_v6  ;;  %v638_v54 = vld [vmem:[%s3272_s26 + $0x230] sm:$0xff] }
  0x92   : > { %v413_v26 = vmul.f32 %v3477_v63, %v381_v9  ;;  %v560_v27 = vmul.f32 %v3580_v7, %v544_v50  ;;  %v3634_v29 = vadd.f32 %v558_v59, %v3558_v44  ;;  %v2633_v31 = vsel %vm572_vm2, 1.0, %v3092_v23  ;;  %v636_v59 = vld [vmem:[%s3279_s29 + $0x30] sm:$0xff] }
  0x93   : > { %v445_v30 = vmul.f32 0.6931472, %v2850_v16  ;;  %v2634_v17 = vsel %vm575_vm6, 1.0, %v3092_v23  ;;  %v578_v34 = vmax.f32 %v3530_v58, 0.0  ;;  %v599_v55 = vand.u32 2147483647, %v596_v12 }
  0x94   : > { %2853 = vlog2.f32 %v514_v28  ;;  %v600_v1 = vand.u32 2147483647, %v597_v18  ;;  %v605_v20 = vmul.f32 0.5, %v596_v12  ;;  %v653_v63 = vsub.f32 0.0, %v652_v21 }
  0x95   : > { %v579_v35 = vmul.f32 %v565_v57, %v3530_v58  ;;  %v606_v36 = vmul.f32 0.5, %v597_v18  ;;  %v607_v44 = vmul.f32 %v604_v33, %v595_v6  ;;  %v2635_v8 = vadd.f32 -0.5, %v598_v61  ;;  %v641_v57 = vld [vmem:[%s3279_s29 + $0x230] sm:$0xff]  ;;  %v3760_v33 = vld [vmem:[%s3272_s26 + $0x40] sm:$0xff] }
  0x96   : > { %v414_v43 = vsel %vm270_vm5, %v3428_v3, %v413_v26  ;;  %v3644_v38 = vadd.f32 %v559_v19, %v3563_v24  ;;  %vm3646_vm7 = vcmp.lt.f32.partialorder %v598_v61, 1.0  ;;  %v3651_v41 = vrot.slane %v2634_v17, %v3300_v22  ;;  %v637_v24 = vld [vmem:[%s3272_s26 + $0x130] sm:$0xff] }
  0x97   : > { %v451_v58 = vsel %vm3605_vm1, %v448_v11, %v445_v30  ;;  %v517_v42 = vmul.f32 -0.5, %v3601_v0  ;;  %vm3656_vm8 = vcmp.lt.f32.partialorder %v599_v55, 1.0  ;;  %v624_v3 = vrot.slane %v2633_v31, %v3300_v22  ;;  %v642_v6 = vld [vmem:[%s3279_s29 + $0x330] sm:$0xff] }
  0x98   : > { %vm3666_vm9 = vcmp.lt.f32.partialorder %v600_v1, 1.0  ;;  %v608_v49 = vmul.f32 %v605_v20, %v596_v12  ;;  %v2636_v53 = vadd.f32 -0.5, %v599_v55  ;;  %v654_v60 = vmul.f32 1.442695, %v653_v63 }
  0x99   : > { %v520_v62 = vand.u32 2147483647, %v3601_v0  ;;  %v609_v4 = vmul.f32 %v606_v36, %v597_v18  ;;  %v2637_v25 = vadd.f32 -0.5, %v600_v1  ;;  %v613_v56 = vsel %vm3646_vm7, %v607_v44, %v2635_v8 }
  0x9a   : > { %v452_v9 = vadd.f32 %v451_v58, %v3504_v37  ;;  %v620_v10 = vsel %vm259_vm4, %v3651_v41, 0.0  ;;  %v666_v11 = vsub.f32 %v637_v24, %v640_v13  ;;  %v723_v50 = vand.u32 2147483647, %v3664_v46 }
  0x9b   : > { %v3683_v12 = vpop.eup %2851  ;;  %v518_v16 = vadd.f32 1.0, %v517_v42  ;;  %v563_v28 = vadd.f32 %v560_v27, %v3589_v51  ;;  %v3686_v18 = vsub.f32 %v578_v34, %v579_v35  ;;  %v667_v21 = vsub.f32 %v638_v54, %v641_v57 }
  0x9c   : > { %v415_v19 = vadd.f32 %v414_v43, %v3603_v2  ;;  %v614_v37 = vsel %vm3656_vm8, %v608_v49, %v2636_v53  ;;  %2855 = vpow2.f32 %v654_v60  ;;  %v668_v61 = vsub.f32 %v639_v5, %v642_v6  ;;  %v707_v6 = vld [vmem:[%s3279_s29 + $0x38] sm:$0xff] }
  0x9d   : > { %vm3691_vm10 = vcmp.lt.f32.partialorder %v520_v62, 0.0004427343  ;;  %v615_v26 = vsel %vm3666_vm9, %v609_v4, %v2637_v25  ;;  %v3699_v51 = vsel %vm258_vm3, %v624_v3, %v620_v10  ;;  %v629_v27 = vmul.f32 %v3651_v41, %v613_v56  ;;  %v708_v62 = vld [vmem:[%s3272_s26 + $0x138] sm:$0xff] }
  0x9e   : > { %vm646_vm11 = vcmp.gt.f32.partialorder %v636_v59, 0.5  ;;  %v484_v2 = vmul.f32 %v3552_v15, %v452_v9  ;;  %v585_v31 = vadd.f32 1.0, %v3683_v12  ;;  %v669_v30 = vand.u32 2147483647, %v666_v11  ;;  %v711_v4 = vld [vmem:[%s3279_s29 + $0x138] sm:$0xff] }
  0x9f   : > { %v724_v17 = vsub.f32 0.0, %v723_v50  ;;  %v519_v34 = vmul.f32 %v3601_v0, %v518_v16  ;;  %v670_v55 = vand.u32 2147483647, %v667_v21  ;;  %v675_v1 = vmul.f32 0.5, %v666_v11  ;;  %v709_v9 = vld [vmem:[%s3272_s26 + $0x238] sm:$0xff] }
  0xa0   : > { %v676_v20 = vmul.f32 0.5, %v667_v21  ;;  %v630_v63 = vmul.f32 %v3651_v41, %v614_v37  ;;  %v631_v35 = vmul.f32 %v3651_v41, %v615_v26  ;;  %v671_v36 = vand.u32 2147483647, %v668_v61  ;;  %v712_v10 = vld [vmem:[%s3279_s29 + $0x238] sm:$0xff] }
  0xa1   : > { %v677_v44 = vmul.f32 0.5, %v668_v61  ;;  %v2854_v8 = vpop.eup %2853  ;;  %v632_v43 = vadd.f32 %v629_v27, %v3634_v29  ;;  %vm643_vm12 = vcmp.ge.f32.partialorder %v636_v59, 0.0  ;;  %v2639_v15 = vsel %vm646_vm11, 1.0, %v3092_v23  ;;  %v713_v37 = vld [vmem:[%s3279_s29 + $0x338] sm:$0xff] }
  0xa2   : > { %v649_v39 = vmax.f32 %v3615_v45, 0.0  ;;  %v485_v0 = vsel %vm270_vm5, %v3515_v40, %v484_v2  ;;  %2857 = vlog2.f32 %v585_v31  ;;  %vm3714_vm13 = vcmp.lt.f32.partialorder %v669_v30, 1.0 }
  0xa3   : > { %v725_v42 = vmul.f32 1.442695, %v724_v17  ;;  %v678_v47 = vmul.f32 %v675_v1, %v666_v11  ;;  %v679_v29 = vmul.f32 %v676_v20, %v667_v21  ;;  %v2640_v3 = vadd.f32 -0.5, %v669_v30  ;;  %v710_v21 = vld [vmem:[%s3272_s26 + $0x338] sm:$0xff] }
  0xa4   : > { %v2641_v24 = vadd.f32 -0.5, %v670_v55  ;;  %v516_v13 = vmul.f32 0.6931472, %v2854_v8  ;;  %vm3718_vm14 = vcmp.lt.f32.partialorder %v670_v55, 1.0  ;;  %v680_v40 = vmul.f32 %v677_v44, %v668_v61 }
  0xa5   : > { %v2642_v49 = vadd.f32 -0.5, %v671_v36  ;;  %v2638_v53 = vsel %vm643_vm12, 1.0, %v3092_v23  ;;  %v650_v54 = vmul.f32 %v636_v59, %v3615_v45  ;;  %vm3724_vm15 = vcmp.lt.f32.partialorder %v671_v36, 1.0 }
  0xa6   : > { %v3729_v60 = vrot.slane %v2639_v15, %v3300_v22  ;;  %v588_v25 = vmul.f32 -0.5, %v3683_v12  ;;  %v633_v56 = vadd.f32 %v630_v63, %v3644_v38  ;;  %v634_v5 = vadd.f32 %v631_v35, %v563_v28 }
  0xa7   : > { %2859 = vpow2.f32 %v725_v42  ;;  %v3738_v45 = vadd.f32 %v485_v0, %v415_v19  ;;  %v591_v59 = vand.u32 2147483647, %v3683_v12  ;;  %v684_v11 = vsel %vm3714_vm13, %v678_v47, %v2640_v3 }
  0xa8   : > { %v685_v50 = vsel %vm3718_vm14, %v679_v29, %v2641_v24  ;;  %v522_v16 = vsel %vm3691_vm10, %v519_v34, %v516_v13  ;;  %v686_v38 = vsel %vm3724_vm15, %v680_v40, %v2642_v49  ;;  %v695_v28 = vrot.slane %v2638_v53, %v3300_v22 }
  0xa9   : > { %v737_v19 = vsub.f32 %v708_v62, %v711_v4  ;;  %v3752_v61 = vpop.eup %2855  ;;  %v3754_v26 = vsub.f32 %v649_v39, %v650_v54  ;;  %v691_v27 = vsel %vm259_vm4, %v3729_v60, 0.0  ;;  %vm714_vm0 = vcmp.ge.f32.partialorder %v707_v6, 0.0 }
  0xaa   : > { %v738_v2 = vsub.f32 %v709_v9, %v712_v10  ;;  %v589_v31 = vadd.f32 1.0, %v588_v25  ;;  %v700_v30 = vmul.f32 %v3729_v60, %v684_v11  ;;  %v701_v17 = vmul.f32 %v3729_v60, %v685_v50  ;;  %v780_v50 = vld [vmem:[%s3272_s26 + $0x240] sm:$0xff] }
  0xab   : > { %vm717_vm1 = vcmp.gt.f32.partialorder %v707_v6, 0.5  ;;  %v523_v34 = vadd.f32 %v522_v16, %v3591_v52  ;;  %vm3765_vm2 = vcmp.lt.f32.partialorder %v591_v59, 0.0004427343  ;;  %v702_v1 = vmul.f32 %v3729_v60, %v686_v38  ;;  %v782_v16 = vld [vmem:[%s3279_s29 + $0x140] sm:$0xff]  ;;  %v3808_v38 = vld [vmem:[%s3272_s26 + $0x48] sm:$0xff] }
  0xac   : > { %v739_v20 = vsub.f32 %v710_v21, %v713_v37  ;;  %v656_v63 = vadd.f32 1.0, %v3752_v61  ;;  %v3773_v35 = vsel %vm258_vm3, %v695_v28, %v691_v27  ;;  %v746_v36 = vmul.f32 0.5, %v737_v19  ;;  %v850_v37 = vld [vmem:[%s3272_s26 + $0x148] sm:$0xff] }
  0xad   : > { %v794_v44 = vand.u32 2147483647, %v3760_v33  ;;  %v2644_v8 = vsel %vm717_vm1, 1.0, %v3092_v23  ;;  %v740_v15 = vand.u32 2147483647, %v737_v19  ;;  %v747_v39 = vmul.f32 0.5, %v738_v2 }
  0xae   : > { %v741_v52 = vand.u32 2147483647, %v738_v2  ;;  %v590_v0 = vmul.f32 %v3683_v12, %v589_v31  ;;  %v3778_v58 = vadd.f32 %v700_v30, %v632_v43  ;;  %v3780_v42 = vadd.f32 %v701_v17, %v633_v56  ;;  %v779_v56 = vld [vmem:[%s3272_s26 + $0x140] sm:$0xff] }
  0xaf   : > { %v2643_v47 = vsel %vm714_vm0, 1.0, %v3092_v23  ;;  %v2858_v29 = vpop.eup %2857  ;;  %v555_v3 = vmul.f32 %v3628_v32, %v523_v34  ;;  %v3785_v24 = vadd.f32 %v702_v1, %v634_v5  ;;  %v742_v13 = vand.u32 2147483647, %v739_v20  ;;  %v781_v30 = vld [vmem:[%s3272_s26 + $0x340] sm:$0xff] }
  0xb0   : > { %v748_v48 = vmul.f32 0.5, %v739_v20  ;;  %2861 = vlog2.f32 %v656_v63  ;;  %v749_v40 = vmul.f32 %v746_v36, %v737_v19  ;;  %v3788_v49 = vrot.slane %v2644_v8, %v3300_v22  ;;  %v784_v17 = vld [vmem:[%s3279_s29 + $0x340] sm:$0xff] }
  0xb1   : > { %v795_v12 = vsub.f32 0.0, %v794_v44  ;;  %v659_v43 = vmul.f32 -0.5, %v3752_v61  ;;  %v750_v53 = vmul.f32 %v747_v39, %v738_v2  ;;  %v2645_v54 = vadd.f32 -0.5, %v740_v15 }
  0xb2   : > { %v2646_v57 = vadd.f32 -0.5, %v741_v52  ;;  %v587_v32 = vmul.f32 0.6931472, %v2858_v29  ;;  %v720_v62 = vmax.f32 %v3664_v46, 0.0  ;;  %vm3792_vm6 = vcmp.lt.f32.partialorder %v740_v15, 1.0 }
  0xb3   : > { %vm3796_vm7 = vcmp.lt.f32.partialorder %v741_v52, 1.0  ;;  %v721_v9 = vmul.f32 %v707_v6, %v3664_v46  ;;  %v751_v10 = vmul.f32 %v748_v48, %v739_v20  ;;  %v2647_v59 = vadd.f32 -0.5, %v742_v13  ;;  %v783_v46 = vld [vmem:[%s3279_s29 + $0x240] sm:$0xff] }
  0xb4   : > { %v3801_v5 = vpop.eup %2859  ;;  %v766_v11 = vrot.slane %v2643_v47, %v3300_v22  ;;  %v556_v28 = vsel %vm270_vm5, %v3580_v7, %v555_v3  ;;  %v662_v21 = vand.u32 2147483647, %v3752_v61  ;;  %vm3814_vm8 = vcmp.lt.f32.partialorder %v742_v13, 1.0  ;;  %v778_v7 = vld [vmem:[%s3279_s29 + $0x40] sm:$0xff] }
  0xb5   : > { %v796_v6 = vmul.f32 1.442695, %v795_v12  ;;  %v660_v19 = vadd.f32 1.0, %v659_v43  ;;  %v755_v27 = vsel %vm3792_vm6, %v749_v40, %v2645_v54  ;;  %v756_v2 = vsel %vm3796_vm7, %v750_v53, %v2646_v57 }
  0xb6   : > { %v762_v31 = vsel %vm259_vm4, %v3788_v49, 0.0  ;;  %v593_v34 = vsel %vm3765_vm2, %v590_v0, %v587_v32  ;;  %v727_v1 = vadd.f32 1.0, %v3801_v5  ;;  %v808_v20 = vsub.f32 %v779_v56, %v782_v16 }
  0xb7   : > { %v865_v63 = vand.u32 2147483647, %v3808_v38  ;;  %v3834_v36 = vadd.f32 %v556_v28, %v3738_v45  ;;  %v3836_v44 = vsub.f32 %v720_v62, %v721_v9  ;;  %v757_v8 = vsel %vm3814_vm8, %v751_v10, %v2647_v59 }
  0xb8   : > { %v809_v15 = vsub.f32 %v780_v50, %v783_v46  ;;  %v771_v52 = vmul.f32 %v3788_v49, %v755_v27  ;;  %vm788_vm9 = vcmp.gt.f32.partialorder %v778_v7, 0.5  ;;  %2863 = vpow2.f32 %v796_v6  ;;  %v853_v46 = vld [vmem:[%s3279_s29 + $0x148] sm:$0xff] }
  0xb9   : > { %v810_v55 = vsub.f32 %v781_v30, %v784_v17  ;;  %v594_v39 = vadd.f32 %v593_v34, %v3686_v18  ;;  %v3843_v0 = vmul.f32 %v3752_v61, %v660_v19  ;;  %vm3845_vm10 = vcmp.lt.f32.partialorder %v662_v21, 0.0004427343 }
  0xba   : > { %v3851_v45 = vsel %vm258_vm3, %v766_v11, %v762_v31  ;;  %v772_v29 = vmul.f32 %v3788_v49, %v756_v2  ;;  %2865 = vlog2.f32 %v727_v1  ;;  %vm785_vm11 = vcmp.ge.f32.partialorder %v778_v7, 0.0  ;;  %v851_v31 = vld [vmem:[%s3272_s26 + $0x248] sm:$0xff] }
  0xbb   : > { %v811_v3 = vand.u32 2147483647, %v808_v20  ;;  %v866_v13 = vsub.f32 0.0, %v865_v63  ;;  %v2649_v48 = vsel %vm788_vm9, 1.0, %v3092_v23  ;;  %v812_v18 = vand.u32 2147483647, %v809_v15 }
  0xbc   : > { %v817_v40 = vmul.f32 0.5, %v808_v20  ;;  %v818_v61 = vmul.f32 0.5, %v809_v15  ;;  %v773_v12 = vmul.f32 %v3788_v49, %v757_v8  ;;  %v3857_v43 = vadd.f32 %v771_v52, %v3778_v58  ;;  %v852_v1 = vld [vmem:[%s3272_s26 + $0x348] sm:$0xff] }
  0xbd   : > { %v813_v53 = vand.u32 2147483647, %v810_v55  ;;  %v819_v54 = vmul.f32 0.5, %v810_v55  ;;  %v2862_v57 = vpop.eup %2861  ;;  %v626_v32 = vmul.f32 %v3699_v51, %v594_v39  ;;  %v2648_v62 = vsel %vm785_vm11, 1.0, %v3092_v23  ;;  %v849_v39 = vld [vmem:[%s3279_s29 + $0x48] sm:$0xff] }
  0xbe   : > { %v791_v4 = vmax.f32 %v3760_v33, 0.0  ;;  %v792_v25 = vmul.f32 %v778_v7, %v3760_v33  ;;  %v730_v56 = vmul.f32 -0.5, %v3801_v5  ;;  %vm3864_vm12 = vcmp.lt.f32.partialorder %v811_v3, 1.0  ;;  %v854_v7 = vld [vmem:[%s3279_s29 + $0x248] sm:$0xff] }
  0xbf   : > { %v3869_v58 = vrot.slane %v2649_v48, %v3300_v22  ;;  %v867_v10 = vmul.f32 1.442695, %v866_v13  ;;  %v820_v51 = vmul.f32 %v817_v40, %v808_v20  ;;  %v821_v59 = vmul.f32 %v818_v61, %v809_v15  ;;  %v855_v20 = vld [vmem:[%s3279_s29 + $0x348] sm:$0xff]  ;;  %v922_v48 = vld [vmem:[%s3272_s26 + $0x250] sm:$0xff] }
  0xc0   : > { %v2650_v11 = vadd.f32 -0.5, %v811_v3  ;;  %v2651_v50 = vadd.f32 -0.5, %v812_v18  ;;  %v658_v16 = vmul.f32 0.6931472, %v2862_v57  ;;  %vm3871_vm13 = vcmp.lt.f32.partialorder %v812_v18, 1.0 }
  0xc1   : > { %v822_v28 = vmul.f32 %v819_v54, %v810_v55  ;;  %v2652_v21 = vadd.f32 -0.5, %v813_v53  ;;  %v733_v6 = vand.u32 2147483647, %v3801_v5  ;;  %v775_v19 = vadd.f32 %v772_v29, %v3780_v42  ;;  %v3895_v42 = vld [vmem:[%s3272_s26 + $0x50] sm:$0xff] }
  0xc2   : > { %v3880_v27 = vadd.f32 %v773_v12, %v3785_v24  ;;  %vm3882_vm14 = vcmp.lt.f32.partialorder %v813_v53, 1.0  ;;  %v627_v30 = vsel %vm270_vm5, %v3651_v41, %v626_v32  ;;  %v731_v17 = vadd.f32 1.0, %v730_v56 }
  0xc3   : > { %v837_v34 = vrot.slane %v2648_v62, %v3300_v22  ;;  %2867 = vpow2.f32 %v867_v10  ;;  %v826_v24 = vsel %vm3864_vm12, %v820_v51, %v2650_v11  ;;  %v827_v63 = vsel %vm3871_vm13, %v821_v59, %v2651_v50 }
  0xc4   : > { %v833_v8 = vsel %vm259_vm4, %v3869_v58, 0.0  ;;  %v879_v15 = vsub.f32 %v850_v37, %v853_v46  ;;  %v664_v41 = vsel %vm3845_vm10, %v3843_v0, %v658_v16  ;;  %v3907_v52 = vsub.f32 %v791_v4, %v792_v25 }
  0xc5   : > { %v828_v55 = vsel %vm3882_vm14, %v822_v28, %v2652_v21  ;;  %v880_v29 = vsub.f32 %v851_v31, %v854_v7  ;;  %v3912_v3 = vpop.eup %2863  ;;  %v628_v13 = vadd.f32 %v627_v30, %v3834_v36  ;;  %vm3915_vm15 = vcmp.lt.f32.partialorder %v733_v6, 0.0004427343  ;;  %v992_v31 = vld [vmem:[%s3272_s26 + $0x158] sm:$0xff] }
  0xc6   : > { %v881_v18 = vsub.f32 %v852_v1, %v855_v20  ;;  %v936_v40 = vand.u32 2147483647, %v3895_v42  ;;  %v732_v0 = vmul.f32 %v3801_v5, %v731_v17  ;;  %v3923_v47 = vsel %vm258_vm3, %v837_v34, %v833_v8  ;;  %v920_v20 = vld [vmem:[%s3279_s29 + $0x50] sm:$0xff]  ;;  %v995_v7 = vld [vmem:[%s3279_s29 + $0x158] sm:$0xff] }
  0xc7   : > { %v842_v61 = vmul.f32 %v3869_v58, %v826_v24  ;;  %v843_v12 = vmul.f32 %v3869_v58, %v827_v63  ;;  %v2866_v53 = vpop.eup %2865  ;;  %v665_v36 = vadd.f32 %v664_v41, %v3754_v26  ;;  %v844_v54 = vmul.f32 %v3869_v58, %v828_v55  ;;  %v921_v24 = vld [vmem:[%s3272_s26 + $0x150] sm:$0xff]  ;;  %v3975_v55 = vld [vmem:[%s3272_s26 + $0x58] sm:$0xff] }
  0xc8   : > { %vm856_vm0 = vcmp.ge.f32.partialorder %v849_v39, 0.0  ;;  %v882_v57 = vand.u32 2147483647, %v879_v15  ;;  %v798_v32 = vadd.f32 1.0, %v3912_v3  ;;  %vm859_vm1 = vcmp.gt.f32.partialorder %v849_v39, 0.5  ;;  %v924_v63 = vld [vmem:[%s3279_s29 + $0x150] sm:$0xff] }
  0xc9   : > { %v888_v62 = vmul.f32 0.5, %v879_v15  ;;  %v889_v5 = vmul.f32 0.5, %v880_v29  ;;  %v883_v4 = vand.u32 2147483647, %v880_v29  ;;  %v884_v25 = vand.u32 2147483647, %v881_v18 }
  0xca   : > { %v890_v56 = vmul.f32 0.5, %v881_v18  ;;  %v937_v9 = vsub.f32 0.0, %v936_v40  ;;  %v729_v10 = vmul.f32 0.6931472, %v2866_v53  ;;  %v3931_v51 = vadd.f32 %v842_v61, %v3857_v43  ;;  %v923_v61 = vld [vmem:[%s3272_s26 + $0x350] sm:$0xff] }
  0xcb   : > { %v3934_v59 = vsel %vm856_vm0, 1.0, %v3092_v23  ;;  %v862_v26 = vmax.f32 %v3808_v38, 0.0  ;;  %v697_v11 = vmul.f32 %v3773_v35, %v665_v36  ;;  %v2654_v50 = vsel %vm859_vm1, 1.0, %v3092_v23 }
  0xcc   : > { %v863_v16 = vmul.f32 %v849_v39, %v3808_v38  ;;  %vm3940_vm2 = vcmp.lt.f32.partialorder %v882_v57, 1.0  ;;  %2869 = vlog2.f32 %v798_v32  ;;  %v891_v28 = vmul.f32 %v888_v62, %v879_v15 }
  0xcd   : > { %v892_v43 = vmul.f32 %v889_v5, %v880_v29  ;;  %v2655_v21 = vadd.f32 -0.5, %v882_v57  ;;  %v893_v37 = vmul.f32 %v890_v56, %v881_v18  ;;  %v2656_v46 = vadd.f32 -0.5, %v883_v4  ;;  %v925_v18 = vld [vmem:[%s3279_s29 + $0x250] sm:$0xff] }
  0xce   : > { %v2657_v6 = vadd.f32 -0.5, %v884_v25  ;;  %v938_v2 = vmul.f32 1.442695, %v937_v9  ;;  %v735_v35 = vsel %vm3915_vm15, %v732_v0, %v729_v10  ;;  %v846_v38 = vadd.f32 %v843_v12, %v775_v19  ;;  %v926_v12 = vld [vmem:[%s3279_s29 + $0x350] sm:$0xff] }
  0xcf   : > { %vm3946_vm6 = vcmp.lt.f32.partialorder %v883_v4, 1.0  ;;  %vm3950_vm7 = vcmp.lt.f32.partialorder %v884_v25, 1.0  ;;  %v698_v17 = vsel %vm270_vm5, %v3729_v60, %v697_v11  ;;  %v801_v34 = vmul.f32 -0.5, %v3912_v3 }
  0xd0   : > { %v3954_v30 = vpop.eup %2867  ;;  %v847_v19 = vadd.f32 %v844_v54, %v3880_v27  ;;  %v3962_v1 = vrot.slane %v2654_v50, %v3300_v22  ;;  %v804_v8 = vand.u32 2147483647, %v3912_v3  ;;  %v3968_v15 = vsub.f32 %v862_v26, %v863_v16 }
  0xd1   : > { %v897_v60 = vsel %vm3940_vm2, %v891_v28, %v2655_v21  ;;  %v908_v41 = vrot.slane %v3934_v59, %v3300_v22  ;;  %v736_v27 = vadd.f32 %v735_v35, %v3836_v44  ;;  %v898_v39 = vsel %vm3946_vm6, %v892_v43, %v2656_v46 }
  0xd2   : > { %v899_v29 = vsel %vm3950_vm7, %v893_v37, %v2657_v6  ;;  %2871 = vpow2.f32 %v938_v2  ;;  %v699_v40 = vadd.f32 %v698_v17, %v628_v13  ;;  %v869_v0 = vadd.f32 1.0, %v3954_v30 }
  0xd3   : > { %vm930_vm8 = vcmp.gt.f32.partialorder %v920_v20, 0.5  ;;  %v950_v53 = vsub.f32 %v921_v24, %v924_v63  ;;  %v802_v36 = vadd.f32 1.0, %v801_v34  ;;  %v904_v44 = vsel %vm259_vm4, %v3962_v1, 0.0  ;;  %v996_v24 = vld [vmem:[%s3279_s29 + $0x258] sm:$0xff] }
  0xd4   : > { %v913_v54 = vmul.f32 %v3962_v1, %v897_v60  ;;  %v1007_v57 = vand.u32 2147483647, %v3975_v55  ;;  %v914_v32 = vmul.f32 %v3962_v1, %v898_v39  ;;  %v915_v62 = vmul.f32 %v3962_v1, %v899_v29 }
  0xd5   : > { %vm927_vm9 = vcmp.ge.f32.partialorder %v920_v20, 0.0  ;;  %v951_v13 = vsub.f32 %v922_v48, %v925_v18  ;;  %v768_v5 = vmul.f32 %v3851_v45, %v736_v27  ;;  %vm3995_vm10 = vcmp.lt.f32.partialorder %v804_v8, 0.0004427343  ;;  %v991_v27 = vld [vmem:[%s3279_s29 + $0x58] sm:$0xff] }
  0xd6   : > { %v2659_v25 = vsel %vm930_vm8, 1.0, %v3092_v23  ;;  %v933_v56 = vmax.f32 %v3895_v42, 0.0  ;;  %v952_v9 = vsub.f32 %v923_v61, %v926_v12  ;;  %2873 = vlog2.f32 %v869_v0  ;;  %v994_v18 = vld [vmem:[%s3272_s26 + $0x358] sm:$0xff] }
  0xd7   : > { %v934_v10 = vmul.f32 %v920_v20, %v3895_v42  ;;  %v953_v59 = vand.u32 2147483647, %v950_v53  ;;  %v959_v26 = vmul.f32 0.5, %v950_v53  ;;  %v803_v11 = vmul.f32 %v3912_v3, %v802_v36  ;;  %v993_v20 = vld [vmem:[%s3272_s26 + $0x258] sm:$0xff]  ;;  %v1063_v36 = vld [vmem:[%s3272_s26 + $0x160] sm:$0xff] }
  0xd8   : > { %v4005_v50 = vsel %vm258_vm3, %v908_v41, %v904_v44  ;;  %v4008_v45 = vadd.f32 %v913_v54, %v3931_v51  ;;  %v1008_v16 = vsub.f32 0.0, %v1007_v57  ;;  %v4010_v33 = vadd.f32 %v914_v32, %v846_v38  ;;  %v997_v0 = vld [vmem:[%s3279_s29 + $0x358] sm:$0xff]  ;;  %v4053_v57 = vld [vmem:[%s3272_s26 + $0x60] sm:$0xff] }
  0xd9   : > { %v2658_v28 = vsel %vm927_vm9, 1.0, %v3092_v23  ;;  %v954_v42 = vand.u32 2147483647, %v951_v13  ;;  %v960_v43 = vmul.f32 0.5, %v951_v13  ;;  %v2870_v3 = vpop.eup %2869  ;;  %v4014_v21 = vadd.f32 %v915_v62, %v847_v19 }
  0xda   : > { %v955_v37 = vand.u32 2147483647, %v952_v9  ;;  %v961_v46 = vmul.f32 0.5, %v952_v9  ;;  %v4017_v6 = vrot.slane %v2659_v25, %v3300_v22  ;;  %v769_v51 = vsel %vm270_vm5, %v3788_v49, %v768_v5 }
  0xdb   : > { %v4022_v2 = vsub.f32 %v933_v56, %v934_v10  ;;  %v962_v35 = vmul.f32 %v959_v26, %v950_v53  ;;  %v2660_v38 = vadd.f32 -0.5, %v953_v59  ;;  %v872_v17 = vmul.f32 -0.5, %v3954_v30 }
  0xdc   : > { %vm4027_vm11 = vcmp.lt.f32.partialorder %v953_v59, 1.0  ;;  %v979_v19 = vrot.slane %v2658_v28, %v3300_v22  ;;  %v1009_v49 = vmul.f32 1.442695, %v1008_v16  ;;  %v800_v63 = vmul.f32 0.6931472, %v2870_v3 }
  0xdd   : > { %v875_v8 = vand.u32 2147483647, %v3954_v30  ;;  %v963_v60 = vmul.f32 %v960_v43, %v951_v13  ;;  %v2661_v41 = vadd.f32 -0.5, %v954_v42  ;;  %vm4036_vm12 = vcmp.lt.f32.partialorder %v954_v42, 1.0 }
  0xde   : > { %v964_v29 = vmul.f32 %v961_v46, %v952_v9  ;;  %v2662_v48 = vadd.f32 -0.5, %v955_v37  ;;  %v1021_v61 = vsub.f32 %v992_v31, %v995_v7  ;;  %v4044_v53 = vadd.f32 %v769_v51, %v699_v40 }
  0xdf   : > { %v4042_v12 = vpop.eup %2871  ;;  %vm4046_vm13 = vcmp.lt.f32.partialorder %v955_v37, 1.0  ;;  %v968_v44 = vsel %vm4027_vm11, %v962_v35, %v2660_v38  ;;  %v1022_v54 = vsub.f32 %v993_v20, %v996_v24  ;;  %v873_v32 = vadd.f32 1.0, %v872_v17 }
  0xe0   : > { %v975_v62 = vsel %vm259_vm4, %v4017_v6, 0.0  ;;  %vm998_vm14 = vcmp.ge.f32.partialorder %v991_v27, 0.0  ;;  %2875 = vpow2.f32 %v1009_v49  ;;  %v806_v40 = vsel %vm3995_vm10, %v803_v11, %v800_v63 }
  0xe1   : > { %vm4060_vm15 = vcmp.lt.f32.partialorder %v875_v8, 0.0004427343  ;;  %v969_v5 = vsel %vm4036_vm12, %v963_v60, %v2661_v41  ;;  %v1023_v25 = vsub.f32 %v994_v18, %v997_v0  ;;  %v940_v56 = vadd.f32 1.0, %v4042_v12 }
  0xe2   : > { %v970_v9 = vsel %vm4046_vm13, %v964_v29, %v2662_v48  ;;  %v1030_v10 = vmul.f32 0.5, %v1021_v61  ;;  %v1078_v59 = vand.u32 2147483647, %v4053_v57  ;;  %vm1001_vm0 = vcmp.gt.f32.partialorder %v991_v27, 0.5 }
  0xe3   : > { %v1024_v26 = vand.u32 2147483647, %v1021_v61  ;;  %v1025_v4 = vand.u32 2147483647, %v1022_v54  ;;  %v1031_v11 = vmul.f32 0.5, %v1022_v54  ;;  %v2874_v16 = vpop.eup %2873  ;;  %v807_v28 = vadd.f32 %v806_v40, %v3907_v52  ;;  %v1067_v40 = vld [vmem:[%s3279_s29 + $0x260] sm:$0xff] }
  0xe4   : > { %v874_v42 = vmul.f32 %v3954_v30, %v873_v32  ;;  %v4074_v43 = vsel %vm258_vm3, %v979_v19, %v975_v62  ;;  %v984_v3 = vmul.f32 %v4017_v6, %v968_v44  ;;  %v985_v37 = vmul.f32 %v4017_v6, %v969_v5  ;;  %v1066_v62 = vld [vmem:[%s3279_s29 + $0x160] sm:$0xff] }
  0xe5   : > { %v986_v46 = vmul.f32 %v4017_v6, %v970_v9  ;;  %v1026_v51 = vand.u32 2147483647, %v1023_v25  ;;  %v1032_v35 = vmul.f32 0.5, %v1023_v25  ;;  %2877 = vlog2.f32 %v940_v56  ;;  %v1062_v9 = vld [vmem:[%s3279_s29 + $0x60] sm:$0xff] }
  0xe6   : > { %v2664_v38 = vsel %vm1001_vm0, 1.0, %v3092_v23  ;;  %v1033_v31 = vmul.f32 %v1030_v10, %v1021_v61  ;;  %v1079_v7 = vsub.f32 0.0, %v1078_v59  ;;  %v871_v52 = vmul.f32 0.6931472, %v2874_v16  ;;  %v1068_v10 = vld [vmem:[%s3279_s29 + $0x360] sm:$0xff] }
  0xe7   : > { %v1034_v17 = vmul.f32 %v1031_v11, %v1022_v54  ;;  %v2665_v30 = vadd.f32 -0.5, %v1024_v26  ;;  %v2666_v34 = vadd.f32 -0.5, %v1025_v4  ;;  %v839_v19 = vmul.f32 %v3923_v47, %v807_v28 }
  0xe8   : > { %v987_v20 = vadd.f32 %v984_v3, %v4008_v45  ;;  %vm4082_vm1 = vcmp.lt.f32.partialorder %v1024_v26, 1.0  ;;  %vm4086_vm2 = vcmp.lt.f32.partialorder %v1025_v4, 1.0  ;;  %v943_v63 = vmul.f32 -0.5, %v4042_v12  ;;  %v4133_v4 = vld [vmem:[%s3272_s26 + $0x68] sm:$0xff] }
  0xe9   : > { %v1035_v8 = vmul.f32 %v1032_v35, %v1023_v25  ;;  %v2667_v60 = vadd.f32 -0.5, %v1026_v51  ;;  %v4092_v41 = vrot.slane %v2664_v38, %v3300_v22  ;;  %v2663_v47 = vsel %vm998_vm14, 1.0, %v3092_v23 }
  0xea   : > { %v1004_v45 = vmax.f32 %v3975_v55, 0.0  ;;  %vm4097_vm6 = vcmp.lt.f32.partialorder %v1026_v51, 1.0  ;;  %v1080_v29 = vmul.f32 1.442695, %v1079_v7  ;;  %v877_v48 = vsel %vm4060_vm15, %v874_v42, %v871_v52 }
  0xeb   : > { %v1005_v18 = vmul.f32 %v991_v27, %v3975_v55  ;;  %v1039_v0 = vsel %vm4082_vm1, %v1033_v31, %v2665_v30  ;;  %v1040_v61 = vsel %vm4086_vm2, %v1034_v17, %v2666_v34  ;;  %v840_v44 = vsel %vm270_vm5, %v3869_v58, %v839_v19  ;;  %v1064_v27 = vld [vmem:[%s3272_s26 + $0x260] sm:$0xff] }
  0xec   : > { %v946_v54 = vand.u32 2147483647, %v4042_v12  ;;  %v988_v32 = vadd.f32 %v985_v37, %v4010_v33  ;;  %v989_v55 = vadd.f32 %v986_v46, %v4014_v21  ;;  %v944_v5 = vadd.f32 1.0, %v943_v63  ;;  %v1065_v33 = vld [vmem:[%s3272_s26 + $0x360] sm:$0xff] }
  0xed   : > { %v4118_v13 = vpop.eup %2875  ;;  %v1041_v25 = vsel %vm4097_vm6, %v1035_v8, %v2667_v60  ;;  %v1046_v58 = vsel %vm259_vm4, %v4092_v41, 0.0  ;;  %v1050_v56 = vrot.slane %v2663_v47, %v3300_v22  ;;  %v878_v21 = vadd.f32 %v877_v48, %v3968_v15 }
  0xee   : > { %v1055_v59 = vmul.f32 %v4092_v41, %v1039_v0  ;;  %v1056_v26 = vmul.f32 %v4092_v41, %v1040_v61  ;;  %2879 = vpow2.f32 %v1080_v29  ;;  %v841_v11 = vadd.f32 %v840_v44, %v4044_v53  ;;  %v1134_v29 = vld [vmem:[%s3272_s26 + $0x168] sm:$0xff] }
  0xef   : > { %v4136_v16 = vsub.f32 %v1004_v45, %v1005_v18  ;;  %v1092_v28 = vsub.f32 %v1063_v36, %v1066_v62  ;;  %v1093_v42 = vsub.f32 %v1064_v27, %v1067_v40  ;;  %vm4138_vm7 = vcmp.lt.f32.partialorder %v946_v54, 0.0004427343  ;;  %v1135_v36 = vld [vmem:[%s3272_s26 + $0x268] sm:$0xff]  ;;  %v4179_v40 = vld [vmem:[%s3272_s26 + $0x70] sm:$0xff] }
  0xf0   : > { %v1011_v37 = vadd.f32 1.0, %v4118_v13  ;;  %vm1072_vm8 = vcmp.gt.f32.partialorder %v1062_v9, 0.5  ;;  %v1094_v15 = vsub.f32 %v1065_v33, %v1068_v10  ;;  %v945_v46 = vmul.f32 %v4042_v12, %v944_v5  ;;  %v1138_v44 = vld [vmem:[%s3279_s29 + $0x268] sm:$0xff] }
  0xf1   : > { %v4146_v51 = vsel %vm258_vm3, %v1050_v56, %v1046_v58  ;;  %v1057_v53 = vmul.f32 %v4092_v41, %v1041_v25  ;;  %v1149_v35 = vand.u32 2147483647, %v4133_v4  ;;  %v910_v38 = vmul.f32 %v4005_v50, %v878_v21  ;;  %v1136_v27 = vld [vmem:[%s3272_s26 + $0x368] sm:$0xff] }
  0xf2   : > { %v4151_v31 = vadd.f32 %v1055_v59, %v987_v20  ;;  %v4153_v7 = vadd.f32 %v1056_v26, %v988_v32  ;;  %vm1069_vm9 = vcmp.ge.f32.partialorder %v1062_v9, 0.0  ;;  %v2878_v52 = vpop.eup %2877  ;;  %v2669_v17 = vsel %vm1072_vm8, 1.0, %v3092_v23  ;;  %v1139_v62 = vld [vmem:[%s3279_s29 + $0x368] sm:$0xff] }
  0xf3   : > { %v1095_v12 = vand.u32 2147483647, %v1092_v28  ;;  %v1101_v30 = vmul.f32 0.5, %v1092_v28  ;;  %v1102_v34 = vmul.f32 0.5, %v1093_v42  ;;  %2881 = vlog2.f32 %v1011_v37  ;;  %v1133_v10 = vld [vmem:[%s3279_s29 + $0x68] sm:$0xff] }
  0xf4   : > { %v1096_v19 = vand.u32 2147483647, %v1093_v42  ;;  %v1097_v24 = vand.u32 2147483647, %v1094_v15  ;;  %v1103_v49 = vmul.f32 0.5, %v1094_v15  ;;  %v4156_v50 = vadd.f32 %v1057_v53, %v989_v55 }
  0xf5   : > { %v2668_v20 = vsel %vm1069_vm9, 1.0, %v3092_v23  ;;  %v1075_v63 = vmax.f32 %v4053_v57, 0.0  ;;  %v1150_v8 = vsub.f32 0.0, %v1149_v35  ;;  %v911_v60 = vsel %vm270_vm5, %v3962_v1, %v910_v38  ;;  %v1137_v1 = vld [vmem:[%s3279_s29 + $0x168] sm:$0xff] }
  0xf6   : > { %v942_v47 = vmul.f32 0.6931472, %v2878_v52  ;;  %v1076_v45 = vmul.f32 %v1062_v9, %v4053_v57  ;;  %v4165_v39 = vrot.slane %v2669_v17, %v3300_v22  ;;  %vm4168_vm10 = vcmp.lt.f32.partialorder %v1095_v12, 1.0 }
  0xf7   : > { %v1104_v18 = vmul.f32 %v1101_v30, %v1092_v28  ;;  %v1105_v0 = vmul.f32 %v1102_v34, %v1093_v42  ;;  %v2670_v61 = vadd.f32 -0.5, %v1095_v12  ;;  %v1014_v54 = vmul.f32 -0.5, %v4118_v13 }
  0xf8   : > { %v1106_v32 = vmul.f32 %v1103_v49, %v1094_v15  ;;  %v2671_v57 = vadd.f32 -0.5, %v1096_v19  ;;  %v2672_v55 = vadd.f32 -0.5, %v1097_v24  ;;  %v1017_v5 = vand.u32 2147483647, %v4118_v13 }
  0xf9   : > { %vm4182_vm11 = vcmp.lt.f32.partialorder %v1096_v19, 1.0  ;;  %vm4186_vm12 = vcmp.lt.f32.partialorder %v1097_v24, 1.0  ;;  %v1151_v56 = vmul.f32 1.442695, %v1150_v8  ;;  %v948_v9 = vsel %vm4138_vm7, %v945_v46, %v942_v47 }
  0xfa   : > { %v4192_v33 = vsub.f32 %v1075_v63, %v1076_v45  ;;  %v1163_v21 = vsub.f32 %v1134_v29, %v1137_v1  ;;  %v1164_v59 = vsub.f32 %v1135_v36, %v1138_v44  ;;  %v4197_v28 = vadd.f32 %v911_v60, %v841_v11 }
  0xfb   : > { %v4195_v26 = vpop.eup %2879  ;;  %v1121_v42 = vrot.slane %v2668_v20, %v3300_v22  ;;  %v1165_v37 = vsub.f32 %v1136_v27, %v1139_v62  ;;  %v1220_v15 = vand.u32 2147483647, %v4179_v40  ;;  %v1015_v53 = vadd.f32 1.0, %v1014_v54 }
  0xfc   : > { %v1110_v35 = vsel %vm4168_vm10, %v1104_v18, %v2670_v61  ;;  %v1111_v3 = vsel %vm4182_vm11, %v1105_v0, %v2671_v57  ;;  %v1112_v46 = vsel %vm4186_vm12, %v1106_v32, %v2672_v55  ;;  %v949_v38 = vadd.f32 %v948_v9, %v4022_v2 }
  0xfd   : > { %vm4208_vm13 = vcmp.lt.f32.partialorder %v1017_v5, 0.0004427343  ;;  %v1117_v52 = vsel %vm259_vm4, %v4165_v39, 0.0  ;;  %vm1143_vm14 = vcmp.gt.f32.partialorder %v1133_v10, 0.5  ;;  %2883 = vpow2.f32 %v1151_v56 }
  0xfe   : > { %v1082_v17 = vadd.f32 1.0, %v4195_v26  ;;  %v1166_v12 = vand.u32 2147483647, %v1163_v21  ;;  %v1172_v30 = vmul.f32 0.5, %v1163_v21  ;;  %v1173_v34 = vmul.f32 0.5, %v1164_v59 }
  0xff   : > { %v1167_v19 = vand.u32 2147483647, %v1164_v59  ;;  %v1168_v24 = vand.u32 2147483647, %v1165_v37  ;;  %v1174_v49 = vmul.f32 0.5, %v1165_v37  ;;  %v1221_v20 = vsub.f32 0.0, %v1220_v15 }
 0x100   : > { %v1016_v2 = vmul.f32 %v4118_v13, %v1015_v53  ;;  %v4219_v63 = vsel %vm258_vm3, %v1121_v42, %v1117_v52  ;;  %v1126_v8 = vmul.f32 %v4165_v39, %v1110_v35  ;;  %v1127_v60 = vmul.f32 %v4165_v39, %v1111_v3  ;;  %v2882_v47 = vpop.eup %2881  ;;  %v4252_v42 = vld [vmem:[%s3272_s26 + $0x78] sm:$0xff]  ;;  %v1206_v35 = vld [vmem:[%s3272_s26 + $0x270] sm:$0xff] }
 0x101   : > { %v981_v45 = vmul.f32 %v4074_v43, %v949_v38  ;;  %v1128_v29 = vmul.f32 %v4165_v39, %v1112_v46  ;;  %vm1140_vm15 = vcmp.ge.f32.partialorder %v1133_v10, 0.0  ;;  %v2674_v48 = vsel %vm1143_vm14, 1.0, %v3092_v23  ;;  %v1209_v3 = vld [vmem:[%s3279_s29 + $0x270] sm:$0xff] }
 0x102   : > { %2885 = vlog2.f32 %v1082_v17  ;;  %v1175_v18 = vmul.f32 %v1172_v30, %v1163_v21  ;;  %v1176_v13 = vmul.f32 %v1173_v34, %v1164_v59  ;;  %v2675_v0 = vadd.f32 -0.5, %v1166_v12  ;;  %v1205_v21 = vld [vmem:[%s3272_s26 + $0x170] sm:$0xff] }
 0x103   : > { %v1177_v61 = vmul.f32 %v1174_v49, %v1165_v37  ;;  %v2676_v36 = vadd.f32 -0.5, %v1167_v19  ;;  %v2677_v1 = vadd.f32 -0.5, %v1168_v24  ;;  %v1222_v44 = vmul.f32 1.442695, %v1221_v20  ;;  %v1208_v59 = vld [vmem:[%s3279_s29 + $0x170] sm:$0xff] }
 0x104   : > { %v1013_v54 = vmul.f32 0.6931472, %v2882_v47  ;;  %vm4227_vm0 = vcmp.lt.f32.partialorder %v1166_v12, 1.0  ;;  %vm4231_vm1 = vcmp.lt.f32.partialorder %v1167_v19, 1.0  ;;  %vm4235_vm2 = vcmp.lt.f32.partialorder %v1168_v24, 1.0  ;;  %v1204_v52 = vld [vmem:[%s3279_s29 + $0x70] sm:$0xff] }
 0x105   : > { %v2673_v55 = vsel %vm1140_vm15, 1.0, %v3092_v23  ;;  %v1146_v27 = vmax.f32 %v4133_v4, 0.0  ;;  %v1147_v62 = vmul.f32 %v1133_v10, %v4133_v4  ;;  %v4243_v5 = vrot.slane %v2674_v48, %v3300_v22  ;;  %v1207_v17 = vld [vmem:[%s3272_s26 + $0x370] sm:$0xff] }
 0x106   : > { %v1085_v25 = vmul.f32 -0.5, %v4195_v26  ;;  %v1088_v58 = vand.u32 2147483647, %v4195_v26  ;;  %v1129_v56 = vadd.f32 %v1126_v8, %v4151_v31  ;;  %v1130_v9 = vadd.f32 %v1127_v60, %v4153_v7  ;;  %v1210_v12 = vld [vmem:[%s3279_s29 + $0x370] sm:$0xff] }
 0x107   : > { %v1181_v4 = vsel %vm4227_vm0, %v1175_v18, %v2675_v0  ;;  %v1182_v10 = vsel %vm4231_vm1, %v1176_v13, %v2676_v36  ;;  %v1183_v37 = vsel %vm4235_vm2, %v1177_v61, %v2677_v1  ;;  %2887 = vpow2.f32 %v1222_v44 }
 0x108   : > { %v982_v31 = vsel %vm270_vm5, %v4017_v6, %v981_v45  ;;  %v1019_v7 = vsel %vm4208_vm13, %v1016_v2, %v1013_v54  ;;  %v1131_v15 = vadd.f32 %v1128_v29, %v4156_v50  ;;  %v1192_v53 = vrot.slane %v2673_v55, %v3300_v22 }
 0x109   : > { %v4269_v46 = vsub.f32 %v1146_v27, %v1147_v62  ;;  %v1188_v38 = vsel %vm259_vm4, %v4243_v5, 0.0  ;;  %v1234_v30 = vsub.f32 %v1205_v21, %v1208_v59  ;;  %v1291_v6 = vand.u32 2147483647, %v4252_v42 }
 0x10a   : > { %v4278_v11 = vpop.eup %2883  ;;  %v1086_v34 = vadd.f32 1.0, %v1085_v25  ;;  %v1197_v50 = vmul.f32 %v4243_v5, %v1181_v4  ;;  %v1198_v19 = vmul.f32 %v4243_v5, %v1182_v10  ;;  %v1199_v24 = vmul.f32 %v4243_v5, %v1183_v37  ;;  %v1276_v10 = vld [vmem:[%s3272_s26 + $0x178] sm:$0xff] }
 0x10b   : > { %v983_v49 = vadd.f32 %v982_v31, %v4197_v28  ;;  %v1020_v20 = vadd.f32 %v1019_v7, %v4136_v16  ;;  %vm4285_vm6 = vcmp.lt.f32.partialorder %v1088_v58, 0.0004427343  ;;  %v1235_v8 = vsub.f32 %v1206_v35, %v1209_v3  ;;  %v1279_v37 = vld [vmem:[%s3279_s29 + $0x178] sm:$0xff] }
 0x10c   : > { %v4291_v60 = vsel %vm258_vm3, %v1192_v53, %v1188_v38  ;;  %vm1211_vm7 = vcmp.ge.f32.partialorder %v1204_v52, 0.0  ;;  %vm1214_vm8 = vcmp.gt.f32.partialorder %v1204_v52, 0.5  ;;  %v1236_v47 = vsub.f32 %v1207_v17, %v1210_v12  ;;  %v1277_v53 = vld [vmem:[%s3272_s26 + $0x278] sm:$0xff]  ;;  %v4338_v12 = vld [vmem:[%s3272_s26 + $0x80] sm:$0xff] }
 0x10d   : > { %v1153_v45 = vadd.f32 1.0, %v4278_v11  ;;  %v1237_v29 = vand.u32 2147483647, %v1234_v30  ;;  %v1243_v48 = vmul.f32 0.5, %v1234_v30  ;;  %v1292_v18 = vsub.f32 0.0, %v1291_v6  ;;  %v1280_v35 = vld [vmem:[%s3279_s29 + $0x278] sm:$0xff] }
 0x10e   : > { %v1087_v28 = vmul.f32 %v4195_v26, %v1086_v34  ;;  %v4295_v16 = vadd.f32 %v1197_v50, %v1129_v56  ;;  %v4297_v13 = vadd.f32 %v1198_v19, %v1130_v9  ;;  %v4299_v0 = vadd.f32 %v1199_v24, %v1131_v15  ;;  %v1275_v17 = vld [vmem:[%s3279_s29 + $0x78] sm:$0xff] }
 0x10f   : > { %v2886_v61 = vpop.eup %2885  ;;  %v1052_v36 = vmul.f32 %v4146_v51, %v1020_v20  ;;  %v2679_v1 = vsel %vm1214_vm8, 1.0, %v3092_v23  ;;  %v1238_v44 = vand.u32 2147483647, %v1235_v8  ;;  %v1244_v54 = vmul.f32 0.5, %v1235_v8  ;;  %v1278_v50 = vld [vmem:[%s3272_s26 + $0x378] sm:$0xff] }
 0x110   : > { %v2678_v43 = vsel %vm1211_vm7, 1.0, %v3092_v23  ;;  %v1217_v32 = vmax.f32 %v4179_v40, 0.0  ;;  %v1239_v26 = vand.u32 2147483647, %v1236_v47  ;;  %v1245_v57 = vmul.f32 0.5, %v1236_v47  ;;  %v1281_v19 = vld [vmem:[%s3279_s29 + $0x378] sm:$0xff] }
 0x111   : > { %2889 = vlog2.f32 %v1153_v45  ;;  %v1246_v55 = vmul.f32 %v1243_v48, %v1234_v30  ;;  %v2680_v27 = vadd.f32 -0.5, %v1237_v29  ;;  %v1293_v62 = vmul.f32 1.442695, %v1292_v18 }
 0x112   : > { %v1084_v25 = vmul.f32 0.6931472, %v2886_v61  ;;  %v1156_v51 = vmul.f32 -0.5, %v4278_v11  ;;  %vm4307_vm9 = vcmp.lt.f32.partialorder %v1237_v29, 1.0  ;;  %v4312_v56 = vrot.slane %v2679_v1, %v3300_v22 }
 0x113   : > { %v1053_v9 = vsel %vm270_vm5, %v4092_v41, %v1052_v36  ;;  %v1218_v21 = vmul.f32 %v1204_v52, %v4179_v40  ;;  %v1247_v59 = vmul.f32 %v1244_v54, %v1235_v8  ;;  %v2681_v4 = vadd.f32 -0.5, %v1238_v44 }
 0x114   : > { %v4320_v31 = vpop.eup %2887  ;;  %vm4322_vm10 = vcmp.lt.f32.partialorder %v1238_v44, 1.0  ;;  %vm4326_vm11 = vcmp.lt.f32.partialorder %v1239_v26, 1.0  ;;  %v1248_v41 = vmul.f32 %v1245_v57, %v1236_v47  ;;  %v1263_v40 = vrot.slane %v2678_v43, %v3300_v22 }
 0x115   : > { %v1159_v3 = vand.u32 2147483647, %v4278_v11  ;;  %v2682_v38 = vadd.f32 -0.5, %v1239_v26  ;;  %v1252_v52 = vsel %vm4307_vm9, %v1246_v55, %v2680_v27  ;;  %2891 = vpow2.f32 %v1293_v62 }
 0x116   : > { %v1090_v30 = vsel %vm4285_vm6, %v1087_v28, %v1084_v25  ;;  %v1157_v6 = vadd.f32 1.0, %v1156_v51  ;;  %v1259_v34 = vsel %vm259_vm4, %v4312_v56, 0.0  ;;  %v1305_v24 = vsub.f32 %v1276_v10, %v1279_v37 }
 0x117   : > { %v4347_v20 = vsub.f32 %v1217_v32, %v1218_v21  ;;  %v1224_v8 = vadd.f32 1.0, %v4320_v31  ;;  %v1253_v47 = vsel %vm4322_vm10, %v1247_v59, %v2681_v4  ;;  %v1306_v45 = vsub.f32 %v1277_v53, %v1280_v35 }
 0x118   : > { %v1054_v29 = vadd.f32 %v1053_v9, %v983_v49  ;;  %v1268_v2 = vmul.f32 %v4312_v56, %v1252_v52  ;;  %vm1282_vm12 = vcmp.ge.f32.partialorder %v1275_v17, 0.0  ;;  %v1362_v48 = vand.u32 2147483647, %v4338_v12 }
 0x119   : > { %v1091_v18 = vadd.f32 %v1090_v30, %v4192_v33  ;;  %v1254_v28 = vsel %vm4326_vm11, %v1248_v41, %v2682_v38  ;;  %v4359_v61 = vsel %vm258_vm3, %v1263_v40, %v1259_v34  ;;  %v1307_v36 = vsub.f32 %v1278_v50, %v1281_v19  ;;  %v1350_v38 = vld [vmem:[%s3279_s29 + $0x180] sm:$0xff] }
 0x11a   : > { %v4362_v1 = vmul.f32 %v4278_v11, %v1157_v6  ;;  %vm4364_vm13 = vcmp.lt.f32.partialorder %v1159_v3, 0.0004427343  ;;  %v1269_v44 = vmul.f32 %v4312_v56, %v1253_v47  ;;  %vm1285_vm14 = vcmp.gt.f32.partialorder %v1275_v17, 0.5  ;;  %v1347_v3 = vld [vmem:[%s3272_s26 + $0x180] sm:$0xff] }
 0x11b   : > { %v1314_v54 = vmul.f32 0.5, %v1305_v24  ;;  %2893 = vlog2.f32 %v1224_v8  ;;  %v1308_v33 = vand.u32 2147483647, %v1305_v24  ;;  %v1309_v43 = vand.u32 2147483647, %v1306_v45  ;;  %v1348_v34 = vld [vmem:[%s3272_s26 + $0x280] sm:$0xff] }
 0x11c   : > { %v1315_v32 = vmul.f32 0.5, %v1306_v45  ;;  %v1270_v26 = vmul.f32 %v4312_v56, %v1254_v28  ;;  %v4371_v57 = vadd.f32 %v1268_v2, %v4295_v16  ;;  %v2683_v11 = vsel %vm1282_vm12, 1.0, %v3092_v23  ;;  %v1351_v50 = vld [vmem:[%s3279_s29 + $0x280] sm:$0xff] }
 0x11d   : > { %v1363_v55 = vsub.f32 0.0, %v1362_v48  ;;  %v1123_v27 = vmul.f32 %v4219_v63, %v1091_v18  ;;  %v2684_v62 = vsel %vm1285_vm14, 1.0, %v3092_v23  ;;  %v1310_v25 = vand.u32 2147483647, %v1307_v36  ;;  %v1346_v48 = vld [vmem:[%s3279_s29 + $0x80] sm:$0xff] }
 0x11e   : > { %v1316_v51 = vmul.f32 0.5, %v1307_v36  ;;  %v2890_v58 = vpop.eup %2889  ;;  %v1272_v9 = vadd.f32 %v1269_v44, %v4297_v13  ;;  %v1288_v21 = vmax.f32 %v4252_v42, 0.0  ;;  %v1289_v16 = vmul.f32 %v1275_v17, %v4252_v42  ;;  %v1349_v18 = vld [vmem:[%s3272_s26 + $0x380] sm:$0xff] }
 0x11f   : > { %v1317_v59 = vmul.f32 %v1314_v54, %v1305_v24  ;;  %v1227_v4 = vmul.f32 -0.5, %v4320_v31  ;;  %v1318_v10 = vmul.f32 %v1315_v32, %v1306_v45  ;;  %v2685_v37 = vadd.f32 -0.5, %v1308_v33  ;;  %v4417_v45 = vld [vmem:[%s3272_s26 + $0x88] sm:$0xff]  ;;  %v1352_v28 = vld [vmem:[%s3279_s29 + $0x380] sm:$0xff] }
 0x120   : > { %v2686_v7 = vadd.f32 -0.5, %v1309_v43  ;;  %vm4381_vm15 = vcmp.lt.f32.partialorder %v1308_v33, 1.0  ;;  %vm4385_vm0 = vcmp.lt.f32.partialorder %v1309_v43, 1.0  ;;  %v4390_v15 = vrot.slane %v2684_v62, %v3300_v22  ;;  %v1420_v43 = vld [vmem:[%s3272_s26 + $0x388] sm:$0xff] }
 0x121   : > { %v1364_v42 = vmul.f32 1.442695, %v1363_v55  ;;  %v1124_v41 = vsel %vm270_vm5, %v4165_v39, %v1123_v27  ;;  %v1155_v40 = vmul.f32 0.6931472, %v2890_v58  ;;  %v1319_v53 = vmul.f32 %v1316_v51, %v1307_v36 }
 0x122   : > { %v2687_v35 = vadd.f32 -0.5, %v1310_v25  ;;  %v4397_v52 = vpop.eup %2891  ;;  %v1230_v17 = vand.u32 2147483647, %v4320_v31  ;;  %v4401_v30 = vadd.f32 %v1270_v26, %v4299_v0  ;;  %vm4403_vm1 = vcmp.lt.f32.partialorder %v1310_v25, 1.0 }
 0x123   : > { %v1334_v39 = vrot.slane %v2683_v11, %v3300_v22  ;;  %v1228_v19 = vadd.f32 1.0, %v1227_v4  ;;  %v4410_v24 = vsub.f32 %v1288_v21, %v1289_v16  ;;  %v1323_v8 = vsel %vm4381_vm15, %v1317_v59, %v2685_v37 }
 0x124   : > { %v1324_v47 = vsel %vm4385_vm0, %v1318_v10, %v2686_v7  ;;  %v4419_v0 = vadd.f32 %v1124_v41, %v1054_v29  ;;  %v1330_v2 = vsel %vm259_vm4, %v4390_v15, 0.0  ;;  %2895 = vpow2.f32 %v1364_v42 }
 0x125   : > { %v1376_v36 = vsub.f32 %v1347_v3, %v1350_v38  ;;  %v1161_v44 = vsel %vm4364_vm13, %v4362_v1, %v1155_v40  ;;  %v1295_v54 = vadd.f32 1.0, %v4397_v52  ;;  %v1325_v33 = vsel %vm4403_vm1, %v1319_v53, %v2687_v35 }
 0x126   : > { %v1377_v29 = vsub.f32 %v1348_v34, %v1351_v50  ;;  %vm4433_vm2 = vcmp.lt.f32.partialorder %v1230_v17, 0.0004427343  ;;  %v1339_v32 = vmul.f32 %v4390_v15, %v1323_v8  ;;  %v1340_v26 = vmul.f32 %v4390_v15, %v1324_v47  ;;  %v1418_v50 = vld [vmem:[%s3272_s26 + $0x188] sm:$0xff] }
 0x127   : > { %v1433_v11 = vand.u32 2147483647, %v4417_v45  ;;  %v1229_v55 = vmul.f32 %v4320_v31, %v1228_v19  ;;  %v4443_v1 = vsel %vm258_vm3, %v1334_v39, %v1330_v2  ;;  %vm1353_vm6 = vcmp.ge.f32.partialorder %v1346_v48, 0.0  ;;  %v1421_v19 = vld [vmem:[%s3279_s29 + $0x188] sm:$0xff] }
 0x128   : > { %v1378_v49 = vsub.f32 %v1349_v18, %v1352_v28  ;;  %v2894_v27 = vpop.eup %2893  ;;  %v1162_v62 = vadd.f32 %v1161_v44, %v4269_v46  ;;  %v1341_v25 = vmul.f32 %v4390_v15, %v1325_v33  ;;  %vm1356_vm7 = vcmp.gt.f32.partialorder %v1346_v48, 0.5  ;;  %v1419_v18 = vld [vmem:[%s3272_s26 + $0x288] sm:$0xff] }
 0x129   : > { %v1385_v51 = vmul.f32 0.5, %v1376_v36  ;;  %2897 = vlog2.f32 %v1295_v54  ;;  %v1379_v58 = vand.u32 2147483647, %v1376_v36  ;;  %v1380_v21 = vand.u32 2147483647, %v1377_v29  ;;  %v1422_v28 = vld [vmem:[%s3279_s29 + $0x288] sm:$0xff] }
 0x12a   : > { %v1386_v16 = vmul.f32 0.5, %v1377_v29  ;;  %v4448_v59 = vadd.f32 %v1339_v32, %v4371_v57  ;;  %v4450_v31 = vadd.f32 %v1340_v26, %v1272_v9  ;;  %v2688_v4 = vsel %vm1353_vm6, 1.0, %v3092_v23  ;;  %v1423_v32 = vld [vmem:[%s3279_s29 + $0x388] sm:$0xff] }
 0x12b   : > { %v1434_v10 = vsub.f32 0.0, %v1433_v11  ;;  %v1226_v37 = vmul.f32 0.6931472, %v2894_v27  ;;  %v2689_v7 = vsel %vm1356_vm7, 1.0, %v3092_v23  ;;  %v1381_v46 = vand.u32 2147483647, %v1378_v49 }
 0x12c   : > { %v1387_v63 = vmul.f32 0.5, %v1378_v49  ;;  %v1194_v13 = vmul.f32 %v4291_v60, %v1162_v62  ;;  %v1359_v42 = vmax.f32 %v4338_v12, 0.0  ;;  %v1360_v41 = vmul.f32 %v1346_v48, %v4338_v12 }
 0x12d   : > { %v1388_v57 = vmul.f32 %v1385_v51, %v1376_v36  ;;  %v1298_v9 = vmul.f32 -0.5, %v4397_v52  ;;  %v1389_v40 = vmul.f32 %v1386_v16, %v1377_v29  ;;  %v2690_v53 = vadd.f32 -0.5, %v1379_v58  ;;  %v4489_v36 = vld [vmem:[%s3272_s26 + $0x90] sm:$0xff]  ;;  %v1417_v29 = vld [vmem:[%s3279_s29 + $0x88] sm:$0xff] }
 0x12e   : > { %v2691_v35 = vadd.f32 -0.5, %v1380_v21  ;;  %vm4458_vm8 = vcmp.lt.f32.partialorder %v1379_v58, 1.0  ;;  %vm4462_vm9 = vcmp.lt.f32.partialorder %v1380_v21, 1.0  ;;  %v4467_v38 = vrot.slane %v2689_v7, %v3300_v22 }
 0x12f   : > { %v1435_v12 = vmul.f32 1.442695, %v1434_v10  ;;  %v1232_v17 = vsel %vm4433_vm2, %v1229_v55, %v1226_v37  ;;  %v1301_v6 = vand.u32 2147483647, %v4397_v52  ;;  %v1390_v39 = vmul.f32 %v1387_v63, %v1378_v49 }
 0x130   : > { %v2692_v34 = vadd.f32 -0.5, %v1381_v46  ;;  %v1195_v8 = vsel %vm270_vm5, %v4243_v5, %v1194_v13  ;;  %v4478_v47 = vadd.f32 %v1341_v25, %v4401_v30  ;;  %v4480_v2 = vsub.f32 %v1359_v42, %v1360_v41 }
 0x131   : > { %vm4482_vm10 = vcmp.lt.f32.partialorder %v1381_v46, 1.0  ;;  %v4491_v44 = vpop.eup %2895  ;;  %v1299_v54 = vadd.f32 1.0, %v1298_v9  ;;  %v1394_v33 = vsel %vm4458_vm8, %v1388_v57, %v2690_v53  ;;  %v1395_v5 = vsel %vm4462_vm9, %v1389_v40, %v2691_v35 }
 0x132   : > { %v1405_v30 = vrot.slane %v2688_v4, %v3300_v22  ;;  %v1233_v26 = vadd.f32 %v1232_v17, %v4347_v20  ;;  %v1401_v11 = vsel %vm259_vm4, %v4467_v38, 0.0  ;;  %2899 = vpow2.f32 %v1435_v12 }
 0x133   : > { %v1447_v55 = vsub.f32 %v1418_v50, %v1421_v19  ;;  %v1196_v49 = vadd.f32 %v1195_v8, %v4419_v0  ;;  %vm4506_vm11 = vcmp.lt.f32.partialorder %v1301_v6, 0.0004427343  ;;  %v1396_v62 = vsel %vm4482_vm10, %v1390_v39, %v2692_v34 }
 0x134   : > { %v1448_v25 = vsub.f32 %v1419_v18, %v1422_v28  ;;  %v1366_v51 = vadd.f32 1.0, %v4491_v44  ;;  %vm1427_vm12 = vcmp.gt.f32.partialorder %v1417_v29, 0.5  ;;  %v1449_v20 = vsub.f32 %v1420_v43, %v1423_v32  ;;  %v1488_v32 = vld [vmem:[%s3279_s29 + $0x90] sm:$0xff] }
 0x135   : > { %v1504_v58 = vand.u32 2147483647, %v4489_v36  ;;  %v1300_v21 = vmul.f32 %v4397_v52, %v1299_v54  ;;  %v4517_v16 = vsel %vm258_vm3, %v1405_v30, %v1401_v11  ;;  %v1410_v0 = vmul.f32 %v4467_v38, %v1394_v33  ;;  %v4551_v33 = vld [vmem:[%s3272_s26 + $0x98] sm:$0xff] }
 0x136   : > { %v1411_v4 = vmul.f32 %v4467_v38, %v1395_v5  ;;  %v2898_v10 = vpop.eup %2897  ;;  %v1265_v37 = vmul.f32 %v4359_v61, %v1233_v26  ;;  %v1412_v7 = vmul.f32 %v4467_v38, %v1396_v62  ;;  %vm1424_vm13 = vcmp.ge.f32.partialorder %v1417_v29, 0.0  ;;  %v1489_v26 = vld [vmem:[%s3272_s26 + $0x190] sm:$0xff]  ;;  %v1563_v54 = vld [vmem:[%s3279_s29 + $0x198] sm:$0xff] }
 0x137   : > { %v1450_v46 = vand.u32 2147483647, %v1447_v55  ;;  %v2694_v63 = vsel %vm1427_vm12, 1.0, %v3092_v23  ;;  %v1451_v13 = vand.u32 2147483647, %v1448_v25  ;;  %v1456_v42 = vmul.f32 0.5, %v1447_v55 }
 0x138   : > { %v1457_v52 = vmul.f32 0.5, %v1448_v25  ;;  %2901 = vlog2.f32 %v1366_v51  ;;  %v1452_v41 = vand.u32 2147483647, %v1449_v20  ;;  %v1458_v57 = vmul.f32 0.5, %v1449_v20 }
 0x139   : > { %v1505_v9 = vsub.f32 0.0, %v1504_v58  ;;  %v1297_v40 = vmul.f32 0.6931472, %v2898_v10  ;;  %v2693_v53 = vsel %vm1424_vm13, 1.0, %v3092_v23  ;;  %v1430_v35 = vmax.f32 %v4417_v45, 0.0 }
 0x13a   : > { %v1431_v61 = vmul.f32 %v1417_v29, %v4417_v45  ;;  %v1266_v3 = vsel %vm270_vm5, %v4312_v56, %v1265_v37  ;;  %vm4530_vm14 = vcmp.lt.f32.partialorder %v1450_v46, 1.0  ;;  %v2695_v12 = vadd.f32 -0.5, %v1450_v46 }
 0x13b   : > { %v4535_v17 = vrot.slane %v2694_v63, %v3300_v22  ;;  %v1369_v6 = vmul.f32 -0.5, %v4491_v44  ;;  %v1459_v39 = vmul.f32 %v1456_v42, %v1447_v55  ;;  %v1460_v34 = vmul.f32 %v1457_v52, %v1448_v25  ;;  %v1493_v25 = vld [vmem:[%s3279_s29 + $0x290] sm:$0xff] }
 0x13c   : > { %v2696_v45 = vadd.f32 -0.5, %v1451_v13  ;;  %vm4538_vm15 = vcmp.lt.f32.partialorder %v1451_v13, 1.0  ;;  %v1461_v56 = vmul.f32 %v1458_v57, %v1449_v20  ;;  %v2697_v19 = vadd.f32 -0.5, %v1452_v41 }
 0x13d   : > { %v1506_v8 = vmul.f32 1.442695, %v1505_v9  ;;  %v1303_v48 = vsel %vm4506_vm11, %v1300_v21, %v1297_v40  ;;  %v1372_v18 = vand.u32 2147483647, %v4491_v44  ;;  %v1413_v28 = vadd.f32 %v1410_v0, %v4448_v59  ;;  %v1492_v59 = vld [vmem:[%s3279_s29 + $0x190] sm:$0xff] }
 0x13e   : > { %vm4546_vm0 = vcmp.lt.f32.partialorder %v1452_v41, 1.0  ;;  %v1414_v5 = vadd.f32 %v1411_v4, %v4450_v31  ;;  %v1415_v30 = vadd.f32 %v1412_v7, %v4478_v47  ;;  %v4555_v29 = vsub.f32 %v1430_v35, %v1431_v61  ;;  %v1490_v47 = vld [vmem:[%s3272_s26 + $0x290] sm:$0xff] }
 0x13f   : > { %v1476_v43 = vrot.slane %v2693_v53, %v3300_v22  ;;  %v4561_v11 = vpop.eup %2899  ;;  %v4563_v55 = vadd.f32 %v1266_v3, %v1196_v49  ;;  %v1370_v27 = vadd.f32 1.0, %v1369_v6  ;;  %v1465_v62 = vsel %vm4530_vm14, %v1459_v39, %v2695_v12  ;;  %v1491_v49 = vld [vmem:[%s3272_s26 + $0x390] sm:$0xff] }
 0x140   : > { %v1466_v31 = vsel %vm4538_vm15, %v1460_v34, %v2696_v45  ;;  %v1304_v51 = vadd.f32 %v1303_v48, %v4410_v24  ;;  %v1467_v20 = vsel %vm4546_vm0, %v1461_v56, %v2697_v19  ;;  %v1472_v58 = vsel %vm259_vm4, %v4535_v17, 0.0  ;;  %v1494_v21 = vld [vmem:[%s3279_s29 + $0x390] sm:$0xff]  ;;  %v1560_v19 = vld [vmem:[%s3272_s26 + $0x198] sm:$0xff] }
 0x141   : > { %2903 = vpow2.f32 %v1506_v8  ;;  %vm4579_vm1 = vcmp.lt.f32.partialorder %v1372_v18, 0.0004427343  ;;  %vm1498_vm2 = vcmp.gt.f32.partialorder %v1488_v32, 0.5  ;;  %v1518_v4 = vsub.f32 %v1489_v26, %v1492_v59 }
 0x142   : > { %v1575_v10 = vand.u32 2147483647, %v4551_v33  ;;  %v1437_v24 = vadd.f32 1.0, %v4561_v11  ;;  %v1481_v37 = vmul.f32 %v4535_v17, %v1465_v62  ;;  %v1482_v7 = vmul.f32 %v4535_v17, %v1466_v31 }
 0x143   : > { %v1519_v46 = vsub.f32 %v1490_v47, %v1493_v25  ;;  %v1371_v63 = vmul.f32 %v4491_v44, %v1370_v27  ;;  %v4590_v13 = vsel %vm258_vm3, %v1476_v43, %v1472_v58  ;;  %v1483_v42 = vmul.f32 %v4535_v17, %v1467_v20  ;;  %v1559_v47 = vld [vmem:[%s3279_s29 + $0x98] sm:$0xff] }
 0x144   : > { %v1520_v52 = vsub.f32 %v1491_v49, %v1494_v21  ;;  %v1336_v41 = vmul.f32 %v4443_v1, %v1304_v51  ;;  %vm1495_vm6 = vcmp.ge.f32.partialorder %v1488_v32, 0.0  ;;  %v2699_v57 = vsel %vm1498_vm2, 1.0, %v3092_v23  ;;  %v1562_v25 = vld [vmem:[%s3272_s26 + $0x398] sm:$0xff] }
 0x145   : > { %v1501_v9 = vmax.f32 %v4489_v36, 0.0  ;;  %v2902_v40 = vpop.eup %2901  ;;  %v1502_v53 = vmul.f32 %v1488_v32, %v4489_v36  ;;  %v1521_v35 = vand.u32 2147483647, %v1518_v4  ;;  %v1527_v44 = vmul.f32 0.5, %v1518_v4  ;;  %v1565_v51 = vld [vmem:[%s3279_s29 + $0x398] sm:$0xff] }
 0x146   : > { %v1576_v61 = vsub.f32 0.0, %v1575_v10  ;;  %2905 = vlog2.f32 %v1437_v24  ;;  %v4597_v3 = vadd.f32 %v1481_v37, %v1413_v28  ;;  %v4599_v60 = vadd.f32 %v1482_v7, %v1414_v5  ;;  %v1561_v28 = vld [vmem:[%s3272_s26 + $0x298] sm:$0xff] }
 0x147   : > { %v1522_v1 = vand.u32 2147483647, %v1519_v46  ;;  %v2698_v12 = vsel %vm1495_vm6, 1.0, %v3092_v23  ;;  %v1523_v6 = vand.u32 2147483647, %v1520_v52  ;;  %v1528_v39 = vmul.f32 0.5, %v1519_v46 }
 0x148   : > { %v1529_v34 = vmul.f32 0.5, %v1520_v52  ;;  %v1337_v36 = vsel %vm270_vm5, %v4390_v15, %v1336_v41  ;;  %v1368_v45 = vmul.f32 0.6931472, %v2902_v40  ;;  %v4605_v50 = vadd.f32 %v1483_v42, %v1415_v30  ;;  %v1564_v5 = vld [vmem:[%s3279_s29 + $0x298] sm:$0xff] }
 0x149   : > { %v4608_v56 = vrot.slane %v2699_v57, %v3300_v22  ;;  %v4611_v8 = vsub.f32 %v1501_v9, %v1502_v53  ;;  %v1530_v48 = vmul.f32 %v1527_v44, %v1518_v4  ;;  %v2700_v18 = vadd.f32 -0.5, %v1521_v35  ;;  %v1633_v53 = vld [vmem:[%s3272_s26 + $0x3a0] sm:$0xff] }
 0x14a   : > { %v1577_v43 = vmul.f32 1.442695, %v1576_v61  ;;  %v1440_v15 = vmul.f32 -0.5, %v4561_v11  ;;  %vm4617_vm7 = vcmp.lt.f32.partialorder %v1521_v35, 1.0  ;;  %vm4621_vm8 = vcmp.lt.f32.partialorder %v1522_v1, 1.0 }
 0x14b   : > { %v1547_v26 = vrot.slane %v2698_v12, %v3300_v22  ;;  %v1531_v59 = vmul.f32 %v1528_v39, %v1519_v46  ;;  %v1532_v27 = vmul.f32 %v1529_v34, %v1520_v52  ;;  %v2701_v62 = vadd.f32 -0.5, %v1522_v1 }
 0x14c   : > { %v2702_v31 = vadd.f32 -0.5, %v1523_v6  ;;  %v1374_v20 = vsel %vm4579_vm1, %v1371_v63, %v1368_v45  ;;  %vm4631_vm9 = vcmp.lt.f32.partialorder %v1523_v6, 1.0  ;;  %v1589_v49 = vsub.f32 %v1560_v19, %v1563_v54  ;;  %v4647_v63 = vld [vmem:[%s3272_s26 + $0xa0] sm:$0xff] }
 0x14d   : > { %v1590_v21 = vsub.f32 %v1561_v28, %v1564_v5  ;;  %v4638_v10 = vadd.f32 %v1337_v36, %v4563_v55  ;;  %v1443_v24 = vand.u32 2147483647, %v4561_v11  ;;  %v1536_v37 = vsel %vm4617_vm7, %v1530_v48, %v2700_v18 }
 0x14e   : > { %v4635_v4 = vpop.eup %2903  ;;  %2907 = vpow2.f32 %v1577_v43  ;;  %v1441_v7 = vadd.f32 1.0, %v1440_v15  ;;  %v1543_v0 = vsel %vm259_vm4, %v4608_v56, 0.0  ;;  %vm1566_vm10 = vcmp.ge.f32.partialorder %v1559_v47, 0.0 }
 0x14f   : > { %v1591_v46 = vsub.f32 %v1562_v25, %v1565_v51  ;;  %v1375_v42 = vadd.f32 %v1374_v20, %v4480_v2  ;;  %v1537_v55 = vsel %vm4621_vm8, %v1531_v59, %v2701_v62  ;;  %v1538_v52 = vsel %vm4631_vm9, %v1532_v27, %v2702_v31 }
 0x150   : > { %vm1569_vm11 = vcmp.gt.f32.partialorder %v1559_v47, 0.5  ;;  %v1508_v41 = vadd.f32 1.0, %v4635_v4  ;;  %v1592_v57 = vand.u32 2147483647, %v1589_v49  ;;  %v1593_v9 = vand.u32 2147483647, %v1590_v21 }
 0x151   : > { %v1598_v40 = vmul.f32 0.5, %v1589_v49  ;;  %vm4655_vm12 = vcmp.lt.f32.partialorder %v1443_v24, 0.0004427343  ;;  %v4661_v35 = vsel %vm258_vm3, %v1547_v26, %v1543_v0  ;;  %v1599_v2 = vmul.f32 0.5, %v1590_v21 }
 0x152   : > { %v1646_v44 = vand.u32 2147483647, %v4647_v63  ;;  %v1442_v61 = vmul.f32 %v4561_v11, %v1441_v7  ;;  %v1552_v1 = vmul.f32 %v4608_v56, %v1536_v37  ;;  %v1594_v12 = vand.u32 2147483647, %v1591_v46 }
 0x153   : > { %v1600_v6 = vmul.f32 0.5, %v1591_v46  ;;  %v2906_v39 = vpop.eup %2905  ;;  %v1407_v34 = vmul.f32 %v4517_v16, %v1375_v42  ;;  %v1553_v36 = vmul.f32 %v4608_v56, %v1537_v55  ;;  %v1554_v45 = vmul.f32 %v4608_v56, %v1538_v52  ;;  %v1630_v52 = vld [vmem:[%s3279_s29 + $0xa0] sm:$0xff] }
 0x154   : > { %v2704_v19 = vsel %vm1569_vm11, 1.0, %v3092_v23  ;;  %2909 = vlog2.f32 %v1508_v41  ;;  %vm4671_vm13 = vcmp.lt.f32.partialorder %v1592_v57, 1.0  ;;  %vm4675_vm14 = vcmp.lt.f32.partialorder %v1593_v9, 1.0  ;;  %v1632_v41 = vld [vmem:[%s3272_s26 + $0x2a0] sm:$0xff] }
 0x155   : > { %v1601_v18 = vmul.f32 %v1598_v40, %v1589_v49  ;;  %v1602_v28 = vmul.f32 %v1599_v2, %v1590_v21  ;;  %v2705_v54 = vadd.f32 -0.5, %v1592_v57  ;;  %v2706_v16 = vadd.f32 -0.5, %v1593_v9  ;;  %v1631_v21 = vld [vmem:[%s3272_s26 + $0x1a0] sm:$0xff] }
 0x156   : > { %v1647_v5 = vsub.f32 0.0, %v1646_v44  ;;  %v1439_v43 = vmul.f32 0.6931472, %v2906_v39  ;;  %v1511_v15 = vmul.f32 -0.5, %v4635_v4  ;;  %v1603_v30 = vmul.f32 %v1600_v6, %v1591_v46  ;;  %v1635_v57 = vld [vmem:[%s3279_s29 + $0x2a0] sm:$0xff]  ;;  %v1775_v39 = vld [vmem:[%s3272_s26 + $0x3b0] sm:$0xff] }
 0x157   : > { %v2707_v32 = vadd.f32 -0.5, %v1594_v12  ;;  %v1572_v26 = vmax.f32 %v4551_v33, 0.0  ;;  %v1573_v59 = vmul.f32 %v1559_v47, %v4551_v33  ;;  %vm4682_vm15 = vcmp.lt.f32.partialorder %v1594_v12, 1.0  ;;  %v1636_v2 = vld [vmem:[%s3279_s29 + $0x3a0] sm:$0xff] }
 0x158   : > { %v4687_v62 = vrot.slane %v2704_v19, %v3300_v22  ;;  %v1408_v31 = vsel %vm270_vm5, %v4467_v38, %v1407_v34  ;;  %v1555_v25 = vadd.f32 %v1552_v1, %v4597_v3  ;;  %v1556_v51 = vadd.f32 %v1553_v36, %v4599_v60  ;;  %v1634_v38 = vld [vmem:[%s3279_s29 + $0x1a0] sm:$0xff]  ;;  %v4704_v3 = vld [vmem:[%s3272_s26 + $0xa8] sm:$0xff] }
 0x159   : > { %v2703_v20 = vsel %vm1566_vm10, 1.0, %v3092_v23  ;;  %v1557_v33 = vadd.f32 %v1554_v45, %v4605_v50  ;;  %v1607_v58 = vsel %vm4671_vm13, %v1601_v18, %v2705_v54  ;;  %v1608_v49 = vsel %vm4675_vm14, %v1602_v28, %v2706_v16 }
 0x15a   : > { %v1648_v24 = vmul.f32 1.442695, %v1647_v5  ;;  %v1445_v50 = vsel %vm4655_vm12, %v1442_v61, %v1439_v43  ;;  %v1512_v47 = vadd.f32 1.0, %v1511_v15  ;;  %v1514_v37 = vand.u32 2147483647, %v4635_v4 }
 0x15b   : > { %v4706_v60 = vpop.eup %2907  ;;  %v1609_v7 = vsel %vm4682_vm15, %v1603_v30, %v2707_v32  ;;  %v4714_v0 = vadd.f32 %v1408_v31, %v4638_v10  ;;  %v4716_v46 = vsub.f32 %v1572_v26, %v1573_v59  ;;  %v1614_v42 = vsel %vm259_vm4, %v4687_v62, 0.0 }
 0x15c   : > { %v1618_v55 = vrot.slane %v2703_v20, %v3300_v22  ;;  %v1623_v9 = vmul.f32 %v4687_v62, %v1607_v58  ;;  %v1624_v40 = vmul.f32 %v4687_v62, %v1608_v49  ;;  %v1660_v44 = vsub.f32 %v1631_v21, %v1634_v38  ;;  %v1702_v21 = vld [vmem:[%s3272_s26 + $0x1a8] sm:$0xff]  ;;  %v4770_v38 = vld [vmem:[%s3272_s26 + $0xb0] sm:$0xff] }
 0x15d   : > { %v1717_v10 = vand.u32 2147483647, %v4704_v3  ;;  %v1446_v61 = vadd.f32 %v1445_v50, %v4555_v29  ;;  %v1579_v1 = vadd.f32 1.0, %v4706_v60  ;;  %v1625_v12 = vmul.f32 %v4687_v62, %v1609_v7  ;;  %v1703_v7 = vld [vmem:[%s3272_s26 + $0x2a8] sm:$0xff] }
 0x15e   : > { %2911 = vpow2.f32 %v1648_v24  ;;  %v4734_v6 = vmul.f32 %v4635_v4, %v1512_v47  ;;  %vm4736_vm0 = vcmp.lt.f32.partialorder %v1514_v37, 0.0004427343  ;;  %vm1637_vm1 = vcmp.ge.f32.partialorder %v1630_v52, 0.0  ;;  %v4778_v37 = vld [vmem:[%s3279_s29 + $0xa8] sm:$0xff] }
 0x15f   : > { %v1661_v34 = vsub.f32 %v1632_v41, %v1635_v57  ;;  %v4742_v36 = vsel %vm258_vm3, %v1618_v55, %v1614_v42  ;;  %vm1640_vm2 = vcmp.gt.f32.partialorder %v1630_v52, 0.5  ;;  %v1662_v29 = vsub.f32 %v1633_v53, %v1636_v2  ;;  %v1704_v41 = vld [vmem:[%s3272_s26 + $0x3a8] sm:$0xff] }
 0x160   : > { %v1718_v45 = vsub.f32 0.0, %v1717_v10  ;;  %v4744_v19 = vadd.f32 %v1623_v9, %v1555_v25  ;;  %v4746_v48 = vadd.f32 %v1624_v40, %v1556_v51  ;;  %v1663_v11 = vand.u32 2147483647, %v1660_v44  ;;  %v1706_v57 = vld [vmem:[%s3279_s29 + $0x2a8] sm:$0xff] }
 0x161   : > { %v1669_v4 = vmul.f32 0.5, %v1660_v44  ;;  %v2910_v18 = vpop.eup %2909  ;;  %v1478_v28 = vmul.f32 %v4590_v13, %v1446_v61  ;;  %2913 = vlog2.f32 %v1579_v1  ;;  %v4749_v54 = vadd.f32 %v1625_v12, %v1557_v33  ;;  %v1707_v9 = vld [vmem:[%s3279_s29 + $0x3a8] sm:$0xff] }
 0x162   : > { %v2708_v16 = vsel %vm1637_vm1, 1.0, %v3092_v23  ;;  %v2709_v5 = vsel %vm1640_vm2, 1.0, %v3092_v23  ;;  %v1643_v43 = vmax.f32 %v4647_v63, 0.0  ;;  %v1664_v15 = vand.u32 2147483647, %v1661_v34 }
 0x163   : > { %v1670_v30 = vmul.f32 0.5, %v1661_v34  ;;  %v1582_v32 = vmul.f32 -0.5, %v4706_v60  ;;  %v1665_v26 = vand.u32 2147483647, %v1662_v29  ;;  %v1671_v59 = vmul.f32 0.5, %v1662_v29 }
 0x164   : > { %v1719_v27 = vmul.f32 1.442695, %v1718_v45  ;;  %v1510_v13 = vmul.f32 0.6931472, %v2910_v18  ;;  %v1644_v31 = vmul.f32 %v1630_v52, %v4647_v63  ;;  %v1672_v25 = vmul.f32 %v1669_v4, %v1660_v44  ;;  %v1705_v63 = vld [vmem:[%s3279_s29 + $0x1a8] sm:$0xff] }
 0x165   : > { %v2710_v51 = vadd.f32 -0.5, %v1663_v11  ;;  %v1479_v20 = vsel %vm270_vm5, %v4535_v17, %v1478_v28  ;;  %vm4759_vm6 = vcmp.lt.f32.partialorder %v1663_v11, 1.0  ;;  %v4764_v58 = vrot.slane %v2709_v5, %v3300_v22 }
 0x166   : > { %v1689_v49 = vrot.slane %v2708_v16, %v3300_v22  ;;  %v1585_v24 = vand.u32 2147483647, %v4706_v60  ;;  %vm4773_vm7 = vcmp.lt.f32.partialorder %v1664_v15, 1.0  ;;  %v1673_v50 = vmul.f32 %v1670_v30, %v1661_v34 }
 0x167   : > { %v2711_v47 = vadd.f32 -0.5, %v1664_v15  ;;  %v1583_v42 = vadd.f32 1.0, %v1582_v32  ;;  %v1674_v55 = vmul.f32 %v1671_v59, %v1662_v29  ;;  %v2712_v52 = vadd.f32 -0.5, %v1665_v26 }
 0x168   : > { %2915 = vpow2.f32 %v1719_v27  ;;  %v1516_v40 = vsel %vm4736_vm0, %v4734_v6, %v1510_v13  ;;  %vm4787_vm8 = vcmp.lt.f32.partialorder %v1665_v26, 1.0  ;;  %v1678_v2 = vsel %vm4759_vm6, %v1672_v25, %v2710_v51 }
 0x169   : > { %v1731_v44 = vsub.f32 %v1702_v21, %v1705_v63  ;;  %v4794_v10 = vadd.f32 %v1479_v20, %v4714_v0  ;;  %v4796_v61 = vsub.f32 %v1643_v43, %v1644_v31  ;;  %v1685_v1 = vsel %vm259_vm4, %v4764_v58, 0.0 }
 0x16a   : > { %v1788_v12 = vand.u32 2147483647, %v4770_v38  ;;  %vm4804_vm9 = vcmp.lt.f32.partialorder %v1585_v24, 0.0004427343  ;;  %v1679_v34 = vsel %vm4773_vm7, %v1673_v50, %v2711_v47  ;;  %vm1711_vm10 = vcmp.gt.f32.partialorder %v4778_v37, 0.5 }
 0x16b   : > { %v4802_v6 = vpop.eup %2911  ;;  %v1732_v0 = vsub.f32 %v1703_v7, %v1706_v57  ;;  %v1733_v29 = vsub.f32 %v1704_v41, %v1707_v9  ;;  %v1517_v45 = vadd.f32 %v1516_v40, %v4611_v8  ;;  %v4813_v11 = vmul.f32 %v4706_v60, %v1583_v42  ;;  %v4849_v41 = vld [vmem:[%s3272_s26 + $0xb8] sm:$0xff] }
 0x16c   : > { %v1680_v4 = vsel %vm4787_vm8, %v1674_v55, %v2712_v52  ;;  %v1694_v18 = vmul.f32 %v4764_v58, %v1678_v2  ;;  %v4820_v28 = vsel %vm258_vm3, %v1689_v49, %v1685_v1  ;;  %vm1708_vm11 = vcmp.ge.f32.partialorder %v4778_v37, 0.0  ;;  %v1772_v2 = vld [vmem:[%s3279_s29 + $0xb0] sm:$0xff] }
 0x16d   : > { %v1734_v16 = vand.u32 2147483647, %v1731_v44  ;;  %v1740_v5 = vmul.f32 0.5, %v1731_v44  ;;  %v1650_v43 = vadd.f32 1.0, %v4802_v6  ;;  %v1695_v8 = vmul.f32 %v4764_v58, %v1679_v34  ;;  %v1776_v1 = vld [vmem:[%s3279_s29 + $0x1b0] sm:$0xff] }
 0x16e   : > { %v2714_v60 = vsel %vm1711_vm10, 1.0, %v3092_v23  ;;  %v1789_v15 = vsub.f32 0.0, %v1788_v12  ;;  %v2914_v30 = vpop.eup %2913  ;;  %v1735_v32 = vand.u32 2147483647, %v1732_v0  ;;  %v1736_v26 = vand.u32 2147483647, %v1733_v29 }
 0x16f   : > { %v1741_v59 = vmul.f32 0.5, %v1732_v0  ;;  %v1742_v27 = vmul.f32 0.5, %v1733_v29  ;;  %v1549_v13 = vmul.f32 %v4661_v35, %v1517_v45  ;;  %v1696_v31 = vmul.f32 %v4764_v58, %v1680_v4  ;;  %v1777_v45 = vld [vmem:[%s3279_s29 + $0x2b0] sm:$0xff] }
 0x170   : > { %v1697_v25 = vadd.f32 %v1694_v18, %v4744_v19  ;;  %v2713_v51 = vsel %vm1708_vm11, 1.0, %v3092_v23  ;;  %vm4830_vm12 = vcmp.lt.f32.partialorder %v1734_v16, 1.0  ;;  %v1743_v33 = vmul.f32 %v1740_v5, %v1731_v44  ;;  %v1773_v44 = vld [vmem:[%s3272_s26 + $0x1b0] sm:$0xff] }
 0x171   : > { %v2715_v49 = vadd.f32 -0.5, %v1734_v16  ;;  %v4835_v21 = vrot.slane %v2714_v60, %v3300_v22  ;;  %v1581_v63 = vmul.f32 0.6931472, %v2914_v30  ;;  %2917 = vlog2.f32 %v1650_v43 }
 0x172   : > { %v1653_v35 = vmul.f32 -0.5, %v4802_v6  ;;  %v1790_v24 = vmul.f32 1.442695, %v1789_v15  ;;  %v1744_v19 = vmul.f32 %v1741_v59, %v1732_v0  ;;  %v1745_v17 = vmul.f32 %v1742_v27, %v1733_v29  ;;  %v1774_v0 = vld [vmem:[%s3272_s26 + $0x2b0] sm:$0xff] }
 0x173   : > { %v2716_v50 = vadd.f32 -0.5, %v1735_v32  ;;  %v2717_v47 = vadd.f32 -0.5, %v1736_v26  ;;  %v1698_v7 = vadd.f32 %v1695_v8, %v4746_v48  ;;  %v1714_v42 = vmax.f32 %v4704_v3, 0.0 }
 0x174   : > { %vm4840_vm13 = vcmp.lt.f32.partialorder %v1735_v32, 1.0  ;;  %vm4844_vm14 = vcmp.lt.f32.partialorder %v1736_v26, 1.0  ;;  %v1550_v9 = vsel %vm270_vm5, %v4608_v56, %v1549_v13  ;;  %v1699_v48 = vadd.f32 %v1696_v31, %v4749_v54 }
 0x175   : > { %v4851_v57 = vpop.eup %2915  ;;  %v1715_v40 = vmul.f32 %v4778_v37, %v4704_v3  ;;  %v1760_v53 = vrot.slane %v2713_v51, %v3300_v22  ;;  %v1587_v12 = vsel %vm4804_vm9, %v4813_v11, %v1581_v63  ;;  %v1654_v34 = vadd.f32 1.0, %v1653_v35  ;;  %v1778_v11 = vld [vmem:[%s3279_s29 + $0x3b0] sm:$0xff] }
 0x176   : > { %v1749_v56 = vsel %vm4830_vm12, %v1743_v33, %v2715_v49  ;;  %2919 = vpow2.f32 %v1790_v24  ;;  %v1656_v54 = vand.u32 2147483647, %v4802_v6  ;;  %v1750_v3 = vsel %vm4840_vm13, %v1744_v19, %v2716_v50 }
 0x177   : > { %v1751_v37 = vsel %vm4844_vm14, %v1745_v17, %v2717_v47  ;;  %v1756_v29 = vsel %vm259_vm4, %v4835_v21, 0.0  ;;  %v1721_v4 = vadd.f32 1.0, %v4851_v57  ;;  %vm1782_vm15 = vcmp.gt.f32.partialorder %v1772_v2, 0.5 }
 0x178   : > { %v1802_v18 = vsub.f32 %v1773_v44, %v1776_v1  ;;  %v1859_v16 = vand.u32 2147483647, %v4849_v41  ;;  %v1551_v5 = vadd.f32 %v1550_v9, %v4794_v10  ;;  %v1588_v43 = vadd.f32 %v1587_v12, %v4716_v46  ;;  %v1847_v44 = vld [vmem:[%s3279_s29 + $0x1b8] sm:$0xff]  ;;  %v4931_v1 = vld [vmem:[%s3272_s26 + $0xc0] sm:$0xff] }
 0x179   : > { %v4884_v8 = vsub.f32 %v1714_v42, %v1715_v40  ;;  %v1765_v60 = vmul.f32 %v4835_v21, %v1749_v56  ;;  %v4888_v15 = vmul.f32 %v4802_v6, %v1654_v34  ;;  %v4892_v30 = vsel %vm258_vm3, %v1760_v53, %v1756_v29  ;;  %v4926_v53 = vld [vmem:[%s3279_s29 + $0xb8] sm:$0xff] }
 0x17a   : > { %v1803_v32 = vsub.f32 %v1774_v0, %v1777_v45  ;;  %v1804_v26 = vsub.f32 %v1775_v39, %v1778_v11  ;;  %vm4894_vm0 = vcmp.lt.f32.partialorder %v1656_v54, 0.0004427343  ;;  %v1766_v10 = vmul.f32 %v4835_v21, %v1750_v3  ;;  %v1845_v0 = vld [vmem:[%s3272_s26 + $0x2b8] sm:$0xff] }
 0x17b   : > { %v1767_v46 = vmul.f32 %v4835_v21, %v1751_v37  ;;  %vm1779_vm1 = vcmp.ge.f32.partialorder %v1772_v2, 0.0  ;;  %v2719_v27 = vsel %vm1782_vm15, 1.0, %v3092_v23  ;;  %2921 = vlog2.f32 %v1721_v4  ;;  %v1848_v54 = vld [vmem:[%s3279_s29 + $0x2b8] sm:$0xff] }
 0x17c   : > { %v1805_v6 = vand.u32 2147483647, %v1802_v18  ;;  %v1811_v13 = vmul.f32 0.5, %v1802_v18  ;;  %v1860_v31 = vsub.f32 0.0, %v1859_v16  ;;  %v1620_v51 = vmul.f32 %v4742_v36, %v1588_v43  ;;  %v1846_v11 = vld [vmem:[%s3272_s26 + $0x3b8] sm:$0xff] }
 0x17d   : > { %v4902_v20 = vadd.f32 %v1765_v60, %v1697_v25  ;;  %v1785_v33 = vmax.f32 %v4770_v38, 0.0  ;;  %v1786_v49 = vmul.f32 %v1772_v2, %v4770_v38  ;;  %v2718_v63 = vsel %vm1779_vm1, 1.0, %v3092_v23  ;;  %v1844_v2 = vld [vmem:[%s3272_s26 + $0x1b8] sm:$0xff] }
 0x17e   : > { %v1806_v35 = vand.u32 2147483647, %v1803_v32  ;;  %v1807_v24 = vand.u32 2147483647, %v1804_v26  ;;  %v1812_v19 = vmul.f32 0.5, %v1803_v32  ;;  %v2918_v17 = vpop.eup %2917  ;;  %v4907_v50 = vadd.f32 %v1766_v10, %v1698_v7  ;;  %v1849_v4 = vld [vmem:[%s3279_s29 + $0x3b8] sm:$0xff] }
 0x17f   : > { %v4909_v47 = vadd.f32 %v1767_v46, %v1699_v48  ;;  %v1813_v36 = vmul.f32 0.5, %v1804_v26  ;;  %v4912_v25 = vrot.slane %v2719_v27, %v3300_v22  ;;  %v1724_v38 = vmul.f32 -0.5, %v4851_v57 }
 0x180   : > { %v1814_v42 = vmul.f32 %v1811_v13, %v1802_v18  ;;  %v2720_v55 = vadd.f32 -0.5, %v1805_v6  ;;  %v1861_v52 = vmul.f32 1.442695, %v1860_v31  ;;  %v1621_v9 = vsel %vm270_vm5, %v4687_v62, %v1620_v51  ;;  %v1914_v13 = vld [vmem:[%s3279_s29 + $0xc0] sm:$0xff] }
 0x181   : > { %v4918_v40 = vsub.f32 %v1785_v33, %v1786_v49  ;;  %vm4920_vm2 = vcmp.lt.f32.partialorder %v1805_v6, 1.0  ;;  %v1831_v48 = vrot.slane %v2718_v63, %v3300_v22  ;;  %v1652_v12 = vmul.f32 0.6931472, %v2918_v17 }
 0x182   : > { %vm4933_vm6 = vcmp.lt.f32.partialorder %v1806_v35, 1.0  ;;  %vm4937_vm7 = vcmp.lt.f32.partialorder %v1807_v24, 1.0  ;;  %v1815_v56 = vmul.f32 %v1812_v19, %v1803_v32  ;;  %v1727_v37 = vand.u32 2147483647, %v4851_v57 }
 0x183   : > { %v4943_v3 = vpop.eup %2919  ;;  %v1816_v29 = vmul.f32 %v1813_v36, %v1804_v26  ;;  %v2721_v39 = vadd.f32 -0.5, %v1806_v35  ;;  %v2722_v45 = vadd.f32 -0.5, %v1807_v24  ;;  %v1725_v18 = vadd.f32 1.0, %v1724_v38 }
 0x184   : > { %v1820_v16 = vsel %vm4920_vm2, %v1814_v42, %v2720_v55  ;;  %2923 = vpow2.f32 %v1861_v52  ;;  %v1873_v43 = vsub.f32 %v1844_v2, %v1847_v44  ;;  %v4950_v60 = vadd.f32 %v1621_v9, %v1551_v5 }
 0x185   : > { %v1827_v32 = vsel %vm259_vm4, %v4912_v25, 0.0  ;;  %vm1850_vm8 = vcmp.ge.f32.partialorder %v4926_v53, 0.0  ;;  %v1874_v10 = vsub.f32 %v1845_v0, %v1848_v54  ;;  %v1658_v26 = vsel %vm4894_vm0, %v4888_v15, %v1652_v12 }
 0x186   : > { %v1792_v46 = vadd.f32 1.0, %v4943_v3  ;;  %v1875_v27 = vsub.f32 %v1846_v11, %v1849_v4  ;;  %v1930_v6 = vand.u32 2147483647, %v4931_v1  ;;  %vm4961_vm9 = vcmp.lt.f32.partialorder %v1727_v37, 0.0004427343  ;;  %v1915_v4 = vld [vmem:[%s3272_s26 + $0x1c0] sm:$0xff] }
 0x187   : > { %v1821_v5 = vsel %vm4933_vm6, %v1815_v56, %v2721_v39  ;;  %v1822_v31 = vsel %vm4937_vm7, %v1816_v29, %v2722_v45  ;;  %v1836_v51 = vmul.f32 %v4912_v25, %v1820_v16  ;;  %v1726_v59 = vmul.f32 %v4851_v57, %v1725_v18  ;;  %v1918_v18 = vld [vmem:[%s3279_s29 + $0x1c0] sm:$0xff] }
 0x188   : > { %v4973_v15 = vsel %vm258_vm3, %v1831_v48, %v1827_v32  ;;  %v1876_v33 = vand.u32 2147483647, %v1873_v43  ;;  %v1882_v49 = vmul.f32 0.5, %v1873_v43  ;;  %v2922_v63 = vpop.eup %2921  ;;  %v1659_v35 = vadd.f32 %v1658_v26, %v4796_v61  ;;  %v1919_v26 = vld [vmem:[%s3279_s29 + $0x2c0] sm:$0xff] }
 0x189   : > { %vm1853_vm10 = vcmp.gt.f32.partialorder %v4926_v53, 0.5  ;;  %v1877_v24 = vand.u32 2147483647, %v1874_v10  ;;  %v1883_v19 = vmul.f32 0.5, %v1874_v10  ;;  %2925 = vlog2.f32 %v1792_v46 }
 0x18a   : > { %v1878_v17 = vand.u32 2147483647, %v1875_v27  ;;  %v1884_v36 = vmul.f32 0.5, %v1875_v27  ;;  %v1931_v38 = vsub.f32 0.0, %v1930_v6  ;;  %v1837_v42 = vmul.f32 %v4912_v25, %v1821_v5  ;;  %v1917_v5 = vld [vmem:[%s3272_s26 + $0x3c0] sm:$0xff] }
 0x18b   : > { %v1838_v57 = vmul.f32 %v4912_v25, %v1822_v31  ;;  %v1839_v55 = vadd.f32 %v1836_v51, %v4902_v20  ;;  %v2723_v52 = vsel %vm1850_vm8, 1.0, %v3092_v23  ;;  %v1723_v9 = vmul.f32 0.6931472, %v2922_v63 }
 0x18c   : > { %v2724_v61 = vsel %vm1853_vm10, 1.0, %v3092_v23  ;;  %v1885_v7 = vmul.f32 %v1882_v49, %v1873_v43  ;;  %v2725_v48 = vadd.f32 -0.5, %v1876_v33  ;;  %v1691_v2 = vmul.f32 %v4820_v28, %v1659_v35 }
 0x18d   : > { %v1795_v44 = vmul.f32 -0.5, %v4943_v3  ;;  %vm4986_vm11 = vcmp.lt.f32.partialorder %v1876_v33, 1.0  ;;  %v1886_v20 = vmul.f32 %v1883_v19, %v1874_v10  ;;  %v1887_v34 = vmul.f32 %v1884_v36, %v1875_v27  ;;  %v5036_v33 = vld [vmem:[%s3272_s26 + $0xc8] sm:$0xff] }
 0x18e   : > { %v2726_v62 = vadd.f32 -0.5, %v1877_v24  ;;  %v2727_v56 = vadd.f32 -0.5, %v1878_v17  ;;  %v1932_v0 = vmul.f32 1.442695, %v1931_v38  ;;  %v1840_v54 = vadd.f32 %v1837_v42, %v4907_v50 }
 0x18f   : > { %vm4991_vm12 = vcmp.lt.f32.partialorder %v1877_v24, 1.0  ;;  %vm4995_vm13 = vcmp.lt.f32.partialorder %v1878_v17, 1.0  ;;  %v5000_v29 = vrot.slane %v2724_v61, %v3300_v22  ;;  %v1729_v39 = vsel %vm4961_vm9, %v1726_v59, %v1723_v9 }
 0x190   : > { %v1856_v45 = vmax.f32 %v4849_v41, 0.0  ;;  %v1857_v50 = vmul.f32 %v4926_v53, %v4849_v41  ;;  %v1891_v11 = vsel %vm4986_vm11, %v1885_v7, %v2725_v48  ;;  %v1692_v43 = vsel %vm270_vm5, %v4764_v58, %v1691_v2  ;;  %v1916_v53 = vld [vmem:[%s3272_s26 + $0x2c0] sm:$0xff] }
 0x191   : > { %v5011_v16 = vpop.eup %2923  ;;  %v1798_v32 = vand.u32 2147483647, %v4943_v3  ;;  %v5018_v10 = vadd.f32 %v1838_v57, %v4909_v47  ;;  %v1902_v41 = vrot.slane %v2723_v52, %v3300_v22  ;;  %v1796_v46 = vadd.f32 1.0, %v1795_v44  ;;  %v1920_v58 = vld [vmem:[%s3279_s29 + $0x3c0] sm:$0xff] }
 0x192   : > { %v1892_v27 = vsel %vm4991_vm12, %v1886_v20, %v2726_v62  ;;  %v1893_v6 = vsel %vm4995_vm13, %v1887_v34, %v2727_v56  ;;  %2927 = vpow2.f32 %v1932_v0  ;;  %v1730_v31 = vadd.f32 %v1729_v39, %v4884_v8 }
 0x193   : > { %v1898_v47 = vsel %vm259_vm4, %v5000_v29, 0.0  ;;  %v1907_v51 = vmul.f32 %v5000_v29, %v1891_v11  ;;  %v1944_v59 = vsub.f32 %v1915_v4, %v1918_v18  ;;  %v1693_v49 = vadd.f32 %v1692_v43, %v4950_v60  ;;  %v1986_v11 = vld [vmem:[%s3272_s26 + $0x1c8] sm:$0xff] }
 0x194   : > { %v5039_v63 = vsub.f32 %v1856_v45, %v1857_v50  ;;  %v1863_v35 = vadd.f32 1.0, %v5011_v16  ;;  %v1945_v24 = vsub.f32 %v1916_v53, %v1919_v26  ;;  %vm5042_vm14 = vcmp.lt.f32.partialorder %v1798_v32, 0.0004427343  ;;  %v1989_v4 = vld [vmem:[%s3279_s29 + $0x1c8] sm:$0xff]  ;;  %v2060_v26 = vld [vmem:[%s3279_s29 + $0x1d0] sm:$0xff] }
 0x195   : > { %v1908_v8 = vmul.f32 %v5000_v29, %v1892_v27  ;;  %vm1924_vm15 = vcmp.gt.f32.partialorder %v1914_v13, 0.5  ;;  %v1946_v17 = vsub.f32 %v1917_v5, %v1920_v58  ;;  %v1797_v36 = vmul.f32 %v4943_v3, %v1796_v46  ;;  %v1987_v32 = vld [vmem:[%s3272_s26 + $0x2c8] sm:$0xff] }
 0x196   : > { %v5050_v38 = vsel %vm258_vm3, %v1902_v41, %v1898_v47  ;;  %v1909_v60 = vmul.f32 %v5000_v29, %v1893_v6  ;;  %v2001_v42 = vand.u32 2147483647, %v5036_v33  ;;  %v2926_v57 = vpop.eup %2925  ;;  %v1762_v52 = vmul.f32 %v4892_v30, %v1730_v31  ;;  %v1990_v41 = vld [vmem:[%s3279_s29 + $0x2c8] sm:$0xff] }
 0x197   : > { %v5055_v9 = vadd.f32 %v1907_v51, %v1839_v55  ;;  %vm1921_vm0 = vcmp.ge.f32.partialorder %v1914_v13, 0.0  ;;  %v1947_v61 = vand.u32 2147483647, %v1944_v59  ;;  %2929 = vlog2.f32 %v1863_v35  ;;  %v1985_v31 = vld [vmem:[%s3279_s29 + $0xc8] sm:$0xff] }
 0x198   : > { %v2729_v7 = vsel %vm1924_vm15, 1.0, %v3092_v23  ;;  %v1953_v48 = vmul.f32 0.5, %v1944_v59  ;;  %v1954_v3 = vmul.f32 0.5, %v1945_v24  ;;  %v5058_v2 = vadd.f32 %v1908_v8, %v1840_v54  ;;  %v1988_v47 = vld [vmem:[%s3272_s26 + $0x3c8] sm:$0xff] }
 0x199   : > { %v1948_v44 = vand.u32 2147483647, %v1945_v24  ;;  %v1949_v12 = vand.u32 2147483647, %v1946_v17  ;;  %v1955_v20 = vmul.f32 0.5, %v1946_v17  ;;  %v2728_v62 = vsel %vm1921_vm0, 1.0, %v3092_v23 }
 0x19a   : > { %v1794_v34 = vmul.f32 0.6931472, %v2926_v57  ;;  %v1927_v30 = vmax.f32 %v4931_v1, 0.0  ;;  %v2002_v55 = vsub.f32 0.0, %v2001_v42  ;;  %v1763_v56 = vsel %vm270_vm5, %v4835_v21, %v1762_v52  ;;  %v1991_v51 = vld [vmem:[%s3279_s29 + $0x3c8] sm:$0xff] }
 0x19b   : > { %v1928_v0 = vmul.f32 %v1914_v13, %v4931_v1  ;;  %vm5066_vm1 = vcmp.lt.f32.partialorder %v1947_v61, 1.0  ;;  %v5071_v37 = vrot.slane %v2729_v7, %v3300_v22  ;;  %v1866_v28 = vmul.f32 -0.5, %v5011_v16  ;;  %v5119_v7 = vld [vmem:[%s3272_s26 + $0xd0] sm:$0xff] }
 0x19c   : > { %v1956_v39 = vmul.f32 %v1953_v48, %v1944_v59  ;;  %v1957_v45 = vmul.f32 %v1954_v3, %v1945_v24  ;;  %v2730_v50 = vadd.f32 -0.5, %v1947_v61  ;;  %v1869_v21 = vand.u32 2147483647, %v5011_v16 }
 0x19d   : > { %v1958_v1 = vmul.f32 %v1955_v20, %v1946_v17  ;;  %v2731_v18 = vadd.f32 -0.5, %v1948_v44  ;;  %v2732_v43 = vadd.f32 -0.5, %v1949_v12  ;;  %v1800_v53 = vsel %vm5042_vm14, %v1797_v36, %v1794_v34 }
 0x19e   : > { %vm5081_vm2 = vcmp.lt.f32.partialorder %v1948_v44, 1.0  ;;  %vm5085_vm6 = vcmp.lt.f32.partialorder %v1949_v12, 1.0  ;;  %v2003_v27 = vmul.f32 1.442695, %v2002_v55  ;;  %v5092_v13 = vadd.f32 %v1909_v60, %v5018_v10  ;;  %v2059_v10 = vld [vmem:[%s3272_s26 + $0x3d0] sm:$0xff] }
 0x19f   : > { %v5089_v6 = vpop.eup %2927  ;;  %v5094_v5 = vsub.f32 %v1927_v30, %v1928_v0  ;;  %v1973_v58 = vrot.slane %v2728_v62, %v3300_v22  ;;  %v2015_v59 = vsub.f32 %v1986_v11, %v1989_v4  ;;  %v5100_v35 = vadd.f32 %v1763_v56, %v1693_v49 }
 0x1a0   : > { %v1867_v24 = vadd.f32 1.0, %v1866_v28  ;;  %v1962_v19 = vsel %vm5066_vm1, %v1956_v39, %v2730_v50  ;;  %v2016_v8 = vsub.f32 %v1987_v32, %v1990_v41  ;;  %v1801_v17 = vadd.f32 %v1800_v53, %v4918_v40 }
 0x1a1   : > { %vm5105_vm7 = vcmp.lt.f32.partialorder %v1869_v21, 0.0004427343  ;;  %v1963_v36 = vsel %vm5081_vm2, %v1957_v45, %v2731_v18  ;;  %v1964_v60 = vsel %vm5085_vm6, %v1958_v1, %v2732_v43  ;;  %v1969_v49 = vsel %vm259_vm4, %v5071_v37, 0.0 }
 0x1a2   : > { %v1934_v42 = vadd.f32 1.0, %v5089_v6  ;;  %vm1992_vm8 = vcmp.ge.f32.partialorder %v1985_v31, 0.0  ;;  %2931 = vpow2.f32 %v2003_v27  ;;  %v2017_v57 = vsub.f32 %v1988_v47, %v1991_v51 }
 0x1a3   : > { %v1978_v40 = vmul.f32 %v5071_v37, %v1962_v19  ;;  %vm1995_vm9 = vcmp.gt.f32.partialorder %v1985_v31, 0.5  ;;  %v2018_v52 = vand.u32 2147483647, %v2015_v59  ;;  %v2024_v61 = vmul.f32 0.5, %v2015_v59 }
 0x1a4   : > { %v1868_v48 = vmul.f32 %v5011_v16, %v1867_v24  ;;  %v5124_v3 = vsel %vm258_vm3, %v1973_v58, %v1969_v49  ;;  %v2019_v44 = vand.u32 2147483647, %v2016_v8  ;;  %v2025_v12 = vmul.f32 0.5, %v2016_v8  ;;  %v2930_v20 = vpop.eup %2929  ;;  %v2058_v24 = vld [vmem:[%s3272_s26 + $0x2d0] sm:$0xff] }
 0x1a5   : > { %v1833_v34 = vmul.f32 %v4973_v15, %v1801_v17  ;;  %v1979_v62 = vmul.f32 %v5071_v37, %v1963_v36  ;;  %v1980_v30 = vmul.f32 %v5071_v37, %v1964_v60  ;;  %v2733_v55 = vsel %vm1992_vm8, 1.0, %v3092_v23  ;;  %v2061_v36 = vld [vmem:[%s3279_s29 + $0x2d0] sm:$0xff] }
 0x1a6   : > { %2933 = vlog2.f32 %v1934_v42  ;;  %v2734_v56 = vsel %vm1995_vm9, 1.0, %v3092_v23  ;;  %v2020_v16 = vand.u32 2147483647, %v2017_v57  ;;  %v2072_v0 = vand.u32 2147483647, %v5119_v7  ;;  %v2062_v60 = vld [vmem:[%s3279_s29 + $0x3d0] sm:$0xff] }
 0x1a7   : > { %vm5133_vm10 = vcmp.lt.f32.partialorder %v2018_v52, 1.0  ;;  %v2026_v15 = vmul.f32 0.5, %v2017_v57  ;;  %v2027_v28 = vmul.f32 %v2024_v61, %v2015_v59  ;;  %v2735_v39 = vadd.f32 -0.5, %v2018_v52  ;;  %v2056_v52 = vld [vmem:[%s3279_s29 + $0xd0] sm:$0xff] }
 0x1a8   : > { %v1865_v45 = vmul.f32 0.6931472, %v2930_v20  ;;  %v1937_v50 = vmul.f32 -0.5, %v5089_v6  ;;  %v2028_v11 = vmul.f32 %v2025_v12, %v2016_v8  ;;  %v2736_v4 = vadd.f32 -0.5, %v2019_v44 }
 0x1a9   : > { %v1981_v21 = vadd.f32 %v1978_v40, %v5055_v9  ;;  %v1998_v1 = vmax.f32 %v5036_v33, 0.0  ;;  %vm5140_vm11 = vcmp.lt.f32.partialorder %v2019_v44, 1.0  ;;  %v5145_v43 = vrot.slane %v2734_v56, %v3300_v22  ;;  %v2057_v9 = vld [vmem:[%s3272_s26 + $0x1d0] sm:$0xff] }
 0x1aa   : > { %v1834_v32 = vsel %vm270_vm5, %v4912_v25, %v1833_v34  ;;  %v1999_v41 = vmul.f32 %v1985_v31, %v5036_v33  ;;  %v2044_v53 = vrot.slane %v2733_v55, %v3300_v22  ;;  %v2073_v46 = vsub.f32 0.0, %v2072_v0 }
 0x1ab   : > { %v1940_v27 = vand.u32 2147483647, %v5089_v6  ;;  %v2029_v58 = vmul.f32 %v2026_v15, %v2017_v57  ;;  %v2737_v47 = vadd.f32 -0.5, %v2020_v16  ;;  %v2033_v51 = vsel %vm5133_vm10, %v2027_v28, %v2735_v39  ;;  %v5206_v39 = vld [vmem:[%s3272_s26 + $0xd8] sm:$0xff] }
 0x1ac   : > { %v1871_v25 = vsel %vm5105_vm7, %v1868_v48, %v1865_v45  ;;  %v1938_v33 = vadd.f32 1.0, %v1937_v50  ;;  %vm5159_vm12 = vcmp.lt.f32.partialorder %v2020_v16, 1.0  ;;  %v2034_v59 = vsel %vm5140_vm11, %v2028_v11, %v2736_v4 }
 0x1ad   : > { %v1982_v19 = vadd.f32 %v1979_v62, %v5058_v2  ;;  %v1983_v8 = vadd.f32 %v1980_v30, %v5092_v13  ;;  %v2040_v17 = vsel %vm259_vm4, %v5145_v43, 0.0  ;;  %v2086_v49 = vsub.f32 %v2057_v9, %v2060_v26 }
 0x1ae   : > { %v5175_v42 = vadd.f32 %v1834_v32, %v5100_v35  ;;  %v5177_v57 = vsub.f32 %v1998_v1, %v1999_v41  ;;  %v2049_v40 = vmul.f32 %v5145_v43, %v2033_v51  ;;  %v2074_v61 = vmul.f32 1.442695, %v2073_v46  ;;  %v2128_v32 = vld [vmem:[%s3272_s26 + $0x1d8] sm:$0xff] }
 0x1af   : > { %v5181_v2 = vpop.eup %2931  ;;  %v1872_v13 = vadd.f32 %v1871_v25, %v5039_v63  ;;  %vm5184_vm13 = vcmp.lt.f32.partialorder %v1940_v27, 0.0004427343  ;;  %v2035_v44 = vsel %vm5159_vm12, %v2029_v58, %v2737_v47  ;;  %v2050_v35 = vmul.f32 %v5145_v43, %v2034_v59  ;;  %v2129_v47 = vld [vmem:[%s3272_s26 + $0x2d8] sm:$0xff] }
 0x1b0   : > { %v1939_v12 = vmul.f32 %v5089_v6, %v1938_v33  ;;  %v5194_v20 = vsel %vm258_vm3, %v2044_v53, %v2040_v17  ;;  %v2087_v34 = vsub.f32 %v2058_v24, %v2061_v36  ;;  %v2088_v62 = vsub.f32 %v2059_v10, %v2062_v60  ;;  %v2131_v53 = vld [vmem:[%s3279_s29 + $0x1d8] sm:$0xff] }
 0x1b1   : > { %vm2063_vm14 = vcmp.ge.f32.partialorder %v2056_v52, 0.0  ;;  %vm2066_vm15 = vcmp.gt.f32.partialorder %v2056_v52, 0.5  ;;  %v2089_v63 = vand.u32 2147483647, %v2086_v49  ;;  %v2095_v30 = vmul.f32 0.5, %v2086_v49  ;;  %v2130_v59 = vld [vmem:[%s3272_s26 + $0x3d8] sm:$0xff] }
 0x1b2   : > { %v2005_v55 = vadd.f32 1.0, %v5181_v2  ;;  %v2051_v56 = vmul.f32 %v5145_v43, %v2035_v44  ;;  %v5198_v16 = vadd.f32 %v2049_v40, %v1981_v21  ;;  %2935 = vpow2.f32 %v2074_v61  ;;  %v2132_v24 = vld [vmem:[%s3279_s29 + $0x2d8] sm:$0xff] }
 0x1b3   : > { %v2934_v6 = vpop.eup %2933  ;;  %v1904_v0 = vmul.f32 %v5050_v38, %v1872_v13  ;;  %v5201_v54 = vadd.f32 %v2050_v35, %v1982_v19  ;;  %v2069_v15 = vmax.f32 %v5119_v7, 0.0  ;;  %v2070_v28 = vmul.f32 %v2056_v52, %v5119_v7  ;;  %v2133_v19 = vld [vmem:[%s3279_s29 + $0x3d8] sm:$0xff] }
 0x1b4   : > { %v2738_v45 = vsel %vm2063_vm14, 1.0, %v3092_v23  ;;  %v2739_v50 = vsel %vm2066_vm15, 1.0, %v3092_v23  ;;  %v2096_v11 = vmul.f32 0.5, %v2087_v34  ;;  %v2097_v4 = vmul.f32 0.5, %v2088_v62 }
 0x1b5   : > { %v2090_v21 = vand.u32 2147483647, %v2087_v34  ;;  %v2091_v1 = vand.u32 2147483647, %v2088_v62  ;;  %v2098_v18 = vmul.f32 %v2095_v30, %v2086_v49  ;;  %v2740_v38 = vadd.f32 -0.5, %v2089_v63  ;;  %v2203_v49 = vld [vmem:[%s3279_s29 + $0x2e0] sm:$0xff] }
 0x1b6   : > { %v1936_v41 = vmul.f32 0.6931472, %v2934_v6  ;;  %2937 = vlog2.f32 %v2005_v55  ;;  %vm5211_vm0 = vcmp.lt.f32.partialorder %v2089_v63, 1.0  ;;  %v2143_v9 = vand.u32 2147483647, %v5206_v39 }
 0x1b7   : > { %v1905_v26 = vsel %vm270_vm5, %v5000_v29, %v1904_v0  ;;  %v5220_v46 = vadd.f32 %v2051_v56, %v1983_v8  ;;  %v5222_v27 = vsub.f32 %v2069_v15, %v2070_v28  ;;  %v5225_v58 = vrot.slane %v2739_v50, %v3300_v22  ;;  %v2127_v8 = vld [vmem:[%s3279_s29 + $0xd8] sm:$0xff] }
 0x1b8   : > { %v2008_v51 = vmul.f32 -0.5, %v5181_v2  ;;  %v2099_v25 = vmul.f32 %v2096_v11, %v2087_v34  ;;  %v2100_v33 = vmul.f32 %v2097_v4, %v2088_v62  ;;  %v2115_v31 = vrot.slane %v2738_v45, %v3300_v22 }
 0x1b9   : > { %v2741_v17 = vadd.f32 -0.5, %v2090_v21  ;;  %v2742_v10 = vadd.f32 -0.5, %v2091_v1  ;;  %v2104_v29 = vsel %vm5211_vm0, %v2098_v18, %v2740_v38  ;;  %v2157_v36 = vsub.f32 %v2128_v32, %v2131_v53 }
 0x1ba   : > { %v1942_v60 = vsel %vm5184_vm13, %v1939_v12, %v1936_v41  ;;  %vm5238_vm1 = vcmp.lt.f32.partialorder %v2090_v21, 1.0  ;;  %vm5242_vm2 = vcmp.lt.f32.partialorder %v2091_v1, 1.0  ;;  %v2144_v52 = vsub.f32 0.0, %v2143_v9 }
 0x1bb   : > { %v2011_v61 = vand.u32 2147483647, %v5181_v2  ;;  %v2111_v13 = vsel %vm259_vm4, %v5225_v58, 0.0  ;;  %v2158_v44 = vsub.f32 %v2129_v47, %v2132_v24  ;;  %v2159_v35 = vsub.f32 %v2130_v59, %v2133_v19  ;;  %v2202_v24 = vld [vmem:[%s3279_s29 + $0x1e0] sm:$0xff] }
 0x1bc   : > { %v5251_v48 = vadd.f32 %v1905_v26, %v5175_v42  ;;  %v2009_v12 = vadd.f32 1.0, %v2008_v51  ;;  %v2120_v34 = vmul.f32 %v5225_v58, %v2104_v29  ;;  %vm2134_vm6 = vcmp.ge.f32.partialorder %v2127_v8, 0.0 }
 0x1bd   : > { %v1943_v62 = vadd.f32 %v1942_v60, %v5094_v5  ;;  %v2105_v63 = vsel %vm5238_vm1, %v2099_v25, %v2741_v17  ;;  %v2106_v30 = vsel %vm5242_vm2, %v2100_v33, %v2742_v10  ;;  %v2160_v55 = vand.u32 2147483647, %v2157_v36  ;;  %v2199_v25 = vld [vmem:[%s3272_s26 + $0x1e0] sm:$0xff] }
 0x1be   : > { %v5261_v56 = vsel %vm258_vm3, %v2115_v31, %v2111_v13  ;;  %vm2137_vm7 = vcmp.gt.f32.partialorder %v2127_v8, 0.5  ;;  %v2145_v42 = vmul.f32 1.442695, %v2144_v52  ;;  %v2166_v6 = vmul.f32 0.5, %v2157_v36  ;;  %v2200_v60 = vld [vmem:[%s3272_s26 + $0x2e0] sm:$0xff]  ;;  %v2274_v31 = vld [vmem:[%s3279_s29 + $0x2e8] sm:$0xff] }
 0x1bf   : > { %v5263_v0 = vpop.eup %2935  ;;  %vm5265_vm8 = vcmp.lt.f32.partialorder %v2011_v61, 0.0004427343  ;;  %v2161_v5 = vand.u32 2147483647, %v2158_v44  ;;  %v2162_v28 = vand.u32 2147483647, %v2159_v35  ;;  %v5270_v11 = vmul.f32 %v5181_v2, %v2009_v12 }
 0x1c0   : > { %v2167_v45 = vmul.f32 0.5, %v2158_v44  ;;  %v2168_v50 = vmul.f32 0.5, %v2159_v35  ;;  %v2121_v4 = vmul.f32 %v5225_v58, %v2105_v63  ;;  %v2122_v21 = vmul.f32 %v5225_v58, %v2106_v30  ;;  %v5286_v2 = vld [vmem:[%s3272_s26 + $0xe0] sm:$0xff] }
 0x1c1   : > { %v2123_v1 = vadd.f32 %v2120_v34, %v5198_v16  ;;  %v1975_v18 = vmul.f32 %v5124_v3, %v1943_v62  ;;  %v5278_v38 = vsel %vm2134_vm6, 1.0, %v3092_v23  ;;  %v2744_v32 = vsel %vm2137_vm7, 1.0, %v3092_v23  ;;  %v2204_v13 = vld [vmem:[%s3279_s29 + $0x3e0] sm:$0xff]  ;;  %v5324_v62 = vld [vmem:[%s3272_s26 + $0xe8] sm:$0xff] }
 0x1c2   : > { %vm5281_vm9 = vcmp.lt.f32.partialorder %v2160_v55, 1.0  ;;  %v2076_v7 = vadd.f32 1.0, %v5263_v0  ;;  %2939 = vpow2.f32 %v2145_v42  ;;  %v2169_v53 = vmul.f32 %v2166_v6, %v2157_v36 }
 0x1c3   : > { %v2745_v16 = vadd.f32 -0.5, %v2160_v55  ;;  %v2938_v3 = vpop.eup %2937  ;;  %v2170_v9 = vmul.f32 %v2167_v45, %v2158_v44  ;;  %v2171_v26 = vmul.f32 %v2168_v50, %v2159_v35  ;;  %v2746_v47 = vadd.f32 -0.5, %v2161_v5  ;;  %v5339_v45 = vld [vmem:[%s3279_s29 + $0xe0] sm:$0xff] }
 0x1c4   : > { %v2747_v51 = vadd.f32 -0.5, %v2162_v28  ;;  %v2079_v33 = vmul.f32 -0.5, %v5263_v0  ;;  %vm5291_vm10 = vcmp.lt.f32.partialorder %v2161_v5, 1.0  ;;  %vm5295_vm11 = vcmp.lt.f32.partialorder %v2162_v28, 1.0 }
 0x1c5   : > { %v2214_v19 = vand.u32 2147483647, %v5286_v2  ;;  %v2124_v17 = vadd.f32 %v2121_v4, %v5201_v54  ;;  %v2125_v10 = vadd.f32 %v2122_v21, %v5220_v46  ;;  %v2140_v29 = vmax.f32 %v5206_v39, 0.0 }
 0x1c6   : > { %v2141_v36 = vmul.f32 %v2127_v8, %v5206_v39  ;;  %v1976_v40 = vsel %vm270_vm5, %v5071_v37, %v1975_v18  ;;  %v2007_v52 = vmul.f32 0.6931472, %v2938_v3  ;;  %2941 = vlog2.f32 %v2076_v7  ;;  %v2201_v8 = vld [vmem:[%s3272_s26 + $0x3e0] sm:$0xff]  ;;  %v2273_v3 = vld [vmem:[%s3279_s29 + $0x1e8] sm:$0xff] }
 0x1c7   : > { %v2175_v61 = vsel %vm5281_vm9, %v2169_v53, %v2745_v16  ;;  %v2176_v54 = vsel %vm5291_vm10, %v2170_v9, %v2746_v47  ;;  %v2177_v46 = vsel %vm5295_vm11, %v2171_v26, %v2747_v51  ;;  %v5317_v39 = vrot.slane %v2744_v32, %v3300_v22  ;;  %v2270_v16 = vld [vmem:[%s3272_s26 + $0x1e8] sm:$0xff] }
 0x1c8   : > { %v2228_v44 = vsub.f32 %v2199_v25, %v2202_v24  ;;  %v2080_v35 = vadd.f32 1.0, %v2079_v33  ;;  %v2186_v37 = vrot.slane %v5278_v38, %v3300_v22  ;;  %v2215_v12 = vsub.f32 0.0, %v2214_v19  ;;  %v2271_v33 = vld [vmem:[%s3272_s26 + $0x2e8] sm:$0xff] }
 0x1c9   : > { %v2229_v34 = vsub.f32 %v2200_v60, %v2203_v49  ;;  %v5327_v63 = vadd.f32 %v1976_v40, %v5251_v48  ;;  %v2082_v30 = vand.u32 2147483647, %v5263_v0  ;;  %v5330_v55 = vsub.f32 %v2140_v29, %v2141_v36  ;;  %v2272_v36 = vld [vmem:[%s3272_s26 + $0x3e8] sm:$0xff] }
 0x1ca   : > { %v2191_v42 = vmul.f32 %v5317_v39, %v2175_v61  ;;  %v2013_v6 = vsel %vm5265_vm8, %v5270_v11, %v2007_v52  ;;  %v2192_v5 = vmul.f32 %v5317_v39, %v2176_v54  ;;  %v2193_v28 = vmul.f32 %v5317_v39, %v2177_v46  ;;  %v5381_v61 = vld [vmem:[%s3279_s29 + $0xe8] sm:$0xff] }
 0x1cb   : > { %v2230_v48 = vsub.f32 %v2201_v8, %v2204_v13  ;;  %v5344_v50 = vsel %vm259_vm4, %v5317_v39, 0.0  ;;  %v2231_v4 = vand.u32 2147483647, %v2228_v44  ;;  %v2237_v21 = vmul.f32 0.5, %v2228_v44 }
 0x1cc   : > { %v2285_v15 = vand.u32 2147483647, %v5324_v62  ;;  %v5348_v11 = vmul.f32 %v5263_v0, %v2080_v35  ;;  %v2216_v18 = vmul.f32 1.442695, %v2215_v12  ;;  %v2232_v32 = vand.u32 2147483647, %v2229_v34 }
 0x1cd   : > { %v2238_v41 = vmul.f32 0.5, %v2229_v34  ;;  %v2014_v7 = vadd.f32 %v2013_v6, %v5177_v57  ;;  %v5351_v53 = vadd.f32 %v2191_v42, %v2123_v1  ;;  %vm2208_vm12 = vcmp.gt.f32.partialorder %v5339_v45, 0.5  ;;  %v2343_v57 = vld [vmem:[%s3272_s26 + $0x3f0] sm:$0xff] }
 0x1ce   : > { %v2286_v9 = vsub.f32 0.0, %v2285_v15  ;;  %v5356_v26 = vadd.f32 %v2192_v5, %v2124_v17  ;;  %v5358_v47 = vadd.f32 %v2193_v28, %v2125_v10  ;;  %v2233_v51 = vand.u32 2147483647, %v2230_v48  ;;  %v2275_v10 = vld [vmem:[%s3279_s29 + $0x3e8] sm:$0xff]  ;;  %v5395_v28 = vld [vmem:[%s3272_s26 + $0xf0] sm:$0xff] }
 0x1cf   : > { %v2239_v25 = vmul.f32 0.5, %v2230_v48  ;;  %v5362_v59 = vpop.eup %2939  ;;  %vm5364_vm13 = vcmp.lt.f32.partialorder %v2231_v4, 1.0  ;;  %v2240_v1 = vmul.f32 %v2237_v21, %v2228_v44  ;;  %v2750_v24 = vadd.f32 -0.5, %v2231_v4 }
 0x1d0   : > { %v2287_v19 = vmul.f32 1.442695, %v2286_v9  ;;  %2943 = vpow2.f32 %v2216_v18  ;;  %v2241_v29 = vmul.f32 %v2238_v41, %v2229_v34  ;;  %v2751_v17 = vadd.f32 -0.5, %v2232_v32  ;;  %v2341_v18 = vld [vmem:[%s3272_s26 + $0x1f0] sm:$0xff] }
 0x1d1   : > { %v2299_v60 = vsub.f32 %v2270_v16, %v2273_v3  ;;  %v5371_v49 = vmul.f32 %v5194_v20, %v2014_v7  ;;  %v2749_v40 = vsel %vm2208_vm12, 1.0, %v3092_v23  ;;  %vm5376_vm14 = vcmp.lt.f32.partialorder %v2232_v32, 1.0  ;;  %v2342_v16 = vld [vmem:[%s3272_s26 + $0x2f0] sm:$0xff] }
 0x1d2   : > { %v2300_v54 = vsub.f32 %v2271_v33, %v2274_v31  ;;  %v2147_v46 = vadd.f32 1.0, %v5362_v59  ;;  %v2150_v8 = vmul.f32 -0.5, %v5362_v59  ;;  %v2242_v13 = vmul.f32 %v2239_v25, %v2230_v48  ;;  %v2344_v3 = vld [vmem:[%s3279_s29 + $0x1f0] sm:$0xff] }
 0x1d3   : > { %v2752_v20 = vadd.f32 -0.5, %v2233_v51  ;;  %v2942_v44 = vpop.eup %2941  ;;  %vm5385_vm15 = vcmp.lt.f32.partialorder %v2233_v51, 1.0  ;;  %v2246_v12 = vsel %vm5364_vm13, %v2240_v1, %v2750_v24  ;;  %2945 = vpow2.f32 %v2287_v19  ;;  %v2345_v9 = vld [vmem:[%s3279_s29 + $0x2f0] sm:$0xff] }
 0x1d4   : > { %v2301_v34 = vsub.f32 %v2272_v36, %v2275_v10  ;;  %v2247_v42 = vsel %vm5376_vm14, %v2241_v29, %v2751_v17  ;;  %vm2279_vm0 = vcmp.gt.f32.partialorder %v5381_v61, 0.5  ;;  %v2302_v6 = vand.u32 2147483647, %v2299_v60  ;;  %v2346_v1 = vld [vmem:[%s3279_s29 + $0x3f0] sm:$0xff]  ;;  %v5502_v36 = vld [vmem:[%s3279_s29 + $0xf8] sm:$0xff] }
 0x1d5   : > { %v2308_v5 = vmul.f32 0.5, %v2299_v60  ;;  %v2153_v48 = vand.u32 2147483647, %v5362_v59  ;;  %v5399_v4 = vrot.slane %v2749_v40, %v3300_v22  ;;  %v2303_v21 = vand.u32 2147483647, %v2300_v54 }
 0x1d6   : > { %v2309_v15 = vmul.f32 0.5, %v2300_v54  ;;  %v5402_v32 = vmul.f32 0.6931472, %v2942_v44  ;;  %2947 = vlog2.f32 %v2147_v46  ;;  %v5404_v41 = vadd.f32 1.0, %v2150_v8  ;;  %v5442_v44 = vld [vmem:[%s3279_s29 + $0xf0] sm:$0xff] }
 0x1d7   : > { %v2248_v7 = vsel %vm5385_vm15, %v2242_v13, %v2752_v20  ;;  %v2262_v51 = vmul.f32 %v5399_v4, %v2246_v12  ;;  %v2263_v25 = vmul.f32 %v5399_v4, %v2247_v42  ;;  %v2754_v33 = vsel %vm2279_vm0, 1.0, %v3092_v23  ;;  %v5471_v13 = vld [vmem:[%s3272_s26 + $0xf8] sm:$0xff] }
 0x1d8   : > { %v2304_v31 = vand.u32 2147483647, %v2301_v34  ;;  %v2310_v24 = vmul.f32 0.5, %v2301_v34  ;;  %v2311_v19 = vmul.f32 %v2308_v5, %v2299_v60  ;;  %v2755_v29 = vadd.f32 -0.5, %v2302_v6 }
 0x1d9   : > { %v2356_v17 = vand.u32 2147483647, %v5395_v28  ;;  %vm5421_vm1 = vcmp.lt.f32.partialorder %v2082_v30, 0.0004427343  ;;  %v2312_v10 = vmul.f32 %v2309_v15, %v2300_v54  ;;  %v2756_v40 = vadd.f32 -0.5, %v2303_v21 }
 0x1da   : > { %v2370_v52 = vsub.f32 %v2341_v18, %v2344_v3  ;;  %v2371_v46 = vsub.f32 %v2342_v16, %v2345_v9  ;;  %vm5425_vm2 = vcmp.lt.f32.partialorder %v2302_v6, 1.0  ;;  %vm5429_vm6 = vcmp.lt.f32.partialorder %v2303_v21, 1.0 }
 0x1db   : > { %v2357_v60 = vsub.f32 0.0, %v2356_v17  ;;  %v2372_v20 = vsub.f32 %v2343_v57, %v2346_v1  ;;  %v2264_v0 = vmul.f32 %v5399_v4, %v2248_v7  ;;  %vm5434_vm7 = vcmp.lt.f32.partialorder %v2304_v31, 1.0 }
 0x1dc   : > { %v5439_v54 = vrot.slane %v2754_v33, %v3300_v22  ;;  %v2373_v35 = vand.u32 2147483647, %v2370_v52  ;;  %v2313_v12 = vmul.f32 %v2310_v24, %v2301_v34  ;;  %v2757_v42 = vadd.f32 -0.5, %v2304_v31 }
 0x1dd   : > { %v2358_v6 = vmul.f32 1.442695, %v2357_v60  ;;  %v2379_v5 = vmul.f32 0.5, %v2370_v52  ;;  %v5444_v21 = vpop.eup %2943  ;;  %v2317_v15 = vsel %vm5425_vm2, %v2311_v19, %v2755_v29  ;;  %v2318_v18 = vsel %vm5429_vm6, %v2312_v10, %v2756_v40 }
 0x1de   : > { %v2374_v7 = vand.u32 2147483647, %v2371_v46  ;;  %v2380_v16 = vmul.f32 0.5, %v2371_v46  ;;  %vm2350_vm8 = vcmp.gt.f32.partialorder %v5442_v44, 0.5  ;;  %v2375_v3 = vand.u32 2147483647, %v2372_v20 }
 0x1df   : > { %2949 = vpow2.f32 %v2358_v6  ;;  %v2381_v9 = vmul.f32 0.5, %v2372_v20  ;;  %v2265_v34 = vadd.f32 %v2262_v51, %v5351_v53  ;;  %v2266_v33 = vadd.f32 %v2263_v25, %v5356_v26 }
 0x1e0   : > { %v2382_v31 = vmul.f32 %v2379_v5, %v2370_v52  ;;  %v2760_v57 = vadd.f32 -0.5, %v2373_v35  ;;  %v5453_v1 = vpop.eup %2945  ;;  %v2218_v24 = vadd.f32 1.0, %v5444_v21  ;;  %v2319_v19 = vsel %vm5434_vm7, %v2313_v12, %v2757_v42  ;;  %v2415_v12 = vld [vmem:[%s3279_s29 + $0x1f8] sm:$0xff] }
 0x1e1   : > { %v2333_v29 = vmul.f32 %v5439_v54, %v2317_v15  ;;  %vm5459_vm9 = vcmp.lt.f32.partialorder %v2373_v35, 1.0  ;;  %v2334_v53 = vmul.f32 %v5439_v54, %v2318_v18  ;;  %v2759_v26 = vsel %vm2350_vm8, 1.0, %v3092_v23  ;;  %v2414_v15 = vld [vmem:[%s3272_s26 + $0x3f8] sm:$0xff] }
 0x1e2   : > { %v2383_v51 = vmul.f32 %v2380_v16, %v2371_v46  ;;  %v2761_v25 = vadd.f32 -0.5, %v2374_v7  ;;  %v2267_v10 = vadd.f32 %v2264_v0, %v5358_v47  ;;  %vm5466_vm10 = vcmp.lt.f32.partialorder %v2374_v7, 1.0  ;;  %v2412_v0 = vld [vmem:[%s3272_s26 + $0x1f8] sm:$0xff] }
 0x1e3   : > { %v2384_v52 = vmul.f32 %v2381_v9, %v2372_v20  ;;  %v2762_v8 = vadd.f32 -0.5, %v2375_v3  ;;  %v2948_v60 = vpop.eup %2947  ;;  %v2289_v30 = vadd.f32 1.0, %v5453_v1  ;;  %v2335_v35 = vmul.f32 %v5439_v54, %v2319_v19  ;;  %v2413_v20 = vld [vmem:[%s3272_s26 + $0x2f8] sm:$0xff] }
 0x1e4   : > { %vm5475_vm11 = vcmp.lt.f32.partialorder %v2375_v3, 1.0  ;;  %v2388_v47 = vsel %vm5459_vm9, %v2382_v31, %v2760_v57  ;;  %v2084_v42 = vsel %vm5421_vm1, %v5348_v11, %v5402_v32  ;;  %v5490_v6 = vmul.f32 %v5362_v59, %v5404_v41  ;;  %v2416_v18 = vld [vmem:[%s3279_s29 + $0x2f8] sm:$0xff] }
 0x1e5   : > { %2951 = vlog2.f32 %v2218_v24  ;;  %v5493_v5 = vrot.slane %v2759_v26, %v3300_v22  ;;  %v2417_v7 = vld [vmem:[%s3279_s29 + $0x3f8] sm:$0xff]  ;;  %v2221_v16 = vmul.f32 -0.5, %v5444_v21  ;;  %v2336_v3 = vadd.f32 %v2333_v29, %v2265_v34 }
 0x1e6   : > { %v2337_v9 = vadd.f32 %v2334_v53, %v2266_v33  ;;  %v2389_v31 = vsel %vm5466_vm10, %v2383_v51, %v2761_v25  ;;  %vm2205_vm12 = vcmp.ge.f32.partialorder %v5339_v45, 0.0  ;;  %v2390_v11 = vsel %vm5475_vm11, %v2384_v52, %v2762_v8 }
 0x1e7   : > { %v2404_v32 = vmul.f32 %v5493_v5, %v2388_v47  ;;  %v2427_v41 = vand.u32 2147483647, %v5471_v13  ;;  %v2441_v57 = vsub.f32 %v2412_v0, %v2415_v12  ;;  %2953 = vlog2.f32 %v2289_v30 }
 0x1e8   : > { %v2338_v24 = vadd.f32 %v2335_v35, %v2267_v10  ;;  %v2442_v19 = vsub.f32 %v2413_v20, %v2416_v18  ;;  %v2443_v34 = vsub.f32 %v2414_v15, %v2417_v7  ;;  %vm5511_vm13 = vcmp.lt.f32.partialorder %v2153_v48, 0.0004427343 }
 0x1e9   : > { %v2405_v29 = vmul.f32 %v5493_v5, %v2389_v31  ;;  %vm2421_vm14 = vcmp.gt.f32.partialorder %v5502_v36, 0.5  ;;  %v2428_v17 = vsub.f32 0.0, %v2427_v41  ;;  %v2444_v53 = vand.u32 2147483647, %v2441_v57 }
 0x1ea   : > { %v2406_v26 = vmul.f32 %v5493_v5, %v2390_v11  ;;  %v2445_v51 = vand.u32 2147483647, %v2442_v19  ;;  %v2446_v25 = vand.u32 2147483647, %v2443_v34  ;;  %v2450_v40 = vmul.f32 0.5, %v2441_v57 }
 0x1eb   : > { %v2407_v10 = vadd.f32 %v2404_v32, %v2336_v3  ;;  %v2429_v52 = vmul.f32 1.442695, %v2428_v17  ;;  %v2451_v8 = vmul.f32 0.5, %v2442_v19  ;;  %v2452_v59 = vmul.f32 0.5, %v2443_v34 }
 0x1ec   : > { %v5518_v48 = vpop.eup %2949  ;;  %v2764_v30 = vsel %vm2421_vm14, 1.0, %v3092_v23  ;;  %vm5521_vm15 = vcmp.lt.f32.partialorder %v2444_v53, 1.0  ;;  %v2453_v46 = vmul.f32 %v2450_v40, %v2441_v57  ;;  %v2765_v47 = vadd.f32 -0.5, %v2444_v53 }
 0x1ed   : > { %v2360_v0 = vadd.f32 1.0, %v5518_v48  ;;  %2955 = vpow2.f32 %v2429_v52  ;;  %vm5526_vm0 = vcmp.lt.f32.partialorder %v2445_v51, 1.0  ;;  %vm5530_vm1 = vcmp.lt.f32.partialorder %v2446_v25, 1.0 }
 0x1ee   : > { %v2454_v15 = vmul.f32 %v2451_v8, %v2442_v19  ;;  %v2455_v18 = vmul.f32 %v2452_v59, %v2443_v34  ;;  %v2766_v7 = vadd.f32 -0.5, %v2445_v51  ;;  %v2767_v3 = vadd.f32 -0.5, %v2446_v25 }
 0x1ef   : > { %2957 = vlog2.f32 %v2360_v0  ;;  %v2408_v31 = vadd.f32 %v2405_v29, %v2337_v9  ;;  %v2459_v11 = vsel %vm5521_vm15, %v2453_v46, %v2765_v47  ;;  %v5538_v32 = vrot.slane %v2764_v30, %v3300_v22 }
 0x1f0   : > { %v2149_v41 = vmul.f32 0.6931472, %v2948_v60  ;;  %v2409_v57 = vadd.f32 %v2406_v26, %v2338_v24  ;;  %v2460_v17 = vsel %vm5526_vm0, %v2454_v15, %v2766_v7  ;;  %v2461_v19 = vsel %vm5530_vm1, %v2455_v18, %v2767_v3 }
 0x1f1   : > { %v2222_v34 = vadd.f32 1.0, %v2221_v16  ;;  %v2292_v53 = vmul.f32 -0.5, %v5453_v1  ;;  %v2475_v51 = vmul.f32 %v5538_v32, %v2459_v11  ;;  %v2476_v9 = vmul.f32 %v5538_v32, %v2460_v17 }
 0x1f2   : > { %v2952_v29 = vpop.eup %2951  ;;  %v2085_v25 = vadd.f32 %v2084_v42, %v5222_v27  ;;  %v2748_v60 = vsel %vm2205_vm12, 1.0, %v3092_v23  ;;  %v2224_v24 = vand.u32 2147483647, %v5444_v21  ;;  %v2477_v26 = vmul.f32 %v5538_v32, %v2461_v19 }
 0x1f3   : > { %v2211_v16 = vmax.f32 %v5286_v2, 0.0  ;;  %v2212_v40 = vmul.f32 %v5339_v45, %v5286_v2  ;;  %v2478_v52 = vadd.f32 %v2475_v51, %v2407_v10  ;;  %v2479_v8 = vadd.f32 %v2476_v9, %v2408_v31 }
 0x1f4   : > { %v2047_v27 = vsel %vm270_vm5, %v5145_v43, %v5371_v49  ;;  %v2155_v42 = vsel %vm5511_vm13, %v5490_v6, %v2149_v41  ;;  %vm2276_vm2 = vcmp.ge.f32.partialorder %v5381_v61, 0.0  ;;  %v2480_v59 = vadd.f32 %v2477_v26, %v2409_v57  ;;  %v2954_v30 = vpop.eup %2953 }
 0x1f5   : > { %v2220_v35 = vmul.f32 0.6931472, %v2952_v29  ;;  %v2223_v46 = vmul.f32 %v5444_v21, %v2222_v34  ;;  %v2293_v47 = vadd.f32 1.0, %v2292_v53  ;;  %v2363_v2 = vmul.f32 -0.5, %v5518_v48  ;;  %2482 = vst [vmem:[%s5568_s5 + $0x8] sm:$0xff] %v2478_v52  ;;  %2483 = vst [vmem:[%s5568_s5 + $0x10] sm:$0xff] %v2479_v8 }
 0x1f6   : > { %v2117_v43 = vmul.f32 %v5261_v56, %v2085_v25  ;;  %vm5573_vm6 = vcmp.lt.f32.partialorder %v2224_v24, 0.0004427343  ;;  %v2257_v49 = vrot.slane %v2748_v60, %v3300_v22  ;;  %v2295_v21 = vand.u32 2147483647, %v5453_v1  ;;  %2484 = vst [vmem:[%s5568_s5 + $0x18] sm:$0xff] %v2480_v59 }
 0x1f7   : > { %v2187_v6 = vsel %vm258_vm3, %v2186_v37, %v5344_v50  ;;  %v2253_v56 = vsel %vm259_vm4, %v5399_v4, 0.0  ;;  %v2282_v33 = vmax.f32 %v5324_v62, 0.0  ;;  %v2283_v10 = vmul.f32 %v5381_v61, %v5324_v62 }
 0x1f8   : > { %v2048_v0 = vadd.f32 %v2047_v27, %v5327_v63  ;;  %v2156_v20 = vadd.f32 %v2155_v42, %v5330_v55  ;;  %v2213_v12 = vsub.f32 %v2211_v16, %v2212_v40  ;;  %v2753_v38 = vsel %vm2276_vm2, 1.0, %v3092_v23 }
 0x1f9   : > { %v2226_v37 = vsel %vm5573_vm6, %v2223_v46, %v2220_v35  ;;  %v2291_v50 = vmul.f32 0.6931472, %v2954_v30  ;;  %v2294_v15 = vmul.f32 %v5453_v1, %v2293_v47  ;;  %v2364_v18 = vadd.f32 1.0, %v2363_v2 }
 0x1fa   : > { %v2956_v7 = vpop.eup %2955  ;;  %v2118_v62 = vsel %vm270_vm5, %v5225_v58, %v2117_v43  ;;  %v2258_v63 = vsel %vm258_vm3, %v2257_v49, %v2253_v56  ;;  %vm5605_vm7 = vcmp.lt.f32.partialorder %v2295_v21, 0.0004427343  ;;  %v2366_v61 = vand.u32 2147483647, %v5518_v48 }
 0x1fb   : > { %v2284_v3 = vsub.f32 %v2282_v33, %v2283_v10  ;;  %v2328_v31 = vrot.slane %v2753_v38, %v3300_v22  ;;  %vm2347_vm8 = vcmp.ge.f32.partialorder %v5442_v44, 0.0  ;;  %v2431_v1 = vadd.f32 1.0, %v2956_v7 }
 0x1fc   : > { %v2958_v11 = vpop.eup %2957  ;;  %v2188_v41 = vmul.f32 %v2187_v6, %v2156_v20  ;;  %v2227_v57 = vadd.f32 %v2226_v37, %v2213_v12  ;;  %v2353_v58 = vmax.f32 %v5395_v28, 0.0  ;;  %v2354_v17 = vmul.f32 %v5442_v44, %v5395_v28 }
 0x1fd   : > { %v2297_v19 = vsel %vm5605_vm7, %v2294_v15, %v2291_v50  ;;  %v2362_v34 = vmul.f32 0.6931472, %v2958_v11  ;;  %v2365_v53 = vmul.f32 %v5518_v48, %v2364_v18  ;;  %2959 = vlog2.f32 %v2431_v1 }
 0x1fe   : > { %v2324_v51 = vsel %vm259_vm4, %v5439_v54, 0.0  ;;  %v2758_v9 = vsel %vm2347_vm8, 1.0, %v3092_v23  ;;  %vm2367_vm9 = vcmp.lt.f32.partialorder %v2366_v61, 0.0004427343  ;;  %v2119_v29 = vadd.f32 %v2118_v62, %v2048_v0 }
 0x1ff   : > { %v2189_v25 = vsel %vm270_vm5, %v5317_v39, %v2188_v41  ;;  %v2259_v28 = vmul.f32 %v2258_v63, %v2227_v57  ;;  %v2298_v44 = vadd.f32 %v2297_v19, %v2284_v3  ;;  %v2355_v60 = vsub.f32 %v2353_v58, %v2354_v17 }
 0x200   : > { %v2329_v24 = vsel %vm258_vm3, %v2328_v31, %v2324_v51  ;;  %v2368_v48 = vsel %vm2367_vm9, %v2365_v53, %v2362_v34  ;;  %v2399_v26 = vrot.slane %v2758_v9, %v3300_v22  ;;  %v2434_v16 = vmul.f32 -0.5, %v2956_v7 }
 0x201   : > { %v2395_v40 = vsel %vm259_vm4, %v5493_v5, 0.0  ;;  %v2190_v52 = vadd.f32 %v2189_v25, %v2119_v29  ;;  %vm2418_vm10 = vcmp.ge.f32.partialorder %v5502_v36, 0.0  ;;  %v2260_v39 = vsel %vm270_vm5, %v5399_v4, %v2259_v28 }
 0x202   : > { %v2330_v8 = vmul.f32 %v2329_v24, %v2298_v44  ;;  %v2369_v27 = vadd.f32 %v2368_v48, %v2355_v60  ;;  %v2400_v42 = vsel %vm258_vm3, %v2399_v26, %v2395_v40  ;;  %v2435_v59 = vadd.f32 1.0, %v2434_v16 }
 0x203   : > { %v2763_v30 = vsel %vm2418_vm10, 1.0, %v3092_v23  ;;  %v2424_v35 = vmax.f32 %v5471_v13, 0.0  ;;  %v2425_v46 = vmul.f32 %v5502_v36, %v5471_v13  ;;  %v2437_v47 = vand.u32 2147483647, %v2956_v7 }
 0x204   : > { %v2261_v2 = vadd.f32 %v2260_v39, %v2190_v52  ;;  %v2331_v4 = vsel %vm270_vm5, %v5439_v54, %v2330_v8  ;;  %v2401_v43 = vmul.f32 %v2400_v42, %v2369_v27  ;;  %v2436_v45 = vmul.f32 %v2956_v7, %v2435_v59 }
 0x205   : > { %v2470_v49 = vrot.slane %v2763_v30, %v3300_v22  ;;  %v2426_v6 = vsub.f32 %v2424_v35, %v2425_v46  ;;  %vm2438_vm11 = vcmp.lt.f32.partialorder %v2437_v47, 0.0004427343  ;;  %v2466_v23 = vsel %vm259_vm4, %v5538_v32, 0.0 }
 0x206   : > { %v2332_v13 = vadd.f32 %v2331_v4, %v2261_v2  ;;  %v2402_v54 = vsel %vm270_vm5, %v5493_v5, %v2401_v43 }
 0x207   : > { %v2471_v22 = vsel %vm258_vm3, %v2470_v49, %v2466_v23 }
 0x208   : > { %v2403_v10 = vadd.f32 %v2402_v54, %v2332_v13 }
 0x20a   : > { %v2960_v21 = vpop.eup %2959 }
 0x20b   : > { %v2433_v36 = vmul.f32 0.6931472, %v2960_v21 }
 0x20d   : > { %v2439_v56 = vsel %vm2438_vm11, %v2436_v45, %v2433_v36 }
 0x20e   : > { %v2440_v33 = vadd.f32 %v2439_v56, %v2426_v6 }
 0x210   : > { %v2472_v0 = vmul.f32 %v2471_v22, %v2440_v33 }
 0x212   : > { %v2473_v20 = vsel %vm270_vm5, %v5538_v32, %v2472_v0 }
 0x213   : > { %v2474_v5 = vadd.f32 %v2473_v20, %v2403_v10 }
 0x215   : > { %2481 = vst [vmem:[%s5568_s5] sm:$0xff] %v2474_v5 }
 0x216   : > { %3030 = shalt.err (!%p3027_p4)
}
 0x217   : > { %s3031_s8 = scalar_lea.hbm %s5661_s28, 512  ;;  %s3035_s4 = scalar_lea.hbm %s5708_s2, 2560 }
 0x218   : > { %p3032_p10 = scmp.ne.s32.totalorder %s5661_s28, %s3031_s8  ;;  %p3036_p5 = scmp.lt.s32.totalorder %s5661_s28, %s5708_s2 }
 0x219   : > { %p3037_p8 = scmp.lt.s32.totalorder %s3035_s4, %s3031_s8 }
 0x21a   : > { %p3033_p11 = pnand %p3032_p10, %p5971_p1 }
 0x21b   : > { %p3038_p6 = por %p3037_p8, %p3036_p5 }
 0x21c   : > { %p3034_p3 = pneg %p3033_p11 }
 0x21e   : > { %p3039_p12 = pnand %p3038_p6, %p3034_p3 }
 0x220   : > { %3042 = shalt.err (!%p3039_p12)
}
 0x221   : > { %s3094_s29 = smov 128   ;;  %s3095_s20 = smov 8  }
 0x222   : > { %2780 = dma.vmem_to_hbm [thread:$0]  (%p5971_p1), %s5663_s14, 512, %s5661_s28, %s2486_s27, %s3094_s29, %s3094_s29, %s3095_s20  }
 0x223 PF: > { %p2794_p13 = scmp.ge.s32.totalorder %s3085_s12, 2  ;;  %s2514_s5 = sand.u32 1, %s3073_s9  }
 0x224   : > { %p5972_p7 = scmp.ne.s32.totalorder %s5714_s22, 0  ;;  %s2515_s6 = scalar_lea.sflag [#allocation4], %s2514_s5 }
 0x226   : > { %p2790_p9 = pnand %p2794_p13, %p5972_p7 }
 0x228   : > { %p2791_p0 = pneg %p2790_p9 }
 0x22a   : > { %3068 = dma.done.wait (%p2791_p0), %s2515_s6, 512  }
 0x22b   : > { %3070 = vsyncadd (%p2791_p0), %s2515_s6, 4294966784  ;;  %p18_p2 = scmp.ge.s32.totalorder %s3136_s15, 7   ;;  %s5973_s9 = smov %s3077_s10 }
 0x22c   : > { %s5974_s10 = smov %s3081_s11  ;;  %s5975_s11 = smov %s3148_s18 }
 0x22d   : > { %s5976_s12 = smov %s3136_s15  ;;  %20 = sbr.rel (!%p18_p2) target bundleno = 7 (0x7), region = 86 }
 0x232   :  { %2520 = vsyncpa [#allocation3], 1 }
 0x233   :  { %2522 = vsyncpa [#allocation3 + $0x1], 1 }
 0x234   :  { %2523 = vsyncpa [#allocation6], 1 }
 0x235   :  { %2525 = vsyncpa [#allocation6 + $0x1], 1 }
 0x236   :  { %2526 = vsyncpa [#allocation4], 1 }
 0x237   :  { %2528 = vsyncpa [#allocation4 + $0x1], 1 }

</bundles_post_ra>
